<compile_context>
chip_gen: v6e
topology: v6e:2x2x1
jax: 0.10.0
libtpu: 0.0.40
codegen_flags: <defaults>
</compile_context>

<pallas_src>
import math

import jax
import jax.numpy as jnp
from jax.experimental import pallas as pl
from jax.experimental.pallas import tpu as pltpu

_BN_EPS = 1e-5

# Dispatch / tiling knobs (byte-bounded so they hold across v5e/v6e/v7x).
_FUSED_BYTES = 10 << 20        # take the fused single-kernel path below this working set
_TILE_M_CAP = 4096             # max rows of the im2col matrix per grid step (tiled path)
_TILE_PATCH_BYTES = 4 << 20    # bf16 patch-block budget per grid step (tiled path)
_BN_BLOCK_BYTES = 2 << 20      # bf16 activation block budget for the BN/act kernel
_CONV_VMEM_LIMIT = 28 << 20    # v7x-safe scoped VMEM (64 MiB/TC total)
_BN_VMEM_LIMIT = 24 << 20


# ---------------------------------------------------------------------------
# Tiling helpers
# ---------------------------------------------------------------------------
def _round8(x):
    return max(8, (x // 8) * 8)


def _pick_tile_m(m, k):
    """Row-tile for the tiled conv path: multiple of 8, byte-bounded, >= 2 grid steps."""
    by_bytes = _round8(_TILE_PATCH_BYTES // max(1, k * 2))
    half = max(8, ((m + 1) // 2 + 7) // 8 * 8)       # guarantee >= 2 steps (v7x megacore)
    return max(8, min(_TILE_M_CAP, by_bytes, half))


def _pick_lane_width(total, c):
    """Lane-dense width for the BN/act kernel.

    Largest w that is a multiple of 128 and of c, divides total, and keeps
    r = total // w >= 8 so vregs and stores are sublane-dense (review rec #4).
    """
    lcm = c * 128 // math.gcd(c, 128)
    if total % lcm != 0:
        return c                                      # narrow fallback, still correct
    q = total // lcm
    best = 1
    d = 1
    while d * d <= q:
        if q % d == 0:
            for cand in (d, q // d):
                w = lcm * cand
                if w <= 8192 and total // w >= 8 and cand > best:
                    best = cand
        d += 1
    return lcm * best


# ---------------------------------------------------------------------------
# Pallas kernels
# ---------------------------------------------------------------------------
def _make_fused_conv_bn_kernel(has_residual: bool, apply_relu: bool, m_rows: int):
    """Whole conv layer in one kernel: matmul + batch stats + BN + residual + ReLU."""
    inv_m = 1.0 / float(m_rows)

    def kernel(p_ref, w_ref, g_ref, b_ref, *rest):
        if has_residual:
            res_ref, out_ref = rest
        else:
            (out_ref,) = rest
        acc = jnp.dot(p_ref[...], w_ref[...], preferred_element_type=jnp.float32)
        # Exact training-mode batch statistics from the f32 accumulator.
        s = jnp.sum(acc, axis=0, keepdims=True)                    # (1, Cout)
        ss = jnp.sum(acc * acc, axis=0, keepdims=True)             # (1, Cout)
        mean = s * inv_m
        var = jnp.maximum(ss * inv_m - mean * mean, 0.0)
        scale = g_ref[...] * jax.lax.rsqrt(var + _BN_EPS)
        bias = b_ref[...] - mean * scale
        y = acc * scale + bias
        if has_residual:
            y = y + res_ref[...].astype(jnp.float32)
        if apply_relu:
            y = jnp.maximum(y, 0.0)
        out_ref[...] = y.astype(out_ref.dtype)                     # bf16 store

    return kernel


def _conv_stats_kernel(p_ref, w_ref, conv_ref, stats_ref):
    """Tiled path, kernel 1: MXU matmul tile + per-tile partial BN statistics."""
    acc = jnp.dot(p_ref[...], w_ref[...], preferred_element_type=jnp.float32)
    conv_ref[...] = acc.astype(conv_ref.dtype)                     # bf16 intermediate
    # Direct row stores (no concatenate): stats kept f32 from the accumulator.
    stats_ref[0, 0:1, :] = jnp.sum(acc, axis=0, keepdims=True)
    stats_ref[0, 1:2, :] = jnp.sum(acc * acc, axis=0, keepdims=True)


def _make_bn_act_kernel(has_residual: bool, apply_relu: bool):
    """Tiled path, kernel 2: lane-dense scale/bias (+ residual) (+ ReLU), f32 math."""

    def kernel(x_ref, scale_ref, bias_ref, *rest):
        if has_residual:
            res_ref, out_ref = rest
        else:
            (out_ref,) = rest
        y = x_ref[...].astype(jnp.float32) * scale_ref[...] + bias_ref[...]
        if has_residual:
            y = y + res_ref[...].astype(jnp.float32)
        if apply_relu:
            y = jnp.maximum(y, 0.0)
        out_ref[...] = y.astype(out_ref.dtype)

    return kernel


def _head_kernel(f_ref, w_ref, b_ref, out_ref):
    """Global average pool over the spatial axis + linear classifier."""
    pooled = jnp.mean(f_ref[...].astype(jnp.float32), axis=1)      # (N, C)
    out_ref[...] = (
        jnp.dot(pooled, w_ref[...], preferred_element_type=jnp.float32) + b_ref[...]
    )


# ---------------------------------------------------------------------------
# Pallas-call wrappers
# ---------------------------------------------------------------------------
def _fused_conv_bn(patches, w_mat, gamma, beta, res_flat, apply_relu):
    """Single-launch fused conv+BN(+residual)(+ReLU).  patches: (M, K) bf16."""
    m, k = patches.shape
    cout = w_mat.shape[1]
    inputs = [
        patches,
        w_mat,
        gamma.astype(jnp.float32).reshape(1, cout),
        beta.astype(jnp.float32).reshape(1, cout),
    ]
    if res_flat is not None:
        inputs.append(res_flat)
    cost = pl.CostEstimate(
        flops=2 * m * k * cout + 8 * m * cout,
        transcendentals=cout,
        bytes_accessed=m * k * 2 + k * cout * 2
        + m * cout * 2 * (2 if res_flat is not None else 1) + 4 * cout * 4,
    )
    out = pl.pallas_call(
        _make_fused_conv_bn_kernel(res_flat is not None, apply_relu, m),
        out_shape=jax.ShapeDtypeStruct((m, cout), jnp.bfloat16),
        in_specs=[pl.BlockSpec(memory_space=pltpu.MemorySpace.VMEM)] * len(inputs),
        out_specs=pl.BlockSpec(memory_space=pltpu.MemorySpace.VMEM),
        compiler_params=pltpu.CompilerParams(vmem_limit_bytes=_CONV_VMEM_LIMIT),
        cost_estimate=cost,
    )(*inputs)
    return out


def _conv_matmul_stats(patches, w_mat, tile_m):
    """Tiled path kernel 1.  patches: (M_pad, K) bf16 -> conv bf16 (M_pad, Cout), stats."""
    m_pad, k = patches.shape
    cout = w_mat.shape[1]
    ntiles = m_pad // tile_m
    cost = pl.CostEstimate(
        flops=2 * m_pad * k * cout,
        transcendentals=0,
        bytes_accessed=m_pad * k * 2 + k * cout * 2 + m_pad * cout * 2
        + ntiles * 2 * cout * 4,
    )
    conv, stats = pl.pallas_call(
        _conv_stats_kernel,
        out_shape=(
            jax.ShapeDtypeStruct((m_pad, cout), jnp.bfloat16),
            jax.ShapeDtypeStruct((ntiles, 2, cout), jnp.float32),
        ),
        grid=(ntiles,),
        in_specs=[
            pl.BlockSpec((tile_m, k), lambda i: (i, 0)),
            pl.BlockSpec((k, cout), lambda i: (0, 0)),      # fetched once (constant index)
        ],
        out_specs=(
            pl.BlockSpec((tile_m, cout), lambda i: (i, 0)),
            pl.BlockSpec((1, 2, cout), lambda i: (i, 0, 0)),
        ),
        compiler_params=pltpu.CompilerParams(
            dimension_semantics=("parallel",), vmem_limit_bytes=_CONV_VMEM_LIMIT),
        cost_estimate=cost,
    )(patches, w_mat)
    return conv, stats


def _bn_act(conv, scale, bias, residual, apply_relu):
    """Tiled path kernel 2.  conv: (M_pad, C) bf16; scale/bias: (C,) f32."""
    m, c = conv.shape
    total = m * c
    w = _pick_lane_width(total, c)
    r = total // w
    reps = w // c
    tile_r = min(r, _round8(_BN_BLOCK_BYTES // (w * 2)))
    if r >= 16:                                          # >= 2 parallel steps (v7x)
        tile_r = min(tile_r, max(8, ((r + 1) // 2 + 7) // 8 * 8))
    grid_r = pl.cdiv(r, tile_r)

    scale_row = jnp.tile(scale.astype(jnp.float32), reps).reshape(1, w)
    bias_row = jnp.tile(bias.astype(jnp.float32), reps).reshape(1, w)

    inputs = [conv.reshape(r, w), scale_row, bias_row]
    in_specs = [
        pl.BlockSpec((tile_r, w), lambda i: (i, 0)),
        pl.BlockSpec((1, w), lambda i: (0, 0)),
        pl.BlockSpec((1, w), lambda i: (0, 0)),
    ]
    if residual is not None:
        inputs.append(residual.reshape(r, w))
        in_specs.append(pl.BlockSpec((tile_r, w), lambda i: (i, 0)))

    n_big = 2 + (1 if residual is not None else 0)
    cost = pl.CostEstimate(
        flops=4 * total,
        transcendentals=0,
        bytes_accessed=n_big * total * 2 + 2 * w * 4,
    )
    out = pl.pallas_call(
        _make_bn_act_kernel(residual is not None, apply_relu),
        out_shape=jax.ShapeDtypeStruct((r, w), jnp.bfloat16),
        grid=(grid_r,),
        in_specs=in_specs,
        out_specs=pl.BlockSpec((tile_r, w), lambda i: (i, 0)),
        input_output_aliases={0: 0},                     # reuse conv buffer for output
        compiler_params=pltpu.CompilerParams(
            dimension_semantics=("parallel",), vmem_limit_bytes=_BN_VMEM_LIMIT),
        cost_estimate=cost,
    )(*inputs)
    return out.reshape(m, c)


# ---------------------------------------------------------------------------
# JAX-side glue (im2col, layer wrappers)
# ---------------------------------------------------------------------------
def _im2col(x, ksize, stride, pad):
    """x: (N,H,W,C) NHWC -> bf16 patches (N*Ho*Wo, k*k*C); column order (ky, kx, cin)."""
    n, h, w, c = x.shape
    xb = x.astype(jnp.bfloat16)
    xp = jnp.pad(xb, ((0, 0), (pad, pad), (pad, pad), (0, 0)))
    ho = (h + 2 * pad - ksize) // stride + 1
    wo = (w + 2 * pad - ksize) // stride + 1
    cols = []
    for ky in range(ksize):
        for kx in range(ksize):
            cols.append(
                xp[:, ky : ky + stride * ho : stride, kx : kx + stride * wo : stride, :]
            )
    patches = jnp.concatenate(cols, axis=-1)             # (N, Ho, Wo, k*k*C)
    return patches.reshape(n * ho * wo, ksize * ksize * c), ho, wo


def conv_bn(x, w_mat, gamma, beta, *, ksize, stride, pad, apply_relu, residual=None):
    """x: (N,H,W,Cin) NHWC; w_mat: (k*k*Cin, Cout) bf16 (pre-transformed at init)."""
    n = x.shape[0]
    cout = w_mat.shape[1]
    patches, ho, wo = _im2col(x, ksize, stride, pad)
    m, k = patches.shape
    res_flat = None
    if residual is not None:
        res_flat = residual.reshape(m, cout).astype(jnp.bfloat16)

    # Working-set estimate for the fused path (patches + weights + f32 acc + bf16 out + res).
    est = m * k * 2 + k * cout * 2 + m * cout * 4 + m * cout * 2
    if res_flat is not None:
        est += m * cout * 2

    if est <= _FUSED_BYTES:
        out = _fused_conv_bn(patches, w_mat, gamma, beta, res_flat, apply_relu)
        return out.reshape(n, ho, wo, cout)

    # --- Tiled fallback (large M): two pipelined kernels, exact two-pass BN. ---
    tile_m = _pick_tile_m(m, k)
    ntiles = pl.cdiv(m, tile_m)
    m_pad = ntiles * tile_m
    if m_pad != m:
        # Zero rows add nothing to the per-tile sums, so stats stay exact (divide by m).
        patches = jnp.pad(patches, ((0, m_pad - m), (0, 0)))
        if res_flat is not None:
            res_flat = jnp.pad(res_flat, ((0, m_pad - m), (0, 0)))

    conv, stats = _conv_matmul_stats(patches, w_mat, tile_m)
    sums = jnp.sum(stats[:, 0, :], axis=0)
    sqs = jnp.sum(stats[:, 1, :], axis=0)
    mean = sums / m
    var = jnp.maximum(sqs / m - mean * mean, 0.0)
    scale = gamma * jax.lax.rsqrt(var + _BN_EPS)
    bias = beta - mean * scale

    out = _bn_act(conv, scale, bias, res_flat, apply_relu)
    return out[:m].reshape(n, ho, wo, cout)


def basic_block(x, p):
    stride = p["stride"]
    out = conv_bn(x, p["conv1_w"], p["bn1_g"], p["bn1_b"],
                  ksize=3, stride=stride, pad=1, apply_relu=True)
    if p["sc_w"] is not None:
        shortcut = conv_bn(x, p["sc_w"], p["bns_g"], p["bns_b"],
                           ksize=1, stride=stride, pad=0, apply_relu=False)
    else:
        shortcut = x
    # relu(bn2(conv2(out)) + shortcut); residual add + ReLU fused into the conv kernel.
    out = conv_bn(out, p["conv2_w"], p["bn2_g"], p["bn2_b"],
                  ksize=3, stride=1, pad=1, apply_relu=True, residual=shortcut)
    return out


def head(x, w_mat, b):
    n, hf, wf, c = x.shape
    feats = x.reshape(n, hf * wf, c)
    num_classes = w_mat.shape[1]
    return pl.pallas_call(
        _head_kernel,
        out_shape=jax.ShapeDtypeStruct((n, num_classes), jnp.float32),
        in_specs=[pl.BlockSpec(memory_space=pltpu.MemorySpace.VMEM)] * 3,
        out_specs=pl.BlockSpec(memory_space=pltpu.MemorySpace.VMEM),
    )(feats, w_mat, b.reshape(1, num_classes))


def resnet_forward(x_nchw, params):
    x = jnp.transpose(x_nchw, (0, 2, 3, 1)).astype(jnp.float32)  # NCHW -> NHWC
    x = conv_bn(x, params["conv1_w"], params["bn1_g"], params["bn1_b"],
                ksize=3, stride=1, pad=1, apply_relu=True)
    for layer in ("layer1", "layer2", "layer3"):
        for blk in params[layer]:
            x = basic_block(x, blk)
    return head(x, params["fc_w"], params["fc_b"])


# ---------------------------------------------------------------------------
# Deterministic parameter init (mirrors _weights_init: kaiming_normal_, fan_in mode).
# Conv weights are stored pre-transformed as (k*k*Cin, Cout) bf16 matmul operands
# whose row order (ky, kx, cin) matches the im2col column order; fc is pre-transposed.
# ---------------------------------------------------------------------------
def _kaiming(key, shape, fan_in):
    return ((2.0 / fan_in) ** 0.5) * jax.random.normal(key, shape, jnp.float32)


def _conv_weight(key, cin, cout, k):
    w = _kaiming(key, (k, k, cin, cout), cin * k * k)
    return w.reshape(k * k * cin, cout).astype(jnp.bfloat16)


def init_params(key, num_blocks=(1, 1, 1), num_classes=10):
    keys = iter(jax.random.split(key, 64))
    p = {}
    p["conv1_w"] = _conv_weight(next(keys), 3, 16, 3)
    p["bn1_g"] = jnp.ones((16,), jnp.float32)
    p["bn1_b"] = jnp.zeros((16,), jnp.float32)
    in_planes = 16
    for name, planes, nb, stride in (
        ("layer1", 16, num_blocks[0], 1),
        ("layer2", 32, num_blocks[1], 2),
        ("layer3", 64, num_blocks[2], 2),
    ):
        blocks = []
        for s in [stride] + [1] * (nb - 1):
            blk = {
                "stride": s,
                "conv1_w": _conv_weight(next(keys), in_planes, planes, 3),
                "bn1_g": jnp.ones((planes,), jnp.float32),
                "bn1_b": jnp.zeros((planes,), jnp.float32),
                "conv2_w": _conv_weight(next(keys), planes, planes, 3),
                "bn2_g": jnp.ones((planes,), jnp.float32),
                "bn2_b": jnp.zeros((planes,), jnp.float32),
            }
            if s != 1 or in_planes != planes:
                blk["sc_w"] = _conv_weight(next(keys), in_planes, planes, 1)
                blk["bns_g"] = jnp.ones((planes,), jnp.float32)
                blk["bns_b"] = jnp.zeros((planes,), jnp.float32)
            else:
                blk["sc_w"] = None
            blocks.append(blk)
            in_planes = planes
        p[name] = blocks
    p["fc_w"] = _kaiming(next(keys), (64, num_classes), 64)   # pre-transposed Linear
    bound = 1.0 / (64 ** 0.5)
    p["fc_b"] = jax.random.uniform(next(keys), (num_classes,), jnp.float32, -bound, bound)
    return p


if __name__ == "__main__":
    key = jax.random.PRNGKey(0)
    k_param, k_x = jax.random.split(key)
    params = init_params(k_param, num_blocks=(1, 1, 1), num_classes=10)
    # Small CIFAR-like input, NCHW as in the PyTorch module.
    x = jax.random.normal(k_x, (2, 3, 16, 16), jnp.float32)
    fwd = jax.jit(lambda inp: resnet_forward(inp, params))   # params closed over (strides stay static)
    logits = jax.block_until_ready(fwd(x))
    assert logits.shape == (2, 10) and bool(jnp.all(jnp.isfinite(logits)))
    print("KERNEL_OK")
</pallas_src>

<mosaic_0001>
module attributes {stable_mosaic.version = 11 : i64} {
  func.func @kernel(%arg0: memref<512x27xbf16, #tpu.memory_space<vmem>>, %arg1: memref<27x16xbf16, #tpu.memory_space<vmem>>, %arg2: memref<1x16xf32, #tpu.memory_space<vmem>>, %arg3: memref<1x16xf32, #tpu.memory_space<vmem>>, %arg4: memref<512x16xbf16, #tpu.memory_space<vmem>>) attributes {dimension_semantics = [], scalar_prefetch = 0 : i64, scratch_operands = 0 : i64, tpu.core_type = #tpu.core_type<tc>} {
    %c0 = arith.constant 0 : index
    %c0_0 = arith.constant 0 : index
    %0 = vector.load %arg0[%c0, %c0_0] : memref<512x27xbf16, #tpu.memory_space<vmem>>, vector<512x27xbf16>
    %c0_1 = arith.constant 0 : index
    %c0_2 = arith.constant 0 : index
    %1 = vector.load %arg1[%c0_1, %c0_2] : memref<27x16xbf16, #tpu.memory_space<vmem>>, vector<27x16xbf16>
    %cst = arith.constant dense<0.000000e+00> : vector<512x16xf32>
    %2 = tpu.matmul %0, %1, %cst {dimension_numbers = #tpu.dot_dimension_numbers<[1], [0], [0], [1], [0, 0, 1, 1], [], []>} : vector<512x27xbf16>, vector<27x16xbf16>, vector<512x16xf32> -> vector<512x16xf32>
    %cst_3 = arith.constant dense<0.000000e+00> : vector<16xf32>
    %3 = vector.multi_reduction <add>, %2, %cst_3 [0] : vector<512x16xf32> to vector<16xf32>
    %4 = vector.shape_cast %3 : vector<16xf32> to vector<1x16xf32>
    %5 = arith.mulf %2, %2 : vector<512x16xf32>
    %cst_4 = arith.constant dense<0.000000e+00> : vector<16xf32>
    %6 = vector.multi_reduction <add>, %5, %cst_4 [0] : vector<512x16xf32> to vector<16xf32>
    %7 = vector.shape_cast %6 : vector<16xf32> to vector<1x16xf32>
    %cst_5 = arith.constant 0.001953125 : f32
    %8 = vector.broadcast %cst_5 : f32 to vector<1x16xf32>
    %9 = arith.mulf %4, %8 : vector<1x16xf32>
    %cst_6 = arith.constant 0.001953125 : f32
    %10 = vector.broadcast %cst_6 : f32 to vector<1x16xf32>
    %11 = arith.mulf %7, %10 : vector<1x16xf32>
    %12 = arith.mulf %9, %9 : vector<1x16xf32>
    %13 = arith.subf %11, %12 : vector<1x16xf32>
    %cst_7 = arith.constant 0.000000e+00 : f32
    %14 = vector.broadcast %cst_7 : f32 to vector<1x16xf32>
    %15 = arith.maximumf %13, %14 : vector<1x16xf32>
    %c0_8 = arith.constant 0 : index
    %c0_9 = arith.constant 0 : index
    %16 = vector.load %arg2[%c0_8, %c0_9] : memref<1x16xf32, #tpu.memory_space<vmem>>, vector<1x16xf32>
    %cst_10 = arith.constant 9.99999974E-6 : f32
    %17 = vector.broadcast %cst_10 : f32 to vector<1x16xf32>
    %18 = arith.addf %15, %17 : vector<1x16xf32>
    %19 = math.rsqrt %18 : vector<1x16xf32>
    %20 = arith.mulf %16, %19 : vector<1x16xf32>
    %c0_11 = arith.constant 0 : index
    %c0_12 = arith.constant 0 : index
    %21 = vector.load %arg3[%c0_11, %c0_12] : memref<1x16xf32, #tpu.memory_space<vmem>>, vector<1x16xf32>
    %22 = arith.mulf %9, %20 : vector<1x16xf32>
    %23 = arith.subf %21, %22 : vector<1x16xf32>
    %24 = vector.broadcast %20 : vector<1x16xf32> to vector<512x16xf32>
    %25 = arith.mulf %2, %24 : vector<512x16xf32>
    %26 = vector.broadcast %23 : vector<1x16xf32> to vector<512x16xf32>
    %27 = arith.addf %25, %26 : vector<512x16xf32>
    %cst_13 = arith.constant 0.000000e+00 : f32
    %28 = vector.broadcast %cst_13 : f32 to vector<512x16xf32>
    %29 = arith.maximumf %27, %28 : vector<512x16xf32>
    %30 = arith.truncf %29 : vector<512x16xf32> to vector<512x16xbf16>
    %c0_14 = arith.constant 0 : index
    %c0_15 = arith.constant 0 : index
    %31 = vector.load %arg4[%c0_14, %c0_15] : memref<512x16xbf16, #tpu.memory_space<vmem>>, vector<512x16xbf16>
    tpu.vector_store %arg4[%c0_14, %c0_15], %30 {strides = array<i32>} : memref<512x16xbf16, #tpu.memory_space<vmem>>, vector<512x16xbf16>,
    return
  }
}

module attributes {stable_mosaic.version = 11 : i64} {
  func.func @kernel(%arg0: memref<512x144xbf16, #tpu.memory_space<vmem>>, %arg1: memref<144x16xbf16, #tpu.memory_space<vmem>>, %arg2: memref<1x16xf32, #tpu.memory_space<vmem>>, %arg3: memref<1x16xf32, #tpu.memory_space<vmem>>, %arg4: memref<512x16xbf16, #tpu.memory_space<vmem>>) attributes {dimension_semantics = [], scalar_prefetch = 0 : i64, scratch_operands = 0 : i64, tpu.core_type = #tpu.core_type<tc>} {
    %c0 = arith.constant 0 : index
    %c0_0 = arith.constant 0 : index
    %0 = vector.load %arg0[%c0, %c0_0] : memref<512x144xbf16, #tpu.memory_space<vmem>>, vector<512x144xbf16>
    %c0_1 = arith.constant 0 : index
    %c0_2 = arith.constant 0 : index
    %1 = vector.load %arg1[%c0_1, %c0_2] : memref<144x16xbf16, #tpu.memory_space<vmem>>, vector<144x16xbf16>
    %cst = arith.constant dense<0.000000e+00> : vector<512x16xf32>
    %2 = tpu.matmul %0, %1, %cst {dimension_numbers = #tpu.dot_dimension_numbers<[1], [0], [0], [1], [0, 0, 1, 1], [], []>} : vector<512x144xbf16>, vector<144x16xbf16>, vector<512x16xf32> -> vector<512x16xf32>
    %cst_3 = arith.constant dense<0.000000e+00> : vector<16xf32>
    %3 = vector.multi_reduction <add>, %2, %cst_3 [0] : vector<512x16xf32> to vector<16xf32>
    %4 = vector.shape_cast %3 : vector<16xf32> to vector<1x16xf32>
    %5 = arith.mulf %2, %2 : vector<512x16xf32>
    %cst_4 = arith.constant dense<0.000000e+00> : vector<16xf32>
    %6 = vector.multi_reduction <add>, %5, %cst_4 [0] : vector<512x16xf32> to vector<16xf32>
    %7 = vector.shape_cast %6 : vector<16xf32> to vector<1x16xf32>
    %cst_5 = arith.constant 0.001953125 : f32
    %8 = vector.broadcast %cst_5 : f32 to vector<1x16xf32>
    %9 = arith.mulf %4, %8 : vector<1x16xf32>
    %cst_6 = arith.constant 0.001953125 : f32
    %10 = vector.broadcast %cst_6 : f32 to vector<1x16xf32>
    %11 = arith.mulf %7, %10 : vector<1x16xf32>
    %12 = arith.mulf %9, %9 : vector<1x16xf32>
    %13 = arith.subf %11, %12 : vector<1x16xf32>
    %cst_7 = arith.constant 0.000000e+00 : f32
    %14 = vector.broadcast %cst_7 : f32 to vector<1x16xf32>
    %15 = arith.maximumf %13, %14 : vector<1x16xf32>
    %c0_8 = arith.constant 0 : index
    %c0_9 = arith.constant 0 : index
    %16 = vector.load %arg2[%c0_8, %c0_9] : memref<1x16xf32, #tpu.memory_space<vmem>>, vector<1x16xf32>
    %cst_10 = arith.constant 9.99999974E-6 : f32
    %17 = vector.broadcast %cst_10 : f32 to vector<1x16xf32>
    %18 = arith.addf %15, %17 : vector<1x16xf32>
    %19 = math.rsqrt %18 : vector<1x16xf32>
    %20 = arith.mulf %16, %19 : vector<1x16xf32>
    %c0_11 = arith.constant 0 : index
    %c0_12 = arith.constant 0 : index
    %21 = vector.load %arg3[%c0_11, %c0_12] : memref<1x16xf32, #tpu.memory_space<vmem>>, vector<1x16xf32>
    %22 = arith.mulf %9, %20 : vector<1x16xf32>
    %23 = arith.subf %21, %22 : vector<1x16xf32>
    %24 = vector.broadcast %20 : vector<1x16xf32> to vector<512x16xf32>
    %25 = arith.mulf %2, %24 : vector<512x16xf32>
    %26 = vector.broadcast %23 : vector<1x16xf32> to vector<512x16xf32>
    %27 = arith.addf %25, %26 : vector<512x16xf32>
    %cst_13 = arith.constant 0.000000e+00 : f32
    %28 = vector.broadcast %cst_13 : f32 to vector<512x16xf32>
    %29 = arith.maximumf %27, %28 : vector<512x16xf32>
    %30 = arith.truncf %29 : vector<512x16xf32> to vector<512x16xbf16>
    %c0_14 = arith.constant 0 : index
    %c0_15 = arith.constant 0 : index
    %31 = vector.load %arg4[%c0_14, %c0_15] : memref<512x16xbf16, #tpu.memory_space<vmem>>, vector<512x16xbf16>
    tpu.vector_store %arg4[%c0_14, %c0_15], %30 {strides = array<i32>} : memref<512x16xbf16, #tpu.memory_space<vmem>>, vector<512x16xbf16>,
    return
  }
}

module attributes {stable_mosaic.version = 11 : i64} {
  func.func @kernel(%arg0: memref<512x144xbf16, #tpu.memory_space<vmem>>, %arg1: memref<144x16xbf16, #tpu.memory_space<vmem>>, %arg2: memref<1x16xf32, #tpu.memory_space<vmem>>, %arg3: memref<1x16xf32, #tpu.memory_space<vmem>>, %arg4: memref<512x16xbf16, #tpu.memory_space<vmem>>, %arg5: memref<512x16xbf16, #tpu.memory_space<vmem>>) attributes {dimension_semantics = [], scalar_prefetch = 0 : i64, scratch_operands = 0 : i64, tpu.core_type = #tpu.core_type<tc>} {
    %c0 = arith.constant 0 : index
    %c0_0 = arith.constant 0 : index
    %0 = vector.load %arg0[%c0, %c0_0] : memref<512x144xbf16, #tpu.memory_space<vmem>>, vector<512x144xbf16>
    %c0_1 = arith.constant 0 : index
    %c0_2 = arith.constant 0 : index
    %1 = vector.load %arg1[%c0_1, %c0_2] : memref<144x16xbf16, #tpu.memory_space<vmem>>, vector<144x16xbf16>
    %cst = arith.constant dense<0.000000e+00> : vector<512x16xf32>
    %2 = tpu.matmul %0, %1, %cst {dimension_numbers = #tpu.dot_dimension_numbers<[1], [0], [0], [1], [0, 0, 1, 1], [], []>} : vector<512x144xbf16>, vector<144x16xbf16>, vector<512x16xf32> -> vector<512x16xf32>
    %cst_3 = arith.constant dense<0.000000e+00> : vector<16xf32>
    %3 = vector.multi_reduction <add>, %2, %cst_3 [0] : vector<512x16xf32> to vector<16xf32>
    %4 = vector.shape_cast %3 : vector<16xf32> to vector<1x16xf32>
    %5 = arith.mulf %2, %2 : vector<512x16xf32>
    %cst_4 = arith.constant dense<0.000000e+00> : vector<16xf32>
    %6 = vector.multi_reduction <add>, %5, %cst_4 [0] : vector<512x16xf32> to vector<16xf32>
    %7 = vector.shape_cast %6 : vector<16xf32> to vector<1x16xf32>
    %cst_5 = arith.constant 0.001953125 : f32
    %8 = vector.broadcast %cst_5 : f32 to vector<1x16xf32>
    %9 = arith.mulf %4, %8 : vector<1x16xf32>
    %cst_6 = arith.constant 0.001953125 : f32
    %10 = vector.broadcast %cst_6 : f32 to vector<1x16xf32>
    %11 = arith.mulf %7, %10 : vector<1x16xf32>
    %12 = arith.mulf %9, %9 : vector<1x16xf32>
    %13 = arith.subf %11, %12 : vector<1x16xf32>
    %cst_7 = arith.constant 0.000000e+00 : f32
    %14 = vector.broadcast %cst_7 : f32 to vector<1x16xf32>
    %15 = arith.maximumf %13, %14 : vector<1x16xf32>
    %c0_8 = arith.constant 0 : index
    %c0_9 = arith.constant 0 : index
    %16 = vector.load %arg2[%c0_8, %c0_9] : memref<1x16xf32, #tpu.memory_space<vmem>>, vector<1x16xf32>
    %cst_10 = arith.constant 9.99999974E-6 : f32
    %17 = vector.broadcast %cst_10 : f32 to vector<1x16xf32>
    %18 = arith.addf %15, %17 : vector<1x16xf32>
    %19 = math.rsqrt %18 : vector<1x16xf32>
    %20 = arith.mulf %16, %19 : vector<1x16xf32>
    %c0_11 = arith.constant 0 : index
    %c0_12 = arith.constant 0 : index
    %21 = vector.load %arg3[%c0_11, %c0_12] : memref<1x16xf32, #tpu.memory_space<vmem>>, vector<1x16xf32>
    %22 = arith.mulf %9, %20 : vector<1x16xf32>
    %23 = arith.subf %21, %22 : vector<1x16xf32>
    %24 = vector.broadcast %20 : vector<1x16xf32> to vector<512x16xf32>
    %25 = arith.mulf %2, %24 : vector<512x16xf32>
    %26 = vector.broadcast %23 : vector<1x16xf32> to vector<512x16xf32>
    %27 = arith.addf %25, %26 : vector<512x16xf32>
    %c0_13 = arith.constant 0 : index
    %c0_14 = arith.constant 0 : index
    %28 = vector.load %arg4[%c0_13, %c0_14] : memref<512x16xbf16, #tpu.memory_space<vmem>>, vector<512x16xbf16>
    %29 = arith.extf %28 : vector<512x16xbf16> to vector<512x16xf32>
    %30 = arith.addf %27, %29 : vector<512x16xf32>
    %cst_15 = arith.constant 0.000000e+00 : f32
    %31 = vector.broadcast %cst_15 : f32 to vector<512x16xf32>
    %32 = arith.maximumf %30, %31 : vector<512x16xf32>
    %33 = arith.truncf %32 : vector<512x16xf32> to vector<512x16xbf16>
    %c0_16 = arith.constant 0 : index
    %c0_17 = arith.constant 0 : index
    %34 = vector.load %arg5[%c0_16, %c0_17] : memref<512x16xbf16, #tpu.memory_space<vmem>>, vector<512x16xbf16>
    tpu.vector_store %arg5[%c0_16, %c0_17], %33 {strides = array<i32>} : memref<512x16xbf16, #tpu.memory_space<vmem>>, vector<512x16xbf16>,
    return
  }
}

module attributes {stable_mosaic.version = 11 : i64} {
  func.func @kernel(%arg0: memref<128x144xbf16, #tpu.memory_space<vmem>>, %arg1: memref<144x32xbf16, #tpu.memory_space<vmem>>, %arg2: memref<1x32xf32, #tpu.memory_space<vmem>>, %arg3: memref<1x32xf32, #tpu.memory_space<vmem>>, %arg4: memref<128x32xbf16, #tpu.memory_space<vmem>>) attributes {dimension_semantics = [], scalar_prefetch = 0 : i64, scratch_operands = 0 : i64, tpu.core_type = #tpu.core_type<tc>} {
    %c0 = arith.constant 0 : index
    %c0_0 = arith.constant 0 : index
    %0 = vector.load %arg0[%c0, %c0_0] : memref<128x144xbf16, #tpu.memory_space<vmem>>, vector<128x144xbf16>
    %c0_1 = arith.constant 0 : index
    %c0_2 = arith.constant 0 : index
    %1 = vector.load %arg1[%c0_1, %c0_2] : memref<144x32xbf16, #tpu.memory_space<vmem>>, vector<144x32xbf16>
    %cst = arith.constant dense<0.000000e+00> : vector<128x32xf32>
    %2 = tpu.matmul %0, %1, %cst {dimension_numbers = #tpu.dot_dimension_numbers<[1], [0], [0], [1], [0, 0, 1, 1], [], []>} : vector<128x144xbf16>, vector<144x32xbf16>, vector<128x32xf32> -> vector<128x32xf32>
    %cst_3 = arith.constant dense<0.000000e+00> : vector<32xf32>
    %3 = vector.multi_reduction <add>, %2, %cst_3 [0] : vector<128x32xf32> to vector<32xf32>
    %4 = vector.shape_cast %3 : vector<32xf32> to vector<1x32xf32>
    %5 = arith.mulf %2, %2 : vector<128x32xf32>
    %cst_4 = arith.constant dense<0.000000e+00> : vector<32xf32>
    %6 = vector.multi_reduction <add>, %5, %cst_4 [0] : vector<128x32xf32> to vector<32xf32>
    %7 = vector.shape_cast %6 : vector<32xf32> to vector<1x32xf32>
    %cst_5 = arith.constant 7.812500e-03 : f32
    %8 = vector.broadcast %cst_5 : f32 to vector<1x32xf32>
    %9 = arith.mulf %4, %8 : vector<1x32xf32>
    %cst_6 = arith.constant 7.812500e-03 : f32
    %10 = vector.broadcast %cst_6 : f32 to vector<1x32xf32>
    %11 = arith.mulf %7, %10 : vector<1x32xf32>
    %12 = arith.mulf %9, %9 : vector<1x32xf32>
    %13 = arith.subf %11, %12 : vector<1x32xf32>
    %cst_7 = arith.constant 0.000000e+00 : f32
    %14 = vector.broadcast %cst_7 : f32 to vector<1x32xf32>
    %15 = arith.maximumf %13, %14 : vector<1x32xf32>
    %c0_8 = arith.constant 0 : index
    %c0_9 = arith.constant 0 : index
    %16 = vector.load %arg2[%c0_8, %c0_9] : memref<1x32xf32, #tpu.memory_space<vmem>>, vector<1x32xf32>
    %cst_10 = arith.constant 9.99999974E-6 : f32
    %17 = vector.broadcast %cst_10 : f32 to vector<1x32xf32>
    %18 = arith.addf %15, %17 : vector<1x32xf32>
    %19 = math.rsqrt %18 : vector<1x32xf32>
    %20 = arith.mulf %16, %19 : vector<1x32xf32>
    %c0_11 = arith.constant 0 : index
    %c0_12 = arith.constant 0 : index
    %21 = vector.load %arg3[%c0_11, %c0_12] : memref<1x32xf32, #tpu.memory_space<vmem>>, vector<1x32xf32>
    %22 = arith.mulf %9, %20 : vector<1x32xf32>
    %23 = arith.subf %21, %22 : vector<1x32xf32>
    %24 = vector.broadcast %20 : vector<1x32xf32> to vector<128x32xf32>
    %25 = arith.mulf %2, %24 : vector<128x32xf32>
    %26 = vector.broadcast %23 : vector<1x32xf32> to vector<128x32xf32>
    %27 = arith.addf %25, %26 : vector<128x32xf32>
    %cst_13 = arith.constant 0.000000e+00 : f32
    %28 = vector.broadcast %cst_13 : f32 to vector<128x32xf32>
    %29 = arith.maximumf %27, %28 : vector<128x32xf32>
    %30 = arith.truncf %29 : vector<128x32xf32> to vector<128x32xbf16>
    %c0_14 = arith.constant 0 : index
    %c0_15 = arith.constant 0 : index
    %31 = vector.load %arg4[%c0_14, %c0_15] : memref<128x32xbf16, #tpu.memory_space<vmem>>, vector<128x32xbf16>
    tpu.vector_store %arg4[%c0_14, %c0_15], %30 {strides = array<i32>} : memref<128x32xbf16, #tpu.memory_space<vmem>>, vector<128x32xbf16>,
    return
  }
}

module attributes {stable_mosaic.version = 11 : i64} {
  func.func @kernel(%arg0: memref<128x16xbf16, #tpu.memory_space<vmem>>, %arg1: memref<16x32xbf16, #tpu.memory_space<vmem>>, %arg2: memref<1x32xf32, #tpu.memory_space<vmem>>, %arg3: memref<1x32xf32, #tpu.memory_space<vmem>>, %arg4: memref<128x32xbf16, #tpu.memory_space<vmem>>) attributes {dimension_semantics = [], scalar_prefetch = 0 : i64, scratch_operands = 0 : i64, tpu.core_type = #tpu.core_type<tc>} {
    %c0 = arith.constant 0 : index
    %c0_0 = arith.constant 0 : index
    %0 = vector.load %arg0[%c0, %c0_0] : memref<128x16xbf16, #tpu.memory_space<vmem>>, vector<128x16xbf16>
    %c0_1 = arith.constant 0 : index
    %c0_2 = arith.constant 0 : index
    %1 = vector.load %arg1[%c0_1, %c0_2] : memref<16x32xbf16, #tpu.memory_space<vmem>>, vector<16x32xbf16>
    %cst = arith.constant dense<0.000000e+00> : vector<128x32xf32>
    %2 = tpu.matmul %0, %1, %cst {dimension_numbers = #tpu.dot_dimension_numbers<[1], [0], [0], [1], [0, 0, 1, 1], [], []>} : vector<128x16xbf16>, vector<16x32xbf16>, vector<128x32xf32> -> vector<128x32xf32>
    %cst_3 = arith.constant dense<0.000000e+00> : vector<32xf32>
    %3 = vector.multi_reduction <add>, %2, %cst_3 [0] : vector<128x32xf32> to vector<32xf32>
    %4 = vector.shape_cast %3 : vector<32xf32> to vector<1x32xf32>
    %5 = arith.mulf %2, %2 : vector<128x32xf32>
    %cst_4 = arith.constant dense<0.000000e+00> : vector<32xf32>
    %6 = vector.multi_reduction <add>, %5, %cst_4 [0] : vector<128x32xf32> to vector<32xf32>
    %7 = vector.shape_cast %6 : vector<32xf32> to vector<1x32xf32>
    %cst_5 = arith.constant 7.812500e-03 : f32
    %8 = vector.broadcast %cst_5 : f32 to vector<1x32xf32>
    %9 = arith.mulf %4, %8 : vector<1x32xf32>
    %cst_6 = arith.constant 7.812500e-03 : f32
    %10 = vector.broadcast %cst_6 : f32 to vector<1x32xf32>
    %11 = arith.mulf %7, %10 : vector<1x32xf32>
    %12 = arith.mulf %9, %9 : vector<1x32xf32>
    %13 = arith.subf %11, %12 : vector<1x32xf32>
    %cst_7 = arith.constant 0.000000e+00 : f32
    %14 = vector.broadcast %cst_7 : f32 to vector<1x32xf32>
    %15 = arith.maximumf %13, %14 : vector<1x32xf32>
    %c0_8 = arith.constant 0 : index
    %c0_9 = arith.constant 0 : index
    %16 = vector.load %arg2[%c0_8, %c0_9] : memref<1x32xf32, #tpu.memory_space<vmem>>, vector<1x32xf32>
    %cst_10 = arith.constant 9.99999974E-6 : f32
    %17 = vector.broadcast %cst_10 : f32 to vector<1x32xf32>
    %18 = arith.addf %15, %17 : vector<1x32xf32>
    %19 = math.rsqrt %18 : vector<1x32xf32>
    %20 = arith.mulf %16, %19 : vector<1x32xf32>
    %c0_11 = arith.constant 0 : index
    %c0_12 = arith.constant 0 : index
    %21 = vector.load %arg3[%c0_11, %c0_12] : memref<1x32xf32, #tpu.memory_space<vmem>>, vector<1x32xf32>
    %22 = arith.mulf %9, %20 : vector<1x32xf32>
    %23 = arith.subf %21, %22 : vector<1x32xf32>
    %24 = vector.broadcast %20 : vector<1x32xf32> to vector<128x32xf32>
    %25 = arith.mulf %2, %24 : vector<128x32xf32>
    %26 = vector.broadcast %23 : vector<1x32xf32> to vector<128x32xf32>
    %27 = arith.addf %25, %26 : vector<128x32xf32>
    %28 = arith.truncf %27 : vector<128x32xf32> to vector<128x32xbf16>
    %c0_13 = arith.constant 0 : index
    %c0_14 = arith.constant 0 : index
    %29 = vector.load %arg4[%c0_13, %c0_14] : memref<128x32xbf16, #tpu.memory_space<vmem>>, vector<128x32xbf16>
    tpu.vector_store %arg4[%c0_13, %c0_14], %28 {strides = array<i32>} : memref<128x32xbf16, #tpu.memory_space<vmem>>, vector<128x32xbf16>,
    return
  }
}

module attributes {stable_mosaic.version = 11 : i64} {
  func.func @kernel(%arg0: memref<128x288xbf16, #tpu.memory_space<vmem>>, %arg1: memref<288x32xbf16, #tpu.memory_space<vmem>>, %arg2: memref<1x32xf32, #tpu.memory_space<vmem>>, %arg3: memref<1x32xf32, #tpu.memory_space<vmem>>, %arg4: memref<128x32xbf16, #tpu.memory_space<vmem>>, %arg5: memref<128x32xbf16, #tpu.memory_space<vmem>>) attributes {dimension_semantics = [], scalar_prefetch = 0 : i64, scratch_operands = 0 : i64, tpu.core_type = #tpu.core_type<tc>} {
    %c0 = arith.constant 0 : index
    %c0_0 = arith.constant 0 : index
    %0 = vector.load %arg0[%c0, %c0_0] : memref<128x288xbf16, #tpu.memory_space<vmem>>, vector<128x288xbf16>
    %c0_1 = arith.constant 0 : index
    %c0_2 = arith.constant 0 : index
    %1 = vector.load %arg1[%c0_1, %c0_2] : memref<288x32xbf16, #tpu.memory_space<vmem>>, vector<288x32xbf16>
    %cst = arith.constant dense<0.000000e+00> : vector<128x32xf32>
    %2 = tpu.matmul %0, %1, %cst {dimension_numbers = #tpu.dot_dimension_numbers<[1], [0], [0], [1], [0, 0, 1, 1], [], []>} : vector<128x288xbf16>, vector<288x32xbf16>, vector<128x32xf32> -> vector<128x32xf32>
    %cst_3 = arith.constant dense<0.000000e+00> : vector<32xf32>
    %3 = vector.multi_reduction <add>, %2, %cst_3 [0] : vector<128x32xf32> to vector<32xf32>
    %4 = vector.shape_cast %3 : vector<32xf32> to vector<1x32xf32>
    %5 = arith.mulf %2, %2 : vector<128x32xf32>
    %cst_4 = arith.constant dense<0.000000e+00> : vector<32xf32>
    %6 = vector.multi_reduction <add>, %5, %cst_4 [0] : vector<128x32xf32> to vector<32xf32>
    %7 = vector.shape_cast %6 : vector<32xf32> to vector<1x32xf32>
    %cst_5 = arith.constant 7.812500e-03 : f32
    %8 = vector.broadcast %cst_5 : f32 to vector<1x32xf32>
    %9 = arith.mulf %4, %8 : vector<1x32xf32>
    %cst_6 = arith.constant 7.812500e-03 : f32
    %10 = vector.broadcast %cst_6 : f32 to vector<1x32xf32>
    %11 = arith.mulf %7, %10 : vector<1x32xf32>
    %12 = arith.mulf %9, %9 : vector<1x32xf32>
    %13 = arith.subf %11, %12 : vector<1x32xf32>
    %cst_7 = arith.constant 0.000000e+00 : f32
    %14 = vector.broadcast %cst_7 : f32 to vector<1x32xf32>
    %15 = arith.maximumf %13, %14 : vector<1x32xf32>
    %c0_8 = arith.constant 0 : index
    %c0_9 = arith.constant 0 : index
    %16 = vector.load %arg2[%c0_8, %c0_9] : memref<1x32xf32, #tpu.memory_space<vmem>>, vector<1x32xf32>
    %cst_10 = arith.constant 9.99999974E-6 : f32
    %17 = vector.broadcast %cst_10 : f32 to vector<1x32xf32>
    %18 = arith.addf %15, %17 : vector<1x32xf32>
    %19 = math.rsqrt %18 : vector<1x32xf32>
    %20 = arith.mulf %16, %19 : vector<1x32xf32>
    %c0_11 = arith.constant 0 : index
    %c0_12 = arith.constant 0 : index
    %21 = vector.load %arg3[%c0_11, %c0_12] : memref<1x32xf32, #tpu.memory_space<vmem>>, vector<1x32xf32>
    %22 = arith.mulf %9, %20 : vector<1x32xf32>
    %23 = arith.subf %21, %22 : vector<1x32xf32>
    %24 = vector.broadcast %20 : vector<1x32xf32> to vector<128x32xf32>
    %25 = arith.mulf %2, %24 : vector<128x32xf32>
    %26 = vector.broadcast %23 : vector<1x32xf32> to vector<128x32xf32>
    %27 = arith.addf %25, %26 : vector<128x32xf32>
    %c0_13 = arith.constant 0 : index
    %c0_14 = arith.constant 0 : index
    %28 = vector.load %arg4[%c0_13, %c0_14] : memref<128x32xbf16, #tpu.memory_space<vmem>>, vector<128x32xbf16>
    %29 = arith.extf %28 : vector<128x32xbf16> to vector<128x32xf32>
    %30 = arith.addf %27, %29 : vector<128x32xf32>
    %cst_15 = arith.constant 0.000000e+00 : f32
    %31 = vector.broadcast %cst_15 : f32 to vector<128x32xf32>
    %32 = arith.maximumf %30, %31 : vector<128x32xf32>
    %33 = arith.truncf %32 : vector<128x32xf32> to vector<128x32xbf16>
    %c0_16 = arith.constant 0 : index
    %c0_17 = arith.constant 0 : index
    %34 = vector.load %arg5[%c0_16, %c0_17] : memref<128x32xbf16, #tpu.memory_space<vmem>>, vector<128x32xbf16>
    tpu.vector_store %arg5[%c0_16, %c0_17], %33 {strides = array<i32>} : memref<128x32xbf16, #tpu.memory_space<vmem>>, vector<128x32xbf16>,
    return
  }
}

module attributes {stable_mosaic.version = 11 : i64} {
  func.func @kernel(%arg0: memref<32x288xbf16, #tpu.memory_space<vmem>>, %arg1: memref<288x64xbf16, #tpu.memory_space<vmem>>, %arg2: memref<1x64xf32, #tpu.memory_space<vmem>>, %arg3: memref<1x64xf32, #tpu.memory_space<vmem>>, %arg4: memref<32x64xbf16, #tpu.memory_space<vmem>>) attributes {dimension_semantics = [], scalar_prefetch = 0 : i64, scratch_operands = 0 : i64, tpu.core_type = #tpu.core_type<tc>} {
    %c0 = arith.constant 0 : index
    %c0_0 = arith.constant 0 : index
    %0 = vector.load %arg0[%c0, %c0_0] : memref<32x288xbf16, #tpu.memory_space<vmem>>, vector<32x288xbf16>
    %c0_1 = arith.constant 0 : index
    %c0_2 = arith.constant 0 : index
    %1 = vector.load %arg1[%c0_1, %c0_2] : memref<288x64xbf16, #tpu.memory_space<vmem>>, vector<288x64xbf16>
    %cst = arith.constant dense<0.000000e+00> : vector<32x64xf32>
    %2 = tpu.matmul %0, %1, %cst {dimension_numbers = #tpu.dot_dimension_numbers<[1], [0], [0], [1], [0, 0, 1, 1], [], []>} : vector<32x288xbf16>, vector<288x64xbf16>, vector<32x64xf32> -> vector<32x64xf32>
    %cst_3 = arith.constant dense<0.000000e+00> : vector<64xf32>
    %3 = vector.multi_reduction <add>, %2, %cst_3 [0] : vector<32x64xf32> to vector<64xf32>
    %4 = vector.shape_cast %3 : vector<64xf32> to vector<1x64xf32>
    %5 = arith.mulf %2, %2 : vector<32x64xf32>
    %cst_4 = arith.constant dense<0.000000e+00> : vector<64xf32>
    %6 = vector.multi_reduction <add>, %5, %cst_4 [0] : vector<32x64xf32> to vector<64xf32>
    %7 = vector.shape_cast %6 : vector<64xf32> to vector<1x64xf32>
    %cst_5 = arith.constant 3.125000e-02 : f32
    %8 = vector.broadcast %cst_5 : f32 to vector<1x64xf32>
    %9 = arith.mulf %4, %8 : vector<1x64xf32>
    %cst_6 = arith.constant 3.125000e-02 : f32
    %10 = vector.broadcast %cst_6 : f32 to vector<1x64xf32>
    %11 = arith.mulf %7, %10 : vector<1x64xf32>
    %12 = arith.mulf %9, %9 : vector<1x64xf32>
    %13 = arith.subf %11, %12 : vector<1x64xf32>
    %cst_7 = arith.constant 0.000000e+00 : f32
    %14 = vector.broadcast %cst_7 : f32 to vector<1x64xf32>
    %15 = arith.maximumf %13, %14 : vector<1x64xf32>
    %c0_8 = arith.constant 0 : index
    %c0_9 = arith.constant 0 : index
    %16 = vector.load %arg2[%c0_8, %c0_9] : memref<1x64xf32, #tpu.memory_space<vmem>>, vector<1x64xf32>
    %cst_10 = arith.constant 9.99999974E-6 : f32
    %17 = vector.broadcast %cst_10 : f32 to vector<1x64xf32>
    %18 = arith.addf %15, %17 : vector<1x64xf32>
    %19 = math.rsqrt %18 : vector<1x64xf32>
    %20 = arith.mulf %16, %19 : vector<1x64xf32>
    %c0_11 = arith.constant 0 : index
    %c0_12 = arith.constant 0 : index
    %21 = vector.load %arg3[%c0_11, %c0_12] : memref<1x64xf32, #tpu.memory_space<vmem>>, vector<1x64xf32>
    %22 = arith.mulf %9, %20 : vector<1x64xf32>
    %23 = arith.subf %21, %22 : vector<1x64xf32>
    %24 = vector.broadcast %20 : vector<1x64xf32> to vector<32x64xf32>
    %25 = arith.mulf %2, %24 : vector<32x64xf32>
    %26 = vector.broadcast %23 : vector<1x64xf32> to vector<32x64xf32>
    %27 = arith.addf %25, %26 : vector<32x64xf32>
    %cst_13 = arith.constant 0.000000e+00 : f32
    %28 = vector.broadcast %cst_13 : f32 to vector<32x64xf32>
    %29 = arith.maximumf %27, %28 : vector<32x64xf32>
    %30 = arith.truncf %29 : vector<32x64xf32> to vector<32x64xbf16>
    %c0_14 = arith.constant 0 : index
    %c0_15 = arith.constant 0 : index
    %31 = vector.load %arg4[%c0_14, %c0_15] : memref<32x64xbf16, #tpu.memory_space<vmem>>, vector<32x64xbf16>
    tpu.vector_store %arg4[%c0_14, %c0_15], %30 {strides = array<i32>} : memref<32x64xbf16, #tpu.memory_space<vmem>>, vector<32x64xbf16>,
    return
  }
}

module attributes {stable_mosaic.version = 11 : i64} {
  func.func @kernel(%arg0: memref<32x576xbf16, #tpu.memory_space<vmem>>, %arg1: memref<576x64xbf16, #tpu.memory_space<vmem>>, %arg2: memref<1x64xf32, #tpu.memory_space<vmem>>, %arg3: memref<1x64xf32, #tpu.memory_space<vmem>>, %arg4: memref<32x64xbf16, #tpu.memory_space<vmem>>, %arg5: memref<32x64xbf16, #tpu.memory_space<vmem>>) attributes {dimension_semantics = [], scalar_prefetch = 0 : i64, scratch_operands = 0 : i64, tpu.core_type = #tpu.core_type<tc>} {
    %c0 = arith.constant 0 : index
    %c0_0 = arith.constant 0 : index
    %0 = vector.load %arg0[%c0, %c0_0] : memref<32x576xbf16, #tpu.memory_space<vmem>>, vector<32x576xbf16>
    %c0_1 = arith.constant 0 : index
    %c0_2 = arith.constant 0 : index
    %1 = vector.load %arg1[%c0_1, %c0_2] : memref<576x64xbf16, #tpu.memory_space<vmem>>, vector<576x64xbf16>
    %cst = arith.constant dense<0.000000e+00> : vector<32x64xf32>
    %2 = tpu.matmul %0, %1, %cst {dimension_numbers = #tpu.dot_dimension_numbers<[1], [0], [0], [1], [0, 0, 1, 1], [], []>} : vector<32x576xbf16>, vector<576x64xbf16>, vector<32x64xf32> -> vector<32x64xf32>
    %cst_3 = arith.constant dense<0.000000e+00> : vector<64xf32>
    %3 = vector.multi_reduction <add>, %2, %cst_3 [0] : vector<32x64xf32> to vector<64xf32>
    %4 = vector.shape_cast %3 : vector<64xf32> to vector<1x64xf32>
    %5 = arith.mulf %2, %2 : vector<32x64xf32>
    %cst_4 = arith.constant dense<0.000000e+00> : vector<64xf32>
    %6 = vector.multi_reduction <add>, %5, %cst_4 [0] : vector<32x64xf32> to vector<64xf32>
    %7 = vector.shape_cast %6 : vector<64xf32> to vector<1x64xf32>
    %cst_5 = arith.constant 3.125000e-02 : f32
    %8 = vector.broadcast %cst_5 : f32 to vector<1x64xf32>
    %9 = arith.mulf %4, %8 : vector<1x64xf32>
    %cst_6 = arith.constant 3.125000e-02 : f32
    %10 = vector.broadcast %cst_6 : f32 to vector<1x64xf32>
    %11 = arith.mulf %7, %10 : vector<1x64xf32>
    %12 = arith.mulf %9, %9 : vector<1x64xf32>
    %13 = arith.subf %11, %12 : vector<1x64xf32>
    %cst_7 = arith.constant 0.000000e+00 : f32
    %14 = vector.broadcast %cst_7 : f32 to vector<1x64xf32>
    %15 = arith.maximumf %13, %14 : vector<1x64xf32>
    %c0_8 = arith.constant 0 : index
    %c0_9 = arith.constant 0 : index
    %16 = vector.load %arg2[%c0_8, %c0_9] : memref<1x64xf32, #tpu.memory_space<vmem>>, vector<1x64xf32>
    %cst_10 = arith.constant 9.99999974E-6 : f32
    %17 = vector.broadcast %cst_10 : f32 to vector<1x64xf32>
    %18 = arith.addf %15, %17 : vector<1x64xf32>
    %19 = math.rsqrt %18 : vector<1x64xf32>
    %20 = arith.mulf %16, %19 : vector<1x64xf32>
    %c0_11 = arith.constant 0 : index
    %c0_12 = arith.constant 0 : index
    %21 = vector.load %arg3[%c0_11, %c0_12] : memref<1x64xf32, #tpu.memory_space<vmem>>, vector<1x64xf32>
    %22 = arith.mulf %9, %20 : vector<1x64xf32>
    %23 = arith.subf %21, %22 : vector<1x64xf32>
    %24 = vector.broadcast %20 : vector<1x64xf32> to vector<32x64xf32>
    %25 = arith.mulf %2, %24 : vector<32x64xf32>
    %26 = vector.broadcast %23 : vector<1x64xf32> to vector<32x64xf32>
    %27 = arith.addf %25, %26 : vector<32x64xf32>
    %c0_13 = arith.constant 0 : index
    %c0_14 = arith.constant 0 : index
    %28 = vector.load %arg4[%c0_13, %c0_14] : memref<32x64xbf16, #tpu.memory_space<vmem>>, vector<32x64xbf16>
    %29 = arith.extf %28 : vector<32x64xbf16> to vector<32x64xf32>
    %30 = arith.addf %27, %29 : vector<32x64xf32>
    %cst_15 = arith.constant 0.000000e+00 : f32
    %31 = vector.broadcast %cst_15 : f32 to vector<32x64xf32>
    %32 = arith.maximumf %30, %31 : vector<32x64xf32>
    %33 = arith.truncf %32 : vector<32x64xf32> to vector<32x64xbf16>
    %c0_16 = arith.constant 0 : index
    %c0_17 = arith.constant 0 : index
    %34 = vector.load %arg5[%c0_16, %c0_17] : memref<32x64xbf16, #tpu.memory_space<vmem>>, vector<32x64xbf16>
    tpu.vector_store %arg5[%c0_16, %c0_17], %33 {strides = array<i32>} : memref<32x64xbf16, #tpu.memory_space<vmem>>, vector<32x64xbf16>,
    return
  }
}

module attributes {stable_mosaic.version = 11 : i64} {
  func.func @kernel(%arg0: memref<32x32xbf16, #tpu.memory_space<vmem>>, %arg1: memref<32x64xbf16, #tpu.memory_space<vmem>>, %arg2: memref<1x64xf32, #tpu.memory_space<vmem>>, %arg3: memref<1x64xf32, #tpu.memory_space<vmem>>, %arg4: memref<32x64xbf16, #tpu.memory_space<vmem>>) attributes {dimension_semantics = [], scalar_prefetch = 0 : i64, scratch_operands = 0 : i64, tpu.core_type = #tpu.core_type<tc>} {
    %c0 = arith.constant 0 : index
    %c0_0 = arith.constant 0 : index
    %0 = vector.load %arg0[%c0, %c0_0] : memref<32x32xbf16, #tpu.memory_space<vmem>>, vector<32x32xbf16>
    %c0_1 = arith.constant 0 : index
    %c0_2 = arith.constant 0 : index
    %1 = vector.load %arg1[%c0_1, %c0_2] : memref<32x64xbf16, #tpu.memory_space<vmem>>, vector<32x64xbf16>
    %cst = arith.constant dense<0.000000e+00> : vector<32x64xf32>
    %2 = tpu.matmul %0, %1, %cst {dimension_numbers = #tpu.dot_dimension_numbers<[1], [0], [0], [1], [0, 0, 1, 1], [], []>} : vector<32x32xbf16>, vector<32x64xbf16>, vector<32x64xf32> -> vector<32x64xf32>
    %cst_3 = arith.constant dense<0.000000e+00> : vector<64xf32>
    %3 = vector.multi_reduction <add>, %2, %cst_3 [0] : vector<32x64xf32> to vector<64xf32>
    %4 = vector.shape_cast %3 : vector<64xf32> to vector<1x64xf32>
    %5 = arith.mulf %2, %2 : vector<32x64xf32>
    %cst_4 = arith.constant dense<0.000000e+00> : vector<64xf32>
    %6 = vector.multi_reduction <add>, %5, %cst_4 [0] : vector<32x64xf32> to vector<64xf32>
    %7 = vector.shape_cast %6 : vector<64xf32> to vector<1x64xf32>
    %cst_5 = arith.constant 3.125000e-02 : f32
    %8 = vector.broadcast %cst_5 : f32 to vector<1x64xf32>
    %9 = arith.mulf %4, %8 : vector<1x64xf32>
    %cst_6 = arith.constant 3.125000e-02 : f32
    %10 = vector.broadcast %cst_6 : f32 to vector<1x64xf32>
    %11 = arith.mulf %7, %10 : vector<1x64xf32>
    %12 = arith.mulf %9, %9 : vector<1x64xf32>
    %13 = arith.subf %11, %12 : vector<1x64xf32>
    %cst_7 = arith.constant 0.000000e+00 : f32
    %14 = vector.broadcast %cst_7 : f32 to vector<1x64xf32>
    %15 = arith.maximumf %13, %14 : vector<1x64xf32>
    %c0_8 = arith.constant 0 : index
    %c0_9 = arith.constant 0 : index
    %16 = vector.load %arg2[%c0_8, %c0_9] : memref<1x64xf32, #tpu.memory_space<vmem>>, vector<1x64xf32>
    %cst_10 = arith.constant 9.99999974E-6 : f32
    %17 = vector.broadcast %cst_10 : f32 to vector<1x64xf32>
    %18 = arith.addf %15, %17 : vector<1x64xf32>
    %19 = math.rsqrt %18 : vector<1x64xf32>
    %20 = arith.mulf %16, %19 : vector<1x64xf32>
    %c0_11 = arith.constant 0 : index
    %c0_12 = arith.constant 0 : index
    %21 = vector.load %arg3[%c0_11, %c0_12] : memref<1x64xf32, #tpu.memory_space<vmem>>, vector<1x64xf32>
    %22 = arith.mulf %9, %20 : vector<1x64xf32>
    %23 = arith.subf %21, %22 : vector<1x64xf32>
    %24 = vector.broadcast %20 : vector<1x64xf32> to vector<32x64xf32>
    %25 = arith.mulf %2, %24 : vector<32x64xf32>
    %26 = vector.broadcast %23 : vector<1x64xf32> to vector<32x64xf32>
    %27 = arith.addf %25, %26 : vector<32x64xf32>
    %28 = arith.truncf %27 : vector<32x64xf32> to vector<32x64xbf16>
    %c0_13 = arith.constant 0 : index
    %c0_14 = arith.constant 0 : index
    %29 = vector.load %arg4[%c0_13, %c0_14] : memref<32x64xbf16, #tpu.memory_space<vmem>>, vector<32x64xbf16>
    tpu.vector_store %arg4[%c0_13, %c0_14], %28 {strides = array<i32>} : memref<32x64xbf16, #tpu.memory_space<vmem>>, vector<32x64xbf16>,
    return
  }
}

module attributes {stable_mosaic.version = 11 : i64} {
  func.func @_head_kernel(%arg0: memref<2x16x64xbf16, #tpu.memory_space<vmem>>, %arg1: memref<64x10xf32, #tpu.memory_space<vmem>>, %arg2: memref<1x10xf32, #tpu.memory_space<vmem>>, %arg3: memref<2x10xf32, #tpu.memory_space<vmem>>) attributes {dimension_semantics = [], scalar_prefetch = 0 : i64, scratch_operands = 0 : i64, tpu.core_type = #tpu.core_type<tc>} {
    %c0 = arith.constant 0 : index
    %c0_0 = arith.constant 0 : index
    %c0_1 = arith.constant 0 : index
    %0 = vector.load %arg0[%c0, %c0_0, %c0_1] : memref<2x16x64xbf16, #tpu.memory_space<vmem>>, vector<2x16x64xbf16>
    %1 = arith.extf %0 : vector<2x16x64xbf16> to vector<2x16x64xf32>
    %cst = arith.constant dense<0.000000e+00> : vector<2x64xf32>
    %2 = vector.multi_reduction <add>, %1, %cst [1] : vector<2x16x64xf32> to vector<2x64xf32>
    %cst_2 = arith.constant 1.600000e+01 : f32
    %3 = vector.broadcast %cst_2 : f32 to vector<2x64xf32>
    %4 = arith.divf %2, %3 : vector<2x64xf32>
    %c0_3 = arith.constant 0 : index
    %c0_4 = arith.constant 0 : index
    %5 = vector.load %arg1[%c0_3, %c0_4] : memref<64x10xf32, #tpu.memory_space<vmem>>, vector<64x10xf32>
    %cst_5 = arith.constant dense<0.000000e+00> : vector<2x10xf32>
    %6 = tpu.matmul %4, %5, %cst_5 {dimension_numbers = #tpu.dot_dimension_numbers<[1], [0], [0], [1], [0, 0, 1, 1], [], []>} : vector<2x64xf32>, vector<64x10xf32>, vector<2x10xf32> -> vector<2x10xf32>
    %c0_6 = arith.constant 0 : index
    %c0_7 = arith.constant 0 : index
    %7 = vector.load %arg2[%c0_6, %c0_7] : memref<1x10xf32, #tpu.memory_space<vmem>>, vector<1x10xf32>
    %8 = vector.broadcast %7 : vector<1x10xf32> to vector<2x10xf32>
    %9 = arith.addf %6, %8 : vector<2x10xf32>
    %c0_8 = arith.constant 0 : index
    %c0_9 = arith.constant 0 : index
    %10 = vector.load %arg3[%c0_8, %c0_9] : memref<2x10xf32, #tpu.memory_space<vmem>>, vector<2x10xf32>
    tpu.vector_store %arg3[%c0_8, %c0_9], %9 {strides = array<i32>} : memref<2x10xf32, #tpu.memory_space<vmem>>, vector<2x10xf32>,
    return
  }
}

</mosaic_0001>

<bundles_post_ra>
// kernel: _lambda_.10
= control target key start
LH: loop header
LB: loop body
LE: loop exit
PB: predicated region body
PF: predicated region fallthrough
CT: control target
= control target key end

     0   :  { %vm354_vm0 = vcmask 1044480   ;;  %vm355_vm1 = vcmask 1045504   ;;  %v1859_v1 = vmov 65535   ;;  %vm257_vm2 = vcmask 220160   ;;  %s3514_s1 = inlined_call_operand.vmem [shape: bf16[27,16], index: 1, kind: input, shape index: {}]   ;;  %s3515_s0 = inlined_call_operand.vmem [shape: bf16[512,27], index: 0, kind: input, shape index: {}]   ;;  %s3516_s2 = inlined_call_operand.vmem [shape: f32[1,16], index: 2, kind: input, shape index: {}]   ;;  %s3517_s3 = inlined_call_operand.vmem [shape: f32[1,16], index: 3, kind: input, shape index: {}]   ;;  %s3518_s4 = inlined_call_operand.vmem [shape: bf16[512,16], index: 4, kind: output, shape index: {}]  }
   0x1   :  { %v1823_v0 = vld [vmem:[%s3514_s1 + $0x8] sm:$0x3f]   ;;  %v356_v2 = vsel %vm354_vm0, 4294967295, %v1859_v1  ;;  %v1825_v4 = vld [vmem:[%s3515_s0] sm:$0xff]   ;;  %v1827_v8 = vld [vmem:[%s3515_s0 + $0x10] sm:$0xff]   ;;  %vm650_vm3 = vcmask 130048  }
   0x2   :  { %v357_v3 = vsel %vm355_vm1, %v356_v2, 0  ;;  %v1824_v6 = vld [vmem:[%s3514_s1] sm:$0xff]   ;;  %1754 = vmatprep.mubr.msk.bf16.mxu0 %vm257_vm2, %v1825_v4  ;;  %v1826_v7 = vld [vmem:[%s3515_s0 + $0x8] sm:$0xff]   ;;  %v1828_v9 = vld [vmem:[%s3515_s0 + $0x18] sm:$0xff]   ;;  %vm1453_vm4 = vcmask 125952  }
   0x3   :  { %v359_v5 = vand.u32 %v1823_v0, %v357_v3  ;;  %v1829_v10 = vld [vmem:[%s3515_s0 + $0x20] sm:$0xff]   ;;  %v1842_v12 = vld [vmem:[%s3515_s0 + $0x88] sm:$0xff]   ;;  %v1843_v13 = vld [vmem:[%s3515_s0 + $0x90] sm:$0xff]  }
   0x4   :  { %v1841_v11 = vld [vmem:[%s3515_s0 + $0x80] sm:$0xff]   ;;  %v1830_v14 = vld [vmem:[%s3515_s0 + $0x28] sm:$0xff]   ;;  %v1831_v15 = vld [vmem:[%s3515_s0 + $0x30] sm:$0xff]  }
   0x5   :  { %1750 = vmatprep.subr.bf16.mxu0 %v359_v5  ;;  %1818 = vmatprep.subr.bf16.mxu1 %v359_v5  ;;  %v1844_v16 = vld [vmem:[%s3515_s0 + $0x98] sm:$0xff]   ;;  %v1845_v17 = vld [vmem:[%s3515_s0 + $0xa0] sm:$0xff]   ;;  %v1846_v19 = vld [vmem:[%s3515_s0 + $0xa8] sm:$0xff]  }
   0x6   :  { %1751 = vmatpush3.bf16.msra.mxu0 %v359_v5  ;;  %1820 = vmatpush3.bf16.msra.mxu1 %v359_v5  ;;  %v1832_v18 = vld [vmem:[%s3515_s0 + $0x38] sm:$0xff]   ;;  %v1833_v20 = vld [vmem:[%s3515_s0 + $0x40] sm:$0xff]   ;;  %v1847_v21 = vld [vmem:[%s3515_s0 + $0xb0] sm:$0xff]  }
   0x7   :  { %1752 = vmatprep.subr.bf16.mxu0 %v1824_v6  ;;  %1819 = vmatprep.subr.bf16.mxu1 %v1824_v6  ;;  %v1834_v22 = vld [vmem:[%s3515_s0 + $0x48] sm:$0xff]   ;;  %v1848_v23 = vld [vmem:[%s3515_s0 + $0xb8] sm:$0xff]   ;;  %v1835_v24 = vld [vmem:[%s3515_s0 + $0x50] sm:$0xff]  }
   0x8   :  { %1786 = vmatprep.mubr.msk.bf16.mxu1 %vm257_vm2, %v1841_v11  ;;  %v1849_v25 = vld [vmem:[%s3515_s0 + $0xc0] sm:$0xff]   ;;  %v1836_v26 = vld [vmem:[%s3515_s0 + $0x58] sm:$0xff]   ;;  %v1850_v27 = vld [vmem:[%s3515_s0 + $0xc8] sm:$0xff]  }
   0x9   :  { %v1837_v28 = vld [vmem:[%s3515_s0 + $0x60] sm:$0xff]   ;;  %v1851_v29 = vld [vmem:[%s3515_s0 + $0xd0] sm:$0xff]   ;;  %v1838_v30 = vld [vmem:[%s3515_s0 + $0x68] sm:$0xff]  }
   0xa   :  { %1753 = vmatpush3.bf16.msra.mxu0 %v1824_v6  ;;  %1821 = vmatpush3.bf16.msra.mxu1 %v1824_v6  ;;  %v1852_v31 = vld [vmem:[%s3515_s0 + $0xd8] sm:$0xff]   ;;  %v1839_v32 = vld [vmem:[%s3515_s0 + $0x70] sm:$0xff]   ;;  %v1853_v33 = vld [vmem:[%s3515_s0 + $0xe0] sm:$0xff]  }
   0xb   :  { %v1840_v34 = vld [vmem:[%s3515_s0 + $0x78] sm:$0xff]   ;;  %v1854_v35 = vld [vmem:[%s3515_s0 + $0xe8] sm:$0xff]   ;;  %v1855_v36 = vld [vmem:[%s3515_s0 + $0xf0] sm:$0xff]  }
   0xc   :  { %v1856_v37 = vld [vmem:[%s3515_s0 + $0xf8] sm:$0xff]  }
   0xd   :  { %1755 = vmatmul.mubr.msk.bf16.vlgmr.msra.gmra.mxu0 %vm257_vm2, %v1826_v7  ;;  %1787 = vmatmul.mubr.msk.bf16.vlgmr.msra.gmra.mxu1 %vm257_vm2, %v1842_v12 }
   0xe   :  { %1758 = vmatprep.mubr.msk.bf16.mxu0 %vm257_vm2, %v1827_v8  ;;  %1790 = vmatprep.mubr.msk.bf16.mxu1 %vm257_vm2, %v1843_v13 }
  0x15   :  { %1759 = vmatmul.mubr.msk.bf16.gmra.mxu0 %vm257_vm2, %v1828_v9  ;;  %1791 = vmatmul.mubr.msk.bf16.gmra.mxu1 %vm257_vm2, %v1844_v16 }
  0x16   :  { %1762 = vmatprep.mubr.msk.bf16.mxu0 %vm257_vm2, %v1829_v10  ;;  %1794 = vmatprep.mubr.msk.bf16.mxu1 %vm257_vm2, %v1845_v17 }
  0x1d   :  { %1763 = vmatmul.mubr.msk.bf16.gmra.mxu0 %vm257_vm2, %v1830_v14  ;;  %1795 = vmatmul.mubr.msk.bf16.gmra.mxu1 %vm257_vm2, %v1846_v19 }
  0x1e   :  { %1766 = vmatprep.mubr.msk.bf16.mxu0 %vm257_vm2, %v1831_v15  ;;  %1798 = vmatprep.mubr.msk.bf16.mxu1 %vm257_vm2, %v1847_v21 }
  0x25   :  { %1767 = vmatmul.mubr.msk.bf16.gmra.mxu0 %vm257_vm2, %v1832_v18  ;;  %1799 = vmatmul.mubr.msk.bf16.gmra.mxu1 %vm257_vm2, %v1848_v23 }
  0x26   :  { %1770 = vmatprep.mubr.msk.bf16.mxu0 %vm257_vm2, %v1833_v20  ;;  %1802 = vmatprep.mubr.msk.bf16.mxu1 %vm257_vm2, %v1849_v25 }
  0x2d   :  { %1771 = vmatmul.mubr.msk.bf16.gmra.mxu0 %vm257_vm2, %v1834_v22  ;;  %1803 = vmatmul.mubr.msk.bf16.gmra.mxu1 %vm257_vm2, %v1850_v27 }
  0x2e   :  { %1774 = vmatprep.mubr.msk.bf16.mxu0 %vm257_vm2, %v1835_v24  ;;  %1806 = vmatprep.mubr.msk.bf16.mxu1 %vm257_vm2, %v1851_v29 }
  0x35   :  { %1775 = vmatmul.mubr.msk.bf16.gmra.mxu0 %vm257_vm2, %v1836_v26  ;;  %1807 = vmatmul.mubr.msk.bf16.gmra.mxu1 %vm257_vm2, %v1852_v31 }
  0x36   :  { %1778 = vmatprep.mubr.msk.bf16.mxu0 %vm257_vm2, %v1837_v28  ;;  %1810 = vmatprep.mubr.msk.bf16.mxu1 %vm257_vm2, %v1853_v33 }
  0x3d   :  { %1779 = vmatmul.mubr.msk.bf16.gmra.mxu0 %vm257_vm2, %v1838_v30  ;;  %1811 = vmatmul.mubr.msk.bf16.gmra.mxu1 %vm257_vm2, %v1854_v35 }
  0x3e   :  { %1782 = vmatprep.mubr.msk.bf16.mxu0 %vm257_vm2, %v1839_v32  ;;  %1814 = vmatprep.mubr.msk.bf16.mxu1 %vm257_vm2, %v1855_v36 }
  0x45   :  { %1783 = vmatmul.mubr.msk.bf16.gmra.mxu0 %vm257_vm2, %v1840_v34  ;;  %1815 = vmatmul.mubr.msk.bf16.gmra.mxu1 %vm257_vm2, %v1856_v37 }
  0xcd   :  { %v2019_v38 = vpop.f32.mrf.mxu0  ;;  %v2039_v49 = vpop.f32.mrf.mxu1 }
  0xce   :  { %v786_v43 = vmul.f32 %v2019_v38, %v2019_v38  ;;  %3560 = vst [vmem:[#allocation2_spill] sm:$0xff] %v2039_v49  ;;  %v654_v50 = vsel %vm650_vm3, %v2019_v38, 0.0 }
  0xcf   :  { %v2021_v39 = vpop.f32.mrf.mxu0  ;;  %v2049_v57 = vpop.f32.mrf.mxu1 }
  0xd0   :  { %v784_v41 = vmul.f32 %v2021_v39, %v2021_v39  ;;  %v651_v44 = vsel %vm650_vm3, %v2021_v39, 0.0  ;;  %3561 = vst [vmem:[#allocation3_spill] sm:$0xff] %v2049_v57  ;;  %v851_v58 = vsel %vm650_vm3, %v786_v43, 0.0 }
  0xd1   :  { %v2023_v40 = vpop.f32.mrf.mxu0  ;;  %v2058_v0 = vpop.f32.mrf.mxu1 }
  0xd2   :  { %v848_v51 = vsel %vm650_vm3, %v784_v41, 0.0  ;;  %v787_v52 = vmul.f32 %v2023_v40, %v2023_v40  ;;  %v656_v59 = vsel %vm650_vm3, %v2023_v40, 0.0 }
  0xd3   :  { %v2027_v42 = vpop.f32.mrf.mxu0  ;;  %v2065_v6 = vpop.f32.mrf.mxu1 }
  0xd4   :  { %v652_v45 = vsel %vm650_vm3, %v2027_v42, 0.0  ;;  %v785_v46 = vmul.f32 %v2027_v42, %v2027_v42  ;;  %v853_v1 = vsel %vm650_vm3, %v787_v52, 0.0 }
  0xd5   :  { %v653_v47 = vadd.f32 %v652_v45, %v651_v44  ;;  %v2037_v48 = vpop.f32.mrf.mxu0  ;;  %v2076_v14 = vpop.f32.mrf.mxu1 }
  0xd6   :  { %v849_v53 = vsel %vm650_vm3, %v785_v46, 0.0  ;;  %v790_v7 = vmul.f32 %v2037_v48, %v2037_v48  ;;  %3562 = vst [vmem:[#allocation4_spill] sm:$0xff] %v2076_v14  ;;  %v662_v15 = vsel %vm650_vm3, %v2037_v48, 0.0 }
  0xd7   :  { %v655_v54 = vadd.f32 %v654_v50, %v653_v47  ;;  %v850_v55 = vadd.f32 %v849_v53, %v848_v51  ;;  %v2047_v56 = vpop.f32.mrf.mxu0  ;;  %v2085_v21 = vpop.f32.mrf.mxu1 }
  0xd8   :  { %v788_v60 = vmul.f32 %v2047_v56, %v2047_v56  ;;  %v658_v2 = vsel %vm650_vm3, %v2047_v56, 0.0  ;;  %3563 = vst [vmem:[#allocation5_spill] sm:$0xff] %v2085_v21  ;;  %v859_v22 = vsel %vm650_vm3, %v790_v7, 0.0 }
  0xd9   :  { %v852_v61 = vadd.f32 %v851_v58, %v850_v55  ;;  %v657_v62 = vadd.f32 %v656_v59, %v655_v54  ;;  %v2056_v63 = vpop.f32.mrf.mxu0  ;;  %v2099_v33 = vpop.f32.mrf.mxu1 }
  0xda   :  { %v855_v8 = vsel %vm650_vm3, %v788_v60, 0.0  ;;  %v791_v16 = vmul.f32 %v2056_v63, %v2056_v63  ;;  %v664_v23 = vsel %vm650_vm3, %v2056_v63, 0.0 }
  0xdb   :  { %v659_v3 = vadd.f32 %v658_v2, %v657_v62  ;;  %v854_v4 = vadd.f32 %v853_v1, %v852_v61  ;;  %v2063_v5 = vpop.f32.mrf.mxu0  ;;  %v2117_v53 = vpop.f32.mrf.mxu1 }
  0xdc   :  { %v660_v9 = vsel %vm650_vm3, %v2063_v5, 0.0  ;;  %v789_v10 = vmul.f32 %v2063_v5, %v2063_v5  ;;  %v861_v28 = vsel %vm650_vm3, %v791_v16, 0.0 }
  0xdd   :  { %v856_v11 = vadd.f32 %v855_v8, %v854_v4  ;;  %v661_v12 = vadd.f32 %v660_v9, %v659_v3  ;;  %v2074_v13 = vpop.f32.mrf.mxu0  ;;  %v2131_v7 = vpop.f32.mrf.mxu1 }
  0xde   :  { %v857_v17 = vsel %vm650_vm3, %v789_v10, 0.0  ;;  %v794_v34 = vmul.f32 %v2074_v13, %v2074_v13  ;;  %v670_v45 = vsel %vm650_vm3, %v2074_v13, 0.0  ;;  %3564 = vst [vmem:[#allocation6_spill] sm:$0xff] %v2131_v7 }
  0xdf   :  { %v663_v18 = vadd.f32 %v662_v15, %v661_v12  ;;  %v858_v19 = vadd.f32 %v857_v17, %v856_v11  ;;  %v2083_v20 = vpop.f32.mrf.mxu0 }
  0xe0   :  { %v792_v24 = vmul.f32 %v2083_v20, %v2083_v20  ;;  %v666_v29 = vsel %vm650_vm3, %v2083_v20, 0.0  ;;  %v867_v54 = vsel %vm650_vm3, %v794_v34, 0.0 }
  0xe1   :  { %v860_v25 = vadd.f32 %v859_v22, %v858_v19  ;;  %v665_v26 = vadd.f32 %v664_v23, %v663_v18  ;;  %v2092_v27 = vpop.f32.mrf.mxu0 }
  0xe2   :  { %v863_v35 = vsel %vm650_vm3, %v792_v24, 0.0  ;;  %v795_v46 = vmul.f32 %v2092_v27, %v2092_v27  ;;  %v672_v55 = vsel %vm650_vm3, %v2092_v27, 0.0 }
  0xe3   :  { %v667_v30 = vadd.f32 %v666_v29, %v665_v26  ;;  %v862_v31 = vadd.f32 %v861_v28, %v860_v25  ;;  %v2097_v32 = vpop.f32.mrf.mxu0  ;;  %v2149_v25 = vpop.f32.mrf.mxu1 }
  0xe4   :  { %v668_v36 = vsel %vm650_vm3, %v2097_v32, 0.0  ;;  %v793_v37 = vmul.f32 %v2097_v32, %v2097_v32  ;;  %v869_v62 = vsel %vm650_vm3, %v795_v46, 0.0  ;;  %3565 = vst [vmem:[#allocation7_spill] sm:$0xff] %v2149_v25 }
  0xe5   :  { %v864_v41 = vadd.f32 %v863_v35, %v862_v31  ;;  %v669_v43 = vadd.f32 %v668_v36, %v667_v30  ;;  %v2108_v44 = vpop.f32.mrf.mxu0 }
  0xe6   :  { %v865_v47 = vsel %vm650_vm3, %v793_v37, 0.0  ;;  %v798_v8 = vmul.f32 %v2108_v44, %v2108_v44  ;;  %v678_v17 = vsel %vm650_vm3, %v2108_v44, 0.0 }
  0xe7   :  { %v671_v50 = vadd.f32 %v670_v45, %v669_v43  ;;  %v866_v51 = vadd.f32 %v865_v47, %v864_v41  ;;  %v2115_v52 = vpop.f32.mrf.mxu0  ;;  %v2163_v45 = vpop.f32.mrf.mxu1 }
  0xe8   :  { %v796_v58 = vmul.f32 %v2115_v52, %v2115_v52  ;;  %v674_v1 = vsel %vm650_vm3, %v2115_v52, 0.0  ;;  %v875_v26 = vsel %vm650_vm3, %v798_v8, 0.0 }
  0xe9   :  { %v868_v59 = vadd.f32 %v867_v54, %v866_v51  ;;  %v673_v60 = vadd.f32 %v672_v55, %v671_v50  ;;  %v2124_v61 = vpop.f32.mrf.mxu0  ;;  %v2181_v8 = vpop.f32.mrf.mxu1 }
  0xea   :  { %v871_v9 = vsel %vm650_vm3, %v796_v58, 0.0  ;;  %v799_v18 = vmul.f32 %v2124_v61, %v2124_v61  ;;  %v680_v28 = vsel %vm650_vm3, %v2124_v61, 0.0 }
  0xeb   :  { %v675_v2 = vadd.f32 %v674_v1, %v673_v60  ;;  %v870_v3 = vadd.f32 %v869_v62, %v868_v59  ;;  %v2129_v4 = vpop.f32.mrf.mxu0 }
  0xec   :  { %v676_v10 = vsel %vm650_vm3, %v2129_v4, 0.0  ;;  %v797_v11 = vmul.f32 %v2129_v4, %v2129_v4  ;;  %v877_v35 = vsel %vm650_vm3, %v799_v18, 0.0 }
  0xed   :  { %v872_v12 = vadd.f32 %v871_v9, %v870_v3  ;;  %v677_v15 = vadd.f32 %v676_v10, %v675_v2  ;;  %v2140_v16 = vpop.f32.mrf.mxu0 }
  0xee   :  { %v873_v19 = vsel %vm650_vm3, %v797_v11, 0.0  ;;  %v802_v46 = vmul.f32 %v2140_v16, %v2140_v16  ;;  %v686_v59 = vsel %vm650_vm3, %v2140_v16, 0.0 }
  0xef   :  { %v679_v22 = vadd.f32 %v678_v17, %v677_v15  ;;  %v874_v23 = vadd.f32 %v873_v19, %v872_v12  ;;  %v2147_v24 = vpop.f32.mrf.mxu0 }
  0xf0   :  { %v800_v29 = vmul.f32 %v2147_v24, %v2147_v24  ;;  %v682_v36 = vsel %vm650_vm3, %v2147_v24, 0.0  ;;  %v883_v9 = vsel %vm650_vm3, %v802_v46, 0.0 }
  0xf1   :  { %v876_v30 = vadd.f32 %v875_v26, %v874_v23  ;;  %v681_v31 = vadd.f32 %v680_v28, %v679_v22  ;;  %v2156_v34 = vpop.f32.mrf.mxu0  ;;  %v2195_v28 = vpop.f32.mrf.mxu1 }
  0xf2   :  { %v879_v47 = vsel %vm650_vm3, %v800_v29, 0.0  ;;  %v803_v60 = vmul.f32 %v2156_v34, %v2156_v34  ;;  %v688_v10 = vsel %vm650_vm3, %v2156_v34, 0.0  ;;  %3566 = vst [vmem:[#allocation8_spill] sm:$0xff] %v2195_v28 }
  0xf3   :  { %v683_v37 = vadd.f32 %v682_v36, %v681_v31  ;;  %v878_v41 = vadd.f32 %v877_v35, %v876_v30  ;;  %v2161_v43 = vpop.f32.mrf.mxu0 }
  0xf4   :  { %v684_v50 = vsel %vm650_vm3, %v2161_v43, 0.0  ;;  %v801_v51 = vmul.f32 %v2161_v43, %v2161_v43  ;;  %v885_v18 = vsel %vm650_vm3, %v803_v60, 0.0 }
  0xf5   :  { %v880_v54 = vadd.f32 %v879_v47, %v878_v41  ;;  %v685_v55 = vadd.f32 %v684_v50, %v683_v37  ;;  %v2172_v58 = vpop.f32.mrf.mxu0 }
  0xf6   :  { %v881_v62 = vsel %vm650_vm3, %v801_v51, 0.0  ;;  %v806_v29 = vmul.f32 %v2172_v58, %v2172_v58  ;;  %v694_v46 = vsel %vm650_vm3, %v2172_v58, 0.0 }
  0xf7   :  { %v687_v1 = vadd.f32 %v686_v59, %v685_v55  ;;  %v882_v2 = vadd.f32 %v881_v62, %v880_v54  ;;  %v2179_v3 = vpop.f32.mrf.mxu0  ;;  %v2213_v59 = vpop.f32.mrf.mxu1 }
  0xf8   :  { %v804_v11 = vmul.f32 %v2179_v3, %v2179_v3  ;;  %v690_v19 = vsel %vm650_vm3, %v2179_v3, 0.0  ;;  %3567 = vst [vmem:[#allocation9_spill] sm:$0xff] %v2213_v59  ;;  %v891_v60 = vsel %vm650_vm3, %v806_v29, 0.0 }
  0xf9   :  { %v884_v12 = vadd.f32 %v883_v9, %v882_v2  ;;  %v689_v15 = vadd.f32 %v688_v10, %v687_v1  ;;  %v2188_v17 = vpop.f32.mrf.mxu0 }
  0xfa   :  { %v887_v30 = vsel %vm650_vm3, %v804_v11, 0.0  ;;  %v807_v47 = vmul.f32 %v2188_v17, %v2188_v17  ;;  %v696_v62 = vsel %vm650_vm3, %v2188_v17, 0.0 }
  0xfb   :  { %v691_v22 = vadd.f32 %v690_v19, %v689_v15  ;;  %v886_v23 = vadd.f32 %v885_v18, %v884_v12  ;;  %v2193_v26 = vpop.f32.mrf.mxu0 }
  0xfc   :  { %v692_v31 = vsel %vm650_vm3, %v2193_v26, 0.0  ;;  %v805_v35 = vmul.f32 %v2193_v26, %v2193_v26  ;;  %v893_v11 = vsel %vm650_vm3, %v807_v47, 0.0 }
  0xfd   :  { %v888_v36 = vadd.f32 %v887_v30, %v886_v23  ;;  %v693_v37 = vadd.f32 %v692_v31, %v691_v22  ;;  %v2204_v41 = vpop.f32.mrf.mxu0  ;;  %v2227_v22 = vpop.f32.mrf.mxu1 }
  0xfe   :  { %v889_v50 = vsel %vm650_vm3, %v805_v35, 0.0  ;;  %v810_v23 = vmul.f32 %v2204_v41, %v2204_v41 }
  0xff   :  { %v695_v51 = vadd.f32 %v694_v46, %v693_v37  ;;  %v890_v54 = vadd.f32 %v889_v50, %v888_v36  ;;  %v2211_v55 = vpop.f32.mrf.mxu0  ;;  %v702_v46 = vsel %vm650_vm3, %v2204_v41, 0.0 }
 0x100   :  { %v808_v1 = vmul.f32 %v2211_v55, %v2211_v55  ;;  %v698_v12 = vsel %vm650_vm3, %v2211_v55, 0.0 }
 0x101   :  { %v892_v2 = vadd.f32 %v891_v60, %v890_v54  ;;  %v697_v9 = vadd.f32 %v696_v62, %v695_v51  ;;  %v2220_v10 = vpop.f32.mrf.mxu0  ;;  %v2245_v62 = vpop.f32.mrf.mxu1 }
 0x102   :  { %v895_v29 = vsel %vm650_vm3, %v808_v1, 0.0  ;;  %v811_v47 = vmul.f32 %v2220_v10, %v2220_v10  ;;  %v899_v1 = vsel %vm650_vm3, %v810_v23, 0.0 }
 0x103   :  { %v699_v15 = vadd.f32 %v698_v12, %v697_v9  ;;  %v894_v18 = vadd.f32 %v893_v11, %v892_v2  ;;  %v2225_v19 = vpop.f32.mrf.mxu0  ;;  %v704_v2 = vsel %vm650_vm3, %v2220_v10, 0.0  ;;  %v2259_v23 = vpop.f32.mrf.mxu1 }
 0x104   :  { %v700_v30 = vsel %vm650_vm3, %v2225_v19, 0.0  ;;  %v809_v31 = vmul.f32 %v2225_v19, %v2225_v19  ;;  %3570 = vst [vmem:[#allocation12_spill] sm:$0xff] %v2259_v23 }
 0x105   :  { %v896_v35 = vadd.f32 %v895_v29, %v894_v18  ;;  %v701_v36 = vadd.f32 %v700_v30, %v699_v15  ;;  %v2236_v37 = vpop.f32.mrf.mxu0  ;;  %v901_v18 = vsel %vm650_vm3, %v811_v47, 0.0 }
 0x106   :  { %3568 = vst [vmem:[#allocation10_spill] sm:$0xff] %v2236_v37  ;;  %v897_v50 = vsel %vm650_vm3, %v809_v31, 0.0 }
 0x107   :  { %v703_v51 = vadd.f32 %v702_v46, %v701_v36  ;;  %v898_v54 = vadd.f32 %v897_v50, %v896_v35  ;;  %v2243_v60 = vpop.f32.mrf.mxu0  ;;  %v814_v36 = vmul.f32 %v2236_v37, %v2236_v37 }
 0x108   :  { %3569 = vst [vmem:[#allocation11_spill] sm:$0xff] %v2243_v60  ;;  %v812_v9 = vmul.f32 %v2243_v60, %v2243_v60  ;;  %v706_v29 = vsel %vm650_vm3, %v2243_v60, 0.0 }
 0x109   :  { %v900_v11 = vadd.f32 %v899_v1, %v898_v54  ;;  %v705_v12 = vadd.f32 %v704_v2, %v703_v51  ;;  %v2252_v15 = vpop.f32.mrf.mxu0  ;;  %v710_v1 = vsel %vm650_vm3, %v2236_v37, 0.0  ;;  %v714_v37 = vsel %vm650_vm3, %v2049_v57, 0.0 }
 0x10a   :  { %v903_v46 = vsel %vm650_vm3, %v812_v9, 0.0  ;;  %v815_v2 = vmul.f32 %v2252_v15, %v2252_v15  ;;  %v907_v9 = vsel %vm650_vm3, %v814_v36, 0.0  ;;  %v712_v60 = vsel %vm650_vm3, %v2252_v15, 0.0 }
 0x10b   :  { %v707_v30 = vadd.f32 %v706_v29, %v705_v12  ;;  %v902_v31 = vadd.f32 %v901_v18, %v900_v11  ;;  %v2257_v35 = vpop.f32.mrf.mxu0  ;;  %v2273_v29 = vpop.f32.mrf.mxu1  ;;  %v818_v36 = vmul.f32 %v2039_v49, %v2039_v49 }
 0x10c   :  { %v708_v50 = vsel %vm650_vm3, %v2257_v35, 0.0  ;;  %v813_v47 = vmul.f32 %v2257_v35, %v2257_v35  ;;  %3571 = vst [vmem:[#allocation13_spill] sm:$0xff] %v2273_v29 }
 0x10d   :  { %v904_v51 = vadd.f32 %v903_v46, %v902_v31  ;;  %v709_v54 = vadd.f32 %v708_v50, %v707_v30  ;;  %v816_v30 = vmul.f32 %v2049_v57, %v2049_v57  ;;  %v909_v50 = vsel %vm650_vm3, %v815_v2, 0.0 }
 0x10e   :  { %v905_v11 = vsel %vm650_vm3, %v813_v47, 0.0  ;;  %v817_v47 = vmul.f32 %v2065_v6, %v2065_v6  ;;  %v915_v57 = vsel %vm650_vm3, %v818_v36, 0.0  ;;  %v822_v36 = vmul.f32 %v2076_v14, %v2076_v14 }
 0x10f   :  { %v711_v12 = vadd.f32 %v710_v1, %v709_v54  ;;  %v906_v18 = vadd.f32 %v905_v11, %v904_v51  ;;  %v2285_v1 = vpop.f32.mrf.mxu1  ;;  %v911_v11 = vsel %vm650_vm3, %v816_v30, 0.0  ;;  %v720_v30 = vsel %vm650_vm3, %v2058_v0, 0.0 }
 0x111   :  { %v713_v31 = vadd.f32 %v712_v60, %v711_v12  ;;  %v908_v46 = vadd.f32 %v907_v9, %v906_v18  ;;  %v716_v60 = vsel %vm650_vm3, %v2065_v6, 0.0  ;;  %v718_v18 = vsel %vm650_vm3, %v2039_v49, 0.0 }
 0x112   :  { %v819_v9 = vmul.f32 %v2058_v0, %v2058_v0  ;;  %v722_v49 = vsel %vm650_vm3, %v2085_v21, 0.0 }
 0x113   :  { %v910_v51 = vadd.f32 %v909_v50, %v908_v46  ;;  %v715_v54 = vadd.f32 %v714_v37, %v713_v31  ;;  %v913_v37 = vsel %vm650_vm3, %v817_v47, 0.0  ;;  %v2297_v50 = vpop.f32.mrf.mxu1  ;;  %v821_v47 = vmul.f32 %v2117_v53, %v2117_v53 }
 0x115   :  { %v717_v12 = vadd.f32 %v716_v60, %v715_v54  ;;  %v912_v2 = vadd.f32 %v911_v11, %v910_v51  ;;  %v820_v51 = vmul.f32 %v2085_v21, %v2085_v21  ;;  %v917_v60 = vsel %vm650_vm3, %v819_v9, 0.0 }
 0x116   :  { %v923_v21 = vsel %vm650_vm3, %v822_v36, 0.0  ;;  %v826_v36 = vmul.f32 %v2131_v7, %v2131_v7 }
 0x117   :  { %v719_v31 = vadd.f32 %v718_v18, %v717_v12  ;;  %v914_v46 = vadd.f32 %v913_v37, %v912_v2  ;;  %v2309_v18 = vpop.f32.mrf.mxu1  ;;  %v919_v37 = vsel %vm650_vm3, %v820_v51, 0.0  ;;  %v728_v51 = vsel %vm650_vm3, %v2099_v33, 0.0 }
 0x118   :  { %3572 = vst [vmem:[#allocation14_spill] sm:$0xff] %v2309_v18 }
 0x119   :  { %v916_v54 = vadd.f32 %v915_v57, %v914_v46  ;;  %v721_v11 = vadd.f32 %v720_v30, %v719_v31  ;;  %v724_v57 = vsel %vm650_vm3, %v2117_v53, 0.0  ;;  %v726_v46 = vsel %vm650_vm3, %v2076_v14, 0.0 }
 0x11a   :  { %v823_v30 = vmul.f32 %v2099_v33, %v2099_v33  ;;  %v730_v14 = vsel %vm650_vm3, %v2149_v25, 0.0 }
 0x11b   :  { %v723_v12 = vadd.f32 %v722_v49, %v721_v11  ;;  %v918_v2 = vadd.f32 %v917_v60, %v916_v54  ;;  %v921_v49 = vsel %vm650_vm3, %v821_v47, 0.0  ;;  %v2321_v60 = vpop.f32.mrf.mxu1  ;;  %v825_v47 = vmul.f32 %v2181_v8, %v2181_v8 }
 0x11c   :  { %3573 = vst [vmem:[#allocation15_spill] sm:$0xff] %v2321_v60 }
 0x11d   :  { %v920_v31 = vadd.f32 %v919_v37, %v918_v2  ;;  %v725_v9 = vadd.f32 %v724_v57, %v723_v12  ;;  %v824_v12 = vmul.f32 %v2149_v25, %v2149_v25  ;;  %v925_v57 = vsel %vm650_vm3, %v823_v30, 0.0 }
 0x11e   :  { %v931_v25 = vsel %vm650_vm3, %v826_v36, 0.0  ;;  %v830_v36 = vmul.f32 %v2195_v28, %v2195_v28 }
 0x11f   :  { %v727_v54 = vadd.f32 %v726_v46, %v725_v9  ;;  %v922_v11 = vadd.f32 %v921_v49, %v920_v31  ;;  %v2333_v46 = vpop.f32.mrf.mxu1  ;;  %v927_v49 = vsel %vm650_vm3, %v824_v12, 0.0  ;;  %v736_v12 = vsel %vm650_vm3, %v2163_v45, 0.0 }
 0x120   :  { %3574 = vst [vmem:[#allocation16_spill] sm:$0xff] %v2333_v46 }
 0x121   :  { %v924_v2 = vadd.f32 %v923_v21, %v922_v11  ;;  %v729_v37 = vadd.f32 %v728_v51, %v727_v54  ;;  %v732_v21 = vsel %vm650_vm3, %v2181_v8, 0.0  ;;  %v734_v11 = vsel %vm650_vm3, %v2131_v7, 0.0 }
 0x122   :  { %v827_v51 = vmul.f32 %v2163_v45, %v2163_v45  ;;  %v738_v7 = vsel %vm650_vm3, %v2213_v59, 0.0 }
 0x123   :  { %v731_v31 = vadd.f32 %v730_v14, %v729_v37  ;;  %v926_v9 = vadd.f32 %v925_v57, %v924_v2  ;;  %v929_v14 = vsel %vm650_vm3, %v825_v47, 0.0  ;;  %v2345_v57 = vpop.f32.mrf.mxu1  ;;  %v829_v47 = vmul.f32 %v2245_v62, %v2245_v62 }
 0x124   :  { %3575 = vst [vmem:[#allocation17_spill] sm:$0xff] %v2345_v57 }
 0x125   :  { %v928_v54 = vadd.f32 %v927_v49, %v926_v9  ;;  %v733_v30 = vadd.f32 %v732_v21, %v731_v31  ;;  %v828_v31 = vmul.f32 %v2213_v59, %v2213_v59  ;;  %v933_v21 = vsel %vm650_vm3, %v827_v51, 0.0 }
 0x126   :  { %v939_v59 = vsel %vm650_vm3, %v830_v36, 0.0  ;;  %v834_v36 = vmul.f32 %v2259_v23, %v2259_v23 }
 0x127   :  { %v735_v2 = vadd.f32 %v734_v11, %v733_v30  ;;  %v930_v37 = vadd.f32 %v929_v14, %v928_v54  ;;  %v2357_v11 = vpop.f32.mrf.mxu1  ;;  %v935_v14 = vsel %vm650_vm3, %v828_v31, 0.0  ;;  %v744_v31 = vsel %vm650_vm3, %v2227_v22, 0.0 }
 0x128   :  { %3576 = vst [vmem:[#allocation18_spill] sm:$0xff] %v2357_v11 }
 0x129   :  { %v932_v9 = vadd.f32 %v931_v25, %v930_v37  ;;  %v737_v49 = vadd.f32 %v736_v12, %v735_v2  ;;  %v740_v25 = vsel %vm650_vm3, %v2245_v62, 0.0  ;;  %v742_v37 = vsel %vm650_vm3, %v2195_v28, 0.0 }
 0x12a   :  { %v831_v12 = vmul.f32 %v2227_v22, %v2227_v22  ;;  %v746_v28 = vsel %vm650_vm3, %v2273_v29, 0.0 }
 0x12b   :  { %v739_v54 = vadd.f32 %v738_v7, %v737_v49  ;;  %v934_v30 = vadd.f32 %v933_v21, %v932_v9  ;;  %v937_v7 = vsel %vm650_vm3, %v829_v47, 0.0  ;;  %v2369_v21 = vpop.f32.mrf.mxu1  ;;  %v833_v47 = vmul.f32 %v2297_v50, %v2297_v50 }
 0x12c   :  { %3577 = vst [vmem:[#allocation19_spill] sm:$0xff] %v2369_v21 }
 0x12d   :  { %v936_v2 = vadd.f32 %v935_v14, %v934_v30  ;;  %v741_v51 = vadd.f32 %v740_v25, %v739_v54  ;;  %v832_v54 = vmul.f32 %v2273_v29, %v2273_v29  ;;  %v941_v25 = vsel %vm650_vm3, %v831_v12, 0.0 }
 0x12e   :  { %v947_v29 = vsel %vm650_vm3, %v834_v36, 0.0  ;;  %v838_v36 = vmul.f32 %v2309_v18, %v2309_v18 }
 0x12f   :  { %v743_v9 = vadd.f32 %v742_v37, %v741_v51  ;;  %v938_v49 = vadd.f32 %v937_v7, %v936_v2  ;;  %v2381_v37 = vpop.f32.mrf.mxu1  ;;  %v943_v7 = vsel %vm650_vm3, %v832_v54, 0.0  ;;  %v752_v54 = vsel %vm650_vm3, %v2285_v1, 0.0 }
 0x130   :  { %3578 = vst [vmem:[#allocation20_spill] sm:$0xff] %v2381_v37 }
 0x131   :  { %v940_v30 = vadd.f32 %v939_v59, %v938_v49  ;;  %v745_v14 = vadd.f32 %v744_v31, %v743_v9  ;;  %v748_v59 = vsel %vm650_vm3, %v2297_v50, 0.0  ;;  %v750_v49 = vsel %vm650_vm3, %v2259_v23, 0.0 }
 0x132   :  { %v835_v31 = vmul.f32 %v2285_v1, %v2285_v1  ;;  %v754_v23 = vsel %vm650_vm3, %v2321_v60, 0.0 }
 0x133   :  { %v747_v2 = vadd.f32 %v746_v28, %v745_v14  ;;  %v942_v51 = vadd.f32 %v941_v25, %v940_v30  ;;  %v945_v28 = vsel %vm650_vm3, %v833_v47, 0.0  ;;  %v2393_v25 = vpop.f32.mrf.mxu1  ;;  %v837_v47 = vmul.f32 %v2345_v57, %v2345_v57 }
 0x134   :  { %3579 = vst [vmem:[#allocation21_spill] sm:$0xff] %v2393_v25 }
 0x135   :  { %v944_v9 = vadd.f32 %v943_v7, %v942_v51  ;;  %v749_v12 = vadd.f32 %v748_v59, %v747_v2  ;;  %v836_v2 = vmul.f32 %v2321_v60, %v2321_v60  ;;  %v949_v59 = vsel %vm650_vm3, %v835_v31, 0.0 }
 0x136   :  { %v955_v60 = vsel %vm650_vm3, %v838_v36, 0.0  ;;  %v842_v36 = vmul.f32 %v2357_v11, %v2357_v11 }
 0x137   :  { %v751_v30 = vadd.f32 %v750_v49, %v749_v12  ;;  %v946_v14 = vadd.f32 %v945_v28, %v944_v9  ;;  %v2405_v49 = vpop.f32.mrf.mxu1  ;;  %v951_v28 = vsel %vm650_vm3, %v836_v2, 0.0  ;;  %v760_v2 = vsel %vm650_vm3, %v2333_v46, 0.0 }
 0x138   :  { %3580 = vst [vmem:[#allocation22_spill] sm:$0xff] %v2405_v49 }
 0x139   :  { %v948_v51 = vadd.f32 %v947_v29, %v946_v14  ;;  %v753_v7 = vadd.f32 %v752_v54, %v751_v30  ;;  %v756_v29 = vsel %vm650_vm3, %v2345_v57, 0.0  ;;  %v758_v14 = vsel %vm650_vm3, %v2309_v18, 0.0 }
 0x13a   :  { %v839_v54 = vmul.f32 %v2333_v46, %v2333_v46  ;;  %v762_v18 = vsel %vm650_vm3, %v2369_v21, 0.0 }
 0x13b   :  { %v755_v9 = vadd.f32 %v754_v23, %v753_v7  ;;  %v950_v12 = vadd.f32 %v949_v59, %v948_v51  ;;  %v953_v23 = vsel %vm650_vm3, %v837_v47, 0.0  ;;  %v2417_v59 = vpop.f32.mrf.mxu1  ;;  %v841_v47 = vmul.f32 %v2393_v25, %v2393_v25 }
 0x13c   :  { %3581 = vst [vmem:[#allocation23_spill] sm:$0xff] %v2417_v59 }
 0x13d   :  { %v952_v30 = vadd.f32 %v951_v28, %v950_v12  ;;  %v757_v31 = vadd.f32 %v756_v29, %v755_v9  ;;  %v840_v9 = vmul.f32 %v2369_v21, %v2369_v21  ;;  %v957_v29 = vsel %vm650_vm3, %v839_v54, 0.0 }
 0x13e   :  { %v963_v21 = vsel %vm650_vm3, %v842_v36, 0.0  ;;  %v846_v36 = vmul.f32 %v2405_v49, %v2405_v49 }
 0x13f   :  { %v759_v51 = vadd.f32 %v758_v14, %v757_v31  ;;  %v954_v7 = vadd.f32 %v953_v23, %v952_v30  ;;  %v2429_v14 = vpop.f32.mrf.mxu1  ;;  %v959_v23 = vsel %vm650_vm3, %v840_v9, 0.0  ;;  %v768_v9 = vsel %vm650_vm3, %v2381_v37, 0.0 }
 0x140   :  { %3582 = vst [vmem:[#allocation24_spill] sm:$0xff] %v2429_v14 }
 0x141   :  { %v956_v12 = vadd.f32 %v955_v60, %v954_v7  ;;  %v761_v28 = vadd.f32 %v760_v2, %v759_v51  ;;  %v764_v60 = vsel %vm650_vm3, %v2393_v25, 0.0  ;;  %v766_v7 = vsel %vm650_vm3, %v2357_v11, 0.0 }
 0x142   :  { %v843_v2 = vmul.f32 %v2381_v37, %v2381_v37  ;;  %v770_v11 = vsel %vm650_vm3, %v2417_v59, 0.0 }
 0x143   :  { %v763_v30 = vadd.f32 %v762_v18, %v761_v28  ;;  %v958_v31 = vadd.f32 %v957_v29, %v956_v12  ;;  %v961_v18 = vsel %vm650_vm3, %v841_v47, 0.0  ;;  %v2441_v29 = vpop.f32.mrf.mxu1 }
 0x144   :  { %3583 = vst [vmem:[#allocation25_spill] sm:$0xff] %v2441_v29  ;;  %v845_v47 = vmul.f32 %v2441_v29, %v2441_v29 }
 0x145   :  { %v960_v51 = vadd.f32 %v959_v23, %v958_v31  ;;  %v765_v54 = vadd.f32 %v764_v60, %v763_v30  ;;  %v844_v30 = vmul.f32 %v2417_v59, %v2417_v59  ;;  %v965_v60 = vsel %vm650_vm3, %v843_v2, 0.0 }
 0x146   :  { %v774_v2 = vsel %vm650_vm3, %v2405_v49, 0.0 }
 0x147   :  { %v767_v12 = vadd.f32 %v766_v7, %v765_v54  ;;  %v962_v28 = vadd.f32 %v961_v18, %v960_v51  ;;  %v967_v7 = vsel %vm650_vm3, %v844_v30, 0.0  ;;  %v772_v18 = vsel %vm650_vm3, %v2441_v29, 0.0 }
 0x148   :  { %v776_v30 = vsel %vm650_vm3, %v2429_v14, 0.0 }
 0x149   :  { %v964_v31 = vadd.f32 %v963_v21, %v962_v28  ;;  %v769_v23 = vadd.f32 %v768_v9, %v767_v12  ;;  %v847_v28 = vmul.f32 %v2429_v14, %v2429_v14  ;;  %v969_v9 = vsel %vm650_vm3, %v845_v47, 0.0 }
 0x14b   :  { %v771_v51 = vadd.f32 %v770_v11, %v769_v23  ;;  %v966_v54 = vadd.f32 %v965_v60, %v964_v31  ;;  %v971_v23 = vsel %vm650_vm3, %v846_v36, 0.0 }
 0x14d   :  { %v968_v21 = vadd.f32 %v967_v7, %v966_v54  ;;  %v773_v12 = vadd.f32 %v772_v18, %v771_v51  ;;  %v973_v54 = vsel %vm650_vm3, %v847_v28, 0.0  ;;  %v994_v28 = vlaneseq }
 0x14f   :  { %v775_v11 = vadd.f32 %v774_v2, %v773_v12  ;;  %v970_v31 = vadd.f32 %v969_v9, %v968_v21 }
 0x151   :  { %v777_v60 = vadd.f32 %v776_v30, %v775_v11  ;;  %v972_v59 = vadd.f32 %v971_v23, %v970_v31 }
 0x153   :  { %v778_v51 = vrot.slane %v777_v60, 4  ;;  %v974_v7 = vadd.f32 %v973_v54, %v972_v59  ;;  %v2467_v59 = vshrl.u32 %v994_v28, 7 }
 0x155   :  { %v779_v18 = vadd.f32 %v778_v51, %v777_v60  ;;  %v975_v49 = vrot.slane %v974_v7, 4 }
 0x157   :  { %v780_v29 = vrot.slane %v779_v18, 2  ;;  %v976_v37 = vadd.f32 %v975_v49, %v974_v7  ;;  %v986_v49 = vld [vmem:[%s3516_s2] sm:$0x1] }
 0x159   :  { %v781_v25 = vadd.f32 %v780_v29, %v779_v18  ;;  %v977_v46 = vrot.slane %v976_v37, 2  ;;  %v3543_v29 = vsub.s32 0, %v2467_v59 }
 0x15b   :  { %v782_v47 = vrot.slane %v781_v25, 1  ;;  %v978_v12 = vadd.f32 %v977_v46, %v976_v37 }
 0x15d   :  { %v783_v21 = vadd.f32 %v782_v47, %v781_v25  ;;  %v979_v2 = vrot.slane %v978_v12, 1  ;;  %v2476_v25 = vld [vmem:[%s3517_s3] sm:$0x1]  ;;  %v3584_v47 = vld [vmem:[#allocation11_spill] sm:$0xff] }
 0x15f   :  { %v980_v36 = vadd.f32 %v979_v2, %v978_v12  ;;  %v981_v9 = vmul.f32 0.001953125, %v783_v21  ;;  %v3585_v12 = vld [vmem:[#allocation10_spill] sm:$0xff]  ;;  %v3586_v21 = vld [vmem:[#allocation3_spill] sm:$0xff] }
 0x161   :  { %v982_v57 = vmul.f32 0.001953125, %v980_v36  ;;  %v983_v14 = vmul.f32 %v981_v9, %v981_v9  ;;  %v3587_v36 = vld [vmem:[#allocation2_spill] sm:$0xff] }
 0x163   :  { %v984_v11 = vsub.f32 %v982_v57, %v983_v14 }
 0x165   :  { %v985_v31 = vmax.f32 %v984_v11, 0.0  ;;  %v3588_v11 = vld [vmem:[#allocation5_spill] sm:$0xff] }
 0x167   :  { %v987_v23 = vadd.f32 1e-05, %v985_v31 }
 0x169   :  { %1857 = vrsqrt.f32 %v987_v23  ;;  %v3589_v23 = vld [vmem:[#allocation4_spill] sm:$0xff] }
 0x176   :  { %v1858_v46 = vpop.eup %1857 }
 0x177   :  { %v989_v37 = vmul.f32 %v1858_v46, %v986_v49  ;;  %v3590_v49 = vld [vmem:[#allocation7_spill] sm:$0xff] }
 0x179   :  { %v2478_v57 = vmul.f32 %v989_v37, %v981_v9  ;;  %v2482_v14 = vrot.slane %v989_v37, %v3543_v29  ;;  %v3591_v37 = vld [vmem:[#allocation6_spill] sm:$0xff]  ;;  %v3604_v29 = vld [vmem:[#allocation16_spill] sm:$0xff] }
 0x17b   :  { %v992_v30 = vsub.f32 %v2476_v25, %v2478_v57  ;;  %v2488_v60 = vmul.f32 %v2482_v14, %v2021_v39  ;;  %v2492_v54 = vmul.f32 %v2482_v14, %v2027_v42  ;;  %v2496_v51 = vmul.f32 %v2019_v38, %v2482_v14  ;;  %v3592_v57 = vld [vmem:[#allocation9_spill] sm:$0xff] }
 0x17c   :  { %v2500_v7 = vmul.f32 %v2023_v40, %v2482_v14  ;;  %v2504_v18 = vmul.f32 %v2482_v14, %v2047_v56  ;;  %v2508_v39 = vmul.f32 %v2482_v14, %v2063_v5  ;;  %v2512_v42 = vmul.f32 %v2037_v48, %v2482_v14 }
 0x17d   :  { %v2516_v38 = vmul.f32 %v2056_v63, %v2482_v14  ;;  %v2520_v40 = vmul.f32 %v2482_v14, %v2083_v20  ;;  %v2524_v56 = vmul.f32 %v2482_v14, %v2097_v32  ;;  %v2528_v5 = vmul.f32 %v2074_v13, %v2482_v14 }
 0x17e   :  { %v2532_v48 = vmul.f32 %v2092_v27, %v2482_v14  ;;  %v2536_v63 = vmul.f32 %v2482_v14, %v2115_v52  ;;  %v2540_v20 = vmul.f32 %v2482_v14, %v2129_v4  ;;  %v2544_v32 = vmul.f32 %v2108_v44, %v2482_v14 }
 0x17f   :  { %v2548_v13 = vmul.f32 %v2124_v61, %v2482_v14  ;;  %v2552_v27 = vmul.f32 %v2482_v14, %v2147_v24  ;;  %v2556_v52 = vmul.f32 %v2482_v14, %v2161_v43  ;;  %v2560_v4 = vmul.f32 %v2140_v16, %v2482_v14 }
 0x180   :  { %v2564_v44 = vmul.f32 %v2156_v34, %v2482_v14  ;;  %v2568_v61 = vmul.f32 %v2482_v14, %v2179_v3  ;;  %v2572_v24 = vmul.f32 %v2482_v14, %v2193_v26  ;;  %v2576_v43 = vmul.f32 %v2172_v58, %v2482_v14 }
 0x181   :  { %v2580_v16 = vmul.f32 %v2188_v17, %v2482_v14  ;;  %v2584_v34 = vmul.f32 %v2482_v14, %v2211_v55  ;;  %v2588_v3 = vmul.f32 %v2482_v14, %v2225_v19  ;;  %v2592_v26 = vmul.f32 %v2204_v41, %v2482_v14 }
 0x182   :  { %v2596_v58 = vmul.f32 %v2220_v10, %v2482_v14  ;;  %v2600_v17 = vmul.f32 %v2482_v14, %v3584_v47  ;;  %v2604_v55 = vmul.f32 %v2482_v14, %v2257_v35  ;;  %v2608_v19 = vmul.f32 %v3585_v12, %v2482_v14  ;;  %v3593_v12 = vld [vmem:[#allocation8_spill] sm:$0xff] }
 0x183   :  { %v2612_v41 = vmul.f32 %v2252_v15, %v2482_v14  ;;  %v2616_v10 = vmul.f32 %v2482_v14, %v3586_v21  ;;  %v2620_v2 = vmul.f32 %v2482_v14, %v2065_v6  ;;  %v2624_v35 = vmul.f32 %v3587_v36, %v2482_v14  ;;  %v3594_v36 = vld [vmem:[#allocation13_spill] sm:$0xff] }
 0x184   :  { %v2628_v9 = vmul.f32 %v2058_v0, %v2482_v14  ;;  %v2632_v15 = vmul.f32 %v2482_v14, %v3588_v11  ;;  %v2636_v31 = vmul.f32 %v2482_v14, %v2117_v53  ;;  %v2640_v6 = vmul.f32 %v3589_v23, %v2482_v14  ;;  %v3595_v23 = vld [vmem:[#allocation12_spill] sm:$0xff] }
 0x185   :  { %v2644_v28 = vmul.f32 %v2099_v33, %v2482_v14  ;;  %v2648_v0 = vmul.f32 %v2482_v14, %v3590_v49  ;;  %v2652_v46 = vmul.f32 %v2482_v14, %v2181_v8  ;;  %v2656_v53 = vmul.f32 %v3591_v37, %v2482_v14  ;;  %v3598_v37 = vld [vmem:[#allocation15_spill] sm:$0xff] }
 0x186   :  { %v2660_v25 = vmul.f32 %v2163_v45, %v2482_v14  ;;  %v2664_v33 = vmul.f32 %v2482_v14, %v3592_v57  ;;  %v2668_v47 = vmul.f32 %v2482_v14, %v2245_v62  ;;  %v2672_v8 = vmul.f32 %v3593_v12, %v2482_v14  ;;  %v3600_v57 = vld [vmem:[#allocation17_spill] sm:$0xff] }
 0x187   :  { %v2676_v21 = vmul.f32 %v2227_v22, %v2482_v14  ;;  %v2680_v45 = vmul.f32 %v2482_v14, %v3594_v36  ;;  %v2684_v11 = vmul.f32 %v2482_v14, %v2297_v50  ;;  %v2688_v62 = vmul.f32 %v3595_v23, %v2482_v14  ;;  %v3602_v36 = vld [vmem:[#allocation14_spill] sm:$0xff] }
 0x188   :  { %v2692_v49 = vmul.f32 %v2285_v1, %v2482_v14  ;;  %v2696_v22 = vmul.f32 %v2482_v14, %v3598_v37  ;;  %v2700_v12 = vmul.f32 %v2482_v14, %v3600_v57  ;;  %v2704_v50 = vmul.f32 %v3602_v36, %v2482_v14 }
 0x189   :  { %3596 = vst [vmem:[#allocation11_spill] sm:$0xff] %v2688_v62  ;;  %v2708_v23 = vmul.f32 %v3604_v29, %v2482_v14  ;;  %v3606_v62 = vld [vmem:[#allocation19_spill] sm:$0xff] }
 0x18a   :  { %3597 = vst [vmem:[#allocation10_spill] sm:$0xff] %v2692_v49  ;;  %3599 = vst [vmem:[#allocation3_spill] sm:$0xff] %v2696_v22  ;;  %v2712_v1 = vmul.f32 %v2482_v14, %v3606_v62  ;;  %v3608_v49 = vld [vmem:[#allocation21_spill] sm:$0xff]  ;;  %v3610_v22 = vld [vmem:[#allocation18_spill] sm:$0xff] }
 0x18b   :  { %3601 = vst [vmem:[#allocation2_spill] sm:$0xff] %v2700_v12  ;;  %3603 = vst [vmem:[#allocation5_spill] sm:$0xff] %v2704_v50  ;;  %v2716_v37 = vmul.f32 %v2482_v14, %v3608_v49  ;;  %v2720_v57 = vmul.f32 %v3610_v22, %v2482_v14  ;;  %v3612_v12 = vld [vmem:[#allocation20_spill] sm:$0xff]  ;;  %v3613_v50 = vsub.s32 0, %v2467_v59 }
 0x18c   :  { %3605 = vst [vmem:[#allocation4_spill] sm:$0xff] %v2708_v23  ;;  %3607 = vst [vmem:[#allocation7_spill] sm:$0xff] %v2712_v1  ;;  %v2724_v36 = vmul.f32 %v3612_v12, %v2482_v14  ;;  %v3614_v23 = vld [vmem:[#allocation23_spill] sm:$0xff]  ;;  %v3615_v1 = vld [vmem:[#allocation25_spill] sm:$0xff] }
 0x18d   :  { %3609 = vst [vmem:[#allocation6_spill] sm:$0xff] %v2716_v37  ;;  %3611 = vst [vmem:[#allocation9_spill] sm:$0xff] %v2720_v57  ;;  %v2728_v29 = vrot.slane %v992_v30, %v3613_v50  ;;  %v2732_v62 = vmul.f32 %v2482_v14, %v3614_v23  ;;  %v2736_v49 = vmul.f32 %v2482_v14, %v3615_v1  ;;  %v3616_v37 = vld [vmem:[#allocation22_spill] sm:$0xff]  ;;  %v3617_v57 = vld [vmem:[#allocation24_spill] sm:$0xff] }
 0x18e   :  { %v2740_v22 = vmul.f32 %v3616_v37, %v2482_v14  ;;  %v2744_v12 = vmul.f32 %v3617_v57, %v2482_v14 }
 0x18f   :  { %v2748_v59 = vadd.f32 %v2728_v29, %v2488_v60  ;;  %v2752_v30 = vadd.f32 %v2728_v29, %v2492_v54  ;;  %v2756_v50 = vadd.f32 %v2728_v29, %v2496_v51  ;;  %v2760_v23 = vadd.f32 %v2728_v29, %v2500_v7 }
 0x190   :  { %v2764_v14 = vadd.f32 %v2728_v29, %v2504_v18  ;;  %v2768_v60 = vadd.f32 %v2728_v29, %v2508_v39  ;;  %v2772_v54 = vadd.f32 %v2728_v29, %v2512_v42  ;;  %v2776_v51 = vadd.f32 %v2728_v29, %v2516_v38  ;;  %v3626_v1 = vld [vmem:[#allocation11_spill] sm:$0xff] }
 0x191   :  { %v2780_v7 = vadd.f32 %v2728_v29, %v2520_v40  ;;  %v2784_v18 = vadd.f32 %v2728_v29, %v2524_v56  ;;  %v2788_v39 = vadd.f32 %v2728_v29, %v2528_v5  ;;  %v2792_v42 = vadd.f32 %v2728_v29, %v2532_v48  ;;  %v3628_v37 = vld [vmem:[#allocation10_spill] sm:$0xff]  ;;  %v3630_v57 = vld [vmem:[#allocation3_spill] sm:$0xff] }
 0x192   :  { %v2796_v38 = vadd.f32 %v2728_v29, %v2536_v63  ;;  %v2800_v40 = vadd.f32 %v2728_v29, %v2540_v20  ;;  %v2804_v56 = vadd.f32 %v2728_v29, %v2544_v32  ;;  %v2808_v5 = vadd.f32 %v2728_v29, %v2548_v13 }
 0x193   :  { %v2812_v48 = vadd.f32 %v2728_v29, %v2552_v27  ;;  %v2816_v63 = vadd.f32 %v2728_v29, %v2556_v52  ;;  %v2820_v20 = vadd.f32 %v2728_v29, %v2560_v4  ;;  %v2824_v32 = vadd.f32 %v2728_v29, %v2564_v44 }
 0x194   :  { %v2828_v13 = vadd.f32 %v2728_v29, %v2568_v61  ;;  %v2832_v27 = vadd.f32 %v2728_v29, %v2572_v24  ;;  %v2836_v52 = vadd.f32 %v2728_v29, %v2576_v43  ;;  %v2840_v4 = vadd.f32 %v2728_v29, %v2580_v16 }
 0x195   :  { %v2844_v44 = vadd.f32 %v2728_v29, %v2584_v34  ;;  %v2848_v61 = vadd.f32 %v2728_v29, %v2588_v3  ;;  %v2852_v24 = vadd.f32 %v2728_v29, %v2592_v26  ;;  %v2856_v43 = vadd.f32 %v2728_v29, %v2596_v58 }
 0x196   :  { %v2860_v16 = vadd.f32 %v2728_v29, %v2600_v17  ;;  %v2864_v34 = vadd.f32 %v2728_v29, %v2604_v55  ;;  %v2868_v3 = vadd.f32 %v2728_v29, %v2608_v19  ;;  %v2872_v26 = vadd.f32 %v2728_v29, %v2612_v41 }
 0x197   :  { %v2876_v58 = vadd.f32 %v2728_v29, %v2616_v10  ;;  %v2880_v17 = vadd.f32 %v2728_v29, %v2620_v2  ;;  %v2884_v55 = vadd.f32 %v2728_v29, %v2624_v35  ;;  %v2888_v19 = vadd.f32 %v2728_v29, %v2628_v9 }
 0x198   :  { %v2892_v41 = vadd.f32 %v2728_v29, %v2632_v15  ;;  %v2896_v10 = vadd.f32 %v2728_v29, %v2636_v31  ;;  %v2900_v2 = vadd.f32 %v2728_v29, %v2640_v6  ;;  %v2904_v35 = vadd.f32 %v2728_v29, %v2644_v28 }
 0x199   :  { %v2908_v9 = vadd.f32 %v2728_v29, %v2648_v0  ;;  %v2912_v15 = vadd.f32 %v2728_v29, %v2652_v46  ;;  %v2916_v31 = vadd.f32 %v2728_v29, %v2656_v53  ;;  %v2920_v6 = vadd.f32 %v2728_v29, %v2660_v25 }
 0x19a   :  { %3618 = vst [vmem:[#allocation8_spill] sm:$0xff] %v2896_v10  ;;  %3619 = vst [vmem:[#allocation13_spill] sm:$0xff] %v2900_v2  ;;  %v2924_v28 = vadd.f32 %v2728_v29, %v2664_v33  ;;  %v2928_v0 = vadd.f32 %v2728_v29, %v2668_v47  ;;  %v2932_v46 = vadd.f32 %v2728_v29, %v2672_v8 }
 0x19b   :  { %3620 = vst [vmem:[#allocation12_spill] sm:$0xff] %v2904_v35  ;;  %3621 = vst [vmem:[#allocation15_spill] sm:$0xff] %v2908_v9  ;;  %v2936_v53 = vadd.f32 %v2728_v29, %v2676_v21  ;;  %v2940_v25 = vadd.f32 %v2728_v29, %v2680_v45  ;;  %v2944_v33 = vadd.f32 %v2728_v29, %v2684_v11 }
 0x19c   :  { %3622 = vst [vmem:[#allocation17_spill] sm:$0xff] %v2912_v15  ;;  %v2948_v47 = vadd.f32 %v2728_v29, %v3626_v1  ;;  %v2952_v8 = vadd.f32 %v2728_v29, %v3628_v37  ;;  %v2956_v21 = vadd.f32 %v2728_v29, %v3630_v57 }
 0x19d   :  { %3623 = vst [vmem:[#allocation14_spill] sm:$0xff] %v2936_v53  ;;  %3624 = vst [vmem:[#allocation16_spill] sm:$0xff] %v2940_v25  ;;  %v3632_v53 = vld [vmem:[#allocation2_spill] sm:$0xff]  ;;  %v3633_v25 = vld [vmem:[#allocation5_spill] sm:$0xff] }
 0x19e   :  { %3625 = vst [vmem:[#allocation19_spill] sm:$0xff] %v2944_v33  ;;  %3627 = vst [vmem:[#allocation21_spill] sm:$0xff] %v2948_v47  ;;  %v2960_v45 = vadd.f32 %v2728_v29, %v3632_v53  ;;  %v2964_v11 = vadd.f32 %v2728_v29, %v3633_v25  ;;  %v3634_v33 = vld [vmem:[#allocation4_spill] sm:$0xff]  ;;  %v3635_v47 = vld [vmem:[#allocation7_spill] sm:$0xff]  ;;  %v2984_v25 = vadd.f32 %v2728_v29, %v2724_v36 }
 0x19f   :  { %3629 = vst [vmem:[#allocation18_spill] sm:$0xff] %v2952_v8  ;;  %3631 = vst [vmem:[#allocation20_spill] sm:$0xff] %v2956_v21  ;;  %v2968_v1 = vadd.f32 %v2728_v29, %v3634_v33  ;;  %v2972_v37 = vadd.f32 %v2728_v29, %v3635_v47  ;;  %v3636_v8 = vld [vmem:[#allocation6_spill] sm:$0xff]  ;;  %v3637_v21 = vld [vmem:[#allocation9_spill] sm:$0xff]  ;;  %v2988_v33 = vadd.f32 %v2728_v29, %v2732_v62 }
 0x1a0   :  { %v2976_v57 = vadd.f32 %v2728_v29, %v3636_v8  ;;  %v2980_v53 = vadd.f32 %v2728_v29, %v3637_v21  ;;  %3639 = vst [vmem:[#allocation25_spill] sm:$0xff] %v2984_v25  ;;  %v2992_v47 = vadd.f32 %v2728_v29, %v2736_v49  ;;  %v2996_v8 = vadd.f32 %v2728_v29, %v2740_v22 }
 0x1a1   :  { %3640 = vst [vmem:[#allocation22_spill] sm:$0xff] %v2988_v33  ;;  %v3000_v21 = vadd.f32 %v2728_v29, %v2744_v12  ;;  %v3650_v10 = vmov %v2984_v25  ;;  %v3651_v2 = vmov %v2988_v33  ;;  %v3654_v33 = vmax.f32 %v2748_v59, 0.0 }
 0x1a2   :  { %3638 = vst [vmem:[#allocation23_spill] sm:$0xff] %v2980_v53  ;;  %3641 = vst [vmem:[#allocation24_spill] sm:$0xff] %v2992_v47  ;;  %v3652_v35 = vmov %v2992_v47  ;;  %v3653_v9 = vmov %v2996_v8  ;;  %v3655_v47 = vmax.f32 %v2752_v30, 0.0  ;;  %v3657_v12 = vmax.f32 %v2760_v23, 0.0 }
 0x1a3   :  { %3642 = vst [vmem:[#allocation11_spill] sm:$0xff] %v2996_v8  ;;  %v1652_v49 = vpack.c.bf16 %v3654_v33, %v3654_v33  ;;  %v3656_v8 = vmax.f32 %v2756_v50, 0.0  ;;  %v3658_v25 = vmax.f32 %v2764_v14, 0.0  ;;  %v3659_v59 = vmax.f32 %v2768_v60, 0.0 }
 0x1a4   :  { %v1653_v22 = vpack.c.bf16 %v3655_v47, %v3655_v47  ;;  %v1655_v36 = vpack.c.bf16 %v3657_v12, %v3657_v12  ;;  %v3660_v30 = vmax.f32 %v2772_v54, 0.0  ;;  %v3661_v50 = vmax.f32 %v2776_v51, 0.0 }
 0x1a5   :  { %v1654_v29 = vpack.c.bf16 %v3656_v8, %v3656_v8  ;;  %v1656_v62 = vpack.c.bf16 %v3658_v25, %v3658_v25  ;;  %v1657_v33 = vpack.c.bf16 %v3659_v59, %v3659_v59  ;;  %v3662_v23 = vmax.f32 %v2780_v7, 0.0  ;;  %1454 = vst.msk [vmem:[%s3518_s4] sm:$0xf] %vm1453_vm4, %v1652_v49 }
 0x1a6   :  { %v3648_v15 = vld [vmem:[#allocation20_spill] sm:$0xff]  ;;  %v1658_v47 = vpack.c.bf16 %v3660_v30, %v3660_v30  ;;  %v1659_v8 = vpack.c.bf16 %v3661_v50, %v3661_v50  ;;  %v3663_v14 = vmax.f32 %v2784_v18, 0.0  ;;  %v3664_v60 = vmax.f32 %v2788_v39, 0.0  ;;  %1455 = vst.msk [vmem:[%s3518_s4 + $0x4] sm:$0xf] %vm1453_vm4, %v1653_v22 }
 0x1a7   :  { %v1660_v12 = vpack.c.bf16 %v3662_v23, %v3662_v23  ;;  %v3665_v54 = vmax.f32 %v2792_v42, 0.0  ;;  %1456 = vst.msk [vmem:[%s3518_s4 + $0x8] sm:$0xf] %vm1453_vm4, %v1654_v29  ;;  %1457 = vst.msk [vmem:[%s3518_s4 + $0xc] sm:$0xf] %vm1453_vm4, %v1655_v36  ;;  %v3666_v51 = vmax.f32 %v2796_v38, 0.0 }
 0x1a8   :  { %v1661_v25 = vpack.c.bf16 %v3663_v14, %v3663_v14  ;;  %v1662_v59 = vpack.c.bf16 %v3664_v60, %v3664_v60  ;;  %v3667_v18 = vmax.f32 %v2800_v40, 0.0  ;;  %v3668_v42 = vmax.f32 %v2804_v56, 0.0  ;;  %1458 = vst.msk [vmem:[%s3518_s4 + $0x10] sm:$0xf] %vm1453_vm4, %v1656_v62  ;;  %1459 = vst.msk [vmem:[%s3518_s4 + $0x14] sm:$0xf] %vm1453_vm4, %v1657_v33 }
 0x1a9   :  { %v3649_v53 = vld [vmem:[#allocation23_spill] sm:$0xff]  ;;  %v1663_v30 = vpack.c.bf16 %v3665_v54, %v3665_v54  ;;  %v1664_v7 = vpack.c.bf16 %v3666_v51, %v3666_v51  ;;  %v3669_v22 = vmax.f32 %v2808_v5, 0.0  ;;  %1460 = vst.msk [vmem:[%s3518_s4 + $0x18] sm:$0xf] %vm1453_vm4, %v1658_v47  ;;  %1461 = vst.msk [vmem:[%s3518_s4 + $0x1c] sm:$0xf] %vm1453_vm4, %v1659_v8 }
 0x1aa   :  { %v1665_v39 = vpack.c.bf16 %v3667_v18, %v3667_v18  ;;  %v1666_v49 = vpack.c.bf16 %v3668_v42, %v3668_v42  ;;  %v3670_v38 = vmax.f32 %v2812_v48, 0.0  ;;  %v3671_v56 = vmax.f32 %v2816_v63, 0.0  ;;  %1462 = vst.msk [vmem:[%s3518_s4 + $0x20] sm:$0xf] %vm1453_vm4, %v1660_v12  ;;  %1463 = vst.msk [vmem:[%s3518_s4 + $0x24] sm:$0xf] %vm1453_vm4, %v1661_v25 }
 0x1ab   :  { %v1667_v29 = vpack.c.bf16 %v3669_v22, %v3669_v22  ;;  %v3672_v36 = vmax.f32 %v2820_v20, 0.0  ;;  %v3673_v33 = vmax.f32 %v2824_v32, 0.0  ;;  %1464 = vst.msk [vmem:[%s3518_s4 + $0x28] sm:$0xf] %vm1453_vm4, %v1662_v59  ;;  %1465 = vst.msk [vmem:[%s3518_s4 + $0x2c] sm:$0xf] %vm1453_vm4, %v1663_v30 }
 0x1ac   :  { %v1668_v40 = vpack.c.bf16 %v3670_v38, %v3670_v38  ;;  %v1669_v5 = vpack.c.bf16 %v3671_v56, %v3671_v56  ;;  %v3674_v48 = vmax.f32 %v2828_v13, 0.0  ;;  %v3675_v20 = vmax.f32 %v2832_v27, 0.0  ;;  %1466 = vst.msk [vmem:[%s3518_s4 + $0x30] sm:$0xf] %vm1453_vm4, %v1664_v7  ;;  %1467 = vst.msk [vmem:[%s3518_s4 + $0x34] sm:$0xf] %vm1453_vm4, %v1665_v39 }
 0x1ad   :  { %v1670_v62 = vpack.c.bf16 %v3672_v36, %v3672_v36  ;;  %v1671_v47 = vpack.c.bf16 %v3673_v33, %v3673_v33  ;;  %v3676_v50 = vmax.f32 %v2836_v52, 0.0  ;;  %v3677_v23 = vmax.f32 %v2840_v4, 0.0  ;;  %1468 = vst.msk [vmem:[%s3518_s4 + $0x38] sm:$0xf] %vm1453_vm4, %v1666_v49  ;;  %1469 = vst.msk [vmem:[%s3518_s4 + $0x3c] sm:$0xf] %vm1453_vm4, %v1667_v29 }
 0x1ae   :  { %v1672_v63 = vpack.c.bf16 %v3674_v48, %v3674_v48  ;;  %v1673_v32 = vpack.c.bf16 %v3675_v20, %v3675_v20  ;;  %v3678_v13 = vmax.f32 %v2844_v44, 0.0  ;;  %v3679_v52 = vmax.f32 %v2848_v61, 0.0  ;;  %1470 = vst.msk [vmem:[%s3518_s4 + $0x40] sm:$0xf] %vm1453_vm4, %v1668_v40  ;;  %1471 = vst.msk [vmem:[%s3518_s4 + $0x44] sm:$0xf] %vm1453_vm4, %v1669_v5 }
 0x1af   :  { %v1674_v8 = vpack.c.bf16 %v3676_v50, %v3676_v50  ;;  %v1675_v12 = vpack.c.bf16 %v3677_v23, %v3677_v23  ;;  %v3680_v14 = vmax.f32 %v2852_v24, 0.0  ;;  %v3681_v60 = vmax.f32 %v2856_v43, 0.0  ;;  %1472 = vst.msk [vmem:[%s3518_s4 + $0x48] sm:$0xf] %vm1453_vm4, %v1670_v62  ;;  %1473 = vst.msk [vmem:[%s3518_s4 + $0x4c] sm:$0xf] %vm1453_vm4, %v1671_v47 }
 0x1b0   :  { %v1676_v27 = vpack.c.bf16 %v3678_v13, %v3678_v13  ;;  %v1677_v4 = vpack.c.bf16 %v3679_v52, %v3679_v52  ;;  %v3682_v44 = vmax.f32 %v2860_v16, 0.0  ;;  %v3683_v24 = vmax.f32 %v2864_v34, 0.0  ;;  %1474 = vst.msk [vmem:[%s3518_s4 + $0x50] sm:$0xf] %vm1453_vm4, %v1672_v63  ;;  %1475 = vst.msk [vmem:[%s3518_s4 + $0x54] sm:$0xf] %vm1453_vm4, %v1673_v32 }
 0x1b1   :  { %v1678_v25 = vpack.c.bf16 %v3680_v14, %v3680_v14  ;;  %v1679_v59 = vpack.c.bf16 %v3681_v60, %v3681_v60  ;;  %v3684_v54 = vmax.f32 %v2868_v3, 0.0  ;;  %v3685_v51 = vmax.f32 %v2872_v26, 0.0  ;;  %1476 = vst.msk [vmem:[%s3518_s4 + $0x58] sm:$0xf] %vm1453_vm4, %v1674_v8  ;;  %1477 = vst.msk [vmem:[%s3518_s4 + $0x5c] sm:$0xf] %vm1453_vm4, %v1675_v12 }
 0x1b2   :  { %v1680_v61 = vpack.c.bf16 %v3682_v44, %v3682_v44  ;;  %v1681_v43 = vpack.c.bf16 %v3683_v24, %v3683_v24  ;;  %v3686_v16 = vmax.f32 %v2876_v58, 0.0  ;;  %v3687_v3 = vmax.f32 %v2880_v17, 0.0  ;;  %1478 = vst.msk [vmem:[%s3518_s4 + $0x60] sm:$0xf] %vm1453_vm4, %v1676_v27  ;;  %1479 = vst.msk [vmem:[%s3518_s4 + $0x64] sm:$0xf] %vm1453_vm4, %v1677_v4 }
 0x1b3   :  { %v1682_v30 = vpack.c.bf16 %v3684_v54, %v3684_v54  ;;  %v1683_v7 = vpack.c.bf16 %v3685_v51, %v3685_v51  ;;  %v3688_v18 = vmax.f32 %v2884_v55, 0.0  ;;  %v3689_v42 = vmax.f32 %v2888_v19, 0.0  ;;  %1480 = vst.msk [vmem:[%s3518_s4 + $0x68] sm:$0xf] %vm1453_vm4, %v1678_v25  ;;  %1481 = vst.msk [vmem:[%s3518_s4 + $0x6c] sm:$0xf] %vm1453_vm4, %v1679_v59 }
 0x1b4   :  { %v1684_v34 = vpack.c.bf16 %v3686_v16, %v3686_v16  ;;  %v1685_v26 = vpack.c.bf16 %v3687_v3, %v3687_v3  ;;  %v3690_v58 = vmax.f32 %v2892_v41, 0.0  ;;  %v3691_v55 = vld [vmem:[#allocation8_spill] sm:$0xff]  ;;  %v3693_v29 = vld [vmem:[#allocation13_spill] sm:$0xff]  ;;  %1482 = vst.msk [vmem:[%s3518_s4 + $0x70] sm:$0xf] %vm1453_vm4, %v1680_v61  ;;  %v3697_v41 = vld [vmem:[#allocation15_spill] sm:$0xff] }
 0x1b5   :  { %v1686_v39 = vpack.c.bf16 %v3688_v18, %v3688_v18  ;;  %v1687_v49 = vpack.c.bf16 %v3689_v42, %v3689_v42  ;;  %v3692_v19 = vmax.f32 %v3691_v55, 0.0  ;;  %v3694_v38 = vmax.f32 %v3693_v29, 0.0  ;;  %v3695_v56 = vld [vmem:[#allocation12_spill] sm:$0xff]  ;;  %1483 = vst.msk [vmem:[%s3518_s4 + $0x74] sm:$0xf] %vm1453_vm4, %v1681_v43  ;;  %v3699_v47 = vld [vmem:[#allocation17_spill] sm:$0xff] }
 0x1b6   :  { %v1688_v17 = vpack.c.bf16 %v3690_v58, %v3690_v58  ;;  %v3696_v5 = vmax.f32 %v3695_v56, 0.0  ;;  %1484 = vst.msk [vmem:[%s3518_s4 + $0x78] sm:$0xf] %vm1453_vm4, %v1682_v30  ;;  %1485 = vst.msk [vmem:[%s3518_s4 + $0x7c] sm:$0xf] %vm1453_vm4, %v1683_v7  ;;  %v3698_v62 = vmax.f32 %v3697_v41, 0.0 }
 0x1b7   :  { %v1689_v22 = vpack.c.bf16 %v3692_v19, %v3692_v19  ;;  %v1690_v40 = vpack.c.bf16 %v3694_v38, %v3694_v38  ;;  %v3700_v48 = vmax.f32 %v3699_v47, 0.0  ;;  %v3701_v20 = vmax.f32 %v2916_v31, 0.0  ;;  %1486 = vst.msk [vmem:[%s3518_s4 + $0x80] sm:$0xf] %vm1453_vm4, %v1684_v34  ;;  %1487 = vst.msk [vmem:[%s3518_s4 + $0x84] sm:$0xf] %vm1453_vm4, %v1685_v26 }
 0x1b8   :  { %v1691_v36 = vpack.c.bf16 %v3696_v5, %v3696_v5  ;;  %v1692_v33 = vpack.c.bf16 %v3698_v62, %v3698_v62  ;;  %v3702_v50 = vmax.f32 %v2920_v6, 0.0  ;;  %1488 = vst.msk [vmem:[%s3518_s4 + $0x88] sm:$0xf] %vm1453_vm4, %v1686_v39  ;;  %1489 = vst.msk [vmem:[%s3518_s4 + $0x8c] sm:$0xf] %vm1453_vm4, %v1687_v49  ;;  %v3703_v31 = vmax.f32 %v2924_v28, 0.0 }
 0x1b9   :  { %v1693_v63 = vpack.c.bf16 %v3700_v48, %v3700_v48  ;;  %v1694_v32 = vpack.c.bf16 %v3701_v20, %v3701_v20  ;;  %v3704_v23 = vmax.f32 %v2928_v0, 0.0  ;;  %v3705_v13 = vmax.f32 %v2932_v46, 0.0  ;;  %v3706_v52 = vld [vmem:[#allocation14_spill] sm:$0xff]  ;;  %1490 = vst.msk [vmem:[%s3518_s4 + $0x90] sm:$0xf] %vm1453_vm4, %v1688_v17  ;;  %v3708_v28 = vld [vmem:[#allocation16_spill] sm:$0xff] }
 0x1ba   :  { %v1695_v8 = vpack.c.bf16 %v3702_v50, %v3702_v50  ;;  %v1696_v6 = vpack.c.bf16 %v3703_v31, %v3703_v31  ;;  %v3707_v4 = vmax.f32 %v3706_v52, 0.0  ;;  %1491 = vst.msk [vmem:[%s3518_s4 + $0x94] sm:$0xf] %vm1453_vm4, %v1689_v22  ;;  %1492 = vst.msk [vmem:[%s3518_s4 + $0x98] sm:$0xf] %vm1453_vm4, %v1690_v40  ;;  %v3709_v0 = vmax.f32 %v3708_v28, 0.0 }
 0x1bb   :  { %v1697_v12 = vpack.c.bf16 %v3704_v23, %v3704_v23  ;;  %v1698_v27 = vpack.c.bf16 %v3705_v13, %v3705_v13  ;;  %1493 = vst.msk [vmem:[%s3518_s4 + $0x9c] sm:$0xf] %vm1453_vm4, %v1691_v36  ;;  %v3710_v25 = vld [vmem:[#allocation19_spill] sm:$0xff]  ;;  %v3712_v44 = vld [vmem:[#allocation21_spill] sm:$0xff]  ;;  %v3714_v43 = vld [vmem:[#allocation18_spill] sm:$0xff]  ;;  %v3716_v51 = vmax.f32 %v3648_v15, 0.0 }
 0x1bc   :  { %v1699_v14 = vpack.c.bf16 %v3707_v4, %v3707_v4  ;;  %v1700_v46 = vpack.c.bf16 %v3709_v0, %v3709_v0  ;;  %v3711_v60 = vmax.f32 %v3710_v25, 0.0  ;;  %v3713_v61 = vmax.f32 %v3712_v44, 0.0  ;;  %1494 = vst.msk [vmem:[%s3518_s4 + $0xa0] sm:$0xf] %vm1453_vm4, %v1692_v33  ;;  %1495 = vst.msk [vmem:[%s3518_s4 + $0xa4] sm:$0xf] %vm1453_vm4, %v1693_v63 }
 0x1bd   :  { %v3715_v54 = vmax.f32 %v3714_v43, 0.0  ;;  %1496 = vst.msk [vmem:[%s3518_s4 + $0xa8] sm:$0xf] %vm1453_vm4, %v1694_v32  ;;  %1497 = vst.msk [vmem:[%s3518_s4 + $0xac] sm:$0xf] %vm1453_vm4, %v1695_v8  ;;  %v1704_v7 = vpack.c.bf16 %v3716_v51, %v3716_v51  ;;  %v3717_v16 = vmax.f32 %v2960_v45, 0.0 }
 0x1be   :  { %v1701_v59 = vpack.c.bf16 %v3711_v60, %v3711_v60  ;;  %v1702_v24 = vpack.c.bf16 %v3713_v61, %v3713_v61  ;;  %v3718_v3 = vmax.f32 %v2964_v11, 0.0  ;;  %v3719_v18 = vmax.f32 %v2968_v1, 0.0  ;;  %1498 = vst.msk [vmem:[%s3518_s4 + $0xb0] sm:$0xf] %vm1453_vm4, %v1696_v6  ;;  %1499 = vst.msk [vmem:[%s3518_s4 + $0xb4] sm:$0xf] %vm1453_vm4, %v1697_v12 }
 0x1bf   :  { %v1703_v30 = vpack.c.bf16 %v3715_v54, %v3715_v54  ;;  %v1705_v34 = vpack.c.bf16 %v3717_v16, %v3717_v16  ;;  %1500 = vst.msk [vmem:[%s3518_s4 + $0xb8] sm:$0xf] %vm1453_vm4, %v1698_v27  ;;  %1501 = vst.msk [vmem:[%s3518_s4 + $0xbc] sm:$0xf] %vm1453_vm4, %v1699_v14  ;;  %v3720_v15 = vmax.f32 %v2972_v37, 0.0  ;;  %v3721_v11 = vmax.f32 %v2976_v57, 0.0 }
 0x1c0   :  { %v1706_v26 = vpack.c.bf16 %v3718_v3, %v3718_v3  ;;  %v1707_v39 = vpack.c.bf16 %v3719_v18, %v3719_v18  ;;  %v3722_v42 = vmax.f32 %v3649_v53, 0.0  ;;  %v3723_v58 = vmax.f32 %v3650_v10, 0.0  ;;  %1502 = vst.msk [vmem:[%s3518_s4 + $0xc0] sm:$0xf] %vm1453_vm4, %v1700_v46  ;;  %1503 = vst.msk [vmem:[%s3518_s4 + $0xc4] sm:$0xf] %vm1453_vm4, %v1701_v59 }
 0x1c1   :  { %v1708_v45 = vpack.c.bf16 %v3720_v15, %v3720_v15  ;;  %v1709_v1 = vpack.c.bf16 %v3721_v11, %v3721_v11  ;;  %1504 = vst.msk [vmem:[%s3518_s4 + $0xc8] sm:$0xf] %vm1453_vm4, %v1702_v24  ;;  %1505 = vst.msk [vmem:[%s3518_s4 + $0xcc] sm:$0xf] %vm1453_vm4, %v1703_v30  ;;  %v3724_v10 = vmax.f32 %v3651_v2, 0.0  ;;  %v3725_v57 = vmax.f32 %v3652_v35, 0.0 }
 0x1c2   :  { %v1710_v49 = vpack.c.bf16 %v3722_v42, %v3722_v42  ;;  %v1711_v17 = vpack.c.bf16 %v3723_v58, %v3723_v58  ;;  %v3726_v55 = vmax.f32 %v3653_v9, 0.0  ;;  %v3727_v22 = vmax.f32 %v3000_v21, 0.0  ;;  %1506 = vst.msk [vmem:[%s3518_s4 + $0xd0] sm:$0xf] %vm1453_vm4, %v1704_v7  ;;  %1507 = vst.msk [vmem:[%s3518_s4 + $0xd4] sm:$0xf] %vm1453_vm4, %v1705_v34 }
 0x1c3   :  { %v1712_v37 = vpack.c.bf16 %v3724_v10, %v3724_v10  ;;  %v1713_v53 = vpack.c.bf16 %v3725_v57, %v3725_v57  ;;  %1508 = vst.msk [vmem:[%s3518_s4 + $0xd8] sm:$0xf] %vm1453_vm4, %v1706_v26  ;;  %1509 = vst.msk [vmem:[%s3518_s4 + $0xdc] sm:$0xf] %vm1453_vm4, %v1707_v39 }
 0x1c4   :  { %v1714_v19 = vpack.c.bf16 %v3726_v55, %v3726_v55  ;;  %v1715_v29 = vpack.c.bf16 %v3727_v22, %v3727_v22  ;;  %1510 = vst.msk [vmem:[%s3518_s4 + $0xe0] sm:$0xf] %vm1453_vm4, %v1708_v45  ;;  %1511 = vst.msk [vmem:[%s3518_s4 + $0xe4] sm:$0xf] %vm1453_vm4, %v1709_v1 }
 0x1c5   :  { %1512 = vst.msk [vmem:[%s3518_s4 + $0xe8] sm:$0xf] %vm1453_vm4, %v1710_v49  ;;  %1513 = vst.msk [vmem:[%s3518_s4 + $0xec] sm:$0xf] %vm1453_vm4, %v1711_v17 }
 0x1c6   :  { %1514 = vst.msk [vmem:[%s3518_s4 + $0xf0] sm:$0xf] %vm1453_vm4, %v1712_v37  ;;  %1515 = vst.msk [vmem:[%s3518_s4 + $0xf4] sm:$0xf] %vm1453_vm4, %v1713_v53 }
 0x1c7   :  { %1516 = vst.msk [vmem:[%s3518_s4 + $0xf8] sm:$0xf] %vm1453_vm4, %v1714_v19  ;;  %1517 = vst.msk [vmem:[%s3518_s4 + $0xfc] sm:$0xf] %vm1453_vm4, %v1715_v29 }

// kernel: _lambda_.11
= control target key start
LH: loop header
LB: loop body
LE: loop exit
PB: predicated region body
PF: predicated region fallthrough
CT: control target
= control target key end

     0   :  { %v2058_v0 = vmov 0   ;;  %vm442_vm0 = vcmask 130048   ;;  %vm1630_vm1 = vcmask 125952   ;;  %s3830_s1 = inlined_call_operand.vmem [shape: bf16[144,16], index: 1, kind: input, shape index: {}]   ;;  %s3831_s0 = inlined_call_operand.vmem [shape: bf16[512,144], index: 0, kind: input, shape index: {}]   ;;  %s3832_s2 = inlined_call_operand.vmem [shape: f32[1,16], index: 2, kind: input, shape index: {}]   ;;  %s3833_s3 = inlined_call_operand.vmem [shape: f32[1,16], index: 3, kind: input, shape index: {}]   ;;  %s3834_s4 = inlined_call_operand.vmem [shape: bf16[512,16], index: 4, kind: output, shape index: {}]  }
   0x1   :  { %539 = vmatprep.subr.bf16.mxu0 %v2058_v0  ;;  %v1951_v1 = vld [vmem:[%s3830_s1 + $0x38] sm:$0xff]   ;;  %1932 = vmatprep.subr.bf16.mxu1 %v2058_v0  ;;  %v1952_v2 = vld [vmem:[%s3830_s1 + $0x30] sm:$0xff]   ;;  %v1953_v3 = vld [vmem:[%s3830_s1 + $0x28] sm:$0xff]  }
   0x2   :  { %540 = vmatpush1.bf16.msra.mxu0 %v1951_v1  ;;  %1941 = vmatpush1.bf16.msra.mxu1 %v1951_v1  ;;  %v1954_v4 = vld [vmem:[%s3830_s1 + $0x20] sm:$0xff]   ;;  %v1955_v6 = vld [vmem:[%s3830_s1 + $0x18] sm:$0xff]   ;;  %v1956_v7 = vld [vmem:[%s3830_s1 + $0x10] sm:$0xff]  }
   0x3   :  { %541 = vmatprep.subr.bf16.mxu0 %v2058_v0  ;;  %1933 = vmatprep.subr.bf16.mxu1 %v2058_v0  ;;  %v1962_v5 = vld [vmem:[%s3831_s0 + $0x4] ss:$8 sps:$4 sm:$0xff]   ;;  %v1960_v12 = vld [vmem:[%s3831_s0] ss:$8 sps:$4 sm:$0xff]   ;;  %v1963_v13 = vld [vmem:[%s3831_s0 + $0x14] ss:$8 sps:$4 sm:$0xff]  }
   0x4   :  { %1772 = vmatprep.mubr.msk.bf16.mxu0 %vm442_vm0, %v1962_v5  ;;  %v1986_v8 = vld [vmem:[%s3831_s0 + $0x104] ss:$8 sps:$4 sm:$0xff]   ;;  %v1984_v14 = vld [vmem:[%s3831_s0 + $0x100] ss:$8 sps:$4 sm:$0xff]   ;;  %v1990_v15 = vld [vmem:[%s3831_s0 + $0x114] ss:$8 sps:$4 sm:$0xff]  }
   0x5   :  { %v1957_v9 = vld [vmem:[%s3830_s1 + $0x8] sm:$0xff]   ;;  %1788 = vmatprep.mubr.msk.bf16.mxu1 %vm442_vm0, %v1986_v8  ;;  %v1958_v10 = vld [vmem:[%s3830_s1] sm:$0xff]   ;;  %v1965_v16 = vld [vmem:[%s3831_s0 + $0x10] ss:$8 sps:$4 sm:$0xff]  }
   0x6   :  { %542 = vmatpush1.bf16.msra.mxu0 %v1952_v2  ;;  %1942 = vmatpush1.bf16.msra.mxu1 %v1952_v2  ;;  %v1959_v11 = vld [vmem:[%s3830_s1 + $0x40] sm:$0xff]   ;;  %v1992_v18 = vld [vmem:[%s3831_s0 + $0x110] ss:$8 sps:$4 sm:$0xff]   ;;  %v1969_v21 = vld [vmem:[%s3831_s0 + $0x34] ss:$8 sps:$4 sm:$0xff]  }
   0x7   :  { %543 = vmatprep.subr.bf16.mxu0 %v2058_v0  ;;  %1934 = vmatprep.subr.bf16.mxu1 %v2058_v0  ;;  %v1966_v17 = vld [vmem:[%s3831_s0 + $0x24] ss:$8 sps:$4 sm:$0xff]   ;;  %v1968_v20 = vld [vmem:[%s3831_s0 + $0x20] ss:$8 sps:$4 sm:$0xff]   ;;  %v2002_v23 = vld [vmem:[%s3831_s0 + $0x134] ss:$8 sps:$4 sm:$0xff]  }
   0x8   :  { %v1996_v19 = vld [vmem:[%s3831_s0 + $0x124] ss:$8 sps:$4 sm:$0xff]   ;;  %v1998_v22 = vld [vmem:[%s3831_s0 + $0x120] ss:$8 sps:$4 sm:$0xff]   ;;  %v1971_v24 = vld [vmem:[%s3831_s0 + $0x30] ss:$8 sps:$4 sm:$0xff]  }
   0x9   :  { %v2004_v25 = vld [vmem:[%s3831_s0 + $0x130] ss:$8 sps:$4 sm:$0xff]   ;;  %v1972_v26 = vld [vmem:[%s3831_s0 + $0x44] ss:$8 sps:$4 sm:$0xff]   ;;  %v1974_v28 = vld [vmem:[%s3831_s0 + $0x40] ss:$8 sps:$4 sm:$0xff]  }
   0xa   :  { %544 = vmatpush1.bf16.msra.mxu0 %v1953_v3  ;;  %1943 = vmatpush1.bf16.msra.mxu1 %v1953_v3  ;;  %v2008_v27 = vld [vmem:[%s3831_s0 + $0x144] ss:$8 sps:$4 sm:$0xff]   ;;  %v2010_v29 = vld [vmem:[%s3831_s0 + $0x140] ss:$8 sps:$4 sm:$0xff]   ;;  %v1975_v30 = vld [vmem:[%s3831_s0 + $0x54] ss:$8 sps:$4 sm:$0xff]  }
   0xb   :  { %545 = vmatprep.subr.bf16.mxu0 %v2058_v0  ;;  %1935 = vmatprep.subr.bf16.mxu1 %v2058_v0  ;;  %v2014_v31 = vld [vmem:[%s3831_s0 + $0x154] ss:$8 sps:$4 sm:$0xff]   ;;  %v1977_v32 = vld [vmem:[%s3831_s0 + $0x50] ss:$8 sps:$4 sm:$0xff]   ;;  %v1978_v34 = vld [vmem:[%s3831_s0 + $0x64] ss:$8 sps:$4 sm:$0xff]  }
   0xc   :  { %v2016_v33 = vld [vmem:[%s3831_s0 + $0x150] ss:$8 sps:$4 sm:$0xff]   ;;  %v2020_v35 = vld [vmem:[%s3831_s0 + $0x164] ss:$8 sps:$4 sm:$0xff]   ;;  %v1980_v36 = vld [vmem:[%s3831_s0 + $0x60] ss:$8 sps:$4 sm:$0xff]  }
   0xd   :  { %v2022_v37 = vld [vmem:[%s3831_s0 + $0x160] ss:$8 sps:$4 sm:$0xff]   ;;  %v1981_v38 = vld [vmem:[%s3831_s0 + $0x74] ss:$8 sps:$4 sm:$0xff]   ;;  %v1983_v40 = vld [vmem:[%s3831_s0 + $0x70] ss:$8 sps:$4 sm:$0xff]  }
   0xe   :  { %546 = vmatpush1.bf16.msra.mxu0 %v1954_v4  ;;  %1944 = vmatpush1.bf16.msra.mxu1 %v1954_v4  ;;  %v2026_v39 = vld [vmem:[%s3831_s0 + $0x174] ss:$8 sps:$4 sm:$0xff]   ;;  %v2028_v41 = vld [vmem:[%s3831_s0 + $0x170] ss:$8 sps:$4 sm:$0xff]   ;;  %v1987_v42 = vld [vmem:[%s3831_s0 + $0x84] ss:$8 sps:$4 sm:$0xff]  }
   0xf   :  { %547 = vmatprep.subr.bf16.mxu0 %v2058_v0  ;;  %1936 = vmatprep.subr.bf16.mxu1 %v2058_v0  ;;  %v2032_v43 = vld [vmem:[%s3831_s0 + $0x184] ss:$8 sps:$4 sm:$0xff]   ;;  %v1989_v44 = vld [vmem:[%s3831_s0 + $0x80] ss:$8 sps:$4 sm:$0xff]   ;;  %v1993_v46 = vld [vmem:[%s3831_s0 + $0x94] ss:$8 sps:$4 sm:$0xff]  }
  0x10   :  { %v2034_v45 = vld [vmem:[%s3831_s0 + $0x180] ss:$8 sps:$4 sm:$0xff]   ;;  %v2035_v47 = vld [vmem:[%s3831_s0 + $0x194] ss:$8 sps:$4 sm:$0xff]   ;;  %v1995_v48 = vld [vmem:[%s3831_s0 + $0x90] ss:$8 sps:$4 sm:$0xff]  }
  0x11   :  { %v2037_v49 = vld [vmem:[%s3831_s0 + $0x190] ss:$8 sps:$4 sm:$0xff]   ;;  %v1999_v50 = vld [vmem:[%s3831_s0 + $0xa4] ss:$8 sps:$4 sm:$0xff]   ;;  %v2001_v52 = vld [vmem:[%s3831_s0 + $0xa0] ss:$8 sps:$4 sm:$0xff]  }
  0x12   :  { %548 = vmatpush1.bf16.msra.mxu0 %v1955_v6  ;;  %1945 = vmatpush1.bf16.msra.mxu1 %v1955_v6  ;;  %v2038_v51 = vld [vmem:[%s3831_s0 + $0x1a4] ss:$8 sps:$4 sm:$0xff]   ;;  %v2040_v53 = vld [vmem:[%s3831_s0 + $0x1a0] ss:$8 sps:$4 sm:$0xff]   ;;  %v2005_v54 = vld [vmem:[%s3831_s0 + $0xb4] ss:$8 sps:$4 sm:$0xff]  }
  0x13   :  { %549 = vmatprep.subr.bf16.mxu0 %v2058_v0  ;;  %1937 = vmatprep.subr.bf16.mxu1 %v2058_v0  ;;  %v2041_v55 = vld [vmem:[%s3831_s0 + $0x1b4] ss:$8 sps:$4 sm:$0xff]   ;;  %v2007_v56 = vld [vmem:[%s3831_s0 + $0xb0] ss:$8 sps:$4 sm:$0xff]   ;;  %v2011_v58 = vld [vmem:[%s3831_s0 + $0xc4] ss:$8 sps:$4 sm:$0xff]  }
  0x14   :  { %v2043_v57 = vld [vmem:[%s3831_s0 + $0x1b0] ss:$8 sps:$4 sm:$0xff]   ;;  %v2044_v59 = vld [vmem:[%s3831_s0 + $0x1c4] ss:$8 sps:$4 sm:$0xff]   ;;  %v2013_v60 = vld [vmem:[%s3831_s0 + $0xc0] ss:$8 sps:$4 sm:$0xff]  }
  0x15   :  { %v2046_v61 = vld [vmem:[%s3831_s0 + $0x1c0] ss:$8 sps:$4 sm:$0xff]   ;;  %v2017_v62 = vld [vmem:[%s3831_s0 + $0xd4] ss:$8 sps:$4 sm:$0xff]   ;;  %v2049_v1 = vld [vmem:[%s3831_s0 + $0x1d0] ss:$8 sps:$4 sm:$0xff]  }
  0x16   :  { %550 = vmatpush1.bf16.msra.mxu0 %v1956_v7  ;;  %1946 = vmatpush1.bf16.msra.mxu1 %v1956_v7  ;;  %v2047_v63 = vld [vmem:[%s3831_s0 + $0x1d4] ss:$8 sps:$4 sm:$0xff]   ;;  %v2023_v2 = vld [vmem:[%s3831_s0 + $0xe4] ss:$8 sps:$4 sm:$0xff]   ;;  %v2025_v4 = vld [vmem:[%s3831_s0 + $0xe0] ss:$8 sps:$4 sm:$0xff]  }
  0x17   :  { %551 = vmatprep.subr.bf16.mxu0 %v2058_v0  ;;  %1938 = vmatprep.subr.bf16.mxu1 %v2058_v0  ;;  %v2050_v3 = vld [vmem:[%s3831_s0 + $0x1e4] ss:$8 sps:$4 sm:$0xff]   ;;  %v2052_v5 = vld [vmem:[%s3831_s0 + $0x1e0] ss:$8 sps:$4 sm:$0xff]   ;;  %v2029_v6 = vld [vmem:[%s3831_s0 + $0xf4] ss:$8 sps:$4 sm:$0xff]  }
  0x18   :  { %v2053_v7 = vld [vmem:[%s3831_s0 + $0x1f4] ss:$8 sps:$4 sm:$0xff]   ;;  %v2031_v8 = vld [vmem:[%s3831_s0 + $0xf0] ss:$8 sps:$4 sm:$0xff]  }
  0x1a   :  { %552 = vmatpush1.bf16.msra.mxu0 %v1957_v9  ;;  %1947 = vmatpush1.bf16.msra.mxu1 %v1957_v9  ;;  %v2055_v9 = vld [vmem:[%s3831_s0 + $0x1f0] ss:$8 sps:$4 sm:$0xff]  }
  0x1b   :  { %553 = vmatprep.subr.bf16.mxu0 %v2058_v0  ;;  %1939 = vmatprep.subr.bf16.mxu1 %v2058_v0 }
  0x1e   :  { %554 = vmatpush1.bf16.msra.mxu0 %v1958_v10  ;;  %1948 = vmatpush1.bf16.msra.mxu1 %v1958_v10 }
  0x1f   :  { %569 = vmatprep.subr.bf16.mxu0 %v2058_v0  ;;  %1940 = vmatprep.subr.bf16.mxu1 %v2058_v0  ;;  %v2019_v0 = vld [vmem:[%s3831_s0 + $0xd0] ss:$8 sps:$4 sm:$0xff]  }
  0x22   :  { %570 = vmatpush2.bf16.msra.mxu0 %v1959_v11  ;;  %1949 = vmatpush2.bf16.msra.mxu1 %v1959_v11 }
  0x25   :  { %572 = vmatmul.mubr.bf16.vlgmr.msra.gmra.mxu0 %v1960_v12  ;;  %700 = vmatmul.mubr.bf16.vlgmr.msra.gmra.mxu1 %v1984_v14 }
  0x26   :  { %1773 = vmatprep.mubr.msk.bf16.mxu0 %vm442_vm0, %v1963_v13  ;;  %1789 = vmatprep.mubr.msk.bf16.mxu1 %vm442_vm0, %v1990_v15 }
  0x2d   :  { %580 = vmatmul.mubr.bf16.gmra.mxu0 %v1965_v16  ;;  %708 = vmatmul.mubr.bf16.gmra.mxu1 %v1992_v18 }
  0x2e   :  { %1774 = vmatprep.mubr.msk.bf16.mxu0 %vm442_vm0, %v1966_v17  ;;  %1790 = vmatprep.mubr.msk.bf16.mxu1 %vm442_vm0, %v1996_v19 }
  0x35   :  { %588 = vmatmul.mubr.bf16.gmra.mxu0 %v1968_v20  ;;  %716 = vmatmul.mubr.bf16.gmra.mxu1 %v1998_v22 }
  0x36   :  { %1775 = vmatprep.mubr.msk.bf16.mxu0 %vm442_vm0, %v1969_v21  ;;  %1791 = vmatprep.mubr.msk.bf16.mxu1 %vm442_vm0, %v2002_v23 }
  0x3d   :  { %596 = vmatmul.mubr.bf16.gmra.mxu0 %v1971_v24  ;;  %724 = vmatmul.mubr.bf16.gmra.mxu1 %v2004_v25 }
  0x3e   :  { %1776 = vmatprep.mubr.msk.bf16.mxu0 %vm442_vm0, %v1972_v26  ;;  %1792 = vmatprep.mubr.msk.bf16.mxu1 %vm442_vm0, %v2008_v27 }
  0x45   :  { %604 = vmatmul.mubr.bf16.gmra.mxu0 %v1974_v28  ;;  %732 = vmatmul.mubr.bf16.gmra.mxu1 %v2010_v29 }
  0x46   :  { %1777 = vmatprep.mubr.msk.bf16.mxu0 %vm442_vm0, %v1975_v30  ;;  %1793 = vmatprep.mubr.msk.bf16.mxu1 %vm442_vm0, %v2014_v31 }
  0x4d   :  { %612 = vmatmul.mubr.bf16.gmra.mxu0 %v1977_v32  ;;  %740 = vmatmul.mubr.bf16.gmra.mxu1 %v2016_v33 }
  0x4e   :  { %1778 = vmatprep.mubr.msk.bf16.mxu0 %vm442_vm0, %v1978_v34  ;;  %1794 = vmatprep.mubr.msk.bf16.mxu1 %vm442_vm0, %v2020_v35 }
  0x55   :  { %620 = vmatmul.mubr.bf16.gmra.mxu0 %v1980_v36  ;;  %748 = vmatmul.mubr.bf16.gmra.mxu1 %v2022_v37 }
  0x56   :  { %1779 = vmatprep.mubr.msk.bf16.mxu0 %vm442_vm0, %v1981_v38  ;;  %1795 = vmatprep.mubr.msk.bf16.mxu1 %vm442_vm0, %v2026_v39 }
  0x5d   :  { %628 = vmatmul.mubr.bf16.gmra.mxu0 %v1983_v40  ;;  %756 = vmatmul.mubr.bf16.gmra.mxu1 %v2028_v41 }
  0x5e   :  { %1780 = vmatprep.mubr.msk.bf16.mxu0 %vm442_vm0, %v1987_v42  ;;  %1796 = vmatprep.mubr.msk.bf16.mxu1 %vm442_vm0, %v2032_v43 }
  0x65   :  { %636 = vmatmul.mubr.bf16.gmra.mxu0 %v1989_v44  ;;  %764 = vmatmul.mubr.bf16.gmra.mxu1 %v2034_v45 }
  0x66   :  { %1781 = vmatprep.mubr.msk.bf16.mxu0 %vm442_vm0, %v1993_v46  ;;  %1797 = vmatprep.mubr.msk.bf16.mxu1 %vm442_vm0, %v2035_v47 }
  0x6d   :  { %644 = vmatmul.mubr.bf16.gmra.mxu0 %v1995_v48  ;;  %772 = vmatmul.mubr.bf16.gmra.mxu1 %v2037_v49 }
  0x6e   :  { %1782 = vmatprep.mubr.msk.bf16.mxu0 %vm442_vm0, %v1999_v50  ;;  %1798 = vmatprep.mubr.msk.bf16.mxu1 %vm442_vm0, %v2038_v51 }
  0x75   :  { %652 = vmatmul.mubr.bf16.gmra.mxu0 %v2001_v52  ;;  %780 = vmatmul.mubr.bf16.gmra.mxu1 %v2040_v53 }
  0x76   :  { %1783 = vmatprep.mubr.msk.bf16.mxu0 %vm442_vm0, %v2005_v54  ;;  %1799 = vmatprep.mubr.msk.bf16.mxu1 %vm442_vm0, %v2041_v55 }
  0x7d   :  { %660 = vmatmul.mubr.bf16.gmra.mxu0 %v2007_v56  ;;  %788 = vmatmul.mubr.bf16.gmra.mxu1 %v2043_v57 }
  0x7e   :  { %1784 = vmatprep.mubr.msk.bf16.mxu0 %vm442_vm0, %v2011_v58  ;;  %1800 = vmatprep.mubr.msk.bf16.mxu1 %vm442_vm0, %v2044_v59 }
  0x85   :  { %668 = vmatmul.mubr.bf16.gmra.mxu0 %v2013_v60  ;;  %796 = vmatmul.mubr.bf16.gmra.mxu1 %v2046_v61 }
  0x86   :  { %1785 = vmatprep.mubr.msk.bf16.mxu0 %vm442_vm0, %v2017_v62  ;;  %1801 = vmatprep.mubr.msk.bf16.mxu1 %vm442_vm0, %v2047_v63 }
  0x8d   :  { %676 = vmatmul.mubr.bf16.gmra.mxu0 %v2019_v0  ;;  %804 = vmatmul.mubr.bf16.gmra.mxu1 %v2049_v1 }
  0x8e   :  { %1786 = vmatprep.mubr.msk.bf16.mxu0 %vm442_vm0, %v2023_v2  ;;  %1802 = vmatprep.mubr.msk.bf16.mxu1 %vm442_vm0, %v2050_v3 }
  0x95   :  { %684 = vmatmul.mubr.bf16.gmra.mxu0 %v2025_v4  ;;  %812 = vmatmul.mubr.bf16.gmra.mxu1 %v2052_v5 }
  0x96   :  { %1787 = vmatprep.mubr.msk.bf16.mxu0 %vm442_vm0, %v2029_v6  ;;  %1803 = vmatprep.mubr.msk.bf16.mxu1 %vm442_vm0, %v2053_v7 }
  0x9d   :  { %692 = vmatmul.mubr.bf16.gmra.mxu0 %v2031_v8  ;;  %820 = vmatmul.mubr.bf16.gmra.mxu1 %v2055_v9 }
  0xe5   :  { %v2335_v10 = vpop.f32.mrf.mxu0  ;;  %v2337_v11 = vpop.f32.mrf.mxu1 }
  0xe7   :  { %v575_v12 = vpop.f32.mrf.mxu0  ;;  %v703_v13 = vpop.f32.mrf.mxu1 }
  0xe8   :  { %v961_v13 = vmul.f32 %v2335_v10, %v2335_v10 }
  0xe9   :  { %v2339_v14 = vpop.f32.mrf.mxu0  ;;  %v2341_v15 = vpop.f32.mrf.mxu1 }
  0xea   :  { %v962_v8 = vmul.f32 %v2339_v14, %v2339_v14 }
  0xeb   :  { %v578_v16 = vpop.f32.mrf.mxu0  ;;  %v706_v17 = vpop.f32.mrf.mxu1 }
  0xec   :  { %v829_v16 = vsel %vm442_vm0, %v2339_v14, 0.0 }
  0xed   :  { %v2343_v18 = vpop.f32.mrf.mxu0  ;;  %v2345_v19 = vpop.f32.mrf.mxu1 }
  0xee   :  { %v963_v17 = vmul.f32 %v2343_v18, %v2343_v18 }
  0xef   :  { %v583_v20 = vpop.f32.mrf.mxu0  ;;  %v711_v21 = vpop.f32.mrf.mxu1 }
  0xf1   :  { %v2347_v22 = vpop.f32.mrf.mxu0  ;;  %v2349_v23 = vpop.f32.mrf.mxu1 }
  0xf3   :  { %v586_v24 = vpop.f32.mrf.mxu0  ;;  %v714_v25 = vpop.f32.mrf.mxu1 }
  0xf4   :  { %v828_v24 = vsel %vm442_vm0, %v2335_v10, 0.0  ;;  %v1026_v25 = vsel %vm442_vm0, %v962_v8, 0.0 }
  0xf5   :  { %v2351_v26 = vpop.f32.mrf.mxu0  ;;  %v2353_v27 = vpop.f32.mrf.mxu1 }
  0xf7   :  { %v591_v28 = vpop.f32.mrf.mxu0  ;;  %v719_v29 = vpop.f32.mrf.mxu1 }
  0xf8   :  { %v831_v28 = vsel %vm442_vm0, %v2343_v18, 0.0  ;;  %v964_v29 = vmul.f32 %v2347_v22, %v2347_v22 }
  0xf9   :  { %v2355_v30 = vpop.f32.mrf.mxu0  ;;  %v2357_v31 = vpop.f32.mrf.mxu1 }
  0xfb   :  { %v594_v32 = vpop.f32.mrf.mxu0  ;;  %v722_v33 = vpop.f32.mrf.mxu1 }
  0xfc   :  { %v830_v32 = vadd.f32 %v829_v16, %v828_v24 }
  0xfd   :  { %v2359_v34 = vpop.f32.mrf.mxu0  ;;  %v2361_v35 = vpop.f32.mrf.mxu1 }
  0xfe   :  { %v967_v8 = vmul.f32 %v2359_v34, %v2359_v34  ;;  %v839_v24 = vsel %vm442_vm0, %v2359_v34, 0.0 }
  0xff   :  { %v599_v36 = vpop.f32.mrf.mxu0  ;;  %v727_v37 = vpop.f32.mrf.mxu1 }
 0x100   :  { %v1025_v37 = vsel %vm442_vm0, %v961_v13, 0.0 }
 0x101   :  { %v2363_v38 = vpop.f32.mrf.mxu0  ;;  %v2365_v39 = vpop.f32.mrf.mxu1 }
 0x103   :  { %v602_v40 = vpop.f32.mrf.mxu0  ;;  %v730_v41 = vpop.f32.mrf.mxu1 }
 0x104   :  { %v1028_v40 = vsel %vm442_vm0, %v963_v17, 0.0  ;;  %v833_v41 = vsel %vm442_vm0, %v2347_v22, 0.0 }
 0x105   :  { %v2367_v42 = vpop.f32.mrf.mxu0  ;;  %v2369_v43 = vpop.f32.mrf.mxu1 }
 0x107   :  { %v607_v44 = vpop.f32.mrf.mxu0  ;;  %v735_v45 = vpop.f32.mrf.mxu1 }
 0x108   :  { %v965_v44 = vmul.f32 %v2351_v26, %v2351_v26  ;;  %v1027_v45 = vadd.f32 %v1026_v25, %v1025_v37  ;;  %v968_v25 = vmul.f32 %v2363_v38, %v2363_v38  ;;  %v841_v37 = vsel %vm442_vm0, %v2363_v38, 0.0 }
 0x109   :  { %v2371_v46 = vpop.f32.mrf.mxu0  ;;  %v2373_v47 = vpop.f32.mrf.mxu1 }
 0x10b   :  { %v610_v48 = vpop.f32.mrf.mxu0  ;;  %v738_v49 = vpop.f32.mrf.mxu1 }
 0x10c   :  { %v832_v48 = vadd.f32 %v831_v28, %v830_v32 }
 0x10d   :  { %v2375_v50 = vpop.f32.mrf.mxu0  ;;  %v2377_v51 = vpop.f32.mrf.mxu1 }
 0x10f   :  { %v615_v52 = vpop.f32.mrf.mxu0  ;;  %v743_v53 = vpop.f32.mrf.mxu1 }
 0x110   :  { %v1030_v53 = vsel %vm442_vm0, %v964_v29, 0.0 }
 0x111   :  { %v2379_v54 = vpop.f32.mrf.mxu0  ;;  %v2381_v55 = vpop.f32.mrf.mxu1 }
 0x113   :  { %v618_v56 = vpop.f32.mrf.mxu0  ;;  %v746_v57 = vpop.f32.mrf.mxu1 }
 0x114   :  { %v835_v56 = vsel %vm442_vm0, %v2351_v26, 0.0  ;;  %v966_v57 = vmul.f32 %v2355_v30, %v2355_v30 }
 0x115   :  { %v2383_v58 = vpop.f32.mrf.mxu0  ;;  %v2385_v59 = vpop.f32.mrf.mxu1 }
 0x116   :  { %v1034_v17 = vsel %vm442_vm0, %v966_v57, 0.0  ;;  %v970_v57 = vmul.f32 %v2371_v46, %v2371_v46 }
 0x117   :  { %v623_v60 = vpop.f32.mrf.mxu0  ;;  %v751_v61 = vpop.f32.mrf.mxu1 }
 0x118   :  { %v1029_v60 = vadd.f32 %v1028_v40, %v1027_v45  ;;  %v834_v61 = vadd.f32 %v833_v41, %v832_v48  ;;  %v969_v40 = vmul.f32 %v2367_v42, %v2367_v42 }
 0x119   :  { %v2387_v62 = vpop.f32.mrf.mxu0  ;;  %v2389_v63 = vpop.f32.mrf.mxu1 }
 0x11a   :  { %3876 = vst [vmem:[#allocation2_spill] sm:$0xff] %v2387_v62 }
 0x11b   :  { %v626_v0 = vpop.f32.mrf.mxu0  ;;  %v754_v1 = vpop.f32.mrf.mxu1 }
 0x11d   :  { %v2391_v2 = vpop.f32.mrf.mxu0  ;;  %v2393_v3 = vpop.f32.mrf.mxu1 }
 0x11e   :  { %3877 = vst [vmem:[#allocation3_spill] sm:$0xff] %v2391_v2 }
 0x11f   :  { %v631_v4 = vpop.f32.mrf.mxu0  ;;  %v759_v5 = vpop.f32.mrf.mxu1 }
 0x120   :  { %v1032_v4 = vsel %vm442_vm0, %v965_v44, 0.0  ;;  %v837_v5 = vsel %vm442_vm0, %v2355_v30, 0.0 }
 0x121   :  { %v2395_v6 = vpop.f32.mrf.mxu0  ;;  %v2397_v7 = vpop.f32.mrf.mxu1 }
 0x122   :  { %3878 = vst [vmem:[#allocation4_spill] sm:$0xff] %v2395_v6 }
 0x123   :  { %v634_v9 = vpop.f32.mrf.mxu0  ;;  %v762_v12 = vpop.f32.mrf.mxu1 }
 0x124   :  { %v1031_v9 = vadd.f32 %v1030_v53, %v1029_v60  ;;  %v836_v12 = vadd.f32 %v835_v56, %v834_v61  ;;  %v1038_v53 = vsel %vm442_vm0, %v968_v25, 0.0  ;;  %v843_v56 = vsel %vm442_vm0, %v2367_v42, 0.0 }
 0x125   :  { %v2407_v20 = vpop.f32.mrf.mxu0  ;;  %v2409_v21 = vpop.f32.mrf.mxu1  ;;  %v1042_v25 = vsel %vm442_vm0, %v970_v57, 0.0 }
 0x126   :  { %3879 = vst [vmem:[#allocation5_spill] sm:$0xff] %v2407_v20  ;;  %v1033_v28 = vadd.f32 %v1032_v4, %v1031_v9  ;;  %v838_v29 = vadd.f32 %v837_v5, %v836_v12  ;;  %v1040_v4 = vsel %vm442_vm0, %v969_v40, 0.0  ;;  %v845_v5 = vsel %vm442_vm0, %v2371_v46, 0.0 }
 0x127   :  { %v639_v33 = vpop.f32.mrf.mxu0  ;;  %v767_v36 = vpop.f32.mrf.mxu1 }
 0x128   :  { %v1036_v36 = vsel %vm442_vm0, %v967_v8, 0.0  ;;  %v1035_v41 = vadd.f32 %v1034_v17, %v1033_v28  ;;  %v840_v44 = vadd.f32 %v839_v24, %v838_v29  ;;  %v971_v8 = vmul.f32 %v2375_v50, %v2375_v50 }
 0x129   :  { %v2424_v49 = vpop.f32.mrf.mxu0  ;;  %v2426_v52 = vpop.f32.mrf.mxu1  ;;  %v847_v28 = vsel %vm442_vm0, %v2375_v50, 0.0  ;;  %v972_v29 = vmul.f32 %v2379_v54, %v2379_v54 }
 0x12a   :  { %3880 = vst [vmem:[#allocation6_spill] sm:$0xff] %v2424_v49  ;;  %v1037_v60 = vadd.f32 %v1036_v36, %v1035_v41  ;;  %v842_v61 = vadd.f32 %v841_v37, %v840_v44  ;;  %v1044_v40 = vsel %vm442_vm0, %v971_v8, 0.0  ;;  %v849_v41 = vsel %vm442_vm0, %v2379_v54, 0.0 }
 0x12b   :  { %v642_v0 = vpop.f32.mrf.mxu0  ;;  %v770_v1 = vpop.f32.mrf.mxu1  ;;  %v973_v44 = vmul.f32 %v2383_v58, %v2383_v58 }
 0x12c   :  { %v1039_v9 = vadd.f32 %v1038_v53, %v1037_v60  ;;  %v844_v12 = vadd.f32 %v843_v56, %v842_v61  ;;  %v1046_v61 = vsel %vm442_vm0, %v972_v29, 0.0 }
 0x12d   :  { %v2438_v13 = vpop.f32.mrf.mxu0  ;;  %v2440_v16 = vpop.f32.mrf.mxu1 }
 0x12e   :  { %3881 = vst [vmem:[#allocation7_spill] sm:$0xff] %v2438_v13 }
 0x12f   :  { %v647_v32 = vpop.f32.mrf.mxu0  ;;  %v775_v33 = vpop.f32.mrf.mxu1 }
 0x130   :  { %v1041_v32 = vadd.f32 %v1040_v4, %v1039_v9  ;;  %v846_v33 = vadd.f32 %v845_v5, %v844_v12  ;;  %v1048_v12 = vsel %vm442_vm0, %v973_v44, 0.0 }
 0x131   :  { %v2452_v45 = vpop.f32.mrf.mxu0  ;;  %v2454_v48 = vpop.f32.mrf.mxu1 }
 0x132   :  { %3882 = vst [vmem:[#allocation8_spill] sm:$0xff] %v2452_v45  ;;  %v1043_v53 = vadd.f32 %v1042_v25, %v1041_v32  ;;  %v848_v56 = vadd.f32 %v847_v28, %v846_v33  ;;  %v853_v25 = vsel %vm442_vm0, %v2387_v62, 0.0  ;;  %v975_v28 = vmul.f32 %v2391_v2, %v2391_v2 }
 0x133   :  { %v650_v0 = vpop.f32.mrf.mxu0  ;;  %v778_v1 = vpop.f32.mrf.mxu1 }
 0x134   :  { %v851_v0 = vsel %vm442_vm0, %v2383_v58, 0.0  ;;  %v974_v1 = vmul.f32 %v2387_v62, %v2387_v62  ;;  %v1045_v4 = vadd.f32 %v1044_v40, %v1043_v53  ;;  %v850_v5 = vadd.f32 %v849_v41, %v848_v56 }
 0x135   :  { %v2466_v17 = vpop.f32.mrf.mxu0  ;;  %v2468_v24 = vpop.f32.mrf.mxu1  ;;  %v855_v40 = vsel %vm442_vm0, %v2391_v2, 0.0  ;;  %v976_v41 = vmul.f32 %v2395_v6, %v2395_v6 }
 0x136   :  { %3883 = vst [vmem:[#allocation9_spill] sm:$0xff] %v2466_v17  ;;  %v1047_v32 = vadd.f32 %v1046_v61, %v1045_v4  ;;  %v852_v29 = vadd.f32 %v851_v0, %v850_v5  ;;  %v857_v61 = vsel %vm442_vm0, %v2395_v6, 0.0  ;;  %v977_v0 = vmul.f32 %v2407_v20, %v2407_v20 }
 0x137   :  { %v655_v36 = vpop.f32.mrf.mxu0  ;;  %v783_v37 = vpop.f32.mrf.mxu1  ;;  %v1054_v62 = vsel %vm442_vm0, %v976_v41, 0.0 }
 0x138   :  { %v1050_v37 = vsel %vm442_vm0, %v974_v1, 0.0  ;;  %v1049_v44 = vadd.f32 %v1048_v12, %v1047_v32  ;;  %v854_v53 = vadd.f32 %v853_v25, %v852_v29  ;;  %v859_v12 = vsel %vm442_vm0, %v2407_v20, 0.0 }
 0x139   :  { %v2480_v57 = vpop.f32.mrf.mxu0  ;;  %v2482_v60 = vpop.f32.mrf.mxu1  ;;  %v978_v25 = vmul.f32 %v2424_v49, %v2424_v49 }
 0x13a   :  { %3884 = vst [vmem:[#allocation10_spill] sm:$0xff] %v2480_v57  ;;  %v1051_v4 = vadd.f32 %v1050_v37, %v1049_v44  ;;  %v856_v1 = vadd.f32 %v855_v40, %v854_v53  ;;  %v861_v37 = vsel %vm442_vm0, %v2424_v49, 0.0  ;;  %v979_v40 = vmul.f32 %v2438_v13, %v2438_v13 }
 0x13b   :  { %v658_v8 = vpop.f32.mrf.mxu0  ;;  %v786_v9 = vpop.f32.mrf.mxu1  ;;  %v1058_v6 = vsel %vm442_vm0, %v978_v25, 0.0 }
 0x13c   :  { %v1052_v9 = vsel %vm442_vm0, %v975_v28, 0.0  ;;  %v858_v32 = vadd.f32 %v857_v61, %v856_v1  ;;  %v980_v61 = vmul.f32 %v2452_v45, %v2452_v45 }
 0x13d   :  { %v2494_v33 = vpop.f32.mrf.mxu0  ;;  %v2496_v36 = vpop.f32.mrf.mxu1  ;;  %v1053_v28 = vadd.f32 %v1052_v9, %v1051_v4  ;;  %v863_v9 = vsel %vm442_vm0, %v2438_v13, 0.0 }
 0x13e   :  { %3885 = vst [vmem:[#allocation11_spill] sm:$0xff] %v2494_v33  ;;  %v860_v41 = vadd.f32 %v859_v12, %v858_v32  ;;  %v981_v12 = vmul.f32 %v2466_v17, %v2466_v17  ;;  %v1062_v49 = vsel %vm442_vm0, %v980_v61, 0.0 }
 0x13f   :  { %v663_v56 = vpop.f32.mrf.mxu0  ;;  %v791_v8 = vpop.f32.mrf.mxu1  ;;  %v1055_v44 = vadd.f32 %v1054_v62, %v1053_v28  ;;  %v865_v62 = vsel %vm442_vm0, %v2452_v45, 0.0 }
 0x140   :  { %v1056_v8 = vsel %vm442_vm0, %v977_v0, 0.0  ;;  %v862_v4 = vadd.f32 %v861_v37, %v860_v41  ;;  %v982_v37 = vmul.f32 %v2480_v57, %v2480_v57 }
 0x141   :  { %v2508_v5 = vpop.f32.mrf.mxu0  ;;  %v2510_v2 = vpop.f32.mrf.mxu1  ;;  %v1057_v0 = vadd.f32 %v1056_v8, %v1055_v44  ;;  %v867_v8 = vsel %vm442_vm0, %v2466_v17, 0.0 }
 0x142   :  { %3886 = vst [vmem:[#allocation12_spill] sm:$0xff] %v2508_v5  ;;  %v864_v25 = vadd.f32 %v863_v9, %v862_v4  ;;  %v983_v9 = vmul.f32 %v2494_v33, %v2494_v33  ;;  %v1066_v45 = vsel %vm442_vm0, %v982_v37, 0.0 }
 0x143   :  { %v666_v29 = vpop.f32.mrf.mxu0  ;;  %v794_v56 = vpop.f32.mrf.mxu1  ;;  %v1059_v28 = vadd.f32 %v1058_v6, %v1057_v0  ;;  %v869_v6 = vsel %vm442_vm0, %v2480_v57, 0.0 }
 0x144   :  { %v1060_v56 = vsel %vm442_vm0, %v979_v40, 0.0  ;;  %v866_v44 = vadd.f32 %v865_v62, %v864_v25  ;;  %v984_v62 = vmul.f32 %v2508_v5, %v2508_v5 }
 0x145   :  { %v2522_v53 = vpop.f32.mrf.mxu0  ;;  %v2524_v20 = vpop.f32.mrf.mxu1  ;;  %v1061_v40 = vadd.f32 %v1060_v56, %v1059_v28  ;;  %v871_v56 = vsel %vm442_vm0, %v2494_v33, 0.0 }
 0x146   :  { %3887 = vst [vmem:[#allocation13_spill] sm:$0xff] %v2522_v53  ;;  %v868_v61 = vadd.f32 %v867_v8, %v866_v44  ;;  %v985_v8 = vmul.f32 %v2522_v53, %v2522_v53  ;;  %v1070_v57 = vsel %vm442_vm0, %v984_v62, 0.0 }
 0x147   :  { %v671_v1 = vpop.f32.mrf.mxu0  ;;  %v799_v29 = vpop.f32.mrf.mxu1  ;;  %v1063_v0 = vadd.f32 %v1062_v49, %v1061_v40  ;;  %v873_v49 = vsel %vm442_vm0, %v2508_v5, 0.0 }
 0x148   :  { %v1064_v29 = vsel %vm442_vm0, %v981_v12, 0.0  ;;  %v870_v28 = vadd.f32 %v869_v6, %v868_v61 }
 0x149   :  { %v2536_v32 = vpop.f32.mrf.mxu0  ;;  %v2538_v13 = vpop.f32.mrf.mxu1  ;;  %v1065_v12 = vadd.f32 %v1064_v29, %v1063_v0  ;;  %v875_v29 = vsel %vm442_vm0, %v2522_v53, 0.0 }
 0x14a   :  { %3888 = vst [vmem:[#allocation14_spill] sm:$0xff] %v2536_v32  ;;  %3889 = vst [vmem:[#allocation15_spill] sm:$0xff] %v2538_v13  ;;  %v872_v37 = vadd.f32 %v871_v56, %v870_v28  ;;  %v986_v6 = vmul.f32 %v2536_v32, %v2536_v32 }
 0x14b   :  { %v674_v41 = vpop.f32.mrf.mxu0  ;;  %v802_v1 = vpop.f32.mrf.mxu1  ;;  %v1067_v40 = vadd.f32 %v1066_v45, %v1065_v12  ;;  %v877_v45 = vsel %vm442_vm0, %v2536_v32, 0.0 }
 0x14c   :  { %v1068_v1 = vsel %vm442_vm0, %v983_v9, 0.0  ;;  %v874_v0 = vadd.f32 %v873_v49, %v872_v37  ;;  %v1074_v5 = vsel %vm442_vm0, %v986_v6, 0.0 }
 0x14d   :  { %v2550_v4 = vpop.f32.mrf.mxu0  ;;  %v2552_v17 = vpop.f32.mrf.mxu1  ;;  %v1069_v9 = vadd.f32 %v1068_v1, %v1067_v40 }
 0x14e   :  { %3890 = vst [vmem:[#allocation16_spill] sm:$0xff] %v2550_v4  ;;  %3891 = vst [vmem:[#allocation17_spill] sm:$0xff] %v2552_v17  ;;  %v987_v56 = vmul.f32 %v2550_v4, %v2550_v4  ;;  %v876_v62 = vadd.f32 %v875_v29, %v874_v0  ;;  %v879_v1 = vsel %vm442_vm0, %v2550_v4, 0.0 }
 0x14f   :  { %v679_v25 = vpop.f32.mrf.mxu0  ;;  %v807_v41 = vpop.f32.mrf.mxu1  ;;  %v1071_v12 = vadd.f32 %v1070_v57, %v1069_v9 }
 0x150   :  { %v1072_v41 = vsel %vm442_vm0, %v985_v8, 0.0  ;;  %v878_v40 = vadd.f32 %v877_v45, %v876_v62 }
 0x151   :  { %v2564_v44 = vpop.f32.mrf.mxu0  ;;  %v2566_v33 = vpop.f32.mrf.mxu1  ;;  %v1073_v8 = vadd.f32 %v1072_v41, %v1071_v12 }
 0x152   :  { %3892 = vst [vmem:[#allocation18_spill] sm:$0xff] %v2564_v44  ;;  %3893 = vst [vmem:[#allocation19_spill] sm:$0xff] %v2566_v33  ;;  %v988_v49 = vmul.f32 %v2564_v44, %v2564_v44  ;;  %v881_v57 = vsel %vm442_vm0, %v2564_v44, 0.0  ;;  %v880_v6 = vadd.f32 %v879_v1, %v878_v40 }
 0x153   :  { %v682_v61 = vpop.f32.mrf.mxu0  ;;  %v810_v25 = vpop.f32.mrf.mxu1  ;;  %v1075_v9 = vadd.f32 %v1074_v5, %v1073_v8 }
 0x154   :  { %v1076_v25 = vsel %vm442_vm0, %v987_v56, 0.0  ;;  %v1078_v32 = vsel %vm442_vm0, %v988_v49, 0.0  ;;  %v882_v12 = vadd.f32 %v881_v57, %v880_v6 }
 0x155   :  { %v2578_v28 = vpop.f32.mrf.mxu0  ;;  %v2580_v53 = vpop.f32.mrf.mxu1  ;;  %v1077_v56 = vadd.f32 %v1076_v25, %v1075_v9 }
 0x156   :  { %3894 = vst [vmem:[#allocation20_spill] sm:$0xff] %v2578_v28  ;;  %3895 = vst [vmem:[#allocation21_spill] sm:$0xff] %v2580_v53  ;;  %v989_v29 = vmul.f32 %v2578_v28, %v2578_v28  ;;  %v883_v41 = vsel %vm442_vm0, %v2578_v28, 0.0 }
 0x157   :  { %v687_v37 = vpop.f32.mrf.mxu0  ;;  %v815_v61 = vpop.f32.mrf.mxu1  ;;  %v1079_v1 = vadd.f32 %v1078_v32, %v1077_v56  ;;  %v884_v8 = vadd.f32 %v883_v41, %v882_v12 }
 0x158   :  { %v1080_v61 = vsel %vm442_vm0, %v989_v29, 0.0 }
 0x159   :  { %v2592_v0 = vpop.f32.mrf.mxu0  ;;  %v2594_v4 = vpop.f32.mrf.mxu1  ;;  %v1081_v57 = vadd.f32 %v1080_v61, %v1079_v1 }
 0x15a   :  { %3896 = vst [vmem:[#allocation22_spill] sm:$0xff] %v2594_v4  ;;  %v990_v45 = vmul.f32 %v2592_v0, %v2592_v0  ;;  %v885_v5 = vsel %vm442_vm0, %v2592_v0, 0.0 }
 0x15b   :  { %v690_v62 = vpop.f32.mrf.mxu0  ;;  %v818_v37 = vpop.f32.mrf.mxu1  ;;  %v886_v9 = vadd.f32 %v885_v5, %v884_v8 }
 0x15c   :  { %v1082_v28 = vsel %vm442_vm0, %v990_v45, 0.0  ;;  %v993_v45 = vmul.f32 %v2337_v11, %v2337_v11 }
 0x15d   :  { %v2604_v40 = vpop.f32.mrf.mxu0  ;;  %v2606_v49 = vpop.f32.mrf.mxu1  ;;  %v1083_v32 = vadd.f32 %v1082_v28, %v1081_v57  ;;  %v994_v28 = vmul.f32 %v2341_v15, %v2341_v15 }
 0x15e   :  { %3897 = vst [vmem:[#allocation23_spill] sm:$0xff] %v2604_v40  ;;  %3898 = vst [vmem:[#allocation24_spill] sm:$0xff] %v2606_v49  ;;  %v887_v44 = vsel %vm442_vm0, %v2604_v40, 0.0  ;;  %v991_v25 = vmul.f32 %v2604_v40, %v2604_v40  ;;  %v893_v40 = vsel %vm442_vm0, %v2341_v15, 0.0 }
 0x15f   :  { %v695_v29 = vpop.f32.mrf.mxu0  ;;  %v823_v6 = vpop.f32.mrf.mxu1  ;;  %v888_v41 = vadd.f32 %v887_v44, %v886_v9  ;;  %v891_v44 = vsel %vm442_vm0, %v2337_v11, 0.0 }
 0x160   :  { %v1084_v62 = vsel %vm442_vm0, %v991_v25, 0.0  ;;  %v1088_v6 = vsel %vm442_vm0, %v993_v45, 0.0 }
 0x161   :  { %v2614_v56 = vpop.f32.mrf.mxu0  ;;  %v2616_v12 = vpop.f32.mrf.mxu1  ;;  %v1085_v5 = vadd.f32 %v1084_v62, %v1083_v32  ;;  %v995_v62 = vmul.f32 %v2345_v19, %v2345_v19 }
 0x162   :  { %3899 = vst [vmem:[#allocation25_spill] sm:$0xff] %v2616_v12  ;;  %v889_v37 = vsel %vm442_vm0, %v2614_v56, 0.0  ;;  %v992_v61 = vmul.f32 %v2614_v56, %v2614_v56 }
 0x163   :  { %v890_v1 = vadd.f32 %v889_v37, %v888_v41  ;;  %v698_v8 = vpop.f32.mrf.mxu0  ;;  %v826_v29 = vpop.f32.mrf.mxu1  ;;  %v1090_v37 = vsel %vm442_vm0, %v994_v28, 0.0  ;;  %v1092_v45 = vsel %vm442_vm0, %v995_v62, 0.0 }
 0x164   :  { %v1086_v25 = vsel %vm442_vm0, %v992_v61, 0.0  ;;  %v895_v8 = vsel %vm442_vm0, %v2345_v19, 0.0  ;;  %v996_v61 = vmul.f32 %v2349_v23, %v2349_v23  ;;  %v897_v29 = vsel %vm442_vm0, %v2349_v23, 0.0 }
 0x165   :  { %v892_v57 = vadd.f32 %v891_v44, %v890_v1  ;;  %v1087_v9 = vadd.f32 %v1086_v25, %v1085_v5  ;;  %v997_v44 = vmul.f32 %v2353_v27, %v2353_v27 }
 0x166   :  { %v1094_v28 = vsel %vm442_vm0, %v996_v61, 0.0 }
 0x167   :  { %v894_v32 = vadd.f32 %v893_v40, %v892_v57  ;;  %v1089_v41 = vadd.f32 %v1088_v6, %v1087_v9  ;;  %v899_v57 = vsel %vm442_vm0, %v2353_v27, 0.0  ;;  %v998_v9 = vmul.f32 %v2357_v31, %v2357_v31 }
 0x168   :  { %v1096_v62 = vsel %vm442_vm0, %v997_v44, 0.0 }
 0x169   :  { %v896_v1 = vadd.f32 %v895_v8, %v894_v32  ;;  %v1091_v5 = vadd.f32 %v1090_v37, %v1089_v41  ;;  %v901_v41 = vsel %vm442_vm0, %v2357_v31, 0.0  ;;  %v999_v37 = vmul.f32 %v2361_v35, %v2361_v35 }
 0x16a   :  { %v1098_v61 = vsel %vm442_vm0, %v998_v9, 0.0 }
 0x16b   :  { %v898_v40 = vadd.f32 %v897_v29, %v896_v1  ;;  %v1093_v25 = vadd.f32 %v1092_v45, %v1091_v5  ;;  %v903_v5 = vsel %vm442_vm0, %v2361_v35, 0.0  ;;  %v1000_v45 = vmul.f32 %v2365_v39, %v2365_v39 }
 0x16c   :  { %v1100_v44 = vsel %vm442_vm0, %v999_v37, 0.0 }
 0x16d   :  { %v900_v6 = vadd.f32 %v899_v57, %v898_v40  ;;  %v1095_v32 = vadd.f32 %v1094_v28, %v1093_v25  ;;  %v905_v25 = vsel %vm442_vm0, %v2365_v39, 0.0  ;;  %v1001_v28 = vmul.f32 %v2369_v43, %v2369_v43 }
 0x16e   :  { %v1102_v9 = vsel %vm442_vm0, %v1000_v45, 0.0 }
 0x16f   :  { %v902_v8 = vadd.f32 %v901_v41, %v900_v6  ;;  %v1097_v1 = vadd.f32 %v1096_v62, %v1095_v32  ;;  %v907_v32 = vsel %vm442_vm0, %v2369_v43, 0.0  ;;  %v1002_v62 = vmul.f32 %v2373_v47, %v2373_v47 }
 0x170   :  { %v1104_v37 = vsel %vm442_vm0, %v1001_v28, 0.0 }
 0x171   :  { %v904_v29 = vadd.f32 %v903_v5, %v902_v8  ;;  %v1099_v40 = vadd.f32 %v1098_v61, %v1097_v1  ;;  %v909_v1 = vsel %vm442_vm0, %v2373_v47, 0.0  ;;  %v1003_v61 = vmul.f32 %v2377_v51, %v2377_v51 }
 0x172   :  { %v1106_v45 = vsel %vm442_vm0, %v1002_v62, 0.0 }
 0x173   :  { %v906_v57 = vadd.f32 %v905_v25, %v904_v29  ;;  %v1101_v6 = vadd.f32 %v1100_v44, %v1099_v40  ;;  %v911_v40 = vsel %vm442_vm0, %v2377_v51, 0.0  ;;  %v1004_v44 = vmul.f32 %v2381_v55, %v2381_v55 }
 0x174   :  { %v1108_v28 = vsel %vm442_vm0, %v1003_v61, 0.0 }
 0x175   :  { %v1103_v41 = vadd.f32 %v1102_v9, %v1101_v6  ;;  %v908_v8 = vadd.f32 %v907_v32, %v906_v57  ;;  %v913_v6 = vsel %vm442_vm0, %v2381_v55, 0.0  ;;  %v1005_v9 = vmul.f32 %v2385_v59, %v2385_v59 }
 0x176   :  { %v1110_v62 = vsel %vm442_vm0, %v1004_v44, 0.0 }
 0x177   :  { %v910_v5 = vadd.f32 %v909_v1, %v908_v8  ;;  %v1105_v29 = vadd.f32 %v1104_v37, %v1103_v41  ;;  %v915_v8 = vsel %vm442_vm0, %v2385_v59, 0.0  ;;  %v1006_v37 = vmul.f32 %v2389_v63, %v2389_v63 }
 0x178   :  { %v1112_v61 = vsel %vm442_vm0, %v1005_v9, 0.0 }
 0x179   :  { %v912_v25 = vadd.f32 %v911_v40, %v910_v5  ;;  %v1107_v57 = vadd.f32 %v1106_v45, %v1105_v29  ;;  %v917_v29 = vsel %vm442_vm0, %v2389_v63, 0.0  ;;  %v1007_v45 = vmul.f32 %v2393_v3, %v2393_v3 }
 0x17a   :  { %v1114_v44 = vsel %vm442_vm0, %v1006_v37, 0.0 }
 0x17b   :  { %v914_v32 = vadd.f32 %v913_v6, %v912_v25  ;;  %v1109_v41 = vadd.f32 %v1108_v28, %v1107_v57  ;;  %v919_v57 = vsel %vm442_vm0, %v2393_v3, 0.0  ;;  %v1008_v28 = vmul.f32 %v2397_v7, %v2397_v7 }
 0x17c   :  { %v1116_v9 = vsel %vm442_vm0, %v1007_v45, 0.0 }
 0x17d   :  { %v916_v1 = vadd.f32 %v915_v8, %v914_v32  ;;  %v1111_v5 = vadd.f32 %v1110_v62, %v1109_v41  ;;  %v921_v41 = vsel %vm442_vm0, %v2397_v7, 0.0  ;;  %v1009_v62 = vmul.f32 %v2409_v21, %v2409_v21 }
 0x17e   :  { %v1118_v37 = vsel %vm442_vm0, %v1008_v28, 0.0 }
 0x17f   :  { %v918_v40 = vadd.f32 %v917_v29, %v916_v1  ;;  %v1113_v25 = vadd.f32 %v1112_v61, %v1111_v5  ;;  %v923_v5 = vsel %vm442_vm0, %v2409_v21, 0.0  ;;  %v1010_v61 = vmul.f32 %v2426_v52, %v2426_v52 }
 0x180   :  { %v1120_v45 = vsel %vm442_vm0, %v1009_v62, 0.0 }
 0x181   :  { %v920_v6 = vadd.f32 %v919_v57, %v918_v40  ;;  %v1115_v32 = vadd.f32 %v1114_v44, %v1113_v25  ;;  %v925_v25 = vsel %vm442_vm0, %v2426_v52, 0.0  ;;  %v1011_v44 = vmul.f32 %v2440_v16, %v2440_v16 }
 0x182   :  { %v1122_v28 = vsel %vm442_vm0, %v1010_v61, 0.0 }
 0x183   :  { %v922_v8 = vadd.f32 %v921_v41, %v920_v6  ;;  %v1117_v1 = vadd.f32 %v1116_v9, %v1115_v32  ;;  %v927_v32 = vsel %vm442_vm0, %v2440_v16, 0.0  ;;  %v1012_v9 = vmul.f32 %v2454_v48, %v2454_v48 }
 0x184   :  { %v1124_v62 = vsel %vm442_vm0, %v1011_v44, 0.0 }
 0x185   :  { %v924_v29 = vadd.f32 %v923_v5, %v922_v8  ;;  %v1119_v40 = vadd.f32 %v1118_v37, %v1117_v1  ;;  %v929_v1 = vsel %vm442_vm0, %v2454_v48, 0.0  ;;  %v1013_v37 = vmul.f32 %v2468_v24, %v2468_v24 }
 0x186   :  { %v1126_v61 = vsel %vm442_vm0, %v1012_v9, 0.0 }
 0x187   :  { %v926_v57 = vadd.f32 %v925_v25, %v924_v29  ;;  %v1121_v6 = vadd.f32 %v1120_v45, %v1119_v40  ;;  %v931_v40 = vsel %vm442_vm0, %v2468_v24, 0.0  ;;  %v1014_v45 = vmul.f32 %v2482_v60, %v2482_v60 }
 0x188   :  { %v1128_v44 = vsel %vm442_vm0, %v1013_v37, 0.0 }
 0x189   :  { %v1123_v41 = vadd.f32 %v1122_v28, %v1121_v6  ;;  %v928_v8 = vadd.f32 %v927_v32, %v926_v57  ;;  %v933_v6 = vsel %vm442_vm0, %v2482_v60, 0.0  ;;  %v1015_v28 = vmul.f32 %v2496_v36, %v2496_v36 }
 0x18a   :  { %v1130_v9 = vsel %vm442_vm0, %v1014_v45, 0.0 }
 0x18b   :  { %v1125_v5 = vadd.f32 %v1124_v62, %v1123_v41  ;;  %v930_v29 = vadd.f32 %v929_v1, %v928_v8  ;;  %v935_v8 = vsel %vm442_vm0, %v2496_v36, 0.0  ;;  %v1016_v62 = vmul.f32 %v2510_v2, %v2510_v2 }
 0x18c   :  { %v1132_v37 = vsel %vm442_vm0, %v1015_v28, 0.0 }
 0x18d   :  { %v1127_v25 = vadd.f32 %v1126_v61, %v1125_v5  ;;  %v932_v57 = vadd.f32 %v931_v40, %v930_v29  ;;  %v937_v29 = vsel %vm442_vm0, %v2510_v2, 0.0  ;;  %v1017_v61 = vmul.f32 %v2524_v20, %v2524_v20 }
 0x18e   :  { %v1134_v45 = vsel %vm442_vm0, %v1016_v62, 0.0 }
 0x18f   :  { %v1129_v32 = vadd.f32 %v1128_v44, %v1127_v25  ;;  %v934_v41 = vadd.f32 %v933_v6, %v932_v57  ;;  %v939_v57 = vsel %vm442_vm0, %v2524_v20, 0.0  ;;  %v1018_v44 = vmul.f32 %v2538_v13, %v2538_v13 }
 0x190   :  { %v1136_v28 = vsel %vm442_vm0, %v1017_v61, 0.0 }
 0x191   :  { %v1131_v1 = vadd.f32 %v1130_v9, %v1129_v32  ;;  %v936_v5 = vadd.f32 %v935_v8, %v934_v41  ;;  %v941_v41 = vsel %vm442_vm0, %v2538_v13, 0.0  ;;  %v1019_v9 = vmul.f32 %v2552_v17, %v2552_v17 }
 0x192   :  { %v1138_v62 = vsel %vm442_vm0, %v1018_v44, 0.0 }
 0x193   :  { %v1133_v40 = vadd.f32 %v1132_v37, %v1131_v1  ;;  %v938_v25 = vadd.f32 %v937_v29, %v936_v5  ;;  %v943_v5 = vsel %vm442_vm0, %v2552_v17, 0.0  ;;  %v1020_v37 = vmul.f32 %v2566_v33, %v2566_v33 }
 0x194   :  { %v1140_v61 = vsel %vm442_vm0, %v1019_v9, 0.0 }
 0x195   :  { %v1135_v6 = vadd.f32 %v1134_v45, %v1133_v40  ;;  %v940_v32 = vadd.f32 %v939_v57, %v938_v25  ;;  %v945_v25 = vsel %vm442_vm0, %v2566_v33, 0.0  ;;  %v1021_v45 = vmul.f32 %v2580_v53, %v2580_v53 }
 0x196   :  { %v1142_v44 = vsel %vm442_vm0, %v1020_v37, 0.0 }
 0x197   :  { %v1137_v8 = vadd.f32 %v1136_v28, %v1135_v6  ;;  %v942_v1 = vadd.f32 %v941_v41, %v940_v32  ;;  %v947_v32 = vsel %vm442_vm0, %v2580_v53, 0.0  ;;  %v1022_v28 = vmul.f32 %v2594_v4, %v2594_v4 }
 0x198   :  { %v1144_v9 = vsel %vm442_vm0, %v1021_v45, 0.0 }
 0x199   :  { %v1139_v29 = vadd.f32 %v1138_v62, %v1137_v8  ;;  %v944_v40 = vadd.f32 %v943_v5, %v942_v1  ;;  %v949_v1 = vsel %vm442_vm0, %v2594_v4, 0.0  ;;  %v1023_v62 = vmul.f32 %v2606_v49, %v2606_v49 }
 0x19a   :  { %v1146_v37 = vsel %vm442_vm0, %v1022_v28, 0.0 }
 0x19b   :  { %v1141_v57 = vadd.f32 %v1140_v61, %v1139_v29  ;;  %v946_v6 = vadd.f32 %v945_v25, %v944_v40  ;;  %v951_v40 = vsel %vm442_vm0, %v2606_v49, 0.0  ;;  %v1024_v61 = vmul.f32 %v2616_v12, %v2616_v12 }
 0x19c   :  { %v1148_v45 = vsel %vm442_vm0, %v1023_v62, 0.0 }
 0x19d   :  { %v1143_v41 = vadd.f32 %v1142_v44, %v1141_v57  ;;  %v948_v8 = vadd.f32 %v947_v32, %v946_v6  ;;  %v953_v6 = vsel %vm442_vm0, %v2616_v12, 0.0 }
 0x19f   :  { %v1145_v5 = vadd.f32 %v1144_v9, %v1143_v41  ;;  %v950_v29 = vadd.f32 %v949_v1, %v948_v8  ;;  %v1150_v41 = vsel %vm442_vm0, %v1024_v61, 0.0  ;;  %v1171_v61 = vlaneseq }
 0x1a1   :  { %v1147_v25 = vadd.f32 %v1146_v37, %v1145_v5  ;;  %v952_v57 = vadd.f32 %v951_v40, %v950_v29 }
 0x1a3   :  { %v1149_v44 = vadd.f32 %v1148_v45, %v1147_v25  ;;  %v954_v32 = vadd.f32 %v953_v6, %v952_v57  ;;  %v2783_v6 = vshrl.u32 %v1171_v61, 7  ;;  %v3907_v61 = vld [vmem:[#allocation9_spill] sm:$0xff] }
 0x1a5   :  { %v955_v8 = vrot.slane %v954_v32, 4  ;;  %v1151_v9 = vadd.f32 %v1150_v41, %v1149_v44  ;;  %v3859_v44 = vsub.s32 0, %v2783_v6 }
 0x1a7   :  { %v956_v28 = vadd.f32 %v955_v8, %v954_v32  ;;  %v1152_v1 = vrot.slane %v1151_v9, 4 }
 0x1a9   :  { %v957_v4 = vrot.slane %v956_v28, 2  ;;  %v1153_v49 = vadd.f32 %v1152_v1, %v1151_v9  ;;  %v3900_v1 = vld [vmem:[#allocation2_spill] sm:$0xff] }
 0x1ab   :  { %v958_v53 = vadd.f32 %v957_v4, %v956_v28  ;;  %v1154_v33 = vrot.slane %v1153_v49, 2  ;;  %v1163_v4 = vld [vmem:[%s3832_s2] sm:$0x1] }
 0x1ad   :  { %v959_v17 = vrot.slane %v958_v53, 1  ;;  %v1155_v5 = vadd.f32 %v1154_v33, %v1153_v49 }
 0x1af   :  { %v960_v29 = vadd.f32 %v959_v17, %v958_v53  ;;  %v1156_v37 = vrot.slane %v1155_v5, 1  ;;  %v2792_v53 = vld [vmem:[%s3833_s3] sm:$0x1] }
 0x1b1   :  { %v1157_v62 = vadd.f32 %v1156_v37, %v1155_v5  ;;  %v1158_v40 = vmul.f32 0.001953125, %v960_v29  ;;  %v3901_v5 = vld [vmem:[#allocation3_spill] sm:$0xff]  ;;  %v3902_v29 = vld [vmem:[#allocation4_spill] sm:$0xff]  ;;  %v3903_v37 = vld [vmem:[#allocation5_spill] sm:$0xff] }
 0x1b3   :  { %v1159_v13 = vmul.f32 0.001953125, %v1157_v62  ;;  %v1160_v12 = vmul.f32 %v1158_v40, %v1158_v40  ;;  %v3904_v62 = vld [vmem:[#allocation6_spill] sm:$0xff] }
 0x1b5   :  { %v1161_v25 = vsub.f32 %v1159_v13, %v1160_v12 }
 0x1b7   :  { %v1162_v57 = vmax.f32 %v1161_v25, 0.0 }
 0x1b9   :  { %v1164_v45 = vadd.f32 1e-05, %v1162_v57  ;;  %v3906_v57 = vld [vmem:[#allocation8_spill] sm:$0xff] }
 0x1bb   :  { %2056 = vrsqrt.f32 %v1164_v45 }
 0x1c8   :  { %v2057_v33 = vpop.eup %2056 }
 0x1c9   :  { %v1166_v17 = vmul.f32 %v2057_v33, %v1163_v4  ;;  %v3908_v33 = vld [vmem:[#allocation10_spill] sm:$0xff] }
 0x1cb   :  { %v2794_v13 = vmul.f32 %v1166_v17, %v1158_v40  ;;  %v2798_v49 = vrot.slane %v1166_v17, %v3859_v44  ;;  %v3905_v40 = vld [vmem:[#allocation7_spill] sm:$0xff]  ;;  %v3916_v44 = vld [vmem:[#allocation20_spill] sm:$0xff] }
 0x1cd   :  { %v1169_v12 = vsub.f32 %v2792_v53, %v2794_v13  ;;  %v2804_v32 = vmul.f32 %v2798_v49, %v2335_v10  ;;  %v2808_v41 = vmul.f32 %v2798_v49, %v2339_v14  ;;  %v2812_v8 = vmul.f32 %v2798_v49, %v2343_v18  ;;  %v3909_v53 = vld [vmem:[#allocation11_spill] sm:$0xff] }
 0x1ce   :  { %v2816_v9 = vmul.f32 %v2798_v49, %v2347_v22  ;;  %v2820_v28 = vmul.f32 %v2798_v49, %v2351_v26  ;;  %v2824_v10 = vmul.f32 %v2798_v49, %v2355_v30  ;;  %v2828_v14 = vmul.f32 %v2798_v49, %v2359_v34 }
 0x1cf   :  { %v2832_v18 = vmul.f32 %v2798_v49, %v2363_v38  ;;  %v2836_v22 = vmul.f32 %v2798_v49, %v2367_v42  ;;  %v2840_v26 = vmul.f32 %v2798_v49, %v2371_v46  ;;  %v2844_v30 = vmul.f32 %v2798_v49, %v2375_v50 }
 0x1d0   :  { %v2848_v34 = vmul.f32 %v2798_v49, %v2379_v54  ;;  %v2852_v38 = vmul.f32 %v2798_v49, %v2383_v58  ;;  %v2856_v42 = vmul.f32 %v2798_v49, %v3900_v1  ;;  %v2860_v46 = vmul.f32 %v2798_v49, %v3901_v5  ;;  %v3910_v1 = vld [vmem:[#allocation12_spill] sm:$0xff] }
 0x1d1   :  { %v2864_v50 = vmul.f32 %v2798_v49, %v3902_v29  ;;  %v2868_v54 = vmul.f32 %v2798_v49, %v3903_v37  ;;  %v2872_v58 = vmul.f32 %v2798_v49, %v3904_v62  ;;  %v2876_v25 = vmul.f32 %v2798_v49, %v3905_v40  ;;  %v3911_v29 = vld [vmem:[#allocation13_spill] sm:$0xff]  ;;  %v3913_v62 = vld [vmem:[#allocation14_spill] sm:$0xff] }
 0x1d2   :  { %v2880_v45 = vmul.f32 %v2798_v49, %v3906_v57  ;;  %v2884_v4 = vmul.f32 %v2798_v49, %v3907_v61  ;;  %v2888_v17 = vmul.f32 %v2798_v49, %v3908_v33  ;;  %v2892_v13 = vmul.f32 %v2798_v49, %v3909_v53  ;;  %v3914_v57 = vld [vmem:[#allocation16_spill] sm:$0xff]  ;;  %v3915_v33 = vld [vmem:[#allocation18_spill] sm:$0xff] }
 0x1d3   :  { %v2896_v5 = vmul.f32 %v2798_v49, %v3910_v1  ;;  %v2900_v37 = vmul.f32 %v2798_v49, %v3911_v29  ;;  %v2904_v40 = vmul.f32 %v2798_v49, %v3913_v62  ;;  %v2908_v61 = vmul.f32 %v2798_v49, %v3914_v57 }
 0x1d4   :  { %v2912_v53 = vmul.f32 %v2798_v49, %v3915_v33  ;;  %v2916_v1 = vmul.f32 %v2798_v49, %v3916_v44  ;;  %v2920_v29 = vmul.f32 %v2798_v49, %v2592_v0  ;;  %v2928_v57 = vmul.f32 %v2798_v49, %v2614_v56 }
 0x1d5   :  { %3912 = vst [vmem:[#allocation2_spill] sm:$0xff] %v2900_v37  ;;  %v3917_v37 = vld [vmem:[#allocation23_spill] sm:$0xff]  ;;  %v2932_v33 = vmul.f32 %v2798_v49, %v2337_v11  ;;  %v2936_v44 = vmul.f32 %v2798_v49, %v2341_v15  ;;  %v2940_v0 = vmul.f32 %v2798_v49, %v2345_v19  ;;  %v2948_v56 = vmul.f32 %v2798_v49, %v2353_v27 }
 0x1d6   :  { %v2924_v62 = vmul.f32 %v2798_v49, %v3917_v37  ;;  %v2944_v37 = vmul.f32 %v2798_v49, %v2349_v23  ;;  %v2952_v11 = vmul.f32 %v2798_v49, %v2357_v31  ;;  %v2956_v15 = vmul.f32 %v2798_v49, %v2361_v35 }
 0x1d7   :  { %v2960_v19 = vmul.f32 %v2798_v49, %v2365_v39  ;;  %v2964_v23 = vmul.f32 %v2798_v49, %v2369_v43  ;;  %v2968_v27 = vmul.f32 %v2798_v49, %v2373_v47  ;;  %v2972_v31 = vmul.f32 %v2798_v49, %v2377_v51 }
 0x1d8   :  { %v2976_v35 = vmul.f32 %v2798_v49, %v2381_v55  ;;  %v2980_v39 = vmul.f32 %v2798_v49, %v2385_v59  ;;  %v2984_v43 = vmul.f32 %v2798_v49, %v2389_v63  ;;  %v2988_v47 = vmul.f32 %v2798_v49, %v2393_v3 }
 0x1d9   :  { %v2992_v51 = vmul.f32 %v2798_v49, %v2397_v7  ;;  %v2996_v55 = vmul.f32 %v2798_v49, %v2409_v21  ;;  %v3000_v59 = vmul.f32 %v2798_v49, %v2426_v52  ;;  %v3004_v63 = vmul.f32 %v2798_v49, %v2440_v16 }
 0x1da   :  { %v3008_v3 = vmul.f32 %v2798_v49, %v2454_v48  ;;  %v3012_v7 = vmul.f32 %v2798_v49, %v2468_v24  ;;  %v3016_v21 = vmul.f32 %v2798_v49, %v2482_v60  ;;  %v3020_v52 = vmul.f32 %v2798_v49, %v2496_v36 }
 0x1db   :  { %v3024_v16 = vmul.f32 %v2798_v49, %v2510_v2  ;;  %v3028_v48 = vmul.f32 %v2798_v49, %v2524_v20 }
 0x1dc   :  { %3918 = vst [vmem:[#allocation3_spill] sm:$0xff] %v3008_v3  ;;  %3919 = vst [vmem:[#allocation4_spill] sm:$0xff] %v3012_v7  ;;  %v3924_v3 = vld [vmem:[#allocation15_spill] sm:$0xff]  ;;  %v3926_v7 = vld [vmem:[#allocation17_spill] sm:$0xff] }
 0x1dd   :  { %3920 = vst [vmem:[#allocation5_spill] sm:$0xff] %v3016_v21  ;;  %3921 = vst [vmem:[#allocation6_spill] sm:$0xff] %v3020_v52  ;;  %v3032_v24 = vmul.f32 %v2798_v49, %v3924_v3  ;;  %v3036_v60 = vmul.f32 %v2798_v49, %v3926_v7  ;;  %v3928_v21 = vld [vmem:[#allocation19_spill] sm:$0xff]  ;;  %v3929_v52 = vsub.s32 0, %v2783_v6 }
 0x1de   :  { %3922 = vst [vmem:[#allocation7_spill] sm:$0xff] %v3024_v16  ;;  %3923 = vst [vmem:[#allocation8_spill] sm:$0xff] %v3028_v48  ;;  %v3040_v36 = vmul.f32 %v2798_v49, %v3928_v21  ;;  %v3930_v16 = vld [vmem:[#allocation21_spill] sm:$0xff]  ;;  %v3931_v48 = vld [vmem:[#allocation22_spill] sm:$0xff] }
 0x1df   :  { %3925 = vst [vmem:[#allocation9_spill] sm:$0xff] %v3032_v24  ;;  %3927 = vst [vmem:[#allocation10_spill] sm:$0xff] %v3036_v60  ;;  %v3044_v2 = vrot.slane %v1169_v12, %v3929_v52  ;;  %v3048_v20 = vmul.f32 %v2798_v49, %v3930_v16  ;;  %v3052_v3 = vmul.f32 %v2798_v49, %v3931_v48  ;;  %v3932_v24 = vld [vmem:[#allocation24_spill] sm:$0xff]  ;;  %v3933_v60 = vld [vmem:[#allocation25_spill] sm:$0xff] }
 0x1e0   :  { %v3056_v7 = vmul.f32 %v2798_v49, %v3932_v24  ;;  %v3060_v21 = vmul.f32 %v2798_v49, %v3933_v60  ;;  %v3934_v48 = vld [vmem:[#allocation2_spill] sm:$0xff] }
 0x1e1   :  { %v3064_v6 = vadd.f32 %v3044_v2, %v2804_v32  ;;  %v3068_v12 = vadd.f32 %v3044_v2, %v2808_v41  ;;  %v3072_v52 = vadd.f32 %v3044_v2, %v2812_v8  ;;  %v3076_v16 = vadd.f32 %v3044_v2, %v2816_v9 }
 0x1e2   :  { %v3080_v49 = vadd.f32 %v3044_v2, %v2820_v28  ;;  %v3084_v32 = vadd.f32 %v3044_v2, %v2824_v10  ;;  %v3088_v41 = vadd.f32 %v3044_v2, %v2828_v14  ;;  %v3092_v8 = vadd.f32 %v3044_v2, %v2832_v18 }
 0x1e3   :  { %v3096_v9 = vadd.f32 %v3044_v2, %v2836_v22  ;;  %v3100_v28 = vadd.f32 %v3044_v2, %v2840_v26  ;;  %v3104_v10 = vadd.f32 %v3044_v2, %v2844_v30  ;;  %v3108_v14 = vadd.f32 %v3044_v2, %v2848_v34  ;;  %v3944_v60 = vld [vmem:[#allocation3_spill] sm:$0xff] }
 0x1e4   :  { %v3112_v18 = vadd.f32 %v3044_v2, %v2852_v38  ;;  %v3116_v22 = vadd.f32 %v3044_v2, %v2856_v42  ;;  %v3120_v26 = vadd.f32 %v3044_v2, %v2860_v46  ;;  %v3124_v30 = vadd.f32 %v3044_v2, %v2864_v50 }
 0x1e5   :  { %v3128_v34 = vadd.f32 %v3044_v2, %v2868_v54  ;;  %v3132_v38 = vadd.f32 %v3044_v2, %v2872_v58  ;;  %v3136_v42 = vadd.f32 %v3044_v2, %v2876_v25  ;;  %v3140_v46 = vadd.f32 %v3044_v2, %v2880_v45 }
 0x1e6   :  { %v3144_v50 = vadd.f32 %v3044_v2, %v2884_v4  ;;  %v3148_v54 = vadd.f32 %v3044_v2, %v2888_v17  ;;  %v3152_v58 = vadd.f32 %v3044_v2, %v2892_v13  ;;  %v3156_v25 = vadd.f32 %v3044_v2, %v2896_v5 }
 0x1e7   :  { %v3160_v45 = vadd.f32 %v3044_v2, %v3934_v48  ;;  %v3164_v4 = vadd.f32 %v3044_v2, %v2904_v40  ;;  %v3168_v17 = vadd.f32 %v3044_v2, %v2908_v61  ;;  %v3172_v13 = vadd.f32 %v3044_v2, %v2912_v53  ;;  %v3946_v48 = vld [vmem:[#allocation4_spill] sm:$0xff] }
 0x1e8   :  { %v3176_v5 = vadd.f32 %v3044_v2, %v2916_v1  ;;  %v3180_v24 = vadd.f32 %v3044_v2, %v2920_v29  ;;  %v3184_v40 = vadd.f32 %v3044_v2, %v2924_v62  ;;  %v3188_v61 = vadd.f32 %v3044_v2, %v2928_v57 }
 0x1e9   :  { %v3192_v53 = vadd.f32 %v3044_v2, %v2932_v33  ;;  %v3196_v1 = vadd.f32 %v3044_v2, %v2936_v44  ;;  %v3200_v29 = vadd.f32 %v3044_v2, %v2940_v0  ;;  %v3204_v62 = vadd.f32 %v3044_v2, %v2944_v37 }
 0x1ea   :  { %v3208_v57 = vadd.f32 %v3044_v2, %v2948_v56  ;;  %v3212_v33 = vadd.f32 %v3044_v2, %v2952_v11  ;;  %v3216_v44 = vadd.f32 %v3044_v2, %v2956_v15  ;;  %v3220_v0 = vadd.f32 %v3044_v2, %v2960_v19 }
 0x1eb   :  { %v3224_v37 = vadd.f32 %v3044_v2, %v2964_v23  ;;  %v3228_v56 = vadd.f32 %v3044_v2, %v2968_v27  ;;  %v3232_v11 = vadd.f32 %v3044_v2, %v2972_v31  ;;  %v3236_v15 = vadd.f32 %v3044_v2, %v2976_v35 }
 0x1ec   :  { %3935 = vst [vmem:[#allocation11_spill] sm:$0xff] %v3212_v33  ;;  %3936 = vst [vmem:[#allocation12_spill] sm:$0xff] %v3216_v44  ;;  %v3240_v19 = vadd.f32 %v3044_v2, %v2980_v39  ;;  %v3244_v23 = vadd.f32 %v3044_v2, %v2984_v43  ;;  %v3248_v27 = vadd.f32 %v3044_v2, %v2988_v47 }
 0x1ed   :  { %3937 = vst [vmem:[#allocation13_spill] sm:$0xff] %v3220_v0  ;;  %3938 = vst [vmem:[#allocation14_spill] sm:$0xff] %v3224_v37  ;;  %v3252_v31 = vadd.f32 %v3044_v2, %v2992_v51  ;;  %v3256_v35 = vadd.f32 %v3044_v2, %v2996_v55  ;;  %v3260_v39 = vadd.f32 %v3044_v2, %v3000_v59 }
 0x1ee   :  { %3939 = vst [vmem:[#allocation16_spill] sm:$0xff] %v3228_v56  ;;  %v3264_v43 = vadd.f32 %v3044_v2, %v3004_v63  ;;  %v3268_v47 = vadd.f32 %v3044_v2, %v3944_v60  ;;  %v3272_v51 = vadd.f32 %v3044_v2, %v3946_v48 }
 0x1ef   :  { %3940 = vst [vmem:[#allocation18_spill] sm:$0xff] %v3252_v31  ;;  %3941 = vst [vmem:[#allocation20_spill] sm:$0xff] %v3256_v35  ;;  %v3948_v31 = vld [vmem:[#allocation5_spill] sm:$0xff]  ;;  %v3949_v35 = vld [vmem:[#allocation6_spill] sm:$0xff] }
 0x1f0   :  { %3942 = vst [vmem:[#allocation23_spill] sm:$0xff] %v3260_v39  ;;  %3943 = vst [vmem:[#allocation15_spill] sm:$0xff] %v3264_v43  ;;  %v3276_v55 = vadd.f32 %v3044_v2, %v3948_v31  ;;  %v3280_v59 = vadd.f32 %v3044_v2, %v3949_v35  ;;  %v3950_v39 = vld [vmem:[#allocation7_spill] sm:$0xff]  ;;  %v3951_v43 = vld [vmem:[#allocation8_spill] sm:$0xff]  ;;  %v3300_v35 = vadd.f32 %v3044_v2, %v3040_v36 }
 0x1f1   :  { %3945 = vst [vmem:[#allocation17_spill] sm:$0xff] %v3268_v47  ;;  %3947 = vst [vmem:[#allocation19_spill] sm:$0xff] %v3272_v51  ;;  %v3284_v63 = vadd.f32 %v3044_v2, %v3950_v39  ;;  %v3288_v60 = vadd.f32 %v3044_v2, %v3951_v43  ;;  %v3952_v47 = vld [vmem:[#allocation9_spill] sm:$0xff]  ;;  %v3953_v51 = vld [vmem:[#allocation10_spill] sm:$0xff]  ;;  %v3304_v39 = vadd.f32 %v3044_v2, %v3048_v20 }
 0x1f2   :  { %v3292_v48 = vadd.f32 %v3044_v2, %v3952_v47  ;;  %v3296_v31 = vadd.f32 %v3044_v2, %v3953_v51  ;;  %3955 = vst [vmem:[#allocation22_spill] sm:$0xff] %v3300_v35  ;;  %v3308_v43 = vadd.f32 %v3044_v2, %v3052_v3  ;;  %v3312_v47 = vadd.f32 %v3044_v2, %v3056_v7 }
 0x1f3   :  { %3956 = vst [vmem:[#allocation24_spill] sm:$0xff] %v3304_v39  ;;  %v3316_v51 = vadd.f32 %v3044_v2, %v3060_v21  ;;  %v3966_v33 = vmov %v3300_v35  ;;  %v3967_v44 = vmov %v3304_v39  ;;  %v3970_v39 = vmax.f32 %v3064_v6, 0.0 }
 0x1f4   :  { %3954 = vst [vmem:[#allocation21_spill] sm:$0xff] %v3296_v31  ;;  %3957 = vst [vmem:[#allocation25_spill] sm:$0xff] %v3308_v43  ;;  %v3968_v0 = vmov %v3308_v43  ;;  %v3969_v37 = vmov %v3312_v47  ;;  %v3971_v43 = vmax.f32 %v3068_v12, 0.0  ;;  %v3973_v21 = vmax.f32 %v3076_v16, 0.0 }
 0x1f5   :  { %3958 = vst [vmem:[#allocation2_spill] sm:$0xff] %v3312_v47  ;;  %v1868_v3 = vpack.c.bf16 %v3970_v39, %v3970_v39  ;;  %v3972_v47 = vmax.f32 %v3072_v52, 0.0  ;;  %v3974_v35 = vmax.f32 %v3080_v49, 0.0  ;;  %v3975_v6 = vmax.f32 %v3084_v32, 0.0 }
 0x1f6   :  { %v1869_v7 = vpack.c.bf16 %v3971_v43, %v3971_v43  ;;  %v1871_v36 = vpack.c.bf16 %v3973_v21, %v3973_v21  ;;  %v3976_v12 = vmax.f32 %v3088_v41, 0.0  ;;  %v3977_v52 = vmax.f32 %v3092_v8, 0.0 }
 0x1f7   :  { %v1870_v2 = vpack.c.bf16 %v3972_v47, %v3972_v47  ;;  %v1872_v20 = vpack.c.bf16 %v3974_v35, %v3974_v35  ;;  %v1873_v39 = vpack.c.bf16 %v3975_v6, %v3975_v6  ;;  %v3978_v16 = vmax.f32 %v3096_v9, 0.0  ;;  %1631 = vst.msk [vmem:[%s3834_s4] sm:$0xf] %vm1630_vm1, %v1868_v3 }
 0x1f8   :  { %v3964_v56 = vld [vmem:[#allocation19_spill] sm:$0xff]  ;;  %v1874_v43 = vpack.c.bf16 %v3976_v12, %v3976_v12  ;;  %v1875_v47 = vpack.c.bf16 %v3977_v52, %v3977_v52  ;;  %v3979_v49 = vmax.f32 %v3100_v28, 0.0  ;;  %v3980_v32 = vmax.f32 %v3104_v10, 0.0  ;;  %1632 = vst.msk [vmem:[%s3834_s4 + $0x4] sm:$0xf] %vm1630_vm1, %v1869_v7 }
 0x1f9   :  { %v1876_v21 = vpack.c.bf16 %v3978_v16, %v3978_v16  ;;  %v3981_v41 = vmax.f32 %v3108_v14, 0.0  ;;  %1633 = vst.msk [vmem:[%s3834_s4 + $0x8] sm:$0xf] %vm1630_vm1, %v1870_v2  ;;  %1634 = vst.msk [vmem:[%s3834_s4 + $0xc] sm:$0xf] %vm1630_vm1, %v1871_v36  ;;  %v3982_v8 = vmax.f32 %v3112_v18, 0.0 }
 0x1fa   :  { %v1877_v35 = vpack.c.bf16 %v3979_v49, %v3979_v49  ;;  %v1878_v6 = vpack.c.bf16 %v3980_v32, %v3980_v32  ;;  %v3983_v28 = vmax.f32 %v3116_v22, 0.0  ;;  %v3984_v14 = vmax.f32 %v3120_v26, 0.0  ;;  %1635 = vst.msk [vmem:[%s3834_s4 + $0x10] sm:$0xf] %vm1630_vm1, %v1872_v20  ;;  %1636 = vst.msk [vmem:[%s3834_s4 + $0x14] sm:$0xf] %vm1630_vm1, %v1873_v39 }
 0x1fb   :  { %v3965_v31 = vld [vmem:[#allocation21_spill] sm:$0xff]  ;;  %v1879_v12 = vpack.c.bf16 %v3981_v41, %v3981_v41  ;;  %v1880_v9 = vpack.c.bf16 %v3982_v8, %v3982_v8  ;;  %v3985_v7 = vmax.f32 %v3124_v30, 0.0  ;;  %1637 = vst.msk [vmem:[%s3834_s4 + $0x18] sm:$0xf] %vm1630_vm1, %v1874_v43  ;;  %1638 = vst.msk [vmem:[%s3834_s4 + $0x1c] sm:$0xf] %vm1630_vm1, %v1875_v47 }
 0x1fc   :  { %v1881_v10 = vpack.c.bf16 %v3983_v28, %v3983_v28  ;;  %v1882_v3 = vpack.c.bf16 %v3984_v14, %v3984_v14  ;;  %v3986_v18 = vmax.f32 %v3128_v34, 0.0  ;;  %v3987_v26 = vmax.f32 %v3132_v38, 0.0  ;;  %1639 = vst.msk [vmem:[%s3834_s4 + $0x20] sm:$0xf] %vm1630_vm1, %v1876_v21  ;;  %1640 = vst.msk [vmem:[%s3834_s4 + $0x24] sm:$0xf] %vm1630_vm1, %v1877_v35 }
 0x1fd   :  { %v1883_v2 = vpack.c.bf16 %v3985_v7, %v3985_v7  ;;  %v3988_v36 = vmax.f32 %v3136_v42, 0.0  ;;  %v3989_v39 = vmax.f32 %v3140_v46, 0.0  ;;  %1641 = vst.msk [vmem:[%s3834_s4 + $0x28] sm:$0xf] %vm1630_vm1, %v1878_v6  ;;  %1642 = vst.msk [vmem:[%s3834_s4 + $0x2c] sm:$0xf] %vm1630_vm1, %v1879_v12 }
 0x1fe   :  { %v1884_v22 = vpack.c.bf16 %v3986_v18, %v3986_v18  ;;  %v1885_v30 = vpack.c.bf16 %v3987_v26, %v3987_v26  ;;  %v3990_v34 = vmax.f32 %v3144_v50, 0.0  ;;  %v3991_v42 = vmax.f32 %v3148_v54, 0.0  ;;  %1643 = vst.msk [vmem:[%s3834_s4 + $0x30] sm:$0xf] %vm1630_vm1, %v1880_v9  ;;  %1644 = vst.msk [vmem:[%s3834_s4 + $0x34] sm:$0xf] %vm1630_vm1, %v1881_v10 }
 0x1ff   :  { %v1886_v20 = vpack.c.bf16 %v3988_v36, %v3988_v36  ;;  %v1887_v43 = vpack.c.bf16 %v3989_v39, %v3989_v39  ;;  %v3992_v52 = vmax.f32 %v3152_v58, 0.0  ;;  %v3993_v16 = vmax.f32 %v3156_v25, 0.0  ;;  %1645 = vst.msk [vmem:[%s3834_s4 + $0x38] sm:$0xf] %vm1630_vm1, %v1882_v3  ;;  %1646 = vst.msk [vmem:[%s3834_s4 + $0x3c] sm:$0xf] %vm1630_vm1, %v1883_v2 }
 0x200   :  { %v1888_v38 = vpack.c.bf16 %v3990_v34, %v3990_v34  ;;  %v1889_v46 = vpack.c.bf16 %v3991_v42, %v3991_v42  ;;  %v3994_v50 = vmax.f32 %v3160_v45, 0.0  ;;  %v3995_v58 = vmax.f32 %v3164_v4, 0.0  ;;  %1647 = vst.msk [vmem:[%s3834_s4 + $0x40] sm:$0xf] %vm1630_vm1, %v1884_v22  ;;  %1648 = vst.msk [vmem:[%s3834_s4 + $0x44] sm:$0xf] %vm1630_vm1, %v1885_v30 }
 0x201   :  { %v1890_v47 = vpack.c.bf16 %v3992_v52, %v3992_v52  ;;  %v1891_v21 = vpack.c.bf16 %v3993_v16, %v3993_v16  ;;  %v3996_v49 = vmax.f32 %v3168_v17, 0.0  ;;  %v3997_v32 = vmax.f32 %v3172_v13, 0.0  ;;  %1649 = vst.msk [vmem:[%s3834_s4 + $0x48] sm:$0xf] %vm1630_vm1, %v1886_v20  ;;  %1650 = vst.msk [vmem:[%s3834_s4 + $0x4c] sm:$0xf] %vm1630_vm1, %v1887_v43 }
 0x202   :  { %v1892_v54 = vpack.c.bf16 %v3994_v50, %v3994_v50  ;;  %v1893_v25 = vpack.c.bf16 %v3995_v58, %v3995_v58  ;;  %v3998_v45 = vmax.f32 %v3176_v5, 0.0  ;;  %v3999_v17 = vmax.f32 %v3180_v24, 0.0  ;;  %1651 = vst.msk [vmem:[%s3834_s4 + $0x50] sm:$0xf] %vm1630_vm1, %v1888_v38  ;;  %1652 = vst.msk [vmem:[%s3834_s4 + $0x54] sm:$0xf] %vm1630_vm1, %v1889_v46 }
 0x203   :  { %v1894_v35 = vpack.c.bf16 %v3996_v49, %v3996_v49  ;;  %v1895_v6 = vpack.c.bf16 %v3997_v32, %v3997_v32  ;;  %v4000_v41 = vmax.f32 %v3184_v40, 0.0  ;;  %v4001_v8 = vmax.f32 %v3188_v61, 0.0  ;;  %1653 = vst.msk [vmem:[%s3834_s4 + $0x58] sm:$0xf] %vm1630_vm1, %v1890_v47  ;;  %1654 = vst.msk [vmem:[%s3834_s4 + $0x5c] sm:$0xf] %vm1630_vm1, %v1891_v21 }
 0x204   :  { %v1896_v4 = vpack.c.bf16 %v3998_v45, %v3998_v45  ;;  %v1897_v13 = vpack.c.bf16 %v3999_v17, %v3999_v17  ;;  %v4002_v5 = vmax.f32 %v3192_v53, 0.0  ;;  %v4003_v40 = vmax.f32 %v3196_v1, 0.0  ;;  %1655 = vst.msk [vmem:[%s3834_s4 + $0x60] sm:$0xf] %vm1630_vm1, %v1892_v54  ;;  %1656 = vst.msk [vmem:[%s3834_s4 + $0x64] sm:$0xf] %vm1630_vm1, %v1893_v25 }
 0x205   :  { %v1898_v12 = vpack.c.bf16 %v4000_v41, %v4000_v41  ;;  %v1899_v9 = vpack.c.bf16 %v4001_v8, %v4001_v8  ;;  %v4004_v28 = vmax.f32 %v3200_v29, 0.0  ;;  %v4005_v14 = vmax.f32 %v3204_v62, 0.0  ;;  %1657 = vst.msk [vmem:[%s3834_s4 + $0x68] sm:$0xf] %vm1630_vm1, %v1894_v35  ;;  %1658 = vst.msk [vmem:[%s3834_s4 + $0x6c] sm:$0xf] %vm1630_vm1, %v1895_v6 }
 0x206   :  { %v1900_v24 = vpack.c.bf16 %v4002_v5, %v4002_v5  ;;  %v1901_v61 = vpack.c.bf16 %v4003_v40, %v4003_v40  ;;  %v4006_v53 = vmax.f32 %v3208_v57, 0.0  ;;  %v4007_v29 = vld [vmem:[#allocation11_spill] sm:$0xff]  ;;  %v4009_v2 = vld [vmem:[#allocation12_spill] sm:$0xff]  ;;  %v4011_v26 = vld [vmem:[#allocation13_spill] sm:$0xff]  ;;  %1659 = vst.msk [vmem:[%s3834_s4 + $0x70] sm:$0xf] %vm1630_vm1, %v1896_v4 }
 0x207   :  { %v1902_v10 = vpack.c.bf16 %v4004_v28, %v4004_v28  ;;  %v1903_v3 = vpack.c.bf16 %v4005_v14, %v4005_v14  ;;  %v4008_v62 = vmax.f32 %v4007_v29, 0.0  ;;  %v4010_v18 = vmax.f32 %v4009_v2, 0.0  ;;  %1660 = vst.msk [vmem:[%s3834_s4 + $0x74] sm:$0xf] %vm1630_vm1, %v1897_v13  ;;  %1661 = vst.msk [vmem:[%s3834_s4 + $0x78] sm:$0xf] %vm1630_vm1, %v1898_v12 }
 0x208   :  { %v1904_v1 = vpack.c.bf16 %v4006_v53, %v4006_v53  ;;  %v4012_v30 = vmax.f32 %v4011_v26, 0.0  ;;  %1662 = vst.msk [vmem:[%s3834_s4 + $0x7c] sm:$0xf] %vm1630_vm1, %v1899_v9  ;;  %v4013_v57 = vld [vmem:[#allocation14_spill] sm:$0xff]  ;;  %v4015_v43 = vld [vmem:[#allocation16_spill] sm:$0xff]  ;;  %v4017_v42 = vmax.f32 %v3232_v11, 0.0 }
 0x209   :  { %v1905_v7 = vpack.c.bf16 %v4008_v62, %v4008_v62  ;;  %v1906_v22 = vpack.c.bf16 %v4010_v18, %v4010_v18  ;;  %v4014_v20 = vmax.f32 %v4013_v57, 0.0  ;;  %v4016_v34 = vmax.f32 %v4015_v43, 0.0  ;;  %1663 = vst.msk [vmem:[%s3834_s4 + $0x80] sm:$0xf] %vm1630_vm1, %v1900_v24  ;;  %1664 = vst.msk [vmem:[%s3834_s4 + $0x84] sm:$0xf] %vm1630_vm1, %v1901_v61 }
 0x20a   :  { %v1907_v36 = vpack.c.bf16 %v4012_v30, %v4012_v30  ;;  %v1910_v46 = vpack.c.bf16 %v4017_v42, %v4017_v42  ;;  %v4018_v52 = vmax.f32 %v3236_v15, 0.0  ;;  %1665 = vst.msk [vmem:[%s3834_s4 + $0x88] sm:$0xf] %vm1630_vm1, %v1902_v10  ;;  %1666 = vst.msk [vmem:[%s3834_s4 + $0x8c] sm:$0xf] %vm1630_vm1, %v1903_v3  ;;  %v4019_v11 = vmax.f32 %v3240_v19, 0.0 }
 0x20b   :  { %v1908_v39 = vpack.c.bf16 %v4014_v20, %v4014_v20  ;;  %v1909_v38 = vpack.c.bf16 %v4016_v34, %v4016_v34  ;;  %v4020_v16 = vmax.f32 %v3244_v23, 0.0  ;;  %v4021_v50 = vmax.f32 %v3248_v27, 0.0  ;;  %v4022_v58 = vld [vmem:[#allocation18_spill] sm:$0xff]  ;;  %1667 = vst.msk [vmem:[%s3834_s4 + $0x90] sm:$0xf] %vm1630_vm1, %v1904_v1  ;;  %v4024_v19 = vld [vmem:[#allocation20_spill] sm:$0xff] }
 0x20c   :  { %v1911_v47 = vpack.c.bf16 %v4018_v52, %v4018_v52  ;;  %v1912_v15 = vpack.c.bf16 %v4019_v11, %v4019_v11  ;;  %v4023_v25 = vmax.f32 %v4022_v58, 0.0  ;;  %1668 = vst.msk [vmem:[%s3834_s4 + $0x94] sm:$0xf] %vm1630_vm1, %v1905_v7  ;;  %1669 = vst.msk [vmem:[%s3834_s4 + $0x98] sm:$0xf] %vm1630_vm1, %v1906_v22  ;;  %v4025_v23 = vmax.f32 %v4024_v19, 0.0 }
 0x20d   :  { %v1913_v21 = vpack.c.bf16 %v4020_v16, %v4020_v16  ;;  %v1914_v54 = vpack.c.bf16 %v4021_v50, %v4021_v50  ;;  %1670 = vst.msk [vmem:[%s3834_s4 + $0x9c] sm:$0xf] %vm1630_vm1, %v1907_v36  ;;  %v4026_v35 = vld [vmem:[#allocation23_spill] sm:$0xff]  ;;  %v4030_v13 = vld [vmem:[#allocation17_spill] sm:$0xff]  ;;  %1671 = vst.msk [vmem:[%s3834_s4 + $0xa0] sm:$0xf] %vm1630_vm1, %v1908_v39 }
 0x20e   :  { %v1915_v49 = vpack.c.bf16 %v4023_v25, %v4023_v25  ;;  %v1916_v27 = vpack.c.bf16 %v4025_v23, %v4025_v23  ;;  %v4027_v32 = vmax.f32 %v4026_v35, 0.0  ;;  %v4028_v45 = vld [vmem:[#allocation15_spill] sm:$0xff]  ;;  %v4031_v41 = vmax.f32 %v4030_v13, 0.0  ;;  %1672 = vst.msk [vmem:[%s3834_s4 + $0xa4] sm:$0xf] %vm1630_vm1, %v1909_v38 }
 0x20f   :  { %v4029_v4 = vmax.f32 %v4028_v45, 0.0  ;;  %1673 = vst.msk [vmem:[%s3834_s4 + $0xa8] sm:$0xf] %vm1630_vm1, %v1910_v46  ;;  %1674 = vst.msk [vmem:[%s3834_s4 + $0xac] sm:$0xf] %vm1630_vm1, %v1911_v47  ;;  %v4032_v8 = vmax.f32 %v3964_v56, 0.0 }
 0x210   :  { %v1917_v6 = vpack.c.bf16 %v4027_v32, %v4027_v32  ;;  %v1919_v12 = vpack.c.bf16 %v4031_v41, %v4031_v41  ;;  %v4033_v5 = vmax.f32 %v3276_v55, 0.0  ;;  %v4034_v40 = vmax.f32 %v3280_v59, 0.0  ;;  %1675 = vst.msk [vmem:[%s3834_s4 + $0xb0] sm:$0xf] %vm1630_vm1, %v1912_v15  ;;  %1676 = vst.msk [vmem:[%s3834_s4 + $0xb4] sm:$0xf] %vm1630_vm1, %v1913_v21 }
 0x211   :  { %v1918_v17 = vpack.c.bf16 %v4029_v4, %v4029_v4  ;;  %v1920_v9 = vpack.c.bf16 %v4032_v8, %v4032_v8  ;;  %v4035_v28 = vmax.f32 %v3284_v63, 0.0  ;;  %1677 = vst.msk [vmem:[%s3834_s4 + $0xb8] sm:$0xf] %vm1630_vm1, %v1914_v54  ;;  %1678 = vst.msk [vmem:[%s3834_s4 + $0xbc] sm:$0xf] %vm1630_vm1, %v1915_v49  ;;  %v4036_v56 = vmax.f32 %v3288_v60, 0.0 }
 0x212   :  { %v1921_v24 = vpack.c.bf16 %v4033_v5, %v4033_v5  ;;  %v1922_v61 = vpack.c.bf16 %v4034_v40, %v4034_v40  ;;  %v4037_v59 = vmax.f32 %v3292_v48, 0.0  ;;  %v4038_v14 = vmax.f32 %v3965_v31, 0.0  ;;  %1679 = vst.msk [vmem:[%s3834_s4 + $0xc0] sm:$0xf] %vm1630_vm1, %v1916_v27  ;;  %1680 = vst.msk [vmem:[%s3834_s4 + $0xc4] sm:$0xf] %vm1630_vm1, %v1917_v6 }
 0x213   :  { %v1923_v10 = vpack.c.bf16 %v4035_v28, %v4035_v28  ;;  %v1924_v55 = vpack.c.bf16 %v4036_v56, %v4036_v56  ;;  %v4039_v53 = vmax.f32 %v3966_v33, 0.0  ;;  %1681 = vst.msk [vmem:[%s3834_s4 + $0xc8] sm:$0xf] %vm1630_vm1, %v1918_v17  ;;  %1682 = vst.msk [vmem:[%s3834_s4 + $0xcc] sm:$0xf] %vm1630_vm1, %v1919_v12  ;;  %v4040_v33 = vmax.f32 %v3967_v44, 0.0 }
 0x214   :  { %v1925_v63 = vpack.c.bf16 %v4037_v59, %v4037_v59  ;;  %v1926_v3 = vpack.c.bf16 %v4038_v14, %v4038_v14  ;;  %v4041_v48 = vmax.f32 %v3968_v0, 0.0  ;;  %v4042_v29 = vmax.f32 %v3969_v37, 0.0  ;;  %1683 = vst.msk [vmem:[%s3834_s4 + $0xd0] sm:$0xf] %vm1630_vm1, %v1920_v9  ;;  %1684 = vst.msk [vmem:[%s3834_s4 + $0xd4] sm:$0xf] %vm1630_vm1, %v1921_v24 }
 0x215   :  { %v1927_v1 = vpack.c.bf16 %v4039_v53, %v4039_v53  ;;  %v1928_v60 = vpack.c.bf16 %v4040_v33, %v4040_v33  ;;  %v4043_v7 = vmax.f32 %v3316_v51, 0.0  ;;  %1685 = vst.msk [vmem:[%s3834_s4 + $0xd8] sm:$0xf] %vm1630_vm1, %v1922_v61  ;;  %1686 = vst.msk [vmem:[%s3834_s4 + $0xdc] sm:$0xf] %vm1630_vm1, %v1923_v10 }
 0x216   :  { %v1929_v31 = vpack.c.bf16 %v4041_v48, %v4041_v48  ;;  %v1930_v62 = vpack.c.bf16 %v4042_v29, %v4042_v29  ;;  %1687 = vst.msk [vmem:[%s3834_s4 + $0xe0] sm:$0xf] %vm1630_vm1, %v1924_v55  ;;  %1688 = vst.msk [vmem:[%s3834_s4 + $0xe4] sm:$0xf] %vm1630_vm1, %v1925_v63 }
 0x217   :  { %v1931_v2 = vpack.c.bf16 %v4043_v7, %v4043_v7  ;;  %1689 = vst.msk [vmem:[%s3834_s4 + $0xe8] sm:$0xf] %vm1630_vm1, %v1926_v3  ;;  %1690 = vst.msk [vmem:[%s3834_s4 + $0xec] sm:$0xf] %vm1630_vm1, %v1927_v1 }
 0x218   :  { %1691 = vst.msk [vmem:[%s3834_s4 + $0xf0] sm:$0xf] %vm1630_vm1, %v1928_v60  ;;  %1692 = vst.msk [vmem:[%s3834_s4 + $0xf4] sm:$0xf] %vm1630_vm1, %v1929_v31 }
 0x219   :  { %1693 = vst.msk [vmem:[%s3834_s4 + $0xf8] sm:$0xf] %vm1630_vm1, %v1930_v62  ;;  %1694 = vst.msk [vmem:[%s3834_s4 + $0xfc] sm:$0xf] %vm1630_vm1, %v1931_v2 }

// kernel: _lambda_.12
= control target key start
LH: loop header
LB: loop body
LE: loop exit
PB: predicated region body
PF: predicated region fallthrough
CT: control target
= control target key end

     0   :  { %v2412_v0 = vmov 0   ;;  %vm445_vm0 = vcmask 130048   ;;  %vm1825_vm1 = vcmask 125952   ;;  %s4741_s1 = inlined_call_operand.vmem [shape: bf16[144,16], index: 1, kind: input, shape index: {}]   ;;  %s4742_s0 = inlined_call_operand.vmem [shape: bf16[512,144], index: 0, kind: input, shape index: {}]   ;;  %s4743_s4 = inlined_call_operand.vmem [shape: bf16[512,16], index: 4, kind: input, shape index: {}]   ;;  %s4744_s2 = inlined_call_operand.vmem [shape: f32[1,16], index: 2, kind: input, shape index: {}]   ;;  %s4745_s3 = inlined_call_operand.vmem [shape: f32[1,16], index: 3, kind: input, shape index: {}]   ;;  %s4746_s5 = inlined_call_operand.vmem [shape: bf16[512,16], index: 5, kind: output, shape index: {}]  }
   0x1   :  { %542 = vmatprep.subr.bf16.mxu0 %v2412_v0  ;;  %v2305_v1 = vld [vmem:[%s4741_s1 + $0x38] sm:$0xff]   ;;  %2286 = vmatprep.subr.bf16.mxu1 %v2412_v0  ;;  %v2306_v2 = vld [vmem:[%s4741_s1 + $0x30] sm:$0xff]   ;;  %v2307_v3 = vld [vmem:[%s4741_s1 + $0x28] sm:$0xff]  }
   0x2   :  { %543 = vmatpush1.bf16.msra.mxu0 %v2305_v1  ;;  %2295 = vmatpush1.bf16.msra.mxu1 %v2305_v1  ;;  %v2308_v4 = vld [vmem:[%s4741_s1 + $0x20] sm:$0xff]   ;;  %v2309_v6 = vld [vmem:[%s4741_s1 + $0x18] sm:$0xff]   ;;  %v2310_v7 = vld [vmem:[%s4741_s1 + $0x10] sm:$0xff]  }
   0x3   :  { %544 = vmatprep.subr.bf16.mxu0 %v2412_v0  ;;  %2287 = vmatprep.subr.bf16.mxu1 %v2412_v0  ;;  %v2316_v5 = vld [vmem:[%s4742_s0 + $0x4] ss:$8 sps:$4 sm:$0xff]   ;;  %v2314_v12 = vld [vmem:[%s4742_s0] ss:$8 sps:$4 sm:$0xff]   ;;  %v2317_v13 = vld [vmem:[%s4742_s0 + $0x14] ss:$8 sps:$4 sm:$0xff]  }
   0x4   :  { %1967 = vmatprep.mubr.msk.bf16.mxu0 %vm445_vm0, %v2316_v5  ;;  %v2340_v8 = vld [vmem:[%s4742_s0 + $0x104] ss:$8 sps:$4 sm:$0xff]   ;;  %v2338_v14 = vld [vmem:[%s4742_s0 + $0x100] ss:$8 sps:$4 sm:$0xff]   ;;  %v2344_v15 = vld [vmem:[%s4742_s0 + $0x114] ss:$8 sps:$4 sm:$0xff]  }
   0x5   :  { %v2311_v9 = vld [vmem:[%s4741_s1 + $0x8] sm:$0xff]   ;;  %1983 = vmatprep.mubr.msk.bf16.mxu1 %vm445_vm0, %v2340_v8  ;;  %v2312_v10 = vld [vmem:[%s4741_s1] sm:$0xff]   ;;  %v2319_v16 = vld [vmem:[%s4742_s0 + $0x10] ss:$8 sps:$4 sm:$0xff]  }
   0x6   :  { %545 = vmatpush1.bf16.msra.mxu0 %v2306_v2  ;;  %2296 = vmatpush1.bf16.msra.mxu1 %v2306_v2  ;;  %v2313_v11 = vld [vmem:[%s4741_s1 + $0x40] sm:$0xff]   ;;  %v2346_v18 = vld [vmem:[%s4742_s0 + $0x110] ss:$8 sps:$4 sm:$0xff]   ;;  %v2323_v21 = vld [vmem:[%s4742_s0 + $0x34] ss:$8 sps:$4 sm:$0xff]  }
   0x7   :  { %546 = vmatprep.subr.bf16.mxu0 %v2412_v0  ;;  %2288 = vmatprep.subr.bf16.mxu1 %v2412_v0  ;;  %v2320_v17 = vld [vmem:[%s4742_s0 + $0x24] ss:$8 sps:$4 sm:$0xff]   ;;  %v2322_v20 = vld [vmem:[%s4742_s0 + $0x20] ss:$8 sps:$4 sm:$0xff]   ;;  %v2356_v23 = vld [vmem:[%s4742_s0 + $0x134] ss:$8 sps:$4 sm:$0xff]  }
   0x8   :  { %v2350_v19 = vld [vmem:[%s4742_s0 + $0x124] ss:$8 sps:$4 sm:$0xff]   ;;  %v2352_v22 = vld [vmem:[%s4742_s0 + $0x120] ss:$8 sps:$4 sm:$0xff]   ;;  %v2325_v24 = vld [vmem:[%s4742_s0 + $0x30] ss:$8 sps:$4 sm:$0xff]  }
   0x9   :  { %v2358_v25 = vld [vmem:[%s4742_s0 + $0x130] ss:$8 sps:$4 sm:$0xff]   ;;  %v2326_v26 = vld [vmem:[%s4742_s0 + $0x44] ss:$8 sps:$4 sm:$0xff]   ;;  %v2328_v28 = vld [vmem:[%s4742_s0 + $0x40] ss:$8 sps:$4 sm:$0xff]  }
   0xa   :  { %547 = vmatpush1.bf16.msra.mxu0 %v2307_v3  ;;  %2297 = vmatpush1.bf16.msra.mxu1 %v2307_v3  ;;  %v2362_v27 = vld [vmem:[%s4742_s0 + $0x144] ss:$8 sps:$4 sm:$0xff]   ;;  %v2364_v29 = vld [vmem:[%s4742_s0 + $0x140] ss:$8 sps:$4 sm:$0xff]   ;;  %v2329_v30 = vld [vmem:[%s4742_s0 + $0x54] ss:$8 sps:$4 sm:$0xff]  }
   0xb   :  { %548 = vmatprep.subr.bf16.mxu0 %v2412_v0  ;;  %2289 = vmatprep.subr.bf16.mxu1 %v2412_v0  ;;  %v2368_v31 = vld [vmem:[%s4742_s0 + $0x154] ss:$8 sps:$4 sm:$0xff]   ;;  %v2331_v32 = vld [vmem:[%s4742_s0 + $0x50] ss:$8 sps:$4 sm:$0xff]   ;;  %v2332_v34 = vld [vmem:[%s4742_s0 + $0x64] ss:$8 sps:$4 sm:$0xff]  }
   0xc   :  { %v2370_v33 = vld [vmem:[%s4742_s0 + $0x150] ss:$8 sps:$4 sm:$0xff]   ;;  %v2374_v35 = vld [vmem:[%s4742_s0 + $0x164] ss:$8 sps:$4 sm:$0xff]   ;;  %v2334_v36 = vld [vmem:[%s4742_s0 + $0x60] ss:$8 sps:$4 sm:$0xff]  }
   0xd   :  { %v2376_v37 = vld [vmem:[%s4742_s0 + $0x160] ss:$8 sps:$4 sm:$0xff]   ;;  %v2335_v38 = vld [vmem:[%s4742_s0 + $0x74] ss:$8 sps:$4 sm:$0xff]   ;;  %v2337_v40 = vld [vmem:[%s4742_s0 + $0x70] ss:$8 sps:$4 sm:$0xff]  }
   0xe   :  { %549 = vmatpush1.bf16.msra.mxu0 %v2308_v4  ;;  %2298 = vmatpush1.bf16.msra.mxu1 %v2308_v4  ;;  %v2380_v39 = vld [vmem:[%s4742_s0 + $0x174] ss:$8 sps:$4 sm:$0xff]   ;;  %v2382_v41 = vld [vmem:[%s4742_s0 + $0x170] ss:$8 sps:$4 sm:$0xff]   ;;  %v2341_v42 = vld [vmem:[%s4742_s0 + $0x84] ss:$8 sps:$4 sm:$0xff]  }
   0xf   :  { %550 = vmatprep.subr.bf16.mxu0 %v2412_v0  ;;  %2290 = vmatprep.subr.bf16.mxu1 %v2412_v0  ;;  %v2386_v43 = vld [vmem:[%s4742_s0 + $0x184] ss:$8 sps:$4 sm:$0xff]   ;;  %v2343_v44 = vld [vmem:[%s4742_s0 + $0x80] ss:$8 sps:$4 sm:$0xff]   ;;  %v2347_v46 = vld [vmem:[%s4742_s0 + $0x94] ss:$8 sps:$4 sm:$0xff]  }
  0x10   :  { %v2388_v45 = vld [vmem:[%s4742_s0 + $0x180] ss:$8 sps:$4 sm:$0xff]   ;;  %v2389_v47 = vld [vmem:[%s4742_s0 + $0x194] ss:$8 sps:$4 sm:$0xff]   ;;  %v2349_v48 = vld [vmem:[%s4742_s0 + $0x90] ss:$8 sps:$4 sm:$0xff]  }
  0x11   :  { %v2391_v49 = vld [vmem:[%s4742_s0 + $0x190] ss:$8 sps:$4 sm:$0xff]   ;;  %v2353_v50 = vld [vmem:[%s4742_s0 + $0xa4] ss:$8 sps:$4 sm:$0xff]   ;;  %v2355_v52 = vld [vmem:[%s4742_s0 + $0xa0] ss:$8 sps:$4 sm:$0xff]  }
  0x12   :  { %551 = vmatpush1.bf16.msra.mxu0 %v2309_v6  ;;  %2299 = vmatpush1.bf16.msra.mxu1 %v2309_v6  ;;  %v2392_v51 = vld [vmem:[%s4742_s0 + $0x1a4] ss:$8 sps:$4 sm:$0xff]   ;;  %v2394_v53 = vld [vmem:[%s4742_s0 + $0x1a0] ss:$8 sps:$4 sm:$0xff]   ;;  %v2359_v54 = vld [vmem:[%s4742_s0 + $0xb4] ss:$8 sps:$4 sm:$0xff]  }
  0x13   :  { %552 = vmatprep.subr.bf16.mxu0 %v2412_v0  ;;  %2291 = vmatprep.subr.bf16.mxu1 %v2412_v0  ;;  %v2395_v55 = vld [vmem:[%s4742_s0 + $0x1b4] ss:$8 sps:$4 sm:$0xff]   ;;  %v2361_v56 = vld [vmem:[%s4742_s0 + $0xb0] ss:$8 sps:$4 sm:$0xff]   ;;  %v2365_v58 = vld [vmem:[%s4742_s0 + $0xc4] ss:$8 sps:$4 sm:$0xff]  }
  0x14   :  { %v2397_v57 = vld [vmem:[%s4742_s0 + $0x1b0] ss:$8 sps:$4 sm:$0xff]   ;;  %v2398_v59 = vld [vmem:[%s4742_s0 + $0x1c4] ss:$8 sps:$4 sm:$0xff]   ;;  %v2367_v60 = vld [vmem:[%s4742_s0 + $0xc0] ss:$8 sps:$4 sm:$0xff]  }
  0x15   :  { %v2400_v61 = vld [vmem:[%s4742_s0 + $0x1c0] ss:$8 sps:$4 sm:$0xff]   ;;  %v2371_v62 = vld [vmem:[%s4742_s0 + $0xd4] ss:$8 sps:$4 sm:$0xff]   ;;  %v2403_v1 = vld [vmem:[%s4742_s0 + $0x1d0] ss:$8 sps:$4 sm:$0xff]  }
  0x16   :  { %553 = vmatpush1.bf16.msra.mxu0 %v2310_v7  ;;  %2300 = vmatpush1.bf16.msra.mxu1 %v2310_v7  ;;  %v2401_v63 = vld [vmem:[%s4742_s0 + $0x1d4] ss:$8 sps:$4 sm:$0xff]   ;;  %v2377_v2 = vld [vmem:[%s4742_s0 + $0xe4] ss:$8 sps:$4 sm:$0xff]   ;;  %v2379_v4 = vld [vmem:[%s4742_s0 + $0xe0] ss:$8 sps:$4 sm:$0xff]  }
  0x17   :  { %554 = vmatprep.subr.bf16.mxu0 %v2412_v0  ;;  %2292 = vmatprep.subr.bf16.mxu1 %v2412_v0  ;;  %v2404_v3 = vld [vmem:[%s4742_s0 + $0x1e4] ss:$8 sps:$4 sm:$0xff]   ;;  %v2406_v5 = vld [vmem:[%s4742_s0 + $0x1e0] ss:$8 sps:$4 sm:$0xff]   ;;  %v2383_v6 = vld [vmem:[%s4742_s0 + $0xf4] ss:$8 sps:$4 sm:$0xff]  }
  0x18   :  { %v2407_v7 = vld [vmem:[%s4742_s0 + $0x1f4] ss:$8 sps:$4 sm:$0xff]   ;;  %v2385_v8 = vld [vmem:[%s4742_s0 + $0xf0] ss:$8 sps:$4 sm:$0xff]  }
  0x1a   :  { %555 = vmatpush1.bf16.msra.mxu0 %v2311_v9  ;;  %2301 = vmatpush1.bf16.msra.mxu1 %v2311_v9  ;;  %v2409_v9 = vld [vmem:[%s4742_s0 + $0x1f0] ss:$8 sps:$4 sm:$0xff]  }
  0x1b   :  { %556 = vmatprep.subr.bf16.mxu0 %v2412_v0  ;;  %2293 = vmatprep.subr.bf16.mxu1 %v2412_v0 }
  0x1e   :  { %557 = vmatpush1.bf16.msra.mxu0 %v2312_v10  ;;  %2302 = vmatpush1.bf16.msra.mxu1 %v2312_v10 }
  0x1f   :  { %572 = vmatprep.subr.bf16.mxu0 %v2412_v0  ;;  %2294 = vmatprep.subr.bf16.mxu1 %v2412_v0  ;;  %v2373_v0 = vld [vmem:[%s4742_s0 + $0xd0] ss:$8 sps:$4 sm:$0xff]  }
  0x22   :  { %573 = vmatpush2.bf16.msra.mxu0 %v2313_v11  ;;  %2303 = vmatpush2.bf16.msra.mxu1 %v2313_v11 }
  0x25   :  { %575 = vmatmul.mubr.bf16.vlgmr.msra.gmra.mxu0 %v2314_v12  ;;  %703 = vmatmul.mubr.bf16.vlgmr.msra.gmra.mxu1 %v2338_v14 }
  0x26   :  { %1968 = vmatprep.mubr.msk.bf16.mxu0 %vm445_vm0, %v2317_v13  ;;  %1984 = vmatprep.mubr.msk.bf16.mxu1 %vm445_vm0, %v2344_v15 }
  0x2d   :  { %583 = vmatmul.mubr.bf16.gmra.mxu0 %v2319_v16  ;;  %711 = vmatmul.mubr.bf16.gmra.mxu1 %v2346_v18 }
  0x2e   :  { %1969 = vmatprep.mubr.msk.bf16.mxu0 %vm445_vm0, %v2320_v17  ;;  %1985 = vmatprep.mubr.msk.bf16.mxu1 %vm445_vm0, %v2350_v19 }
  0x35   :  { %591 = vmatmul.mubr.bf16.gmra.mxu0 %v2322_v20  ;;  %719 = vmatmul.mubr.bf16.gmra.mxu1 %v2352_v22 }
  0x36   :  { %1970 = vmatprep.mubr.msk.bf16.mxu0 %vm445_vm0, %v2323_v21  ;;  %1986 = vmatprep.mubr.msk.bf16.mxu1 %vm445_vm0, %v2356_v23 }
  0x3d   :  { %599 = vmatmul.mubr.bf16.gmra.mxu0 %v2325_v24  ;;  %727 = vmatmul.mubr.bf16.gmra.mxu1 %v2358_v25 }
  0x3e   :  { %1971 = vmatprep.mubr.msk.bf16.mxu0 %vm445_vm0, %v2326_v26  ;;  %1987 = vmatprep.mubr.msk.bf16.mxu1 %vm445_vm0, %v2362_v27 }
  0x45   :  { %607 = vmatmul.mubr.bf16.gmra.mxu0 %v2328_v28  ;;  %735 = vmatmul.mubr.bf16.gmra.mxu1 %v2364_v29 }
  0x46   :  { %1972 = vmatprep.mubr.msk.bf16.mxu0 %vm445_vm0, %v2329_v30  ;;  %1988 = vmatprep.mubr.msk.bf16.mxu1 %vm445_vm0, %v2368_v31 }
  0x4d   :  { %615 = vmatmul.mubr.bf16.gmra.mxu0 %v2331_v32  ;;  %743 = vmatmul.mubr.bf16.gmra.mxu1 %v2370_v33 }
  0x4e   :  { %1973 = vmatprep.mubr.msk.bf16.mxu0 %vm445_vm0, %v2332_v34  ;;  %1989 = vmatprep.mubr.msk.bf16.mxu1 %vm445_vm0, %v2374_v35 }
  0x55   :  { %623 = vmatmul.mubr.bf16.gmra.mxu0 %v2334_v36  ;;  %751 = vmatmul.mubr.bf16.gmra.mxu1 %v2376_v37 }
  0x56   :  { %1974 = vmatprep.mubr.msk.bf16.mxu0 %vm445_vm0, %v2335_v38  ;;  %1990 = vmatprep.mubr.msk.bf16.mxu1 %vm445_vm0, %v2380_v39 }
  0x5d   :  { %631 = vmatmul.mubr.bf16.gmra.mxu0 %v2337_v40  ;;  %759 = vmatmul.mubr.bf16.gmra.mxu1 %v2382_v41 }
  0x5e   :  { %1975 = vmatprep.mubr.msk.bf16.mxu0 %vm445_vm0, %v2341_v42  ;;  %1991 = vmatprep.mubr.msk.bf16.mxu1 %vm445_vm0, %v2386_v43 }
  0x65   :  { %639 = vmatmul.mubr.bf16.gmra.mxu0 %v2343_v44  ;;  %767 = vmatmul.mubr.bf16.gmra.mxu1 %v2388_v45 }
  0x66   :  { %1976 = vmatprep.mubr.msk.bf16.mxu0 %vm445_vm0, %v2347_v46  ;;  %1992 = vmatprep.mubr.msk.bf16.mxu1 %vm445_vm0, %v2389_v47 }
  0x6d   :  { %647 = vmatmul.mubr.bf16.gmra.mxu0 %v2349_v48  ;;  %775 = vmatmul.mubr.bf16.gmra.mxu1 %v2391_v49 }
  0x6e   :  { %1977 = vmatprep.mubr.msk.bf16.mxu0 %vm445_vm0, %v2353_v50  ;;  %1993 = vmatprep.mubr.msk.bf16.mxu1 %vm445_vm0, %v2392_v51 }
  0x75   :  { %655 = vmatmul.mubr.bf16.gmra.mxu0 %v2355_v52  ;;  %783 = vmatmul.mubr.bf16.gmra.mxu1 %v2394_v53 }
  0x76   :  { %1978 = vmatprep.mubr.msk.bf16.mxu0 %vm445_vm0, %v2359_v54  ;;  %1994 = vmatprep.mubr.msk.bf16.mxu1 %vm445_vm0, %v2395_v55 }
  0x7d   :  { %663 = vmatmul.mubr.bf16.gmra.mxu0 %v2361_v56  ;;  %791 = vmatmul.mubr.bf16.gmra.mxu1 %v2397_v57 }
  0x7e   :  { %1979 = vmatprep.mubr.msk.bf16.mxu0 %vm445_vm0, %v2365_v58  ;;  %1995 = vmatprep.mubr.msk.bf16.mxu1 %vm445_vm0, %v2398_v59 }
  0x85   :  { %671 = vmatmul.mubr.bf16.gmra.mxu0 %v2367_v60  ;;  %799 = vmatmul.mubr.bf16.gmra.mxu1 %v2400_v61 }
  0x86   :  { %1980 = vmatprep.mubr.msk.bf16.mxu0 %vm445_vm0, %v2371_v62  ;;  %1996 = vmatprep.mubr.msk.bf16.mxu1 %vm445_vm0, %v2401_v63 }
  0x8d   :  { %679 = vmatmul.mubr.bf16.gmra.mxu0 %v2373_v0  ;;  %807 = vmatmul.mubr.bf16.gmra.mxu1 %v2403_v1 }
  0x8e   :  { %1981 = vmatprep.mubr.msk.bf16.mxu0 %vm445_vm0, %v2377_v2  ;;  %1997 = vmatprep.mubr.msk.bf16.mxu1 %vm445_vm0, %v2404_v3 }
  0x95   :  { %687 = vmatmul.mubr.bf16.gmra.mxu0 %v2379_v4  ;;  %815 = vmatmul.mubr.bf16.gmra.mxu1 %v2406_v5 }
  0x96   :  { %1982 = vmatprep.mubr.msk.bf16.mxu0 %vm445_vm0, %v2383_v6  ;;  %1998 = vmatprep.mubr.msk.bf16.mxu1 %vm445_vm0, %v2407_v7 }
  0x9d   :  { %695 = vmatmul.mubr.bf16.gmra.mxu0 %v2385_v8  ;;  %823 = vmatmul.mubr.bf16.gmra.mxu1 %v2409_v9 }
  0xe5   :  { %v2694_v10 = vpop.f32.mrf.mxu0  ;;  %v2696_v11 = vpop.f32.mrf.mxu1 }
  0xe7   :  { %v578_v12 = vpop.f32.mrf.mxu0  ;;  %v706_v13 = vpop.f32.mrf.mxu1 }
  0xe8   :  { %v964_v13 = vmul.f32 %v2694_v10, %v2694_v10 }
  0xe9   :  { %v2698_v14 = vpop.f32.mrf.mxu0  ;;  %v2700_v15 = vpop.f32.mrf.mxu1 }
  0xea   :  { %v965_v8 = vmul.f32 %v2698_v14, %v2698_v14 }
  0xeb   :  { %v581_v16 = vpop.f32.mrf.mxu0  ;;  %v709_v17 = vpop.f32.mrf.mxu1 }
  0xec   :  { %v832_v16 = vsel %vm445_vm0, %v2698_v14, 0.0 }
  0xed   :  { %v2702_v18 = vpop.f32.mrf.mxu0  ;;  %v2704_v19 = vpop.f32.mrf.mxu1 }
  0xee   :  { %v966_v17 = vmul.f32 %v2702_v18, %v2702_v18 }
  0xef   :  { %v586_v20 = vpop.f32.mrf.mxu0  ;;  %v714_v21 = vpop.f32.mrf.mxu1 }
  0xf1   :  { %v2706_v22 = vpop.f32.mrf.mxu0  ;;  %v2708_v23 = vpop.f32.mrf.mxu1 }
  0xf3   :  { %v589_v24 = vpop.f32.mrf.mxu0  ;;  %v717_v25 = vpop.f32.mrf.mxu1 }
  0xf4   :  { %v831_v24 = vsel %vm445_vm0, %v2694_v10, 0.0  ;;  %v1029_v25 = vsel %vm445_vm0, %v965_v8, 0.0 }
  0xf5   :  { %v2710_v26 = vpop.f32.mrf.mxu0  ;;  %v2712_v27 = vpop.f32.mrf.mxu1 }
  0xf7   :  { %v594_v28 = vpop.f32.mrf.mxu0  ;;  %v722_v29 = vpop.f32.mrf.mxu1 }
  0xf8   :  { %v834_v28 = vsel %vm445_vm0, %v2702_v18, 0.0  ;;  %v967_v29 = vmul.f32 %v2706_v22, %v2706_v22 }
  0xf9   :  { %v2714_v30 = vpop.f32.mrf.mxu0  ;;  %v2716_v31 = vpop.f32.mrf.mxu1 }
  0xfb   :  { %v597_v32 = vpop.f32.mrf.mxu0  ;;  %v725_v33 = vpop.f32.mrf.mxu1 }
  0xfc   :  { %v833_v32 = vadd.f32 %v832_v16, %v831_v24 }
  0xfd   :  { %v2718_v34 = vpop.f32.mrf.mxu0  ;;  %v2720_v35 = vpop.f32.mrf.mxu1 }
  0xfe   :  { %v970_v8 = vmul.f32 %v2718_v34, %v2718_v34  ;;  %v842_v24 = vsel %vm445_vm0, %v2718_v34, 0.0 }
  0xff   :  { %v602_v36 = vpop.f32.mrf.mxu0  ;;  %v730_v37 = vpop.f32.mrf.mxu1 }
 0x100   :  { %v1028_v37 = vsel %vm445_vm0, %v964_v13, 0.0 }
 0x101   :  { %v2722_v38 = vpop.f32.mrf.mxu0  ;;  %v2724_v39 = vpop.f32.mrf.mxu1 }
 0x103   :  { %v605_v40 = vpop.f32.mrf.mxu0  ;;  %v733_v41 = vpop.f32.mrf.mxu1 }
 0x104   :  { %v1031_v40 = vsel %vm445_vm0, %v966_v17, 0.0  ;;  %v836_v41 = vsel %vm445_vm0, %v2706_v22, 0.0 }
 0x105   :  { %v2726_v42 = vpop.f32.mrf.mxu0  ;;  %v2728_v43 = vpop.f32.mrf.mxu1 }
 0x107   :  { %v610_v44 = vpop.f32.mrf.mxu0  ;;  %v738_v45 = vpop.f32.mrf.mxu1 }
 0x108   :  { %v968_v44 = vmul.f32 %v2710_v26, %v2710_v26  ;;  %v1030_v45 = vadd.f32 %v1029_v25, %v1028_v37  ;;  %v971_v25 = vmul.f32 %v2722_v38, %v2722_v38  ;;  %v844_v37 = vsel %vm445_vm0, %v2722_v38, 0.0 }
 0x109   :  { %v2730_v46 = vpop.f32.mrf.mxu0  ;;  %v2732_v47 = vpop.f32.mrf.mxu1 }
 0x10b   :  { %v613_v48 = vpop.f32.mrf.mxu0  ;;  %v741_v49 = vpop.f32.mrf.mxu1 }
 0x10c   :  { %v835_v48 = vadd.f32 %v834_v28, %v833_v32 }
 0x10d   :  { %v2734_v50 = vpop.f32.mrf.mxu0  ;;  %v2736_v51 = vpop.f32.mrf.mxu1 }
 0x10f   :  { %v618_v52 = vpop.f32.mrf.mxu0  ;;  %v746_v53 = vpop.f32.mrf.mxu1 }
 0x110   :  { %v1033_v53 = vsel %vm445_vm0, %v967_v29, 0.0 }
 0x111   :  { %v2738_v54 = vpop.f32.mrf.mxu0  ;;  %v2740_v55 = vpop.f32.mrf.mxu1 }
 0x113   :  { %v621_v56 = vpop.f32.mrf.mxu0  ;;  %v749_v57 = vpop.f32.mrf.mxu1 }
 0x114   :  { %v838_v56 = vsel %vm445_vm0, %v2710_v26, 0.0  ;;  %v969_v57 = vmul.f32 %v2714_v30, %v2714_v30 }
 0x115   :  { %v2742_v58 = vpop.f32.mrf.mxu0  ;;  %v2744_v59 = vpop.f32.mrf.mxu1 }
 0x116   :  { %v1037_v17 = vsel %vm445_vm0, %v969_v57, 0.0  ;;  %v973_v57 = vmul.f32 %v2730_v46, %v2730_v46 }
 0x117   :  { %v626_v60 = vpop.f32.mrf.mxu0  ;;  %v754_v61 = vpop.f32.mrf.mxu1 }
 0x118   :  { %v1032_v60 = vadd.f32 %v1031_v40, %v1030_v45  ;;  %v837_v61 = vadd.f32 %v836_v41, %v835_v48  ;;  %v972_v40 = vmul.f32 %v2726_v42, %v2726_v42 }
 0x119   :  { %v2746_v62 = vpop.f32.mrf.mxu0  ;;  %v2748_v63 = vpop.f32.mrf.mxu1 }
 0x11a   :  { %4851 = vst [vmem:[#allocation2_spill] sm:$0xff] %v2746_v62 }
 0x11b   :  { %v629_v0 = vpop.f32.mrf.mxu0  ;;  %v757_v1 = vpop.f32.mrf.mxu1 }
 0x11d   :  { %v2750_v2 = vpop.f32.mrf.mxu0  ;;  %v2752_v3 = vpop.f32.mrf.mxu1 }
 0x11e   :  { %4852 = vst [vmem:[#allocation3_spill] sm:$0xff] %v2750_v2 }
 0x11f   :  { %v634_v4 = vpop.f32.mrf.mxu0  ;;  %v762_v5 = vpop.f32.mrf.mxu1 }
 0x120   :  { %v1035_v4 = vsel %vm445_vm0, %v968_v44, 0.0  ;;  %v840_v5 = vsel %vm445_vm0, %v2714_v30, 0.0 }
 0x121   :  { %v2754_v6 = vpop.f32.mrf.mxu0  ;;  %v2756_v7 = vpop.f32.mrf.mxu1 }
 0x122   :  { %4853 = vst [vmem:[#allocation4_spill] sm:$0xff] %v2754_v6 }
 0x123   :  { %v637_v9 = vpop.f32.mrf.mxu0  ;;  %v765_v12 = vpop.f32.mrf.mxu1 }
 0x124   :  { %v1034_v9 = vadd.f32 %v1033_v53, %v1032_v60  ;;  %v839_v12 = vadd.f32 %v838_v56, %v837_v61  ;;  %v1041_v53 = vsel %vm445_vm0, %v971_v25, 0.0  ;;  %v846_v56 = vsel %vm445_vm0, %v2726_v42, 0.0 }
 0x125   :  { %v2766_v20 = vpop.f32.mrf.mxu0  ;;  %v2768_v21 = vpop.f32.mrf.mxu1  ;;  %v1045_v25 = vsel %vm445_vm0, %v973_v57, 0.0 }
 0x126   :  { %4854 = vst [vmem:[#allocation5_spill] sm:$0xff] %v2766_v20  ;;  %v1036_v28 = vadd.f32 %v1035_v4, %v1034_v9  ;;  %v841_v29 = vadd.f32 %v840_v5, %v839_v12  ;;  %v1043_v4 = vsel %vm445_vm0, %v972_v40, 0.0  ;;  %v848_v5 = vsel %vm445_vm0, %v2730_v46, 0.0 }
 0x127   :  { %v642_v33 = vpop.f32.mrf.mxu0  ;;  %v770_v36 = vpop.f32.mrf.mxu1 }
 0x128   :  { %v1039_v36 = vsel %vm445_vm0, %v970_v8, 0.0  ;;  %v1038_v41 = vadd.f32 %v1037_v17, %v1036_v28  ;;  %v843_v44 = vadd.f32 %v842_v24, %v841_v29  ;;  %v974_v8 = vmul.f32 %v2734_v50, %v2734_v50 }
 0x129   :  { %v2783_v49 = vpop.f32.mrf.mxu0  ;;  %v2785_v52 = vpop.f32.mrf.mxu1  ;;  %v850_v28 = vsel %vm445_vm0, %v2734_v50, 0.0  ;;  %v975_v29 = vmul.f32 %v2738_v54, %v2738_v54 }
 0x12a   :  { %4855 = vst [vmem:[#allocation6_spill] sm:$0xff] %v2783_v49  ;;  %v1040_v60 = vadd.f32 %v1039_v36, %v1038_v41  ;;  %v845_v61 = vadd.f32 %v844_v37, %v843_v44  ;;  %v1047_v40 = vsel %vm445_vm0, %v974_v8, 0.0  ;;  %v852_v41 = vsel %vm445_vm0, %v2738_v54, 0.0 }
 0x12b   :  { %v645_v0 = vpop.f32.mrf.mxu0  ;;  %v773_v1 = vpop.f32.mrf.mxu1  ;;  %v976_v44 = vmul.f32 %v2742_v58, %v2742_v58 }
 0x12c   :  { %v1042_v9 = vadd.f32 %v1041_v53, %v1040_v60  ;;  %v847_v12 = vadd.f32 %v846_v56, %v845_v61  ;;  %v1049_v61 = vsel %vm445_vm0, %v975_v29, 0.0 }
 0x12d   :  { %v2797_v13 = vpop.f32.mrf.mxu0  ;;  %v2799_v16 = vpop.f32.mrf.mxu1 }
 0x12e   :  { %4856 = vst [vmem:[#allocation7_spill] sm:$0xff] %v2797_v13 }
 0x12f   :  { %v650_v32 = vpop.f32.mrf.mxu0  ;;  %v778_v33 = vpop.f32.mrf.mxu1 }
 0x130   :  { %v1044_v32 = vadd.f32 %v1043_v4, %v1042_v9  ;;  %v849_v33 = vadd.f32 %v848_v5, %v847_v12  ;;  %v1051_v12 = vsel %vm445_vm0, %v976_v44, 0.0 }
 0x131   :  { %v2811_v45 = vpop.f32.mrf.mxu0  ;;  %v2813_v48 = vpop.f32.mrf.mxu1 }
 0x132   :  { %4857 = vst [vmem:[#allocation8_spill] sm:$0xff] %v2811_v45  ;;  %v1046_v53 = vadd.f32 %v1045_v25, %v1044_v32  ;;  %v851_v56 = vadd.f32 %v850_v28, %v849_v33  ;;  %v856_v25 = vsel %vm445_vm0, %v2746_v62, 0.0  ;;  %v978_v28 = vmul.f32 %v2750_v2, %v2750_v2 }
 0x133   :  { %v653_v0 = vpop.f32.mrf.mxu0  ;;  %v781_v1 = vpop.f32.mrf.mxu1 }
 0x134   :  { %v854_v0 = vsel %vm445_vm0, %v2742_v58, 0.0  ;;  %v977_v1 = vmul.f32 %v2746_v62, %v2746_v62  ;;  %v1048_v4 = vadd.f32 %v1047_v40, %v1046_v53  ;;  %v853_v5 = vadd.f32 %v852_v41, %v851_v56 }
 0x135   :  { %v2825_v17 = vpop.f32.mrf.mxu0  ;;  %v2827_v24 = vpop.f32.mrf.mxu1  ;;  %v858_v40 = vsel %vm445_vm0, %v2750_v2, 0.0  ;;  %v979_v41 = vmul.f32 %v2754_v6, %v2754_v6 }
 0x136   :  { %4858 = vst [vmem:[#allocation9_spill] sm:$0xff] %v2825_v17  ;;  %v1050_v32 = vadd.f32 %v1049_v61, %v1048_v4  ;;  %v855_v29 = vadd.f32 %v854_v0, %v853_v5  ;;  %v860_v61 = vsel %vm445_vm0, %v2754_v6, 0.0  ;;  %v980_v0 = vmul.f32 %v2766_v20, %v2766_v20 }
 0x137   :  { %v658_v36 = vpop.f32.mrf.mxu0  ;;  %v786_v37 = vpop.f32.mrf.mxu1  ;;  %v1057_v62 = vsel %vm445_vm0, %v979_v41, 0.0 }
 0x138   :  { %v1053_v37 = vsel %vm445_vm0, %v977_v1, 0.0  ;;  %v1052_v44 = vadd.f32 %v1051_v12, %v1050_v32  ;;  %v857_v53 = vadd.f32 %v856_v25, %v855_v29  ;;  %v862_v12 = vsel %vm445_vm0, %v2766_v20, 0.0 }
 0x139   :  { %v2839_v57 = vpop.f32.mrf.mxu0  ;;  %v2841_v60 = vpop.f32.mrf.mxu1  ;;  %v981_v25 = vmul.f32 %v2783_v49, %v2783_v49 }
 0x13a   :  { %4859 = vst [vmem:[#allocation10_spill] sm:$0xff] %v2839_v57  ;;  %v1054_v4 = vadd.f32 %v1053_v37, %v1052_v44  ;;  %v859_v1 = vadd.f32 %v858_v40, %v857_v53  ;;  %v864_v37 = vsel %vm445_vm0, %v2783_v49, 0.0  ;;  %v982_v40 = vmul.f32 %v2797_v13, %v2797_v13 }
 0x13b   :  { %v661_v8 = vpop.f32.mrf.mxu0  ;;  %v789_v9 = vpop.f32.mrf.mxu1  ;;  %v1061_v6 = vsel %vm445_vm0, %v981_v25, 0.0 }
 0x13c   :  { %v1055_v9 = vsel %vm445_vm0, %v978_v28, 0.0  ;;  %v861_v32 = vadd.f32 %v860_v61, %v859_v1  ;;  %v983_v61 = vmul.f32 %v2811_v45, %v2811_v45 }
 0x13d   :  { %v2853_v33 = vpop.f32.mrf.mxu0  ;;  %v2855_v36 = vpop.f32.mrf.mxu1  ;;  %v1056_v28 = vadd.f32 %v1055_v9, %v1054_v4  ;;  %v866_v9 = vsel %vm445_vm0, %v2797_v13, 0.0 }
 0x13e   :  { %4860 = vst [vmem:[#allocation11_spill] sm:$0xff] %v2853_v33  ;;  %v863_v41 = vadd.f32 %v862_v12, %v861_v32  ;;  %v984_v12 = vmul.f32 %v2825_v17, %v2825_v17  ;;  %v1065_v49 = vsel %vm445_vm0, %v983_v61, 0.0 }
 0x13f   :  { %v666_v56 = vpop.f32.mrf.mxu0  ;;  %v794_v8 = vpop.f32.mrf.mxu1  ;;  %v1058_v44 = vadd.f32 %v1057_v62, %v1056_v28  ;;  %v868_v62 = vsel %vm445_vm0, %v2811_v45, 0.0 }
 0x140   :  { %v1059_v8 = vsel %vm445_vm0, %v980_v0, 0.0  ;;  %v865_v4 = vadd.f32 %v864_v37, %v863_v41  ;;  %v985_v37 = vmul.f32 %v2839_v57, %v2839_v57 }
 0x141   :  { %v2867_v5 = vpop.f32.mrf.mxu0  ;;  %v2869_v2 = vpop.f32.mrf.mxu1  ;;  %v1060_v0 = vadd.f32 %v1059_v8, %v1058_v44  ;;  %v870_v8 = vsel %vm445_vm0, %v2825_v17, 0.0 }
 0x142   :  { %4861 = vst [vmem:[#allocation12_spill] sm:$0xff] %v2867_v5  ;;  %v867_v25 = vadd.f32 %v866_v9, %v865_v4  ;;  %v986_v9 = vmul.f32 %v2853_v33, %v2853_v33  ;;  %v1069_v45 = vsel %vm445_vm0, %v985_v37, 0.0 }
 0x143   :  { %v669_v29 = vpop.f32.mrf.mxu0  ;;  %v797_v56 = vpop.f32.mrf.mxu1  ;;  %v1062_v28 = vadd.f32 %v1061_v6, %v1060_v0  ;;  %v872_v6 = vsel %vm445_vm0, %v2839_v57, 0.0 }
 0x144   :  { %v1063_v56 = vsel %vm445_vm0, %v982_v40, 0.0  ;;  %v869_v44 = vadd.f32 %v868_v62, %v867_v25  ;;  %v987_v62 = vmul.f32 %v2867_v5, %v2867_v5 }
 0x145   :  { %v2881_v53 = vpop.f32.mrf.mxu0  ;;  %v2883_v20 = vpop.f32.mrf.mxu1  ;;  %v1064_v40 = vadd.f32 %v1063_v56, %v1062_v28  ;;  %v874_v56 = vsel %vm445_vm0, %v2853_v33, 0.0 }
 0x146   :  { %4862 = vst [vmem:[#allocation13_spill] sm:$0xff] %v2881_v53  ;;  %v871_v61 = vadd.f32 %v870_v8, %v869_v44  ;;  %v988_v8 = vmul.f32 %v2881_v53, %v2881_v53  ;;  %v1073_v57 = vsel %vm445_vm0, %v987_v62, 0.0 }
 0x147   :  { %v674_v1 = vpop.f32.mrf.mxu0  ;;  %v802_v29 = vpop.f32.mrf.mxu1  ;;  %v1066_v0 = vadd.f32 %v1065_v49, %v1064_v40  ;;  %v876_v49 = vsel %vm445_vm0, %v2867_v5, 0.0 }
 0x148   :  { %v1067_v29 = vsel %vm445_vm0, %v984_v12, 0.0  ;;  %v873_v28 = vadd.f32 %v872_v6, %v871_v61 }
 0x149   :  { %v2895_v32 = vpop.f32.mrf.mxu0  ;;  %v2897_v13 = vpop.f32.mrf.mxu1  ;;  %v1068_v12 = vadd.f32 %v1067_v29, %v1066_v0  ;;  %v878_v29 = vsel %vm445_vm0, %v2881_v53, 0.0 }
 0x14a   :  { %4863 = vst [vmem:[#allocation14_spill] sm:$0xff] %v2895_v32  ;;  %v875_v37 = vadd.f32 %v874_v56, %v873_v28  ;;  %v989_v6 = vmul.f32 %v2895_v32, %v2895_v32 }
 0x14b   :  { %v677_v41 = vpop.f32.mrf.mxu0  ;;  %v805_v1 = vpop.f32.mrf.mxu1  ;;  %v1070_v40 = vadd.f32 %v1069_v45, %v1068_v12  ;;  %v880_v45 = vsel %vm445_vm0, %v2895_v32, 0.0 }
 0x14c   :  { %v1071_v1 = vsel %vm445_vm0, %v986_v9, 0.0  ;;  %v877_v0 = vadd.f32 %v876_v49, %v875_v37  ;;  %v1077_v5 = vsel %vm445_vm0, %v989_v6, 0.0 }
 0x14d   :  { %v2909_v4 = vpop.f32.mrf.mxu0  ;;  %v2911_v17 = vpop.f32.mrf.mxu1  ;;  %v1072_v9 = vadd.f32 %v1071_v1, %v1070_v40 }
 0x14e   :  { %4864 = vst [vmem:[#allocation15_spill] sm:$0xff] %v2909_v4  ;;  %4865 = vst [vmem:[#allocation16_spill] sm:$0xff] %v2911_v17  ;;  %v990_v56 = vmul.f32 %v2909_v4, %v2909_v4  ;;  %v879_v62 = vadd.f32 %v878_v29, %v877_v0  ;;  %v882_v1 = vsel %vm445_vm0, %v2909_v4, 0.0 }
 0x14f   :  { %v682_v25 = vpop.f32.mrf.mxu0  ;;  %v810_v41 = vpop.f32.mrf.mxu1  ;;  %v1074_v12 = vadd.f32 %v1073_v57, %v1072_v9 }
 0x150   :  { %v1075_v41 = vsel %vm445_vm0, %v988_v8, 0.0  ;;  %v881_v40 = vadd.f32 %v880_v45, %v879_v62 }
 0x151   :  { %v2923_v44 = vpop.f32.mrf.mxu0  ;;  %v2925_v33 = vpop.f32.mrf.mxu1  ;;  %v1076_v8 = vadd.f32 %v1075_v41, %v1074_v12 }
 0x152   :  { %4866 = vst [vmem:[#allocation17_spill] sm:$0xff] %v2923_v44  ;;  %4867 = vst [vmem:[#allocation18_spill] sm:$0xff] %v2925_v33  ;;  %v991_v49 = vmul.f32 %v2923_v44, %v2923_v44  ;;  %v884_v57 = vsel %vm445_vm0, %v2923_v44, 0.0  ;;  %v883_v6 = vadd.f32 %v882_v1, %v881_v40 }
 0x153   :  { %v685_v61 = vpop.f32.mrf.mxu0  ;;  %v813_v25 = vpop.f32.mrf.mxu1  ;;  %v1078_v9 = vadd.f32 %v1077_v5, %v1076_v8 }
 0x154   :  { %v1079_v25 = vsel %vm445_vm0, %v990_v56, 0.0  ;;  %v1081_v32 = vsel %vm445_vm0, %v991_v49, 0.0  ;;  %v885_v12 = vadd.f32 %v884_v57, %v883_v6 }
 0x155   :  { %v2937_v28 = vpop.f32.mrf.mxu0  ;;  %v2939_v53 = vpop.f32.mrf.mxu1  ;;  %v1080_v56 = vadd.f32 %v1079_v25, %v1078_v9 }
 0x156   :  { %4868 = vst [vmem:[#allocation19_spill] sm:$0xff] %v2937_v28  ;;  %4869 = vst [vmem:[#allocation20_spill] sm:$0xff] %v2939_v53  ;;  %v992_v29 = vmul.f32 %v2937_v28, %v2937_v28  ;;  %v886_v41 = vsel %vm445_vm0, %v2937_v28, 0.0 }
 0x157   :  { %v690_v37 = vpop.f32.mrf.mxu0  ;;  %v818_v61 = vpop.f32.mrf.mxu1  ;;  %v1082_v1 = vadd.f32 %v1081_v32, %v1080_v56  ;;  %v887_v8 = vadd.f32 %v886_v41, %v885_v12 }
 0x158   :  { %v1083_v61 = vsel %vm445_vm0, %v992_v29, 0.0 }
 0x159   :  { %v2951_v0 = vpop.f32.mrf.mxu0  ;;  %v2953_v4 = vpop.f32.mrf.mxu1  ;;  %v1084_v57 = vadd.f32 %v1083_v61, %v1082_v1 }
 0x15a   :  { %4870 = vst [vmem:[#allocation21_spill] sm:$0xff] %v2953_v4  ;;  %v993_v45 = vmul.f32 %v2951_v0, %v2951_v0  ;;  %v888_v5 = vsel %vm445_vm0, %v2951_v0, 0.0 }
 0x15b   :  { %v693_v62 = vpop.f32.mrf.mxu0  ;;  %v821_v37 = vpop.f32.mrf.mxu1  ;;  %v889_v9 = vadd.f32 %v888_v5, %v887_v8 }
 0x15c   :  { %v1085_v28 = vsel %vm445_vm0, %v993_v45, 0.0  ;;  %v996_v45 = vmul.f32 %v2696_v11, %v2696_v11 }
 0x15d   :  { %v2963_v40 = vpop.f32.mrf.mxu0  ;;  %v2965_v49 = vpop.f32.mrf.mxu1  ;;  %v1086_v32 = vadd.f32 %v1085_v28, %v1084_v57  ;;  %v997_v28 = vmul.f32 %v2700_v15, %v2700_v15 }
 0x15e   :  { %4871 = vst [vmem:[#allocation22_spill] sm:$0xff] %v2963_v40  ;;  %4872 = vst [vmem:[#allocation23_spill] sm:$0xff] %v2965_v49  ;;  %v890_v44 = vsel %vm445_vm0, %v2963_v40, 0.0  ;;  %v994_v25 = vmul.f32 %v2963_v40, %v2963_v40  ;;  %v896_v40 = vsel %vm445_vm0, %v2700_v15, 0.0 }
 0x15f   :  { %v698_v29 = vpop.f32.mrf.mxu0  ;;  %v826_v6 = vpop.f32.mrf.mxu1  ;;  %v891_v41 = vadd.f32 %v890_v44, %v889_v9  ;;  %v894_v44 = vsel %vm445_vm0, %v2696_v11, 0.0 }
 0x160   :  { %v1087_v62 = vsel %vm445_vm0, %v994_v25, 0.0  ;;  %v1091_v6 = vsel %vm445_vm0, %v996_v45, 0.0 }
 0x161   :  { %v2973_v56 = vpop.f32.mrf.mxu0  ;;  %v2975_v12 = vpop.f32.mrf.mxu1  ;;  %v1088_v5 = vadd.f32 %v1087_v62, %v1086_v32  ;;  %v998_v62 = vmul.f32 %v2704_v19, %v2704_v19 }
 0x162   :  { %4873 = vst [vmem:[#allocation24_spill] sm:$0xff] %v2975_v12  ;;  %v892_v37 = vsel %vm445_vm0, %v2973_v56, 0.0  ;;  %v995_v61 = vmul.f32 %v2973_v56, %v2973_v56 }
 0x163   :  { %v893_v1 = vadd.f32 %v892_v37, %v891_v41  ;;  %v701_v8 = vpop.f32.mrf.mxu0  ;;  %v829_v29 = vpop.f32.mrf.mxu1  ;;  %v1093_v37 = vsel %vm445_vm0, %v997_v28, 0.0  ;;  %v1095_v45 = vsel %vm445_vm0, %v998_v62, 0.0 }
 0x164   :  { %v1089_v25 = vsel %vm445_vm0, %v995_v61, 0.0  ;;  %v898_v8 = vsel %vm445_vm0, %v2704_v19, 0.0  ;;  %v999_v61 = vmul.f32 %v2708_v23, %v2708_v23  ;;  %v900_v29 = vsel %vm445_vm0, %v2708_v23, 0.0 }
 0x165   :  { %v895_v57 = vadd.f32 %v894_v44, %v893_v1  ;;  %v1090_v9 = vadd.f32 %v1089_v25, %v1088_v5  ;;  %v1000_v44 = vmul.f32 %v2712_v27, %v2712_v27 }
 0x166   :  { %v1097_v28 = vsel %vm445_vm0, %v999_v61, 0.0 }
 0x167   :  { %v897_v32 = vadd.f32 %v896_v40, %v895_v57  ;;  %v1092_v41 = vadd.f32 %v1091_v6, %v1090_v9  ;;  %v902_v57 = vsel %vm445_vm0, %v2712_v27, 0.0  ;;  %v1001_v9 = vmul.f32 %v2716_v31, %v2716_v31 }
 0x168   :  { %v1099_v62 = vsel %vm445_vm0, %v1000_v44, 0.0 }
 0x169   :  { %v899_v1 = vadd.f32 %v898_v8, %v897_v32  ;;  %v1094_v5 = vadd.f32 %v1093_v37, %v1092_v41  ;;  %v904_v41 = vsel %vm445_vm0, %v2716_v31, 0.0  ;;  %v1002_v37 = vmul.f32 %v2720_v35, %v2720_v35 }
 0x16a   :  { %v1101_v61 = vsel %vm445_vm0, %v1001_v9, 0.0 }
 0x16b   :  { %v901_v40 = vadd.f32 %v900_v29, %v899_v1  ;;  %v1096_v25 = vadd.f32 %v1095_v45, %v1094_v5  ;;  %v906_v5 = vsel %vm445_vm0, %v2720_v35, 0.0  ;;  %v1003_v45 = vmul.f32 %v2724_v39, %v2724_v39 }
 0x16c   :  { %v1103_v44 = vsel %vm445_vm0, %v1002_v37, 0.0 }
 0x16d   :  { %v903_v6 = vadd.f32 %v902_v57, %v901_v40  ;;  %v1098_v32 = vadd.f32 %v1097_v28, %v1096_v25  ;;  %v908_v25 = vsel %vm445_vm0, %v2724_v39, 0.0  ;;  %v1004_v28 = vmul.f32 %v2728_v43, %v2728_v43 }
 0x16e   :  { %v1105_v9 = vsel %vm445_vm0, %v1003_v45, 0.0 }
 0x16f   :  { %v905_v8 = vadd.f32 %v904_v41, %v903_v6  ;;  %v1100_v1 = vadd.f32 %v1099_v62, %v1098_v32  ;;  %v910_v32 = vsel %vm445_vm0, %v2728_v43, 0.0  ;;  %v1005_v62 = vmul.f32 %v2732_v47, %v2732_v47 }
 0x170   :  { %v1107_v37 = vsel %vm445_vm0, %v1004_v28, 0.0 }
 0x171   :  { %v907_v29 = vadd.f32 %v906_v5, %v905_v8  ;;  %v1102_v40 = vadd.f32 %v1101_v61, %v1100_v1  ;;  %v912_v1 = vsel %vm445_vm0, %v2732_v47, 0.0  ;;  %v1006_v61 = vmul.f32 %v2736_v51, %v2736_v51 }
 0x172   :  { %v1109_v45 = vsel %vm445_vm0, %v1005_v62, 0.0 }
 0x173   :  { %v909_v57 = vadd.f32 %v908_v25, %v907_v29  ;;  %v1104_v6 = vadd.f32 %v1103_v44, %v1102_v40  ;;  %v914_v40 = vsel %vm445_vm0, %v2736_v51, 0.0  ;;  %v1007_v44 = vmul.f32 %v2740_v55, %v2740_v55 }
 0x174   :  { %v1111_v28 = vsel %vm445_vm0, %v1006_v61, 0.0 }
 0x175   :  { %v1106_v41 = vadd.f32 %v1105_v9, %v1104_v6  ;;  %v911_v8 = vadd.f32 %v910_v32, %v909_v57  ;;  %v916_v6 = vsel %vm445_vm0, %v2740_v55, 0.0  ;;  %v1008_v9 = vmul.f32 %v2744_v59, %v2744_v59 }
 0x176   :  { %v1113_v62 = vsel %vm445_vm0, %v1007_v44, 0.0 }
 0x177   :  { %v913_v5 = vadd.f32 %v912_v1, %v911_v8  ;;  %v1108_v29 = vadd.f32 %v1107_v37, %v1106_v41  ;;  %v918_v8 = vsel %vm445_vm0, %v2744_v59, 0.0  ;;  %v1009_v37 = vmul.f32 %v2748_v63, %v2748_v63 }
 0x178   :  { %v1115_v61 = vsel %vm445_vm0, %v1008_v9, 0.0 }
 0x179   :  { %v915_v25 = vadd.f32 %v914_v40, %v913_v5  ;;  %v1110_v57 = vadd.f32 %v1109_v45, %v1108_v29  ;;  %v920_v29 = vsel %vm445_vm0, %v2748_v63, 0.0  ;;  %v1010_v45 = vmul.f32 %v2752_v3, %v2752_v3 }
 0x17a   :  { %v1117_v44 = vsel %vm445_vm0, %v1009_v37, 0.0 }
 0x17b   :  { %v917_v32 = vadd.f32 %v916_v6, %v915_v25  ;;  %v1112_v41 = vadd.f32 %v1111_v28, %v1110_v57  ;;  %v922_v57 = vsel %vm445_vm0, %v2752_v3, 0.0  ;;  %v1011_v28 = vmul.f32 %v2756_v7, %v2756_v7 }
 0x17c   :  { %v1119_v9 = vsel %vm445_vm0, %v1010_v45, 0.0 }
 0x17d   :  { %v919_v1 = vadd.f32 %v918_v8, %v917_v32  ;;  %v1114_v5 = vadd.f32 %v1113_v62, %v1112_v41  ;;  %v924_v41 = vsel %vm445_vm0, %v2756_v7, 0.0  ;;  %v1012_v62 = vmul.f32 %v2768_v21, %v2768_v21 }
 0x17e   :  { %v1121_v37 = vsel %vm445_vm0, %v1011_v28, 0.0 }
 0x17f   :  { %v921_v40 = vadd.f32 %v920_v29, %v919_v1  ;;  %v1116_v25 = vadd.f32 %v1115_v61, %v1114_v5  ;;  %v926_v5 = vsel %vm445_vm0, %v2768_v21, 0.0  ;;  %v1013_v61 = vmul.f32 %v2785_v52, %v2785_v52 }
 0x180   :  { %v1123_v45 = vsel %vm445_vm0, %v1012_v62, 0.0 }
 0x181   :  { %v923_v6 = vadd.f32 %v922_v57, %v921_v40  ;;  %v1118_v32 = vadd.f32 %v1117_v44, %v1116_v25  ;;  %v928_v25 = vsel %vm445_vm0, %v2785_v52, 0.0  ;;  %v1014_v44 = vmul.f32 %v2799_v16, %v2799_v16 }
 0x182   :  { %v1125_v28 = vsel %vm445_vm0, %v1013_v61, 0.0 }
 0x183   :  { %v925_v8 = vadd.f32 %v924_v41, %v923_v6  ;;  %v1120_v1 = vadd.f32 %v1119_v9, %v1118_v32  ;;  %v930_v32 = vsel %vm445_vm0, %v2799_v16, 0.0  ;;  %v1015_v9 = vmul.f32 %v2813_v48, %v2813_v48 }
 0x184   :  { %v1127_v62 = vsel %vm445_vm0, %v1014_v44, 0.0 }
 0x185   :  { %v927_v29 = vadd.f32 %v926_v5, %v925_v8  ;;  %v1122_v40 = vadd.f32 %v1121_v37, %v1120_v1  ;;  %v932_v1 = vsel %vm445_vm0, %v2813_v48, 0.0  ;;  %v1016_v37 = vmul.f32 %v2827_v24, %v2827_v24 }
 0x186   :  { %v1129_v61 = vsel %vm445_vm0, %v1015_v9, 0.0 }
 0x187   :  { %v929_v57 = vadd.f32 %v928_v25, %v927_v29  ;;  %v1124_v6 = vadd.f32 %v1123_v45, %v1122_v40  ;;  %v934_v40 = vsel %vm445_vm0, %v2827_v24, 0.0  ;;  %v1017_v45 = vmul.f32 %v2841_v60, %v2841_v60 }
 0x188   :  { %v1131_v44 = vsel %vm445_vm0, %v1016_v37, 0.0 }
 0x189   :  { %v1126_v41 = vadd.f32 %v1125_v28, %v1124_v6  ;;  %v931_v8 = vadd.f32 %v930_v32, %v929_v57  ;;  %v936_v6 = vsel %vm445_vm0, %v2841_v60, 0.0  ;;  %v1018_v28 = vmul.f32 %v2855_v36, %v2855_v36 }
 0x18a   :  { %v1133_v9 = vsel %vm445_vm0, %v1017_v45, 0.0 }
 0x18b   :  { %v1128_v5 = vadd.f32 %v1127_v62, %v1126_v41  ;;  %v933_v29 = vadd.f32 %v932_v1, %v931_v8  ;;  %v938_v8 = vsel %vm445_vm0, %v2855_v36, 0.0  ;;  %v1019_v62 = vmul.f32 %v2869_v2, %v2869_v2 }
 0x18c   :  { %v1135_v37 = vsel %vm445_vm0, %v1018_v28, 0.0 }
 0x18d   :  { %v1130_v25 = vadd.f32 %v1129_v61, %v1128_v5  ;;  %v935_v57 = vadd.f32 %v934_v40, %v933_v29  ;;  %v940_v29 = vsel %vm445_vm0, %v2869_v2, 0.0  ;;  %v1020_v61 = vmul.f32 %v2883_v20, %v2883_v20 }
 0x18e   :  { %v1137_v45 = vsel %vm445_vm0, %v1019_v62, 0.0 }
 0x18f   :  { %v1132_v32 = vadd.f32 %v1131_v44, %v1130_v25  ;;  %v937_v41 = vadd.f32 %v936_v6, %v935_v57  ;;  %v942_v57 = vsel %vm445_vm0, %v2883_v20, 0.0  ;;  %v1021_v44 = vmul.f32 %v2897_v13, %v2897_v13 }
 0x190   :  { %v1139_v28 = vsel %vm445_vm0, %v1020_v61, 0.0 }
 0x191   :  { %v1134_v1 = vadd.f32 %v1133_v9, %v1132_v32  ;;  %v939_v5 = vadd.f32 %v938_v8, %v937_v41  ;;  %v944_v41 = vsel %vm445_vm0, %v2897_v13, 0.0  ;;  %v1022_v9 = vmul.f32 %v2911_v17, %v2911_v17 }
 0x192   :  { %v1141_v62 = vsel %vm445_vm0, %v1021_v44, 0.0 }
 0x193   :  { %v1136_v40 = vadd.f32 %v1135_v37, %v1134_v1  ;;  %v941_v25 = vadd.f32 %v940_v29, %v939_v5  ;;  %v946_v5 = vsel %vm445_vm0, %v2911_v17, 0.0  ;;  %v1023_v37 = vmul.f32 %v2925_v33, %v2925_v33 }
 0x194   :  { %v1143_v61 = vsel %vm445_vm0, %v1022_v9, 0.0 }
 0x195   :  { %v1138_v6 = vadd.f32 %v1137_v45, %v1136_v40  ;;  %v943_v32 = vadd.f32 %v942_v57, %v941_v25  ;;  %v948_v25 = vsel %vm445_vm0, %v2925_v33, 0.0  ;;  %v1024_v45 = vmul.f32 %v2939_v53, %v2939_v53 }
 0x196   :  { %v1145_v44 = vsel %vm445_vm0, %v1023_v37, 0.0 }
 0x197   :  { %v1140_v8 = vadd.f32 %v1139_v28, %v1138_v6  ;;  %v945_v1 = vadd.f32 %v944_v41, %v943_v32  ;;  %v950_v32 = vsel %vm445_vm0, %v2939_v53, 0.0  ;;  %v1025_v28 = vmul.f32 %v2953_v4, %v2953_v4 }
 0x198   :  { %v1147_v9 = vsel %vm445_vm0, %v1024_v45, 0.0 }
 0x199   :  { %v1142_v29 = vadd.f32 %v1141_v62, %v1140_v8  ;;  %v947_v40 = vadd.f32 %v946_v5, %v945_v1  ;;  %v952_v1 = vsel %vm445_vm0, %v2953_v4, 0.0  ;;  %v1026_v62 = vmul.f32 %v2965_v49, %v2965_v49 }
 0x19a   :  { %v1149_v37 = vsel %vm445_vm0, %v1025_v28, 0.0 }
 0x19b   :  { %v1144_v57 = vadd.f32 %v1143_v61, %v1142_v29  ;;  %v949_v6 = vadd.f32 %v948_v25, %v947_v40  ;;  %v954_v40 = vsel %vm445_vm0, %v2965_v49, 0.0  ;;  %v1027_v61 = vmul.f32 %v2975_v12, %v2975_v12 }
 0x19c   :  { %v1151_v45 = vsel %vm445_vm0, %v1026_v62, 0.0 }
 0x19d   :  { %v1146_v41 = vadd.f32 %v1145_v44, %v1144_v57  ;;  %v951_v8 = vadd.f32 %v950_v32, %v949_v6  ;;  %v956_v6 = vsel %vm445_vm0, %v2975_v12, 0.0 }
 0x19f   :  { %v1148_v5 = vadd.f32 %v1147_v9, %v1146_v41  ;;  %v953_v29 = vadd.f32 %v952_v1, %v951_v8  ;;  %v1153_v41 = vsel %vm445_vm0, %v1027_v61, 0.0 }
 0x1a1   :  { %v1150_v25 = vadd.f32 %v1149_v37, %v1148_v5  ;;  %v955_v57 = vadd.f32 %v954_v40, %v953_v29 }
 0x1a3   :  { %v1152_v44 = vadd.f32 %v1151_v45, %v1150_v25  ;;  %v957_v32 = vadd.f32 %v956_v6, %v955_v57  ;;  %v1174_v57 = vlaneseq }
 0x1a5   :  { %v958_v8 = vrot.slane %v957_v32, 4  ;;  %v1154_v9 = vadd.f32 %v1153_v41, %v1152_v44  ;;  %v3146_v44 = vshrl.u32 %v1174_v57, 7  ;;  %v3178_v41 = vld [vmem:[%s4743_s4 + $0x28] sm:$0xff]   ;;  %v3220_v57 = vld [vmem:[%s4743_s4 + $0x58] sm:$0xff]  }
 0x1a6   :  { %4879 = vst [vmem:[#allocation30_spill] sm:$0xff] %v3178_v41  ;;  %4885 = vst [vmem:[#allocation36_spill] sm:$0xff] %v3220_v57  ;;  %v3281_v57 = vld [vmem:[%s4743_s4 + $0xa0] sm:$0xff]  }
 0x1a7   :  { %v959_v28 = vadd.f32 %v958_v8, %v957_v32  ;;  %v1155_v1 = vrot.slane %v1154_v9, 4  ;;  %v3183_v8 = vld [vmem:[%s4743_s4 + $0x30] sm:$0xff]   ;;  %4894 = vst [vmem:[#allocation45_spill] sm:$0xff] %v3281_v57  ;;  %v3343_v41 = vld [vmem:[%s4743_s4 + $0xe0] sm:$0xff]   ;;  %v4917_v57 = vld [vmem:[#allocation11_spill] sm:$0xff] }
 0x1a8   :  { %4880 = vst [vmem:[#allocation31_spill] sm:$0xff] %v3183_v8  ;;  %4902 = vst [vmem:[#allocation53_spill] sm:$0xff] %v3343_v41  ;;  %v3362_v8 = vld [vmem:[%s4745_s3] sm:$0x1]  ;;  %v4914_v41 = vld [vmem:[#allocation9_spill] sm:$0xff] }
 0x1a9   :  { %v960_v4 = vrot.slane %v959_v28, 2  ;;  %v1156_v49 = vadd.f32 %v1155_v1, %v1154_v9  ;;  %v3225_v1 = vld [vmem:[%s4743_s4 + $0x60] sm:$0xff]   ;;  %v3239_v9 = vld [vmem:[%s4743_s4 + $0x70] sm:$0xff]  }
 0x1aa   :  { %4886 = vst [vmem:[#allocation37_spill] sm:$0xff] %v3225_v1  ;;  %4888 = vst [vmem:[#allocation39_spill] sm:$0xff] %v3239_v9  ;;  %v3307_v9 = vld [vmem:[%s4743_s4 + $0xb8] sm:$0xff]  }
 0x1ab   :  { %v961_v53 = vadd.f32 %v960_v4, %v959_v28  ;;  %v1157_v33 = vrot.slane %v1156_v49, 2  ;;  %v3151_v4 = vld [vmem:[%s4743_s4] sm:$0xff]   ;;  %v3290_v28 = vld [vmem:[%s4743_s4 + $0xa8] sm:$0xff]   ;;  %4897 = vst [vmem:[#allocation48_spill] sm:$0xff] %v3307_v9  ;;  %v3338_v1 = vld [vmem:[%s4743_s4 + $0xd8] sm:$0xff]  }
 0x1ac   :  { %4874 = vst [vmem:[#allocation25_spill] sm:$0xff] %v3151_v4  ;;  %4895 = vst [vmem:[#allocation46_spill] sm:$0xff] %v3290_v28  ;;  %v4909_v28 = vld [vmem:[#allocation4_spill] sm:$0xff]  ;;  %v4923_v4 = vld [vmem:[#allocation15_spill] sm:$0xff] }
 0x1ad   :  { %v962_v17 = vrot.slane %v961_v53, 1  ;;  %v1158_v5 = vadd.f32 %v1157_v33, %v1156_v49  ;;  %v3161_v33 = vld [vmem:[%s4743_s4 + $0x10] sm:$0xff]   ;;  %v3171_v49 = vld [vmem:[%s4743_s4 + $0x20] sm:$0xff]   ;;  %4901 = vst [vmem:[#allocation52_spill] sm:$0xff] %v3338_v1 }
 0x1ae   :  { %4876 = vst [vmem:[#allocation27_spill] sm:$0xff] %v3161_v33  ;;  %4878 = vst [vmem:[#allocation29_spill] sm:$0xff] %v3171_v49  ;;  %v3330_v49 = vld [vmem:[%s4743_s4 + $0xd0] sm:$0xff]   ;;  %v4915_v1 = vld [vmem:[#allocation10_spill] sm:$0xff] }
 0x1af   :  { %v963_v29 = vadd.f32 %v962_v17, %v961_v53  ;;  %v1159_v37 = vrot.slane %v1158_v5, 1  ;;  %v3156_v17 = vld [vmem:[%s4743_s4 + $0x8] sm:$0xff]   ;;  %v3166_v53 = vld [vmem:[%s4743_s4 + $0x18] sm:$0xff]   ;;  %4900 = vst [vmem:[#allocation51_spill] sm:$0xff] %v3330_v49 }
 0x1b0   :  { %4875 = vst [vmem:[#allocation26_spill] sm:$0xff] %v3156_v17  ;;  %4877 = vst [vmem:[#allocation28_spill] sm:$0xff] %v3166_v53  ;;  %v4910_v49 = vld [vmem:[#allocation5_spill] sm:$0xff]  ;;  %v4919_v53 = vld [vmem:[#allocation12_spill] sm:$0xff] }
 0x1b1   :  { %v1160_v62 = vadd.f32 %v1159_v37, %v1158_v5  ;;  %v3142_v40 = vmul.f32 0.001953125, %v963_v29  ;;  %v3192_v29 = vld [vmem:[%s4743_s4 + $0x38] sm:$0xff]   ;;  %v3197_v37 = vld [vmem:[%s4743_s4 + $0x40] sm:$0xff]  }
 0x1b2   :  { %4881 = vst [vmem:[#allocation32_spill] sm:$0xff] %v3192_v29  ;;  %4882 = vst [vmem:[#allocation33_spill] sm:$0xff] %v3197_v37  ;;  %v3276_v5 = vld [vmem:[%s4743_s4 + $0x98] sm:$0xff]   ;;  %v3316_v29 = vld [vmem:[%s4743_s4 + $0xc0] sm:$0xff]  }
 0x1b3   :  { %v1162_v12 = vmul.f32 0.001953125, %v1160_v62  ;;  %v1163_v25 = vmul.f32 %v3142_v40, %v3142_v40  ;;  %v3262_v62 = vld [vmem:[%s4743_s4 + $0x88] sm:$0xff]   ;;  %4893 = vst [vmem:[#allocation44_spill] sm:$0xff] %v3276_v5  ;;  %4898 = vst [vmem:[#allocation49_spill] sm:$0xff] %v3316_v29  ;;  %v3376_v29 = vld [vmem:[%s4743_s4 + $0xf8] sm:$0xff]  }
 0x1b4   :  { %4891 = vst [vmem:[#allocation42_spill] sm:$0xff] %v3262_v62  ;;  %v4905_v62 = vsub.s32 0, %v3146_v44  ;;  %4906 = vst [vmem:[#allocation56_spill] sm:$0xff] %v3376_v29  ;;  %v4911_v29 = vld [vmem:[#allocation6_spill] sm:$0xff]  ;;  %v4920_v33 = vld [vmem:[#allocation13_spill] sm:$0xff] }
 0x1b5   :  { %v1164_v61 = vsub.f32 %v1162_v12, %v1163_v25  ;;  %v3248_v25 = vld [vmem:[%s4743_s4 + $0x78] sm:$0xff]   ;;  %v3253_v12 = vld [vmem:[%s4743_s4 + $0x80] sm:$0xff]  }
 0x1b6   :  { %4889 = vst [vmem:[#allocation40_spill] sm:$0xff] %v3248_v25  ;;  %4890 = vst [vmem:[#allocation41_spill] sm:$0xff] %v3253_v12  ;;  %v3321_v25 = vld [vmem:[%s4743_s4 + $0xc8] sm:$0xff]   ;;  %v4922_v17 = vld [vmem:[#allocation14_spill] sm:$0xff] }
 0x1b7   :  { %v1165_v45 = vmax.f32 %v1164_v61, 0.0  ;;  %v3234_v61 = vld [vmem:[%s4743_s4 + $0x68] sm:$0xff]   ;;  %4899 = vst [vmem:[#allocation50_spill] sm:$0xff] %v3321_v25 }
 0x1b8   :  { %4887 = vst [vmem:[#allocation38_spill] sm:$0xff] %v3234_v61  ;;  %v3295_v61 = vld [vmem:[%s4743_s4 + $0xb0] sm:$0xff]   ;;  %v3352_v12 = vld [vmem:[%s4743_s4 + $0xe8] sm:$0xff]  }
 0x1b9   :  { %v1167_v6 = vadd.f32 1e-05, %v1165_v45  ;;  %v3206_v45 = vld [vmem:[%s4743_s4 + $0x48] sm:$0xff]   ;;  %4896 = vst [vmem:[#allocation47_spill] sm:$0xff] %v3295_v61  ;;  %4903 = vst [vmem:[#allocation54_spill] sm:$0xff] %v3352_v12  ;;  %v4913_v12 = vld [vmem:[#allocation8_spill] sm:$0xff] }
 0x1ba   :  { %4883 = vst [vmem:[#allocation34_spill] sm:$0xff] %v3206_v45  ;;  %v3267_v45 = vld [vmem:[%s4743_s4 + $0x90] sm:$0xff]  }
 0x1bb   :  { %2410 = vrsqrt.f32 %v1167_v6  ;;  %v3211_v6 = vld [vmem:[%s4743_s4 + $0x50] sm:$0xff]   ;;  %4892 = vst [vmem:[#allocation43_spill] sm:$0xff] %v3267_v45 }
 0x1bc   :  { %4884 = vst [vmem:[#allocation35_spill] sm:$0xff] %v3211_v6  ;;  %v1166_v6 = vld [vmem:[%s4744_s2] sm:$0x1]  ;;  %v3357_v45 = vld [vmem:[%s4743_s4 + $0xf0] sm:$0xff]  }
 0x1bd   :  { %4904 = vst [vmem:[#allocation55_spill] sm:$0xff] %v3357_v45  ;;  %v4912_v45 = vld [vmem:[#allocation7_spill] sm:$0xff] }
 0x1c8   :  { %v2411_v32 = vpop.eup %2410 }
 0x1c9   :  { %v1169_v5 = vmul.f32 %v2411_v32, %v1166_v6 }
 0x1cb   :  { %v3365_v32 = vmul.f32 %v1169_v5, %v3142_v40  ;;  %v3369_v6 = vrot.slane %v1169_v5, %v4905_v62  ;;  %v4907_v40 = vld [vmem:[#allocation2_spill] sm:$0xff]  ;;  %v4908_v62 = vld [vmem:[#allocation3_spill] sm:$0xff] }
 0x1cd   :  { %v3390_v9 = vmul.f32 %v3369_v6, %v2694_v10  ;;  %v3396_v5 = vmul.f32 %v3369_v6, %v2698_v14  ;;  %v3400_v37 = vmul.f32 %v3369_v6, %v2702_v18  ;;  %v3404_v25 = vmul.f32 %v3369_v6, %v2706_v22 }
 0x1ce   :  { %v3408_v10 = vmul.f32 %v3369_v6, %v2710_v26  ;;  %v3412_v61 = vmul.f32 %v3369_v6, %v2714_v30  ;;  %v3416_v14 = vmul.f32 %v3369_v6, %v2718_v34  ;;  %v3420_v18 = vmul.f32 %v3369_v6, %v2722_v38 }
 0x1cf   :  { %v3424_v22 = vmul.f32 %v3369_v6, %v2726_v42  ;;  %v3428_v26 = vmul.f32 %v3369_v6, %v2730_v46  ;;  %v3432_v30 = vmul.f32 %v3369_v6, %v2734_v50  ;;  %v3436_v34 = vmul.f32 %v3369_v6, %v2738_v54 }
 0x1d0   :  { %v3440_v38 = vmul.f32 %v3369_v6, %v2742_v58  ;;  %v3444_v42 = vmul.f32 %v3369_v6, %v4907_v40  ;;  %v3448_v46 = vmul.f32 %v3369_v6, %v4908_v62  ;;  %v3452_v50 = vmul.f32 %v3369_v6, %v4909_v28 }
 0x1d1   :  { %v3456_v54 = vmul.f32 %v3369_v6, %v4910_v49  ;;  %v3460_v58 = vmul.f32 %v3369_v6, %v4911_v29  ;;  %v3464_v40 = vmul.f32 %v3369_v6, %v4912_v45  ;;  %v3468_v62 = vmul.f32 %v3369_v6, %v4913_v12 }
 0x1d2   :  { %v3472_v28 = vmul.f32 %v3369_v6, %v4914_v41  ;;  %v3476_v49 = vmul.f32 %v3369_v6, %v4915_v1  ;;  %v3480_v29 = vmul.f32 %v3369_v6, %v4917_v57  ;;  %v3484_v45 = vmul.f32 %v3369_v6, %v4919_v53 }
 0x1d3   :  { %v3488_v12 = vmul.f32 %v3369_v6, %v4920_v33  ;;  %v3492_v41 = vmul.f32 %v3369_v6, %v4922_v17  ;;  %v3496_v1 = vmul.f32 %v3369_v6, %v4923_v4  ;;  %v3508_v33 = vmul.f32 %v3369_v6, %v2951_v0 }
 0x1d4   :  { %4916 = vst [vmem:[#allocation2_spill] sm:$0xff] %v3476_v49  ;;  %4918 = vst [vmem:[#allocation3_spill] sm:$0xff] %v3480_v29  ;;  %v4924_v49 = vld [vmem:[#allocation17_spill] sm:$0xff]  ;;  %v4925_v29 = vld [vmem:[#allocation19_spill] sm:$0xff]  ;;  %v3516_v4 = vmul.f32 %v3369_v6, %v2973_v56  ;;  %v3528_v0 = vmul.f32 %v3369_v6, %v2704_v19  ;;  %v3536_v56 = vmul.f32 %v3369_v6, %v2712_v27 }
 0x1d5   :  { %4921 = vst [vmem:[#allocation4_spill] sm:$0xff] %v3488_v12  ;;  %v3500_v57 = vmul.f32 %v3369_v6, %v4924_v49  ;;  %v3504_v53 = vmul.f32 %v3369_v6, %v4925_v29  ;;  %v4926_v12 = vld [vmem:[#allocation22_spill] sm:$0xff]  ;;  %v3520_v49 = vmul.f32 %v3369_v6, %v2696_v11  ;;  %v3524_v29 = vmul.f32 %v3369_v6, %v2700_v15 }
 0x1d6   :  { %v3512_v17 = vmul.f32 %v3369_v6, %v4926_v12  ;;  %v3532_v12 = vmul.f32 %v3369_v6, %v2708_v23  ;;  %v3540_v11 = vmul.f32 %v3369_v6, %v2716_v31  ;;  %v3544_v15 = vmul.f32 %v3369_v6, %v2720_v35 }
 0x1d7   :  { %v3548_v19 = vmul.f32 %v3369_v6, %v2724_v39  ;;  %v3552_v23 = vmul.f32 %v3369_v6, %v2728_v43  ;;  %v3556_v27 = vmul.f32 %v3369_v6, %v2732_v47  ;;  %v3560_v31 = vmul.f32 %v3369_v6, %v2736_v51 }
 0x1d8   :  { %v3564_v35 = vmul.f32 %v3369_v6, %v2740_v55  ;;  %v3568_v39 = vmul.f32 %v3369_v6, %v2744_v59  ;;  %v3572_v43 = vmul.f32 %v3369_v6, %v2748_v63  ;;  %v3576_v47 = vmul.f32 %v3369_v6, %v2752_v3 }
 0x1d9   :  { %v3580_v51 = vmul.f32 %v3369_v6, %v2756_v7  ;;  %v3584_v55 = vmul.f32 %v3369_v6, %v2768_v21  ;;  %v3588_v59 = vmul.f32 %v3369_v6, %v2785_v52  ;;  %v3592_v63 = vmul.f32 %v3369_v6, %v2799_v16 }
 0x1da   :  { %v3596_v3 = vmul.f32 %v3369_v6, %v2813_v48  ;;  %v3600_v7 = vmul.f32 %v3369_v6, %v2827_v24  ;;  %v3604_v21 = vmul.f32 %v3369_v6, %v2841_v60  ;;  %v3608_v52 = vmul.f32 %v3369_v6, %v2855_v36 }
 0x1db   :  { %v3612_v16 = vmul.f32 %v3369_v6, %v2869_v2  ;;  %v3616_v48 = vmul.f32 %v3369_v6, %v2883_v20  ;;  %v3620_v24 = vmul.f32 %v3369_v6, %v2897_v13  ;;  %v4937_v2 = vsub.f32 %v3362_v8, %v3365_v32  ;;  %v4938_v20 = vld [vmem:[#allocation20_spill] sm:$0xff]  ;;  %v4939_v13 = vld [vmem:[#allocation21_spill] sm:$0xff] }
 0x1dc   :  { %4927 = vst [vmem:[#allocation5_spill] sm:$0xff] %v3600_v7  ;;  %4928 = vst [vmem:[#allocation6_spill] sm:$0xff] %v3604_v21  ;;  %v4933_v7 = vld [vmem:[#allocation16_spill] sm:$0xff]  ;;  %v4935_v21 = vld [vmem:[#allocation18_spill] sm:$0xff] }
 0x1dd   :  { %4929 = vst [vmem:[#allocation7_spill] sm:$0xff] %v3608_v52  ;;  %4930 = vst [vmem:[#allocation8_spill] sm:$0xff] %v3612_v16  ;;  %v3624_v60 = vmul.f32 %v3369_v6, %v4933_v7  ;;  %v3628_v36 = vmul.f32 %v3369_v6, %v4935_v21  ;;  %v4936_v52 = vsub.s32 0, %v3146_v44  ;;  %v4940_v7 = vld [vmem:[#allocation23_spill] sm:$0xff]  ;;  %v4941_v21 = vld [vmem:[#allocation24_spill] sm:$0xff] }
 0x1de   :  { %4931 = vst [vmem:[#allocation9_spill] sm:$0xff] %v3616_v48  ;;  %4932 = vst [vmem:[#allocation10_spill] sm:$0xff] %v3620_v24  ;;  %v3639_v48 = vmul.f32 %v3369_v6, %v4938_v20  ;;  %v3643_v24 = vmul.f32 %v3369_v6, %v4939_v13  ;;  %v3651_v44 = vmul.f32 %v3369_v6, %v4941_v21  ;;  %v4942_v20 = vld [vmem:[#allocation2_spill] sm:$0xff]  ;;  %v4943_v13 = vld [vmem:[#allocation3_spill] sm:$0xff] }
 0x1df   :  { %4934 = vst [vmem:[#allocation11_spill] sm:$0xff] %v3624_v60  ;;  %v3635_v16 = vrot.slane %v4937_v2, %v4936_v52  ;;  %v3647_v60 = vmul.f32 %v3369_v6, %v4940_v7  ;;  %v4944_v7 = vld [vmem:[#allocation4_spill] sm:$0xff] }
 0x1e1   :  { %v3655_v8 = vadd.f32 %v3635_v16, %v3390_v9  ;;  %v3659_v32 = vadd.f32 %v3635_v16, %v3396_v5  ;;  %v3663_v52 = vadd.f32 %v3635_v16, %v3400_v37  ;;  %v3667_v2 = vadd.f32 %v3635_v16, %v3404_v25 }
 0x1e2   :  { %v3671_v6 = vadd.f32 %v3635_v16, %v3408_v10  ;;  %v3675_v9 = vadd.f32 %v3635_v16, %v3412_v61  ;;  %v3679_v5 = vadd.f32 %v3635_v16, %v3416_v14  ;;  %v3683_v37 = vadd.f32 %v3635_v16, %v3420_v18 }
 0x1e3   :  { %v3687_v25 = vadd.f32 %v3635_v16, %v3424_v22  ;;  %v3691_v10 = vadd.f32 %v3635_v16, %v3428_v26  ;;  %v3695_v61 = vadd.f32 %v3635_v16, %v3432_v30  ;;  %v3699_v14 = vadd.f32 %v3635_v16, %v3436_v34 }
 0x1e4   :  { %v3703_v18 = vadd.f32 %v3635_v16, %v3440_v38  ;;  %v3707_v22 = vadd.f32 %v3635_v16, %v3444_v42  ;;  %v3711_v26 = vadd.f32 %v3635_v16, %v3448_v46  ;;  %v3715_v30 = vadd.f32 %v3635_v16, %v3452_v50 }
 0x1e5   :  { %v3719_v34 = vadd.f32 %v3635_v16, %v3456_v54  ;;  %v3723_v38 = vadd.f32 %v3635_v16, %v3460_v58  ;;  %v3727_v42 = vadd.f32 %v3635_v16, %v3464_v40  ;;  %v3731_v46 = vadd.f32 %v3635_v16, %v3468_v62 }
 0x1e6   :  { %v3735_v50 = vadd.f32 %v3635_v16, %v3472_v28  ;;  %v3739_v54 = vadd.f32 %v3635_v16, %v4942_v20  ;;  %v3743_v58 = vadd.f32 %v3635_v16, %v4943_v13  ;;  %v3747_v40 = vadd.f32 %v3635_v16, %v3484_v45 }
 0x1e7   :  { %v3751_v62 = vadd.f32 %v3635_v16, %v4944_v7  ;;  %v3755_v28 = vadd.f32 %v3635_v16, %v3492_v41  ;;  %v3759_v21 = vadd.f32 %v3635_v16, %v3496_v1  ;;  %v3763_v20 = vadd.f32 %v3635_v16, %v3500_v57  ;;  %v4950_v7 = vld [vmem:[#allocation5_spill] sm:$0xff] }
 0x1e8   :  { %v3767_v45 = vadd.f32 %v3635_v16, %v3504_v53  ;;  %v3771_v13 = vadd.f32 %v3635_v16, %v3508_v33  ;;  %v3775_v41 = vadd.f32 %v3635_v16, %v3512_v17  ;;  %v3779_v1 = vadd.f32 %v3635_v16, %v3516_v4 }
 0x1e9   :  { %v3783_v57 = vadd.f32 %v3635_v16, %v3520_v49  ;;  %v3787_v53 = vadd.f32 %v3635_v16, %v3524_v29  ;;  %v3791_v33 = vadd.f32 %v3635_v16, %v3528_v0  ;;  %v3795_v17 = vadd.f32 %v3635_v16, %v3532_v12 }
 0x1ea   :  { %v3799_v4 = vadd.f32 %v3635_v16, %v3536_v56  ;;  %v3803_v49 = vadd.f32 %v3635_v16, %v3540_v11  ;;  %v3807_v29 = vadd.f32 %v3635_v16, %v3544_v15  ;;  %v3811_v0 = vadd.f32 %v3635_v16, %v3548_v19 }
 0x1eb   :  { %v3815_v12 = vadd.f32 %v3635_v16, %v3552_v23  ;;  %v3819_v56 = vadd.f32 %v3635_v16, %v3556_v27  ;;  %v3823_v11 = vadd.f32 %v3635_v16, %v3560_v31  ;;  %v3827_v15 = vadd.f32 %v3635_v16, %v3564_v35 }
 0x1ec   :  { %v3831_v19 = vadd.f32 %v3635_v16, %v3568_v39  ;;  %v3835_v23 = vadd.f32 %v3635_v16, %v3572_v43  ;;  %v3839_v27 = vadd.f32 %v3635_v16, %v3576_v47  ;;  %v3843_v31 = vadd.f32 %v3635_v16, %v3580_v51 }
 0x1ed   :  { %v3847_v35 = vadd.f32 %v3635_v16, %v3584_v55  ;;  %v3851_v39 = vadd.f32 %v3635_v16, %v3588_v59  ;;  %v3855_v43 = vadd.f32 %v3635_v16, %v3592_v63  ;;  %v3859_v47 = vadd.f32 %v3635_v16, %v3596_v3 }
 0x1ee   :  { %4945 = vst [vmem:[#allocation12_spill] sm:$0xff] %v3843_v31  ;;  %v3863_v51 = vadd.f32 %v3635_v16, %v4950_v7  ;;  %v4952_v31 = vld [vmem:[#allocation6_spill] sm:$0xff] }
 0x1ef   :  { %4946 = vst [vmem:[#allocation13_spill] sm:$0xff] %v3847_v35  ;;  %4947 = vst [vmem:[#allocation14_spill] sm:$0xff] %v3851_v39  ;;  %v3867_v55 = vadd.f32 %v3635_v16, %v4952_v31  ;;  %v4953_v35 = vld [vmem:[#allocation7_spill] sm:$0xff]  ;;  %v4954_v39 = vld [vmem:[#allocation8_spill] sm:$0xff] }
 0x1f0   :  { %4948 = vst [vmem:[#allocation15_spill] sm:$0xff] %v3855_v43  ;;  %4949 = vst [vmem:[#allocation17_spill] sm:$0xff] %v3859_v47  ;;  %v3871_v59 = vadd.f32 %v3635_v16, %v4953_v35  ;;  %v3875_v63 = vadd.f32 %v3635_v16, %v4954_v39  ;;  %v4955_v43 = vld [vmem:[#allocation9_spill] sm:$0xff]  ;;  %v4956_v47 = vld [vmem:[#allocation10_spill] sm:$0xff]  ;;  %v3891_v35 = vadd.f32 %v3635_v16, %v3628_v36 }
 0x1f1   :  { %4951 = vst [vmem:[#allocation19_spill] sm:$0xff] %v3863_v51  ;;  %v3879_v3 = vadd.f32 %v3635_v16, %v4955_v43  ;;  %v3883_v7 = vadd.f32 %v3635_v16, %v4956_v47  ;;  %v4958_v51 = vld [vmem:[#allocation11_spill] sm:$0xff]  ;;  %v3895_v39 = vadd.f32 %v3635_v16, %v3639_v48  ;;  %v3899_v43 = vadd.f32 %v3635_v16, %v3643_v24  ;;  %v4967_v24 = vld [vmem:[#allocation26_spill] sm:$0xff] }
 0x1f2   :  { %v3887_v31 = vadd.f32 %v3635_v16, %v4958_v51  ;;  %4960 = vst [vmem:[#allocation18_spill] sm:$0xff] %v3891_v35  ;;  %v3903_v47 = vadd.f32 %v3635_v16, %v3647_v60  ;;  %v3907_v51 = vadd.f32 %v3635_v16, %v3651_v44  ;;  %v4969_v60 = vunpack.c.h.bf16 %v4967_v24  ;;  %v4970_v44 = vld [vmem:[#allocation27_spill] sm:$0xff] }
 0x1f3   :  { %4957 = vst [vmem:[#allocation22_spill] sm:$0xff] %v3883_v7  ;;  %4961 = vst [vmem:[#allocation20_spill] sm:$0xff] %v3895_v39 }
 0x1f4   :  { %4959 = vst [vmem:[#allocation16_spill] sm:$0xff] %v3887_v31  ;;  %4962 = vst [vmem:[#allocation21_spill] sm:$0xff] %v3899_v43  ;;  %v4964_v31 = vld [vmem:[#allocation25_spill] sm:$0xff]  ;;  %v4968_v43 = vunpack.c.l.bf16 %v4967_v24  ;;  %v3927_v16 = vadd.f32 %v4969_v60, %v3667_v2 }
 0x1f5   :  { %4963 = vst [vmem:[#allocation23_spill] sm:$0xff] %v3907_v51  ;;  %v4965_v36 = vunpack.c.l.bf16 %v4964_v31  ;;  %v4966_v48 = vunpack.c.h.bf16 %v4964_v31  ;;  %v4971_v51 = vunpack.c.l.bf16 %v4970_v44  ;;  %v4972_v31 = vunpack.c.h.bf16 %v4970_v44  ;;  %v4976_v24 = vld [vmem:[#allocation29_spill] sm:$0xff]  ;;  %v4979_v44 = vld [vmem:[#allocation30_spill] sm:$0xff] }
 0x1f6   :  { %v3922_v7 = vadd.f32 %v4968_v43, %v3663_v52  ;;  %v4977_v60 = vunpack.c.l.bf16 %v4976_v24 }
 0x1f7   :  { %v3912_v35 = vadd.f32 %v4965_v36, %v3655_v8  ;;  %v3917_v39 = vadd.f32 %v4966_v48, %v3659_v32  ;;  %v3932_v8 = vadd.f32 %v4971_v51, %v3671_v6  ;;  %v3937_v32 = vadd.f32 %v4972_v31, %v3675_v9  ;;  %v4973_v36 = vld [vmem:[#allocation28_spill] sm:$0xff] }
 0x1f8   :  { %v4974_v48 = vunpack.c.l.bf16 %v4973_v36  ;;  %v4975_v43 = vunpack.c.h.bf16 %v4973_v36  ;;  %v3952_v6 = vadd.f32 %v4977_v60, %v3687_v25  ;;  %v4978_v51 = vunpack.c.h.bf16 %v4976_v24  ;;  %v4985_v60 = vld [vmem:[#allocation32_spill] sm:$0xff] }
 0x1f9   :  { %v4980_v31 = vunpack.c.l.bf16 %v4979_v44  ;;  %v4981_v36 = vunpack.c.h.bf16 %v4979_v44  ;;  %v4987_v44 = vunpack.c.h.bf16 %v4985_v60 }
 0x1fa   :  { %v3942_v52 = vadd.f32 %v4974_v48, %v3679_v5  ;;  %v3947_v2 = vadd.f32 %v4975_v43, %v3683_v37  ;;  %v3957_v9 = vadd.f32 %v4978_v51, %v3691_v10  ;;  %v4982_v48 = vld [vmem:[#allocation31_spill] sm:$0xff]  ;;  %v4986_v51 = vunpack.c.l.bf16 %v4985_v60 }
 0x1fb   :  { %v3962_v5 = vadd.f32 %v4980_v31, %v3695_v61  ;;  %v3967_v37 = vadd.f32 %v4981_v36, %v3699_v14  ;;  %v4983_v43 = vunpack.c.l.bf16 %v4982_v48  ;;  %v4984_v24 = vunpack.c.h.bf16 %v4982_v48  ;;  %v4988_v31 = vld [vmem:[#allocation33_spill] sm:$0xff] }
 0x1fc   :  { %v3982_v61 = vadd.f32 %v4986_v51, %v3711_v26  ;;  %v3987_v14 = vadd.f32 %v4987_v44, %v3715_v30  ;;  %v4989_v36 = vunpack.c.l.bf16 %v4988_v31  ;;  %v4990_v48 = vunpack.c.h.bf16 %v4988_v31  ;;  %v4994_v51 = vld [vmem:[#allocation35_spill] sm:$0xff] }
 0x1fd   :  { %v3972_v25 = vadd.f32 %v4983_v43, %v3703_v18  ;;  %v3977_v10 = vadd.f32 %v4984_v24, %v3707_v22  ;;  %v4991_v43 = vld [vmem:[#allocation34_spill] sm:$0xff]  ;;  %v4995_v44 = vunpack.c.l.bf16 %v4994_v51  ;;  %v4996_v31 = vunpack.c.h.bf16 %v4994_v51 }
 0x1fe   :  { %v3992_v18 = vadd.f32 %v4989_v36, %v3719_v34  ;;  %v3997_v22 = vadd.f32 %v4990_v48, %v3723_v38  ;;  %v4992_v24 = vunpack.c.l.bf16 %v4991_v43  ;;  %v4993_v60 = vunpack.c.h.bf16 %v4991_v43  ;;  %v4997_v36 = vld [vmem:[#allocation36_spill] sm:$0xff] }
 0x1ff   :  { %v4012_v34 = vadd.f32 %v4995_v44, %v3735_v50  ;;  %v4017_v38 = vadd.f32 %v4996_v31, %v3739_v54  ;;  %v4998_v48 = vunpack.c.l.bf16 %v4997_v36  ;;  %v4999_v43 = vunpack.c.h.bf16 %v4997_v36  ;;  %v5003_v44 = vld [vmem:[#allocation38_spill] sm:$0xff] }
 0x200   :  { %v4002_v26 = vadd.f32 %v4992_v24, %v3727_v42  ;;  %v4007_v30 = vadd.f32 %v4993_v60, %v3731_v46  ;;  %v5000_v24 = vld [vmem:[#allocation37_spill] sm:$0xff]  ;;  %v5004_v31 = vunpack.c.l.bf16 %v5003_v44  ;;  %v5005_v36 = vunpack.c.h.bf16 %v5003_v44 }
 0x201   :  { %v4022_v42 = vadd.f32 %v4998_v48, %v3743_v58  ;;  %v4027_v46 = vadd.f32 %v4999_v43, %v3747_v40  ;;  %v5001_v60 = vunpack.c.l.bf16 %v5000_v24  ;;  %v5002_v51 = vunpack.c.h.bf16 %v5000_v24  ;;  %v5006_v48 = vld [vmem:[#allocation39_spill] sm:$0xff] }
 0x202   :  { %v4042_v58 = vadd.f32 %v5004_v31, %v3759_v21  ;;  %v4047_v40 = vadd.f32 %v5005_v36, %v3763_v20  ;;  %v5007_v43 = vunpack.c.l.bf16 %v5006_v48  ;;  %v5008_v24 = vunpack.c.h.bf16 %v5006_v48  ;;  %v5012_v31 = vld [vmem:[#allocation41_spill] sm:$0xff] }
 0x203   :  { %v4032_v50 = vadd.f32 %v5001_v60, %v3751_v62  ;;  %v4037_v54 = vadd.f32 %v5002_v51, %v3755_v28  ;;  %v5009_v60 = vld [vmem:[#allocation40_spill] sm:$0xff]  ;;  %v5013_v36 = vunpack.c.l.bf16 %v5012_v31  ;;  %v5015_v48 = vunpack.c.h.bf16 %v5012_v31 }
 0x204   :  { %v4052_v62 = vadd.f32 %v5007_v43, %v3767_v45  ;;  %v4057_v28 = vadd.f32 %v5008_v24, %v3771_v13  ;;  %v5010_v51 = vunpack.c.l.bf16 %v5009_v60  ;;  %v5011_v44 = vunpack.c.h.bf16 %v5009_v60  ;;  %v5017_v43 = vld [vmem:[#allocation42_spill] sm:$0xff] }
 0x205   :  { %v4072_v45 = vadd.f32 %v5013_v36, %v3783_v57  ;;  %v4077_v13 = vadd.f32 %v5015_v48, %v3787_v53  ;;  %v5018_v24 = vunpack.c.l.bf16 %v5017_v43  ;;  %v5020_v60 = vunpack.c.h.bf16 %v5017_v43  ;;  %v5026_v36 = vld [vmem:[#allocation44_spill] sm:$0xff] }
 0x206   :  { %v4062_v21 = vadd.f32 %v5010_v51, %v3775_v41  ;;  %v4067_v20 = vadd.f32 %v5011_v44, %v3779_v1  ;;  %v5022_v51 = vld [vmem:[#allocation43_spill] sm:$0xff]  ;;  %v5027_v48 = vunpack.c.l.bf16 %v5026_v36  ;;  %v5028_v43 = vunpack.c.h.bf16 %v5026_v36 }
 0x207   :  { %5014 = vst [vmem:[#allocation24_spill] sm:$0xff] %v4072_v45  ;;  %5016 = vst [vmem:[#allocation2_spill] sm:$0xff] %v4077_v13  ;;  %v4082_v41 = vadd.f32 %v5018_v24, %v3791_v33  ;;  %v4087_v1 = vadd.f32 %v5020_v60, %v3795_v17  ;;  %v5023_v44 = vunpack.c.l.bf16 %v5022_v51  ;;  %v5025_v31 = vunpack.c.h.bf16 %v5022_v51  ;;  %v5029_v24 = vld [vmem:[#allocation45_spill] sm:$0xff] }
 0x208   :  { %v4102_v33 = vadd.f32 %v5027_v48, %v3807_v29  ;;  %v4107_v17 = vadd.f32 %v5028_v43, %v3811_v0  ;;  %v5030_v60 = vunpack.c.l.bf16 %v5029_v24  ;;  %v5031_v51 = vunpack.c.h.bf16 %v5029_v24  ;;  %v5038_v48 = vld [vmem:[#allocation47_spill] sm:$0xff] }
 0x209   :  { %5019 = vst [vmem:[#allocation3_spill] sm:$0xff] %v4082_v41  ;;  %5021 = vst [vmem:[#allocation4_spill] sm:$0xff] %v4087_v1  ;;  %v4092_v57 = vadd.f32 %v5023_v44, %v3799_v4  ;;  %v4097_v53 = vadd.f32 %v5025_v31, %v3803_v49  ;;  %v5033_v44 = vld [vmem:[#allocation46_spill] sm:$0xff]  ;;  %v5039_v43 = vunpack.c.l.bf16 %v5038_v48  ;;  %v5041_v24 = vunpack.c.h.bf16 %v5038_v48 }
 0x20a   :  { %v4112_v4 = vadd.f32 %v5030_v60, %v3815_v12  ;;  %v4117_v49 = vadd.f32 %v5031_v51, %v3819_v56  ;;  %v5034_v31 = vunpack.c.l.bf16 %v5033_v44  ;;  %v5036_v36 = vunpack.c.h.bf16 %v5033_v44  ;;  %v5043_v60 = vld [vmem:[#allocation48_spill] sm:$0xff] }
 0x20b   :  { %5024 = vst [vmem:[#allocation5_spill] sm:$0xff] %v4092_v57  ;;  %v4132_v12 = vadd.f32 %v5039_v43, %v3831_v19  ;;  %v4137_v56 = vadd.f32 %v5041_v24, %v3835_v23  ;;  %v5044_v51 = vunpack.c.l.bf16 %v5043_v60  ;;  %v5047_v44 = vunpack.c.h.bf16 %v5043_v60  ;;  %v5052_v43 = vld [vmem:[#allocation14_spill] sm:$0xff]  ;;  %v5054_v24 = vld [vmem:[#allocation15_spill] sm:$0xff] }
 0x20c   :  { %5032 = vst [vmem:[#allocation6_spill] sm:$0xff] %v4117_v49  ;;  %v4122_v29 = vadd.f32 %v5034_v31, %v3823_v11  ;;  %v4127_v0 = vadd.f32 %v5036_v36, %v3827_v15  ;;  %v5046_v31 = vld [vmem:[#allocation12_spill] sm:$0xff]  ;;  %v5049_v36 = vld [vmem:[#allocation13_spill] sm:$0xff] }
 0x20d   :  { %5040 = vst [vmem:[#allocation9_spill] sm:$0xff] %v4132_v12  ;;  %5042 = vst [vmem:[#allocation10_spill] sm:$0xff] %v4137_v56  ;;  %v4142_v11 = vadd.f32 %v5044_v51, %v3839_v27  ;;  %v4147_v15 = vadd.f32 %v5047_v44, %v5046_v31  ;;  %v5055_v56 = vld [vmem:[#allocation50_spill] sm:$0xff]  ;;  %v5057_v51 = vld [vmem:[#allocation17_spill] sm:$0xff] }
 0x20e   :  { %5035 = vst [vmem:[#allocation7_spill] sm:$0xff] %v4122_v29  ;;  %5037 = vst [vmem:[#allocation8_spill] sm:$0xff] %v4127_v0  ;;  %v5050_v0 = vld [vmem:[#allocation49_spill] sm:$0xff]  ;;  %v5056_v12 = vunpack.c.l.bf16 %v5055_v56  ;;  %v5058_v60 = vunpack.c.h.bf16 %v5055_v56  ;;  %v5059_v44 = vld [vmem:[#allocation19_spill] sm:$0xff] }
 0x20f   :  { %5045 = vst [vmem:[#allocation11_spill] sm:$0xff] %v4142_v11  ;;  %5048 = vst [vmem:[#allocation25_spill] sm:$0xff] %v4147_v15  ;;  %v5051_v29 = vunpack.c.l.bf16 %v5050_v0  ;;  %v5053_v48 = vunpack.c.h.bf16 %v5050_v0  ;;  %v5060_v15 = vld [vmem:[#allocation51_spill] sm:$0xff] }
 0x210   :  { %v4162_v27 = vadd.f32 %v5056_v12, %v5054_v24  ;;  %v4167_v31 = vadd.f32 %v5058_v60, %v5057_v51  ;;  %v5061_v11 = vunpack.c.l.bf16 %v5060_v15  ;;  %v5063_v0 = vunpack.c.h.bf16 %v5060_v15  ;;  %v5070_v51 = vld [vmem:[#allocation53_spill] sm:$0xff] }
 0x211   :  { %v4152_v19 = vadd.f32 %v5051_v29, %v5049_v36  ;;  %v4157_v23 = vadd.f32 %v5053_v48, %v5052_v43  ;;  %v5065_v43 = vld [vmem:[#allocation52_spill] sm:$0xff]  ;;  %v5071_v60 = vunpack.c.l.bf16 %v5070_v51  ;;  %v5073_v15 = vunpack.c.h.bf16 %v5070_v51 }
 0x212   :  { %v4172_v29 = vadd.f32 %v5061_v11, %v5059_v44  ;;  %v4177_v36 = vadd.f32 %v5063_v0, %v3867_v55  ;;  %v5066_v48 = vunpack.c.l.bf16 %v5065_v43  ;;  %v5068_v56 = vunpack.c.h.bf16 %v5065_v43  ;;  %v5072_v44 = vld [vmem:[#allocation22_spill] sm:$0xff]  ;;  %v5075_v0 = vld [vmem:[#allocation16_spill] sm:$0xff] }
 0x213   :  { %v4192_v11 = vadd.f32 %v5071_v60, %v3879_v3  ;;  %v4197_v55 = vadd.f32 %v5073_v15, %v5072_v44  ;;  %v5083_v60 = vld [vmem:[#allocation21_spill] sm:$0xff]  ;;  %v5085_v15 = vld [vmem:[#allocation56_spill] sm:$0xff] }
 0x214   :  { %5062 = vst [vmem:[#allocation26_spill] sm:$0xff] %v4172_v29  ;;  %5064 = vst [vmem:[#allocation27_spill] sm:$0xff] %v4177_v36  ;;  %v4182_v12 = vadd.f32 %v5066_v48, %v3871_v59  ;;  %v4187_v24 = vadd.f32 %v5068_v56, %v3875_v63  ;;  %v5076_v36 = vld [vmem:[#allocation54_spill] sm:$0xff]  ;;  %v5080_v56 = vld [vmem:[#allocation20_spill] sm:$0xff] }
 0x215   :  { %5074 = vst [vmem:[#allocation30_spill] sm:$0xff] %v4197_v55  ;;  %v5077_v29 = vunpack.c.l.bf16 %v5076_v36  ;;  %v5078_v48 = vld [vmem:[#allocation18_spill] sm:$0xff]  ;;  %v5079_v43 = vunpack.c.h.bf16 %v5076_v36  ;;  %v5086_v55 = vunpack.c.l.bf16 %v5085_v15  ;;  %v5088_v36 = vunpack.c.h.bf16 %v5085_v15 }
 0x216   :  { %5067 = vst [vmem:[#allocation28_spill] sm:$0xff] %v4182_v12  ;;  %5069 = vst [vmem:[#allocation29_spill] sm:$0xff] %v4187_v24  ;;  %v5081_v24 = vld [vmem:[#allocation55_spill] sm:$0xff]  ;;  %v5092_v41 = vld [vmem:[#allocation10_spill] sm:$0xff]  ;;  %v5102_v15 = vmax.f32 %v3922_v7, 0.0  ;;  %v5107_v7 = vmax.f32 %v3947_v2, 0.0 }
 0x217   :  { %v4202_v59 = vadd.f32 %v5077_v29, %v5075_v0  ;;  %v4207_v63 = vadd.f32 %v5079_v43, %v5078_v48  ;;  %v5082_v12 = vunpack.c.l.bf16 %v5081_v24  ;;  %v5084_v51 = vunpack.c.h.bf16 %v5081_v24  ;;  %v5087_v0 = vld [vmem:[#allocation23_spill] sm:$0xff]  ;;  %v5094_v57 = vld [vmem:[#allocation25_spill] sm:$0xff] }
 0x218   :  { %v4222_v29 = vadd.f32 %v5086_v55, %v3903_v47  ;;  %v4227_v48 = vadd.f32 %v5088_v36, %v5087_v0  ;;  %v5101_v47 = vmax.f32 %v3917_v39, 0.0  ;;  %v2065_v0 = vpack.c.bf16 %v5102_v15, %v5102_v15 }
 0x219   :  { %v4212_v3 = vadd.f32 %v5082_v12, %v5080_v56  ;;  %v4217_v44 = vadd.f32 %v5084_v51, %v5083_v60  ;;  %v5100_v60 = vmax.f32 %v3912_v35, 0.0  ;;  %v5103_v36 = vmax.f32 %v3927_v16, 0.0 }
 0x21a   :  { %v2064_v55 = vpack.c.bf16 %v5101_v47, %v5101_v47  ;;  %v5104_v56 = vmax.f32 %v3932_v8, 0.0  ;;  %v5105_v35 = vmax.f32 %v3937_v32, 0.0  ;;  %v5106_v39 = vmax.f32 %v3942_v52, 0.0  ;;  %1828 = vst.msk [vmem:[%s4746_s5 + $0x8] sm:$0xf] %vm1825_vm1, %v2065_v0 }
 0x21b   :  { %v5095_v49 = vld [vmem:[#allocation26_spill] sm:$0xff]  ;;  %v5096_v43 = vld [vmem:[#allocation27_spill] sm:$0xff]  ;;  %v2063_v51 = vpack.c.bf16 %v5100_v60, %v5100_v60  ;;  %v2066_v12 = vpack.c.bf16 %v5103_v36, %v5103_v36  ;;  %v2070_v15 = vpack.c.bf16 %v5107_v7, %v5107_v7  ;;  %v5108_v16 = vmax.f32 %v3952_v6, 0.0 }
 0x21c   :  { %v5099_v1 = vld [vmem:[#allocation30_spill] sm:$0xff]  ;;  %v2067_v24 = vpack.c.bf16 %v5104_v56, %v5104_v56  ;;  %v2068_v60 = vpack.c.bf16 %v5105_v35, %v5105_v35  ;;  %v2069_v47 = vpack.c.bf16 %v5106_v39, %v5106_v39  ;;  %v5109_v8 = vmax.f32 %v3957_v9, 0.0  ;;  %1827 = vst.msk [vmem:[%s4746_s5 + $0x4] sm:$0xf] %vm1825_vm1, %v2064_v55 }
 0x21d   :  { %v5097_v45 = vld [vmem:[#allocation28_spill] sm:$0xff]  ;;  %v5098_v13 = vld [vmem:[#allocation29_spill] sm:$0xff]  ;;  %v2071_v36 = vpack.c.bf16 %v5108_v16, %v5108_v16  ;;  %v5110_v32 = vmax.f32 %v3962_v5, 0.0  ;;  %v5111_v52 = vmax.f32 %v3967_v37, 0.0  ;;  %1826 = vst.msk [vmem:[%s4746_s5] sm:$0xf] %vm1825_vm1, %v2063_v51 }
 0x21e   :  { %v2072_v56 = vpack.c.bf16 %v5109_v8, %v5109_v8  ;;  %1829 = vst.msk [vmem:[%s4746_s5 + $0xc] sm:$0xf] %vm1825_vm1, %v2066_v12  ;;  %v5112_v2 = vmax.f32 %v3972_v25, 0.0  ;;  %v5113_v9 = vmax.f32 %v3977_v10, 0.0  ;;  %v5114_v37 = vmax.f32 %v3982_v61, 0.0 }
 0x21f   :  { %v2073_v35 = vpack.c.bf16 %v5110_v32, %v5110_v32  ;;  %v2074_v39 = vpack.c.bf16 %v5111_v52, %v5111_v52  ;;  %v5115_v55 = vmax.f32 %v3987_v14, 0.0  ;;  %1830 = vst.msk [vmem:[%s4746_s5 + $0x10] sm:$0xf] %vm1825_vm1, %v2067_v24  ;;  %1831 = vst.msk [vmem:[%s4746_s5 + $0x14] sm:$0xf] %vm1825_vm1, %v2068_v60  ;;  %v5116_v25 = vmax.f32 %v3992_v18, 0.0 }
 0x220   :  { %v2075_v6 = vpack.c.bf16 %v5112_v2, %v5112_v2  ;;  %v2076_v5 = vpack.c.bf16 %v5113_v9, %v5113_v9  ;;  %v2077_v51 = vpack.c.bf16 %v5114_v37, %v5114_v37  ;;  %1832 = vst.msk [vmem:[%s4746_s5 + $0x18] sm:$0xf] %vm1825_vm1, %v2069_v47  ;;  %1833 = vst.msk [vmem:[%s4746_s5 + $0x1c] sm:$0xf] %vm1825_vm1, %v2070_v15  ;;  %v5117_v61 = vmax.f32 %v3997_v22, 0.0  ;;  %v5136_v37 = vld [vmem:[#allocation3_spill] sm:$0xff] }
 0x221   :  { %v2078_v0 = vpack.c.bf16 %v5115_v55, %v5115_v55  ;;  %v2079_v10 = vpack.c.bf16 %v5116_v25, %v5116_v25  ;;  %v5118_v12 = vmax.f32 %v4002_v26, 0.0  ;;  %v5119_v60 = vmax.f32 %v4007_v30, 0.0  ;;  %1834 = vst.msk [vmem:[%s4746_s5 + $0x20] sm:$0xf] %vm1825_vm1, %v2071_v36  ;;  %1835 = vst.msk [vmem:[%s4746_s5 + $0x24] sm:$0xf] %vm1825_vm1, %v2072_v56 }
 0x222   :  { %v2080_v14 = vpack.c.bf16 %v5117_v61, %v5117_v61  ;;  %1836 = vst.msk [vmem:[%s4746_s5 + $0x28] sm:$0xf] %vm1825_vm1, %v2073_v35  ;;  %1837 = vst.msk [vmem:[%s4746_s5 + $0x2c] sm:$0xf] %vm1825_vm1, %v2074_v39  ;;  %v5120_v18 = vmax.f32 %v4012_v34, 0.0  ;;  %v5121_v26 = vmax.f32 %v4017_v38, 0.0 }
 0x223   :  { %v2081_v24 = vpack.c.bf16 %v5118_v12, %v5118_v12  ;;  %v2082_v47 = vpack.c.bf16 %v5119_v60, %v5119_v60  ;;  %v5122_v7 = vmax.f32 %v4022_v42, 0.0  ;;  %v5123_v16 = vmax.f32 %v4027_v46, 0.0  ;;  %1838 = vst.msk [vmem:[%s4746_s5 + $0x30] sm:$0xf] %vm1825_vm1, %v2075_v6  ;;  %1839 = vst.msk [vmem:[%s4746_s5 + $0x34] sm:$0xf] %vm1825_vm1, %v2076_v5 }
 0x224   :  { %v2083_v22 = vpack.c.bf16 %v5120_v18, %v5120_v18  ;;  %v2084_v30 = vpack.c.bf16 %v5121_v26, %v5121_v26  ;;  %1840 = vst.msk [vmem:[%s4746_s5 + $0x38] sm:$0xf] %vm1825_vm1, %v2077_v51  ;;  %1841 = vst.msk [vmem:[%s4746_s5 + $0x3c] sm:$0xf] %vm1825_vm1, %v2078_v0  ;;  %v5124_v34 = vmax.f32 %v4032_v50, 0.0  ;;  %v5125_v42 = vmax.f32 %v4037_v54, 0.0 }
 0x225   :  { %v2085_v15 = vpack.c.bf16 %v5122_v7, %v5122_v7  ;;  %v2086_v36 = vpack.c.bf16 %v5123_v16, %v5123_v16  ;;  %v5126_v8 = vmax.f32 %v4042_v58, 0.0  ;;  %v5127_v32 = vmax.f32 %v4047_v40, 0.0  ;;  %1842 = vst.msk [vmem:[%s4746_s5 + $0x40] sm:$0xf] %vm1825_vm1, %v2079_v10  ;;  %1843 = vst.msk [vmem:[%s4746_s5 + $0x44] sm:$0xf] %vm1825_vm1, %v2080_v14 }
 0x226   :  { %v2087_v38 = vpack.c.bf16 %v5124_v34, %v5124_v34  ;;  %v2088_v46 = vpack.c.bf16 %v5125_v42, %v5125_v42  ;;  %1844 = vst.msk [vmem:[%s4746_s5 + $0x48] sm:$0xf] %vm1825_vm1, %v2081_v24  ;;  %1845 = vst.msk [vmem:[%s4746_s5 + $0x4c] sm:$0xf] %vm1825_vm1, %v2082_v47  ;;  %v5128_v50 = vmax.f32 %v4052_v62, 0.0  ;;  %v5129_v58 = vmax.f32 %v4057_v28, 0.0 }
 0x227   :  { %v2089_v56 = vpack.c.bf16 %v5126_v8, %v5126_v8  ;;  %v2090_v35 = vpack.c.bf16 %v5127_v32, %v5127_v32  ;;  %v5130_v52 = vmax.f32 %v4062_v21, 0.0  ;;  %v5131_v2 = vmax.f32 %v4067_v20, 0.0  ;;  %1846 = vst.msk [vmem:[%s4746_s5 + $0x50] sm:$0xf] %vm1825_vm1, %v2083_v22  ;;  %1847 = vst.msk [vmem:[%s4746_s5 + $0x54] sm:$0xf] %vm1825_vm1, %v2084_v30 }
 0x228   :  { %v2091_v54 = vpack.c.bf16 %v5128_v50, %v5128_v50  ;;  %v2092_v40 = vpack.c.bf16 %v5129_v58, %v5129_v58  ;;  %1848 = vst.msk [vmem:[%s4746_s5 + $0x58] sm:$0xf] %vm1825_vm1, %v2085_v15  ;;  %1849 = vst.msk [vmem:[%s4746_s5 + $0x5c] sm:$0xf] %vm1825_vm1, %v2086_v36  ;;  %v5132_v62 = vld [vmem:[#allocation24_spill] sm:$0xff]  ;;  %v5134_v20 = vld [vmem:[#allocation2_spill] sm:$0xff] }
 0x229   :  { %v2093_v39 = vpack.c.bf16 %v5130_v52, %v5130_v52  ;;  %v2094_v6 = vpack.c.bf16 %v5131_v2, %v5131_v2  ;;  %v5133_v28 = vmax.f32 %v5132_v62, 0.0  ;;  %v5135_v9 = vmax.f32 %v5134_v20, 0.0  ;;  %v5138_v0 = vld [vmem:[#allocation4_spill] sm:$0xff]  ;;  %1850 = vst.msk [vmem:[%s4746_s5 + $0x60] sm:$0xf] %vm1825_vm1, %v2087_v38  ;;  %v5140_v61 = vld [vmem:[#allocation5_spill] sm:$0xff] }
 0x22a   :  { %v5137_v51 = vmax.f32 %v5136_v37, 0.0  ;;  %v5139_v25 = vmax.f32 %v5138_v0, 0.0  ;;  %1851 = vst.msk [vmem:[%s4746_s5 + $0x64] sm:$0xf] %vm1825_vm1, %v2088_v46  ;;  %1852 = vst.msk [vmem:[%s4746_s5 + $0x68] sm:$0xf] %vm1825_vm1, %v2089_v56 }
 0x22b   :  { %v2095_v21 = vpack.c.bf16 %v5133_v28, %v5133_v28  ;;  %v2096_v5 = vpack.c.bf16 %v5135_v9, %v5135_v9  ;;  %1853 = vst.msk [vmem:[%s4746_s5 + $0x6c] sm:$0xf] %vm1825_vm1, %v2090_v35  ;;  %v5141_v14 = vmax.f32 %v5140_v61, 0.0  ;;  %v5142_v24 = vmax.f32 %v4097_v53, 0.0  ;;  %1854 = vst.msk [vmem:[%s4746_s5 + $0x70] sm:$0xf] %vm1825_vm1, %v2091_v54 }
 0x22c   :  { %v2097_v55 = vpack.c.bf16 %v5137_v51, %v5137_v51  ;;  %v2098_v10 = vpack.c.bf16 %v5139_v25, %v5139_v25  ;;  %v5143_v47 = vmax.f32 %v4102_v33, 0.0  ;;  %v5144_v22 = vmax.f32 %v4107_v17, 0.0  ;;  %1855 = vst.msk [vmem:[%s4746_s5 + $0x74] sm:$0xf] %vm1825_vm1, %v2092_v40  ;;  %1856 = vst.msk [vmem:[%s4746_s5 + $0x78] sm:$0xf] %vm1825_vm1, %v2093_v39 }
 0x22d   :  { %v2099_v12 = vpack.c.bf16 %v5141_v14, %v5141_v14  ;;  %v2100_v60 = vpack.c.bf16 %v5142_v24, %v5142_v24  ;;  %1857 = vst.msk [vmem:[%s4746_s5 + $0x7c] sm:$0xf] %vm1825_vm1, %v2094_v6  ;;  %v5145_v53 = vmax.f32 %v4112_v4, 0.0  ;;  %v5146_v17 = vld [vmem:[#allocation6_spill] sm:$0xff]  ;;  %v5148_v15 = vld [vmem:[#allocation7_spill] sm:$0xff]  ;;  %v5150_v34 = vld [vmem:[#allocation8_spill] sm:$0xff] }
 0x22e   :  { %v2101_v18 = vpack.c.bf16 %v5143_v47, %v5143_v47  ;;  %v2102_v26 = vpack.c.bf16 %v5144_v22, %v5144_v22  ;;  %v5147_v30 = vmax.f32 %v5146_v17, 0.0  ;;  %v5149_v16 = vmax.f32 %v5148_v15, 0.0  ;;  %1858 = vst.msk [vmem:[%s4746_s5 + $0x80] sm:$0xf] %vm1825_vm1, %v2095_v21  ;;  %1859 = vst.msk [vmem:[%s4746_s5 + $0x84] sm:$0xf] %vm1825_vm1, %v2096_v5 }
 0x22f   :  { %v2103_v33 = vpack.c.bf16 %v5145_v53, %v5145_v53  ;;  %v5151_v38 = vmax.f32 %v5150_v34, 0.0  ;;  %1860 = vst.msk [vmem:[%s4746_s5 + $0x88] sm:$0xf] %vm1825_vm1, %v2097_v55  ;;  %1861 = vst.msk [vmem:[%s4746_s5 + $0x8c] sm:$0xf] %vm1825_vm1, %v2098_v10  ;;  %v5152_v4 = vld [vmem:[#allocation9_spill] sm:$0xff] }
 0x230   :  { %v2104_v7 = vpack.c.bf16 %v5147_v30, %v5147_v30  ;;  %v2105_v36 = vpack.c.bf16 %v5149_v16, %v5149_v16  ;;  %v5153_v46 = vmax.f32 %v5152_v4, 0.0  ;;  %v5154_v56 = vmax.f32 %v5092_v41, 0.0  ;;  %v5155_v35 = vld [vmem:[#allocation11_spill] sm:$0xff]  ;;  %1862 = vst.msk [vmem:[%s4746_s5 + $0x90] sm:$0xf] %vm1825_vm1, %v2099_v12 }
 0x231   :  { %v2106_v42 = vpack.c.bf16 %v5151_v38, %v5151_v38  ;;  %v5156_v50 = vmax.f32 %v5155_v35, 0.0  ;;  %v5157_v58 = vmax.f32 %v5094_v57, 0.0  ;;  %1863 = vst.msk [vmem:[%s4746_s5 + $0x94] sm:$0xf] %vm1825_vm1, %v2100_v60  ;;  %1864 = vst.msk [vmem:[%s4746_s5 + $0x98] sm:$0xf] %vm1825_vm1, %v2101_v18 }
 0x232   :  { %v2107_v8 = vpack.c.bf16 %v5153_v46, %v5153_v46  ;;  %v2108_v32 = vpack.c.bf16 %v5154_v56, %v5154_v56  ;;  %1865 = vst.msk [vmem:[%s4746_s5 + $0x9c] sm:$0xf] %vm1825_vm1, %v2102_v26  ;;  %v5158_v41 = vmax.f32 %v4152_v19, 0.0  ;;  %v5159_v52 = vmax.f32 %v4157_v23, 0.0  ;;  %1866 = vst.msk [vmem:[%s4746_s5 + $0xa0] sm:$0xf] %vm1825_vm1, %v2103_v33 }
 0x233   :  { %v2109_v54 = vpack.c.bf16 %v5156_v50, %v5156_v50  ;;  %v2110_v40 = vpack.c.bf16 %v5157_v58, %v5157_v58  ;;  %v5160_v2 = vmax.f32 %v4162_v27, 0.0  ;;  %v5161_v62 = vmax.f32 %v4167_v31, 0.0  ;;  %1867 = vst.msk [vmem:[%s4746_s5 + $0xa4] sm:$0xf] %vm1825_vm1, %v2104_v7  ;;  %1868 = vst.msk [vmem:[%s4746_s5 + $0xa8] sm:$0xf] %vm1825_vm1, %v2105_v36 }
 0x234   :  { %v2111_v57 = vpack.c.bf16 %v5158_v41, %v5158_v41  ;;  %v2112_v39 = vpack.c.bf16 %v5159_v52, %v5159_v52  ;;  %1869 = vst.msk [vmem:[%s4746_s5 + $0xac] sm:$0xf] %vm1825_vm1, %v2106_v42  ;;  %v5162_v19 = vmax.f32 %v5095_v49, 0.0  ;;  %v5163_v27 = vmax.f32 %v5096_v43, 0.0  ;;  %1870 = vst.msk [vmem:[%s4746_s5 + $0xb0] sm:$0xf] %vm1825_vm1, %v2107_v8 }
 0x235   :  { %v2113_v6 = vpack.c.bf16 %v5160_v2, %v5160_v2  ;;  %v2114_v28 = vpack.c.bf16 %v5161_v62, %v5161_v62  ;;  %v5164_v21 = vmax.f32 %v5097_v45, 0.0  ;;  %v5165_v9 = vmax.f32 %v5098_v13, 0.0  ;;  %1871 = vst.msk [vmem:[%s4746_s5 + $0xb4] sm:$0xf] %vm1825_vm1, %v2108_v32  ;;  %1872 = vst.msk [vmem:[%s4746_s5 + $0xb8] sm:$0xf] %vm1825_vm1, %v2109_v54 }
 0x236   :  { %v2115_v23 = vpack.c.bf16 %v5162_v19, %v5162_v19  ;;  %v2116_v31 = vpack.c.bf16 %v5163_v27, %v5163_v27  ;;  %1873 = vst.msk [vmem:[%s4746_s5 + $0xbc] sm:$0xf] %vm1825_vm1, %v2110_v40  ;;  %v5166_v45 = vmax.f32 %v4192_v11, 0.0  ;;  %v5167_v49 = vmax.f32 %v5099_v1, 0.0  ;;  %1874 = vst.msk [vmem:[%s4746_s5 + $0xc0] sm:$0xf] %vm1825_vm1, %v2111_v57 }
 0x237   :  { %v2117_v20 = vpack.c.bf16 %v5164_v21, %v5164_v21  ;;  %v2118_v5 = vpack.c.bf16 %v5165_v9, %v5165_v9  ;;  %v5168_v37 = vmax.f32 %v4202_v59, 0.0  ;;  %v5169_v55 = vmax.f32 %v4207_v63, 0.0  ;;  %1875 = vst.msk [vmem:[%s4746_s5 + $0xc4] sm:$0xf] %vm1825_vm1, %v2112_v39  ;;  %1876 = vst.msk [vmem:[%s4746_s5 + $0xc8] sm:$0xf] %vm1825_vm1, %v2113_v6 }
 0x238   :  { %v2119_v13 = vpack.c.bf16 %v5166_v45, %v5166_v45  ;;  %v2120_v43 = vpack.c.bf16 %v5167_v49, %v5167_v49  ;;  %1877 = vst.msk [vmem:[%s4746_s5 + $0xcc] sm:$0xf] %vm1825_vm1, %v2114_v28  ;;  %v5170_v1 = vmax.f32 %v4212_v3, 0.0  ;;  %v5171_v59 = vmax.f32 %v4217_v44, 0.0  ;;  %1878 = vst.msk [vmem:[%s4746_s5 + $0xd0] sm:$0xf] %vm1825_vm1, %v2115_v23 }
 0x239   :  { %v2121_v51 = vpack.c.bf16 %v5168_v37, %v5168_v37  ;;  %v2122_v0 = vpack.c.bf16 %v5169_v55, %v5169_v55  ;;  %v5172_v25 = vmax.f32 %v4222_v29, 0.0  ;;  %v5173_v61 = vmax.f32 %v4227_v48, 0.0  ;;  %1879 = vst.msk [vmem:[%s4746_s5 + $0xd4] sm:$0xf] %vm1825_vm1, %v2116_v31  ;;  %1880 = vst.msk [vmem:[%s4746_s5 + $0xd8] sm:$0xf] %vm1825_vm1, %v2117_v20 }
 0x23a   :  { %v2123_v11 = vpack.c.bf16 %v5170_v1, %v5170_v1  ;;  %v2124_v63 = vpack.c.bf16 %v5171_v59, %v5171_v59  ;;  %1881 = vst.msk [vmem:[%s4746_s5 + $0xdc] sm:$0xf] %vm1825_vm1, %v2118_v5  ;;  %1882 = vst.msk [vmem:[%s4746_s5 + $0xe0] sm:$0xf] %vm1825_vm1, %v2119_v13 }
 0x23b   :  { %v2125_v10 = vpack.c.bf16 %v5172_v25, %v5172_v25  ;;  %v2126_v14 = vpack.c.bf16 %v5173_v61, %v5173_v61  ;;  %1883 = vst.msk [vmem:[%s4746_s5 + $0xe4] sm:$0xf] %vm1825_vm1, %v2120_v43  ;;  %1884 = vst.msk [vmem:[%s4746_s5 + $0xe8] sm:$0xf] %vm1825_vm1, %v2121_v51 }
 0x23c   :  { %1885 = vst.msk [vmem:[%s4746_s5 + $0xec] sm:$0xf] %vm1825_vm1, %v2122_v0  ;;  %1886 = vst.msk [vmem:[%s4746_s5 + $0xf0] sm:$0xf] %vm1825_vm1, %v2123_v11 }
 0x23d   :  { %1887 = vst.msk [vmem:[%s4746_s5 + $0xf4] sm:$0xf] %vm1825_vm1, %v2124_v63  ;;  %1888 = vst.msk [vmem:[%s4746_s5 + $0xf8] sm:$0xf] %vm1825_vm1, %v2125_v10 }
 0x23e   :  { %1889 = vst.msk [vmem:[%s4746_s5 + $0xfc] sm:$0xf] %vm1825_vm1, %v2126_v14 }

// kernel: _lambda_.13
= control target key start
LH: loop header
LB: loop body
LE: loop exit
PB: predicated region body
PF: predicated region fallthrough
CT: control target
= control target key end

     0   :  { %v667_v0 = vmov 0   ;;  %vm178_vm0 = vcmask 130048   ;;  %vm300_vm1 = vcmask 261120   ;;  %vm527_vm2 = vcmask 257024   ;;  %s974_s1 = inlined_call_operand.vmem [shape: bf16[144,32], index: 1, kind: input, shape index: {}]   ;;  %s975_s0 = inlined_call_operand.vmem [shape: bf16[128,144], index: 0, kind: input, shape index: {}]   ;;  %s976_s2 = inlined_call_operand.vmem [shape: f32[1,32], index: 2, kind: input, shape index: {}]   ;;  %s977_s3 = inlined_call_operand.vmem [shape: f32[1,32], index: 3, kind: input, shape index: {}]   ;;  %s978_s4 = inlined_call_operand.vmem [shape: bf16[128,32], index: 4, kind: output, shape index: {}]  }
   0x1   :  { %203 = vmatprep.subr.bf16.mxu0 %v667_v0  ;;  %v632_v1 = vld [vmem:[%s974_s1 + $0x38] sm:$0xff]   ;;  %613 = vmatprep.subr.bf16.mxu1 %v667_v0  ;;  %v633_v2 = vld [vmem:[%s974_s1 + $0x30] sm:$0xff]   ;;  %v634_v3 = vld [vmem:[%s974_s1 + $0x28] sm:$0xff]  }
   0x2   :  { %204 = vmatpush1.bf16.msra.mxu0 %v632_v1  ;;  %622 = vmatpush1.bf16.msra.mxu1 %v632_v1  ;;  %v635_v4 = vld [vmem:[%s974_s1 + $0x20] sm:$0xff]   ;;  %v636_v7 = vld [vmem:[%s974_s1 + $0x18] sm:$0xff]   ;;  %v637_v8 = vld [vmem:[%s974_s1 + $0x10] sm:$0xff]  }
   0x3   :  { %205 = vmatprep.subr.bf16.mxu0 %v667_v0  ;;  %614 = vmatprep.subr.bf16.mxu1 %v667_v0  ;;  %v643_v5 = vld [vmem:[%s975_s0 + $0x4] ss:$8 sps:$4 sm:$0xff]   ;;  %v641_v12 = vld [vmem:[%s975_s0] ss:$8 sps:$4 sm:$0xff]   ;;  %v644_v14 = vld [vmem:[%s975_s0 + $0x14] ss:$8 sps:$4 sm:$0xff]  }
   0x4   :  { %573 = vmatprep.mubr.msk.bf16.mxu0 %vm178_vm0, %v643_v5  ;;  %v649_v6 = vld [vmem:[%s975_s0 + $0x44] ss:$8 sps:$4 sm:$0xff]   ;;  %v647_v13 = vld [vmem:[%s975_s0 + $0x40] ss:$8 sps:$4 sm:$0xff]   ;;  %v653_v15 = vld [vmem:[%s975_s0 + $0x54] ss:$8 sps:$4 sm:$0xff]  }
   0x5   :  { %577 = vmatprep.mubr.msk.bf16.mxu1 %vm178_vm0, %v649_v6  ;;  %v638_v9 = vld [vmem:[%s974_s1 + $0x8] sm:$0xff]   ;;  %v639_v10 = vld [vmem:[%s974_s1] sm:$0xff]   ;;  %v646_v16 = vld [vmem:[%s975_s0 + $0x10] ss:$8 sps:$4 sm:$0xff]  }
   0x6   :  { %206 = vmatpush1.bf16.msra.mxu0 %v633_v2  ;;  %623 = vmatpush1.bf16.msra.mxu1 %v633_v2  ;;  %v640_v11 = vld [vmem:[%s974_s1 + $0x40] sm:$0xff]   ;;  %v655_v17 = vld [vmem:[%s975_s0 + $0x50] ss:$8 sps:$4 sm:$0xff]   ;;  %v656_v22 = vld [vmem:[%s975_s0 + $0x34] ss:$8 sps:$4 sm:$0xff]  }
   0x7   :  { %207 = vmatprep.subr.bf16.mxu0 %v667_v0  ;;  %615 = vmatprep.subr.bf16.mxu1 %v667_v0  ;;  %v650_v18 = vld [vmem:[%s975_s0 + $0x24] ss:$8 sps:$4 sm:$0xff]   ;;  %v652_v20 = vld [vmem:[%s975_s0 + $0x20] ss:$8 sps:$4 sm:$0xff]   ;;  %v662_v23 = vld [vmem:[%s975_s0 + $0x74] ss:$8 sps:$4 sm:$0xff]  }
   0x8   :  { %v659_v19 = vld [vmem:[%s975_s0 + $0x64] ss:$8 sps:$4 sm:$0xff]   ;;  %v661_v21 = vld [vmem:[%s975_s0 + $0x60] ss:$8 sps:$4 sm:$0xff]   ;;  %v658_v24 = vld [vmem:[%s975_s0 + $0x30] ss:$8 sps:$4 sm:$0xff]  }
   0x9   :  { %v664_v25 = vld [vmem:[%s975_s0 + $0x70] ss:$8 sps:$4 sm:$0xff]  }
   0xa   :  { %208 = vmatpush1.bf16.msra.mxu0 %v634_v3  ;;  %624 = vmatpush1.bf16.msra.mxu1 %v634_v3 }
   0xb   :  { %209 = vmatprep.subr.bf16.mxu0 %v667_v0  ;;  %616 = vmatprep.subr.bf16.mxu1 %v667_v0 }
   0xe   :  { %210 = vmatpush1.bf16.msra.mxu0 %v635_v4  ;;  %625 = vmatpush1.bf16.msra.mxu1 %v635_v4 }
   0xf   :  { %211 = vmatprep.subr.bf16.mxu0 %v667_v0  ;;  %617 = vmatprep.subr.bf16.mxu1 %v667_v0 }
  0x12   :  { %212 = vmatpush1.bf16.msra.mxu0 %v636_v7  ;;  %626 = vmatpush1.bf16.msra.mxu1 %v636_v7 }
  0x13   :  { %213 = vmatprep.subr.bf16.mxu0 %v667_v0  ;;  %618 = vmatprep.subr.bf16.mxu1 %v667_v0 }
  0x16   :  { %214 = vmatpush1.bf16.msra.mxu0 %v637_v8  ;;  %627 = vmatpush1.bf16.msra.mxu1 %v637_v8 }
  0x17   :  { %215 = vmatprep.subr.bf16.mxu0 %v667_v0  ;;  %619 = vmatprep.subr.bf16.mxu1 %v667_v0 }
  0x1a   :  { %216 = vmatpush1.bf16.msra.mxu0 %v638_v9  ;;  %628 = vmatpush1.bf16.msra.mxu1 %v638_v9 }
  0x1b   :  { %217 = vmatprep.subr.bf16.mxu0 %v667_v0  ;;  %620 = vmatprep.subr.bf16.mxu1 %v667_v0 }
  0x1e   :  { %218 = vmatpush1.bf16.msra.mxu0 %v639_v10  ;;  %629 = vmatpush1.bf16.msra.mxu1 %v639_v10 }
  0x1f   :  { %233 = vmatprep.subr.bf16.mxu0 %v667_v0  ;;  %621 = vmatprep.subr.bf16.mxu1 %v667_v0 }
  0x22   :  { %234 = vmatpush2.bf16.msra.mxu0 %v640_v11  ;;  %630 = vmatpush2.bf16.msra.mxu1 %v640_v11 }
  0x25   :  { %236 = vmatmul.mubr.bf16.vlgmr.msra.gmra.mxu0 %v641_v12  ;;  %268 = vmatmul.mubr.bf16.vlgmr.msra.gmra.mxu1 %v647_v13 }
  0x26   :  { %574 = vmatprep.mubr.msk.bf16.mxu0 %vm178_vm0, %v644_v14  ;;  %578 = vmatprep.mubr.msk.bf16.mxu1 %vm178_vm0, %v653_v15 }
  0x2d   :  { %244 = vmatmul.mubr.bf16.gmra.mxu0 %v646_v16  ;;  %276 = vmatmul.mubr.bf16.gmra.mxu1 %v655_v17 }
  0x2e   :  { %575 = vmatprep.mubr.msk.bf16.mxu0 %vm178_vm0, %v650_v18  ;;  %579 = vmatprep.mubr.msk.bf16.mxu1 %vm178_vm0, %v659_v19 }
  0x35   :  { %252 = vmatmul.mubr.bf16.gmra.mxu0 %v652_v20  ;;  %284 = vmatmul.mubr.bf16.gmra.mxu1 %v661_v21 }
  0x36   :  { %576 = vmatprep.mubr.msk.bf16.mxu0 %vm178_vm0, %v656_v22  ;;  %580 = vmatprep.mubr.msk.bf16.mxu1 %vm178_vm0, %v662_v23 }
  0x3d   :  { %260 = vmatmul.mubr.bf16.gmra.mxu0 %v658_v24  ;;  %292 = vmatmul.mubr.bf16.gmra.mxu1 %v664_v25 }
  0xe5   :  { %v776_v26 = vpop.f32.mrf.mxu0  ;;  %v778_v27 = vpop.f32.mrf.mxu1 }
  0xe6   :  { %v338_v43 = vmul.f32 %v776_v26, %v776_v26  ;;  %v301_v48 = vsel %vm300_vm1, %v776_v26, 0.0  ;;  %v346_v24 = vmul.f32 %v778_v27, %v778_v27 }
  0xe7   :  { %v239_v28 = vpop.f32.mrf.mxu0  ;;  %v271_v29 = vpop.f32.mrf.mxu1 }
  0xe8   :  { %v354_v55 = vsel %vm300_vm1, %v338_v43, 0.0 }
  0xe9   :  { %v780_v30 = vpop.f32.mrf.mxu0  ;;  %v782_v31 = vpop.f32.mrf.mxu1 }
  0xea   :  { %v339_v40 = vmul.f32 %v780_v30, %v780_v30  ;;  %v302_v44 = vsel %vm300_vm1, %v780_v30, 0.0 }
  0xeb   :  { %v242_v32 = vpop.f32.mrf.mxu0  ;;  %v274_v33 = vpop.f32.mrf.mxu1  ;;  %v303_v52 = vadd.f32 %v302_v44, %v301_v48  ;;  %v369_v44 = vsel %vm300_vm1, %v346_v24, 0.0 }
  0xec   :  { %v355_v49 = vsel %vm300_vm1, %v339_v40, 0.0  ;;  %v347_v40 = vmul.f32 %v782_v31, %v782_v31 }
  0xed   :  { %v784_v34 = vpop.f32.mrf.mxu0  ;;  %v786_v35 = vpop.f32.mrf.mxu1  ;;  %v356_v59 = vadd.f32 %v355_v49, %v354_v55 }
  0xee   :  { %v340_v45 = vmul.f32 %v784_v34, %v784_v34  ;;  %v304_v50 = vsel %vm300_vm1, %v784_v34, 0.0  ;;  %v348_v48 = vmul.f32 %v786_v35, %v786_v35 }
  0xef   :  { %v247_v36 = vpop.f32.mrf.mxu0  ;;  %v279_v37 = vpop.f32.mrf.mxu1  ;;  %v305_v60 = vadd.f32 %v304_v50, %v303_v52  ;;  %v320_v52 = vsel %vm300_vm1, %v786_v35, 0.0 }
  0xf0   :  { %v357_v56 = vsel %vm300_vm1, %v340_v45, 0.0  ;;  %v316_v37 = vsel %vm300_vm1, %v778_v27, 0.0  ;;  %v318_v45 = vsel %vm300_vm1, %v782_v31, 0.0 }
  0xf1   :  { %v788_v38 = vpop.f32.mrf.mxu0  ;;  %v790_v39 = vpop.f32.mrf.mxu1  ;;  %v358_v2 = vadd.f32 %v357_v56, %v356_v59  ;;  %v373_v56 = vsel %vm300_vm1, %v348_v48, 0.0 }
  0xf2   :  { %v341_v51 = vmul.f32 %v788_v38, %v788_v38  ;;  %v306_v57 = vsel %vm300_vm1, %v788_v38, 0.0 }
  0xf3   :  { %v250_v41 = vpop.f32.mrf.mxu0  ;;  %v282_v42 = vpop.f32.mrf.mxu1  ;;  %v307_v3 = vadd.f32 %v306_v57, %v305_v60  ;;  %v322_v57 = vsel %vm300_vm1, %v790_v39, 0.0 }
  0xf4   :  { %v359_v63 = vsel %vm300_vm1, %v341_v51, 0.0  ;;  %v371_v51 = vsel %vm300_vm1, %v347_v40, 0.0 }
  0xf5   :  { %v800_v46 = vpop.f32.mrf.mxu0  ;;  %v802_v47 = vpop.f32.mrf.mxu1  ;;  %v360_v8 = vadd.f32 %v359_v63, %v358_v2 }
  0xf6   :  { %v342_v58 = vmul.f32 %v800_v46, %v800_v46  ;;  %v308_v0 = vsel %vm300_vm1, %v800_v46, 0.0 }
  0xf7   :  { %v255_v53 = vpop.f32.mrf.mxu0  ;;  %v287_v54 = vpop.f32.mrf.mxu1  ;;  %v309_v9 = vadd.f32 %v308_v0, %v307_v3  ;;  %v324_v0 = vsel %vm300_vm1, %v802_v47, 0.0 }
  0xf8   :  { %v361_v6 = vsel %vm300_vm1, %v342_v58, 0.0  ;;  %v349_v53 = vmul.f32 %v790_v39, %v790_v39  ;;  %v350_v58 = vmul.f32 %v802_v47, %v802_v47 }
  0xf9   :  { %v817_v61 = vpop.f32.mrf.mxu0  ;;  %v819_v62 = vpop.f32.mrf.mxu1  ;;  %v362_v15 = vadd.f32 %v361_v6, %v360_v8 }
  0xfa   :  { %v343_v1 = vmul.f32 %v817_v61, %v817_v61  ;;  %v310_v7 = vsel %vm300_vm1, %v817_v61, 0.0  ;;  %v375_v63 = vsel %vm300_vm1, %v349_v53, 0.0 }
  0xfb   :  { %v258_v4 = vpop.f32.mrf.mxu0  ;;  %v290_v5 = vpop.f32.mrf.mxu1  ;;  %v311_v16 = vadd.f32 %v310_v7, %v309_v9 }
  0xfc   :  { %v363_v12 = vsel %vm300_vm1, %v343_v1, 0.0  ;;  %v351_v1 = vmul.f32 %v819_v62, %v819_v62  ;;  %v377_v4 = vsel %vm300_vm1, %v350_v58, 0.0  ;;  %v326_v5 = vsel %vm300_vm1, %v819_v62, 0.0  ;;  %v400_v58 = vld [vmem:[%s977_s3] sm:$0x1] }
  0xfd   :  { %v829_v10 = vpop.f32.mrf.mxu0  ;;  %v831_v11 = vpop.f32.mrf.mxu1  ;;  %v364_v20 = vadd.f32 %v363_v12, %v362_v15 }
  0xfe   :  { %v312_v13 = vsel %vm300_vm1, %v829_v10, 0.0  ;;  %v344_v14 = vmul.f32 %v829_v10, %v829_v10  ;;  %v352_v6 = vmul.f32 %v831_v11, %v831_v11  ;;  %v379_v9 = vsel %vm300_vm1, %v351_v1, 0.0 }
  0xff   :  { %v263_v17 = vpop.f32.mrf.mxu0  ;;  %v295_v18 = vpop.f32.mrf.mxu1  ;;  %v313_v21 = vadd.f32 %v312_v13, %v311_v16  ;;  %v328_v12 = vsel %vm300_vm1, %v831_v11, 0.0 }
 0x100   :  { %v365_v19 = vsel %vm300_vm1, %v344_v14, 0.0  ;;  %v381_v16 = vsel %vm300_vm1, %v352_v6, 0.0 }
 0x101   :  { %v839_v22 = vpop.f32.mrf.mxu0  ;;  %v841_v23 = vpop.f32.mrf.mxu1  ;;  %v366_v29 = vadd.f32 %v365_v19, %v364_v20 }
 0x102   :  { %v314_v25 = vsel %vm300_vm1, %v839_v22, 0.0  ;;  %v345_v28 = vmul.f32 %v839_v22, %v839_v22  ;;  %v353_v13 = vmul.f32 %v841_v23, %v841_v23  ;;  %v330_v17 = vsel %vm300_vm1, %v841_v23, 0.0 }
 0x103   :  { %v315_v32 = vadd.f32 %v314_v25, %v313_v21  ;;  %v266_v33 = vpop.f32.mrf.mxu0  ;;  %v298_v36 = vpop.f32.mrf.mxu1 }
 0x104   :  { %v367_v41 = vsel %vm300_vm1, %v345_v28, 0.0  ;;  %v383_v20 = vsel %vm300_vm1, %v353_v13, 0.0 }
 0x105   :  { %v317_v42 = vadd.f32 %v316_v37, %v315_v32  ;;  %v368_v43 = vadd.f32 %v367_v41, %v366_v29 }
 0x107   :  { %v319_v49 = vadd.f32 %v318_v45, %v317_v42  ;;  %v370_v50 = vadd.f32 %v369_v44, %v368_v43 }
 0x109   :  { %v372_v54 = vadd.f32 %v371_v51, %v370_v50  ;;  %v321_v55 = vadd.f32 %v320_v52, %v319_v49  ;;  %v404_v52 = vlaneseq }
 0x10b   :  { %v323_v59 = vadd.f32 %v322_v57, %v321_v55  ;;  %v374_v60 = vadd.f32 %v373_v56, %v372_v54  ;;  %v405_v53 = vshrl.u32 %v404_v52, 7  ;;  %v396_v54 = vld [vmem:[%s976_s2] sm:$0x1] }
 0x10d   :  { %v325_v2 = vadd.f32 %v324_v0, %v323_v59  ;;  %v376_v3 = vadd.f32 %v375_v63, %v374_v60  ;;  %v406_v55 = vsub.s32 0, %v405_v53 }
 0x10f   :  { %v327_v7 = vadd.f32 %v326_v5, %v325_v2  ;;  %v378_v8 = vadd.f32 %v377_v4, %v376_v3 }
 0x111   :  { %v380_v14 = vadd.f32 %v379_v9, %v378_v8  ;;  %v329_v15 = vadd.f32 %v328_v12, %v327_v7 }
 0x113   :  { %v382_v18 = vadd.f32 %v381_v16, %v380_v14  ;;  %v331_v19 = vadd.f32 %v330_v17, %v329_v15 }
 0x115   :  { %v332_v21 = vrot.slane %v331_v19, 4  ;;  %v384_v24 = vadd.f32 %v383_v20, %v382_v18 }
 0x117   :  { %v333_v25 = vadd.f32 %v332_v21, %v331_v19  ;;  %v385_v28 = vrot.slane %v384_v24, 4 }
 0x119   :  { %v334_v29 = vrot.slane %v333_v25, 2  ;;  %v386_v32 = vadd.f32 %v385_v28, %v384_v24 }
 0x11b   :  { %v335_v33 = vadd.f32 %v334_v29, %v333_v25  ;;  %v387_v36 = vrot.slane %v386_v32, 2 }
 0x11d   :  { %v336_v37 = vrot.slane %v335_v33, 1  ;;  %v388_v40 = vadd.f32 %v387_v36, %v386_v32 }
 0x11f   :  { %v337_v41 = vadd.f32 %v336_v37, %v335_v33  ;;  %v389_v42 = vrot.slane %v388_v40, 1 }
 0x121   :  { %v390_v43 = vadd.f32 %v389_v42, %v388_v40  ;;  %v391_v44 = vmul.f32 0.0078125, %v337_v41 }
 0x123   :  { %v392_v45 = vmul.f32 0.0078125, %v390_v43  ;;  %v393_v48 = vmul.f32 %v391_v44, %v391_v44 }
 0x125   :  { %v394_v49 = vsub.f32 %v392_v45, %v393_v48 }
 0x127   :  { %v395_v50 = vmax.f32 %v394_v49, 0.0 }
 0x129   :  { %v397_v51 = vadd.f32 1e-05, %v395_v50 }
 0x12b   :  { %665 = vrsqrt.f32 %v397_v51 }
 0x138   :  { %v666_v56 = vpop.eup %665 }
 0x139   :  { %v399_v57 = vmul.f32 %v666_v56, %v396_v54 }
 0x13b   :  { %v401_v59 = vmul.f32 %v399_v57, %v391_v44  ;;  %v407_v60 = vrot.slane %v399_v57, %v406_v55 }
 0x13d   :  { %v402_v63 = vsub.f32 %v400_v58, %v401_v59  ;;  %v409_v0 = vmul.f32 %v407_v60, %v776_v26  ;;  %v410_v1 = vmul.f32 %v407_v60, %v780_v30  ;;  %v411_v2 = vmul.f32 %v407_v60, %v784_v34 }
 0x13e   :  { %v412_v3 = vmul.f32 %v407_v60, %v788_v38  ;;  %v413_v4 = vmul.f32 %v407_v60, %v800_v46  ;;  %v414_v5 = vmul.f32 %v407_v60, %v817_v61  ;;  %v415_v6 = vmul.f32 %v407_v60, %v829_v10 }
 0x13f   :  { %v416_v7 = vmul.f32 %v407_v60, %v839_v22  ;;  %v417_v8 = vmul.f32 %v407_v60, %v778_v27  ;;  %v418_v9 = vmul.f32 %v407_v60, %v782_v31  ;;  %v419_v26 = vmul.f32 %v407_v60, %v786_v35 }
 0x140   :  { %v420_v30 = vmul.f32 %v407_v60, %v790_v39  ;;  %v429_v12 = vrot.slane %v402_v63, %v406_v55  ;;  %v421_v34 = vmul.f32 %v407_v60, %v802_v47  ;;  %v422_v38 = vmul.f32 %v407_v60, %v819_v62 }
 0x141   :  { %v423_v46 = vmul.f32 %v407_v60, %v831_v11  ;;  %v424_v61 = vmul.f32 %v407_v60, %v841_v23 }
 0x142   :  { %v431_v10 = vadd.f32 %v429_v12, %v409_v0  ;;  %v432_v22 = vadd.f32 %v429_v12, %v410_v1  ;;  %v433_v13 = vadd.f32 %v429_v12, %v411_v2  ;;  %v434_v27 = vadd.f32 %v429_v12, %v412_v3 }
 0x143   :  { %v435_v14 = vadd.f32 %v429_v12, %v413_v4  ;;  %v436_v31 = vadd.f32 %v429_v12, %v414_v5  ;;  %v437_v15 = vadd.f32 %v429_v12, %v415_v6  ;;  %v438_v35 = vadd.f32 %v429_v12, %v416_v7 }
 0x144   :  { %v439_v16 = vadd.f32 %v429_v12, %v417_v8  ;;  %v440_v39 = vadd.f32 %v429_v12, %v418_v9  ;;  %v441_v17 = vadd.f32 %v429_v12, %v419_v26  ;;  %v442_v18 = vadd.f32 %v429_v12, %v420_v30 }
 0x145   :  { %v443_v47 = vadd.f32 %v429_v12, %v421_v34  ;;  %v444_v19 = vadd.f32 %v429_v12, %v422_v38  ;;  %v445_v62 = vadd.f32 %v429_v12, %v423_v46  ;;  %v446_v20 = vadd.f32 %v429_v12, %v424_v61 }
 0x146   :  { %v447_v11 = vmax.f32 %v431_v10, 0.0  ;;  %v448_v21 = vmax.f32 %v432_v22, 0.0  ;;  %v449_v23 = vmax.f32 %v433_v13, 0.0  ;;  %v450_v24 = vmax.f32 %v434_v27, 0.0 }
 0x147   :  { %v451_v25 = vmax.f32 %v435_v14, 0.0  ;;  %v452_v28 = vmax.f32 %v436_v31, 0.0  ;;  %v453_v29 = vmax.f32 %v437_v15, 0.0  ;;  %v454_v32 = vmax.f32 %v438_v35, 0.0 }
 0x148   :  { %v455_v33 = vmax.f32 %v439_v16, 0.0  ;;  %v456_v36 = vmax.f32 %v440_v39, 0.0  ;;  %v457_v37 = vmax.f32 %v441_v17, 0.0  ;;  %v458_v40 = vmax.f32 %v442_v18, 0.0 }
 0x149   :  { %v459_v41 = vmax.f32 %v443_v47, 0.0  ;;  %v460_v42 = vmax.f32 %v444_v19, 0.0  ;;  %v461_v43 = vmax.f32 %v445_v62, 0.0  ;;  %v462_v44 = vmax.f32 %v446_v20, 0.0 }
 0x14a   :  { %v597_v45 = vpack.c.bf16 %v447_v11, %v447_v11  ;;  %v598_v48 = vpack.c.bf16 %v448_v21, %v448_v21  ;;  %v599_v49 = vpack.c.bf16 %v449_v23, %v449_v23  ;;  %v600_v50 = vpack.c.bf16 %v450_v24, %v450_v24 }
 0x14b   :  { %v601_v51 = vpack.c.bf16 %v451_v25, %v451_v25  ;;  %v602_v52 = vpack.c.bf16 %v452_v28, %v452_v28  ;;  %v603_v53 = vpack.c.bf16 %v453_v29, %v453_v29  ;;  %v604_v54 = vpack.c.bf16 %v454_v32, %v454_v32 }
 0x14c   :  { %v605_v55 = vpack.c.bf16 %v455_v33, %v455_v33  ;;  %v606_v56 = vpack.c.bf16 %v456_v36, %v456_v36  ;;  %v607_v57 = vpack.c.bf16 %v457_v37, %v457_v37  ;;  %v608_v58 = vpack.c.bf16 %v458_v40, %v458_v40  ;;  %528 = vst.msk [vmem:[%s978_s4] sm:$0xf] %vm527_vm2, %v597_v45 }
 0x14d   :  { %529 = vst.msk [vmem:[%s978_s4 + $0x4] sm:$0xf] %vm527_vm2, %v598_v48  ;;  %530 = vst.msk [vmem:[%s978_s4 + $0x8] sm:$0xf] %vm527_vm2, %v599_v49  ;;  %v609_v59 = vpack.c.bf16 %v459_v41, %v459_v41  ;;  %v610_v60 = vpack.c.bf16 %v460_v42, %v460_v42  ;;  %v611_v63 = vpack.c.bf16 %v461_v43, %v461_v43 }
 0x14e   :  { %531 = vst.msk [vmem:[%s978_s4 + $0xc] sm:$0xf] %vm527_vm2, %v600_v50  ;;  %v612_v0 = vpack.c.bf16 %v462_v44, %v462_v44  ;;  %532 = vst.msk [vmem:[%s978_s4 + $0x10] sm:$0xf] %vm527_vm2, %v601_v51 }
 0x14f   :  { %533 = vst.msk [vmem:[%s978_s4 + $0x14] sm:$0xf] %vm527_vm2, %v602_v52  ;;  %534 = vst.msk [vmem:[%s978_s4 + $0x18] sm:$0xf] %vm527_vm2, %v603_v53 }
 0x150   :  { %535 = vst.msk [vmem:[%s978_s4 + $0x1c] sm:$0xf] %vm527_vm2, %v604_v54  ;;  %536 = vst.msk [vmem:[%s978_s4 + $0x20] sm:$0xf] %vm527_vm2, %v605_v55 }
 0x151   :  { %537 = vst.msk [vmem:[%s978_s4 + $0x24] sm:$0xf] %vm527_vm2, %v606_v56  ;;  %538 = vst.msk [vmem:[%s978_s4 + $0x28] sm:$0xf] %vm527_vm2, %v607_v57 }
 0x152   :  { %539 = vst.msk [vmem:[%s978_s4 + $0x2c] sm:$0xf] %vm527_vm2, %v608_v58  ;;  %540 = vst.msk [vmem:[%s978_s4 + $0x30] sm:$0xf] %vm527_vm2, %v609_v59 }
 0x153   :  { %541 = vst.msk [vmem:[%s978_s4 + $0x34] sm:$0xf] %vm527_vm2, %v610_v60  ;;  %542 = vst.msk [vmem:[%s978_s4 + $0x38] sm:$0xf] %vm527_vm2, %v611_v63 }
 0x154   :  { %543 = vst.msk [vmem:[%s978_s4 + $0x3c] sm:$0xf] %vm527_vm2, %v612_v0 }

// kernel: _lambda_.14
= control target key start
LH: loop header
LB: loop body
LE: loop exit
PB: predicated region body
PF: predicated region fallthrough
CT: control target
= control target key end

     0   :  { %vm82_vm0 = vcmask 130048   ;;  %vm204_vm1 = vcmask 261120   ;;  %vm415_vm2 = vcmask 257024   ;;  %s783_s1 = inlined_call_operand.vmem [shape: bf16[16,32], index: 1, kind: input, shape index: {}]   ;;  %s784_s0 = inlined_call_operand.vmem [shape: bf16[128,16], index: 0, kind: input, shape index: {}]   ;;  %s785_s2 = inlined_call_operand.vmem [shape: f32[1,32], index: 2, kind: input, shape index: {}]   ;;  %s786_s3 = inlined_call_operand.vmem [shape: f32[1,32], index: 3, kind: input, shape index: {}]   ;;  %s787_s4 = inlined_call_operand.vmem [shape: bf16[128,32], index: 4, kind: output, shape index: {}]  }
   0x1   :  { %v514_v0 = vld [vmem:[%s783_s1] sm:$0xff]   ;;  %v516_v2 = vld [vmem:[%s784_s0 + $0x8] sm:$0xff]   ;;  %v517_v3 = vld [vmem:[%s784_s0 + $0x10] sm:$0xff]  }
   0x2   :  { %v515_v1 = vld [vmem:[%s784_s0] sm:$0xff]   ;;  %494 = vmatprep.subr.bf16.mxu0 %v514_v0  ;;  %512 = vmatprep.subr.bf16.mxu1 %v514_v0  ;;  %v520_v5 = vld [vmem:[%s784_s0 + $0x28] sm:$0xff]   ;;  %v521_v6 = vld [vmem:[%s784_s0 + $0x30] sm:$0xff]  }
   0x3   :  { %495 = vmatpush3.bf16.msra.mxu0 %v514_v0  ;;  %496 = vmatprep.mubr.msk.bf16.mxu0 %vm82_vm0, %v515_v1  ;;  %v519_v4 = vld [vmem:[%s784_s0 + $0x20] sm:$0xff]   ;;  %v518_v7 = vld [vmem:[%s784_s0 + $0x18] sm:$0xff]  }
   0x4   :  { %513 = vmatpush3.bf16.msra.mxu1 %v514_v0  ;;  %504 = vmatprep.mubr.msk.bf16.mxu1 %vm82_vm0, %v519_v4  ;;  %v522_v8 = vld [vmem:[%s784_s0 + $0x38] sm:$0xff]  }
   0x6   :  { %497 = vmatmul.mubr.msk.bf16.vlgmr.msra.gmra.mxu0 %vm82_vm0, %v516_v2 }
   0x7   :  { %500 = vmatprep.mubr.msk.bf16.mxu0 %vm82_vm0, %v517_v3  ;;  %505 = vmatmul.mubr.msk.bf16.vlgmr.msra.gmra.mxu1 %vm82_vm0, %v520_v5 }
   0x8   :  { %508 = vmatprep.mubr.msk.bf16.mxu1 %vm82_vm0, %v521_v6 }
   0xe   :  { %501 = vmatmul.mubr.msk.bf16.gmra.mxu0 %vm82_vm0, %v518_v7 }
   0xf   :  { %509 = vmatmul.mubr.msk.bf16.gmra.mxu1 %vm82_vm0, %v522_v8 }
  0xc6   :  { %v585_v9 = vpop.f32.mrf.mxu0 }
  0xc7   :  { %v589_v11 = vpop.f32.mrf.mxu1  ;;  %v244_v17 = vmul.f32 %v585_v9, %v585_v9  ;;  %v208_v23 = vsel %vm204_vm1, %v585_v9, 0.0 }
  0xc8   :  { %v587_v10 = vpop.f32.mrf.mxu0  ;;  %v252_v2 = vmul.f32 %v589_v11, %v589_v11  ;;  %v224_v7 = vsel %vm204_vm1, %v589_v11, 0.0 }
  0xc9   :  { %v593_v13 = vpop.f32.mrf.mxu1  ;;  %v242_v14 = vmul.f32 %v587_v10, %v587_v10  ;;  %v205_v18 = vsel %vm204_vm1, %v587_v10, 0.0  ;;  %v261_v31 = vsel %vm204_vm1, %v244_v17, 0.0 }
  0xca   :  { %v591_v12 = vpop.f32.mrf.mxu0  ;;  %v250_v57 = vmul.f32 %v593_v13, %v593_v13  ;;  %v220_v61 = vsel %vm204_vm1, %v593_v13, 0.0 }
  0xcb   :  { %v599_v16 = vpop.f32.mrf.mxu1  ;;  %v258_v24 = vsel %vm204_vm1, %v242_v14, 0.0  ;;  %v245_v25 = vmul.f32 %v591_v12, %v591_v12  ;;  %v210_v32 = vsel %vm204_vm1, %v591_v12, 0.0 }
  0xcc   :  { %v597_v15 = vpop.f32.mrf.mxu0  ;;  %v273_v3 = vsel %vm204_vm1, %v250_v57, 0.0  ;;  %v253_v8 = vmul.f32 %v599_v16, %v599_v16 }
  0xcd   :  { %v206_v19 = vsel %vm204_vm1, %v597_v15, 0.0  ;;  %v243_v20 = vmul.f32 %v597_v15, %v597_v15  ;;  %v619_v30 = vpop.f32.mrf.mxu1  ;;  %v263_v37 = vsel %vm204_vm1, %v245_v25, 0.0 }
  0xce   :  { %v207_v21 = vadd.f32 %v206_v19, %v205_v18  ;;  %v609_v22 = vpop.f32.mrf.mxu0  ;;  %v251_v62 = vmul.f32 %v619_v30, %v619_v30  ;;  %v222_v4 = vsel %vm204_vm1, %v619_v30, 0.0 }
  0xcf   :  { %v259_v26 = vsel %vm204_vm1, %v243_v20, 0.0  ;;  %v633_v42 = vpop.f32.mrf.mxu1  ;;  %v248_v43 = vmul.f32 %v609_v22, %v609_v22  ;;  %v216_v49 = vsel %vm204_vm1, %v609_v22, 0.0  ;;  %v277_v20 = vsel %vm204_vm1, %v252_v2, 0.0 }
  0xd0   :  { %v209_v27 = vadd.f32 %v208_v23, %v207_v21  ;;  %v260_v28 = vadd.f32 %v259_v26, %v258_v24  ;;  %v617_v29 = vpop.f32.mrf.mxu0  ;;  %v275_v14 = vsel %vm204_vm1, %v251_v62, 0.0  ;;  %v226_v21 = vsel %vm204_vm1, %v599_v16, 0.0 }
  0xd1   :  { %v246_v33 = vmul.f32 %v617_v29, %v617_v29  ;;  %v212_v38 = vsel %vm204_vm1, %v617_v29, 0.0  ;;  %v647_v54 = vpop.f32.mrf.mxu1  ;;  %v269_v55 = vsel %vm204_vm1, %v248_v43, 0.0  ;;  %v279_v26 = vsel %vm204_vm1, %v253_v8, 0.0 }
  0xd2   :  { %v262_v34 = vadd.f32 %v261_v31, %v260_v28  ;;  %v211_v35 = vadd.f32 %v210_v32, %v209_v27  ;;  %v626_v36 = vpop.f32.mrf.mxu0  ;;  %v254_v23 = vmul.f32 %v647_v54, %v647_v54  ;;  %v228_v27 = vsel %vm204_vm1, %v647_v54, 0.0 }
  0xd3   :  { %v265_v44 = vsel %vm204_vm1, %v246_v33, 0.0  ;;  %v249_v50 = vmul.f32 %v626_v36, %v626_v36  ;;  %v218_v56 = vsel %vm204_vm1, %v626_v36, 0.0  ;;  %v659_v1 = vpop.f32.mrf.mxu1  ;;  %v256_v33 = vmul.f32 %v633_v42, %v633_v42 }
  0xd4   :  { %v213_v39 = vadd.f32 %v212_v38, %v211_v35  ;;  %v264_v40 = vadd.f32 %v263_v37, %v262_v34  ;;  %v631_v41 = vpop.f32.mrf.mxu0  ;;  %v281_v34 = vsel %vm204_vm1, %v254_v23, 0.0  ;;  %v308_v8 = vlaneseq  ;;  %v304_v23 = vld [vmem:[%s786_s3] sm:$0x1] }
  0xd5   :  { %v214_v45 = vsel %vm204_vm1, %v631_v41, 0.0  ;;  %v247_v46 = vmul.f32 %v631_v41, %v631_v41  ;;  %v271_v60 = vsel %vm204_vm1, %v249_v50, 0.0  ;;  %v671_v19 = vpop.f32.mrf.mxu1 }
  0xd6   :  { %v266_v47 = vadd.f32 %v265_v44, %v264_v40  ;;  %v215_v48 = vadd.f32 %v214_v45, %v213_v39  ;;  %v255_v28 = vmul.f32 %v671_v19, %v671_v19  ;;  %v230_v35 = vsel %vm204_vm1, %v671_v19, 0.0 }
  0xd7   :  { %v267_v51 = vsel %vm204_vm1, %v247_v46, 0.0  ;;  %v232_v39 = vsel %vm204_vm1, %v633_v42, 0.0  ;;  %v257_v40 = vmul.f32 %v659_v1, %v659_v1  ;;  %v285_v46 = vsel %vm204_vm1, %v256_v33, 0.0 }
  0xd8   :  { %v217_v52 = vadd.f32 %v216_v49, %v215_v48  ;;  %v268_v53 = vadd.f32 %v267_v51, %v266_v47  ;;  %v283_v43 = vsel %vm204_vm1, %v255_v28, 0.0  ;;  %v234_v47 = vsel %vm204_vm1, %v659_v1, 0.0 }
  0xd9   :  { %v287_v50 = vsel %vm204_vm1, %v257_v40, 0.0 }
  0xda   :  { %v219_v58 = vadd.f32 %v218_v56, %v217_v52  ;;  %v270_v59 = vadd.f32 %v269_v55, %v268_v53 }
  0xdc   :  { %v272_v63 = vadd.f32 %v271_v60, %v270_v59  ;;  %v221_v0 = vadd.f32 %v220_v61, %v219_v58 }
  0xde   :  { %v223_v5 = vadd.f32 %v222_v4, %v221_v0  ;;  %v274_v6 = vadd.f32 %v273_v3, %v272_v63 }
  0xe0   :  { %v225_v17 = vadd.f32 %v224_v7, %v223_v5  ;;  %v276_v18 = vadd.f32 %v275_v14, %v274_v6  ;;  %v309_v14 = vshrl.u32 %v308_v8, 7 }
  0xe2   :  { %v278_v24 = vadd.f32 %v277_v20, %v276_v18  ;;  %v227_v25 = vadd.f32 %v226_v21, %v225_v17  ;;  %v300_v17 = vld [vmem:[%s785_s2] sm:$0x1]  ;;  %v310_v18 = vsub.s32 0, %v309_v14 }
  0xe4   :  { %v229_v31 = vadd.f32 %v228_v27, %v227_v25  ;;  %v280_v32 = vadd.f32 %v279_v26, %v278_v24 }
  0xe6   :  { %v282_v37 = vadd.f32 %v281_v34, %v280_v32  ;;  %v231_v38 = vadd.f32 %v230_v35, %v229_v31 }
  0xe8   :  { %v233_v44 = vadd.f32 %v232_v39, %v231_v38  ;;  %v284_v45 = vadd.f32 %v283_v43, %v282_v37 }
  0xea   :  { %v235_v48 = vadd.f32 %v234_v47, %v233_v44  ;;  %v286_v49 = vadd.f32 %v285_v46, %v284_v45 }
  0xec   :  { %v236_v51 = vrot.slane %v235_v48, 4  ;;  %v288_v52 = vadd.f32 %v287_v50, %v286_v49 }
  0xee   :  { %v237_v53 = vadd.f32 %v236_v51, %v235_v48  ;;  %v289_v55 = vrot.slane %v288_v52, 4 }
  0xf0   :  { %v238_v56 = vrot.slane %v237_v53, 2  ;;  %v290_v57 = vadd.f32 %v289_v55, %v288_v52 }
  0xf2   :  { %v239_v58 = vadd.f32 %v238_v56, %v237_v53  ;;  %v291_v59 = vrot.slane %v290_v57, 2 }
  0xf4   :  { %v240_v60 = vrot.slane %v239_v58, 1  ;;  %v292_v61 = vadd.f32 %v291_v59, %v290_v57 }
  0xf6   :  { %v241_v62 = vadd.f32 %v240_v60, %v239_v58  ;;  %v293_v63 = vrot.slane %v292_v61, 1 }
  0xf8   :  { %v294_v0 = vadd.f32 %v293_v63, %v292_v61  ;;  %v295_v2 = vmul.f32 0.0078125, %v241_v62 }
  0xfa   :  { %v296_v3 = vmul.f32 0.0078125, %v294_v0  ;;  %v297_v4 = vmul.f32 %v295_v2, %v295_v2 }
  0xfc   :  { %v298_v5 = vsub.f32 %v296_v3, %v297_v4 }
  0xfe   :  { %v299_v6 = vmax.f32 %v298_v5, 0.0 }
 0x100   :  { %v301_v7 = vadd.f32 1e-05, %v299_v6 }
 0x102   :  { %523 = vrsqrt.f32 %v301_v7 }
 0x10f   :  { %v524_v20 = vpop.eup %523 }
 0x110   :  { %v303_v21 = vmul.f32 %v524_v20, %v300_v17 }
 0x112   :  { %v305_v24 = vmul.f32 %v303_v21, %v295_v2  ;;  %v311_v25 = vrot.slane %v303_v21, %v310_v18 }
 0x114   :  { %v306_v26 = vsub.f32 %v304_v23, %v305_v24  ;;  %v313_v27 = vmul.f32 %v311_v25, %v587_v10  ;;  %v314_v28 = vmul.f32 %v311_v25, %v597_v15  ;;  %v315_v31 = vmul.f32 %v585_v9, %v311_v25 }
 0x115   :  { %v316_v32 = vmul.f32 %v591_v12, %v311_v25  ;;  %v317_v33 = vmul.f32 %v311_v25, %v617_v29  ;;  %v318_v34 = vmul.f32 %v311_v25, %v631_v41  ;;  %v319_v35 = vmul.f32 %v609_v22, %v311_v25 }
 0x116   :  { %v320_v37 = vmul.f32 %v626_v36, %v311_v25  ;;  %v321_v38 = vmul.f32 %v311_v25, %v593_v13  ;;  %v322_v39 = vmul.f32 %v311_v25, %v619_v30  ;;  %v323_v10 = vmul.f32 %v589_v11, %v311_v25 }
 0x117   :  { %v324_v15 = vmul.f32 %v599_v16, %v311_v25  ;;  %v333_v40 = vrot.slane %v306_v26, %v310_v18  ;;  %v325_v9 = vmul.f32 %v311_v25, %v647_v54  ;;  %v326_v12 = vmul.f32 %v311_v25, %v671_v19 }
 0x118   :  { %v327_v29 = vmul.f32 %v633_v42, %v311_v25  ;;  %v328_v41 = vmul.f32 %v659_v1, %v311_v25 }
 0x119   :  { %v335_v22 = vadd.f32 %v333_v40, %v313_v27  ;;  %v336_v43 = vadd.f32 %v333_v40, %v314_v28  ;;  %v337_v36 = vadd.f32 %v333_v40, %v315_v31  ;;  %v338_v44 = vadd.f32 %v333_v40, %v316_v32 }
 0x11a   :  { %v339_v13 = vadd.f32 %v333_v40, %v317_v33  ;;  %v340_v45 = vadd.f32 %v333_v40, %v318_v34  ;;  %v341_v30 = vadd.f32 %v333_v40, %v319_v35  ;;  %v342_v46 = vadd.f32 %v333_v40, %v320_v37 }
 0x11b   :  { %v343_v11 = vadd.f32 %v333_v40, %v321_v38  ;;  %v344_v47 = vadd.f32 %v333_v40, %v322_v39  ;;  %v345_v16 = vadd.f32 %v333_v40, %v323_v10  ;;  %v346_v48 = vadd.f32 %v333_v40, %v324_v15 }
 0x11c   :  { %v347_v49 = vadd.f32 %v333_v40, %v325_v9  ;;  %v348_v54 = vadd.f32 %v333_v40, %v326_v12  ;;  %v349_v50 = vadd.f32 %v333_v40, %v327_v29  ;;  %v350_v19 = vadd.f32 %v333_v40, %v328_v41 }
 0x11d   :  { %v469_v51 = vpack.c.bf16 %v335_v22, %v335_v22  ;;  %v470_v42 = vpack.c.bf16 %v336_v43, %v336_v43  ;;  %v471_v52 = vpack.c.bf16 %v337_v36, %v337_v36  ;;  %v472_v1 = vpack.c.bf16 %v338_v44, %v338_v44 }
 0x11e   :  { %v473_v53 = vpack.c.bf16 %v339_v13, %v339_v13  ;;  %v474_v55 = vpack.c.bf16 %v340_v45, %v340_v45  ;;  %v475_v56 = vpack.c.bf16 %v341_v30, %v341_v30  ;;  %v476_v57 = vpack.c.bf16 %v342_v46, %v342_v46 }
 0x11f   :  { %v477_v58 = vpack.c.bf16 %v343_v11, %v343_v11  ;;  %v478_v59 = vpack.c.bf16 %v344_v47, %v344_v47  ;;  %v479_v60 = vpack.c.bf16 %v345_v16, %v345_v16  ;;  %v480_v61 = vpack.c.bf16 %v346_v48, %v346_v48  ;;  %416 = vst.msk [vmem:[%s787_s4] sm:$0xf] %vm415_vm2, %v469_v51 }
 0x120   :  { %417 = vst.msk [vmem:[%s787_s4 + $0x4] sm:$0xf] %vm415_vm2, %v470_v42  ;;  %418 = vst.msk [vmem:[%s787_s4 + $0x8] sm:$0xf] %vm415_vm2, %v471_v52  ;;  %v481_v62 = vpack.c.bf16 %v347_v49, %v347_v49  ;;  %v482_v63 = vpack.c.bf16 %v348_v54, %v348_v54  ;;  %v483_v0 = vpack.c.bf16 %v349_v50, %v349_v50 }
 0x121   :  { %419 = vst.msk [vmem:[%s787_s4 + $0xc] sm:$0xf] %vm415_vm2, %v472_v1  ;;  %v484_v2 = vpack.c.bf16 %v350_v19, %v350_v19  ;;  %420 = vst.msk [vmem:[%s787_s4 + $0x10] sm:$0xf] %vm415_vm2, %v473_v53 }
 0x122   :  { %421 = vst.msk [vmem:[%s787_s4 + $0x14] sm:$0xf] %vm415_vm2, %v474_v55  ;;  %422 = vst.msk [vmem:[%s787_s4 + $0x18] sm:$0xf] %vm415_vm2, %v475_v56 }
 0x123   :  { %423 = vst.msk [vmem:[%s787_s4 + $0x1c] sm:$0xf] %vm415_vm2, %v476_v57  ;;  %424 = vst.msk [vmem:[%s787_s4 + $0x20] sm:$0xf] %vm415_vm2, %v477_v58 }
 0x124   :  { %425 = vst.msk [vmem:[%s787_s4 + $0x24] sm:$0xf] %vm415_vm2, %v478_v59  ;;  %426 = vst.msk [vmem:[%s787_s4 + $0x28] sm:$0xf] %vm415_vm2, %v479_v60 }
 0x125   :  { %427 = vst.msk [vmem:[%s787_s4 + $0x2c] sm:$0xf] %vm415_vm2, %v480_v61  ;;  %428 = vst.msk [vmem:[%s787_s4 + $0x30] sm:$0xf] %vm415_vm2, %v481_v62 }
 0x126   :  { %429 = vst.msk [vmem:[%s787_s4 + $0x34] sm:$0xf] %vm415_vm2, %v482_v63  ;;  %430 = vst.msk [vmem:[%s787_s4 + $0x38] sm:$0xf] %vm415_vm2, %v483_v0 }
 0x127   :  { %431 = vst.msk [vmem:[%s787_s4 + $0x3c] sm:$0xf] %vm415_vm2, %v484_v2 }

// kernel: _lambda_.15
= control target key start
LH: loop header
LB: loop body
LE: loop exit
PB: predicated region body
PF: predicated region fallthrough
CT: control target
= control target key end

     0   :  { %vm317_vm0 = vcmask 261120   ;;  %vm810_vm1 = vcmask 257024   ;;  %s1552_s1 = inlined_call_operand.vmem [shape: bf16[288,32], index: 1, kind: input, shape index: {}]   ;;  %s1553_s0 = inlined_call_operand.vmem [shape: bf16[128,288], index: 0, kind: input, shape index: {}]   ;;  %s1554_s2 = inlined_call_operand.vmem [shape: f32[1,32], index: 2, kind: input, shape index: {}]   ;;  %s1555_s4 = inlined_call_operand.vmem [shape: bf16[128,32], index: 4, kind: input, shape index: {}]   ;;  %s1556_s3 = inlined_call_operand.vmem [shape: f32[1,32], index: 3, kind: input, shape index: {}]   ;;  %s1557_s5 = inlined_call_operand.vmem [shape: bf16[128,32], index: 5, kind: output, shape index: {}]  }
   0x1   :  { %v1062_v0 = vld [vmem:[%s1552_s1 + $0x78] sm:$0xff]   ;;  %v1064_v2 = vld [vmem:[%s1552_s1 + $0x70] sm:$0xff]   ;;  %v1066_v4 = vld [vmem:[%s1552_s1 + $0x68] sm:$0xff]  }
   0x2   :  { %v1063_v1 = vld [vmem:[%s1552_s1 + $0x38] sm:$0xff]   ;;  %952 = vmatprep.subr.bf16.mxu0 %v1062_v0  ;;  %1046 = vmatprep.subr.bf16.mxu1 %v1062_v0  ;;  %v1065_v3 = vld [vmem:[%s1552_s1 + $0x30] sm:$0xff]   ;;  %v1067_v5 = vld [vmem:[%s1552_s1 + $0x28] sm:$0xff]  }
   0x3   :  { %953 = vmatpush3.bf16.msra.mxu0 %v1063_v1  ;;  %1054 = vmatpush3.bf16.msra.mxu1 %v1063_v1  ;;  %v1068_v6 = vld [vmem:[%s1552_s1 + $0x60] sm:$0xff]   ;;  %v1070_v8 = vld [vmem:[%s1552_s1 + $0x58] sm:$0xff]   ;;  %v1072_v10 = vld [vmem:[%s1552_s1 + $0x50] sm:$0xff]  }
   0x4   :  { %954 = vmatprep.subr.bf16.mxu0 %v1064_v2  ;;  %1047 = vmatprep.subr.bf16.mxu1 %v1064_v2  ;;  %v1069_v7 = vld [vmem:[%s1552_s1 + $0x20] sm:$0xff]   ;;  %v1071_v9 = vld [vmem:[%s1552_s1 + $0x18] sm:$0xff]   ;;  %v1073_v13 = vld [vmem:[%s1552_s1 + $0x10] sm:$0xff]  }
   0x5   :  { %v1080_v11 = vld [vmem:[%s1553_s0 + $0x4] ss:$12 sps:$4 sm:$0xff]   ;;  %v1083_v12 = vld [vmem:[%s1553_s0 + $0x94] ss:$12 sps:$4 sm:$0xff]   ;;  %v1074_v14 = vld [vmem:[%s1552_s1 + $0x48] sm:$0xff]  }
   0x6   :  { %374 = vmatprep.mubr.bf16.mxu0 %v1080_v11  ;;  %422 = vmatprep.mubr.bf16.mxu1 %v1083_v12  ;;  %v1075_v15 = vld [vmem:[%s1552_s1 + $0x8] sm:$0xff]   ;;  %v1076_v16 = vld [vmem:[%s1552_s1 + $0x40] sm:$0xff]   ;;  %v1081_v20 = vld [vmem:[%s1553_s0 + $0x90] ss:$12 sps:$4 sm:$0xff]  }
   0x7   :  { %955 = vmatpush3.bf16.msra.mxu0 %v1065_v3  ;;  %1055 = vmatpush3.bf16.msra.mxu1 %v1065_v3  ;;  %v1077_v17 = vld [vmem:[%s1552_s1] sm:$0xff]   ;;  %v1084_v19 = vld [vmem:[%s1552_s1 + $0x88] sm:$0xff]   ;;  %v1095_v28 = vld [vmem:[%s1553_s0 + $0x30] ss:$12 sps:$4 sm:$0xff]  }
   0x8   :  { %956 = vmatprep.subr.bf16.mxu0 %v1066_v4  ;;  %1048 = vmatprep.subr.bf16.mxu1 %v1066_v4  ;;  %v1078_v18 = vld [vmem:[%s1553_s0] ss:$12 sps:$4 sm:$0xff]   ;;  %v1085_v21 = vld [vmem:[%s1553_s0 + $0x1c] ss:$12 sps:$4 sm:$0xff]   ;;  %v1089_v24 = vld [vmem:[%s1553_s0 + $0x18] ss:$12 sps:$4 sm:$0xff]  }
   0x9   :  { %v1087_v22 = vld [vmem:[%s1553_s0 + $0xac] ss:$12 sps:$4 sm:$0xff]   ;;  %v1091_v23 = vld [vmem:[%s1552_s1 + $0x80] sm:$0xff]   ;;  %v1090_v25 = vld [vmem:[%s1553_s0 + $0xa8] ss:$12 sps:$4 sm:$0xff]  }
   0xa   :  { %v1092_v26 = vld [vmem:[%s1553_s0 + $0x34] ss:$12 sps:$4 sm:$0xff]   ;;  %v1097_v30 = vld [vmem:[%s1553_s0 + $0x4c] ss:$12 sps:$4 sm:$0xff]   ;;  %v1101_v33 = vld [vmem:[%s1553_s0 + $0x50] ss:$12 sps:$4 sm:$0xff]  }
   0xb   :  { %957 = vmatpush3.bf16.msra.mxu0 %v1067_v5  ;;  %1056 = vmatpush3.bf16.msra.mxu1 %v1067_v5  ;;  %v1094_v27 = vld [vmem:[%s1553_s0 + $0x8] ss:$12 sps:$4 sm:$0xff]   ;;  %v1096_v29 = vld [vmem:[%s1553_s0 + $0x20] ss:$12 sps:$4 sm:$0xff]   ;;  %v1099_v31 = vld [vmem:[%s1553_s0 + $0x38] ss:$12 sps:$4 sm:$0xff]  }
   0xc   :  { %958 = vmatprep.subr.bf16.mxu0 %v1068_v6  ;;  %1049 = vmatprep.subr.bf16.mxu1 %v1068_v6  ;;  %v1100_v32 = vld [vmem:[%s1553_s0 + $0x48] ss:$12 sps:$4 sm:$0xff]   ;;  %v1102_v34 = vld [vmem:[%s1553_s0 + $0x64] ss:$12 sps:$4 sm:$0xff]   ;;  %v1105_v36 = vld [vmem:[%s1553_s0 + $0x60] ss:$12 sps:$4 sm:$0xff]  }
   0xd   :  { %v1104_v35 = vld [vmem:[%s1553_s0 + $0x68] ss:$12 sps:$4 sm:$0xff]   ;;  %v1106_v37 = vld [vmem:[%s1553_s0 + $0x80] ss:$12 sps:$4 sm:$0xff]   ;;  %v1109_v39 = vld [vmem:[%s1553_s0 + $0x98] ss:$12 sps:$4 sm:$0xff]  }
   0xe   :  { %v1107_v38 = vld [vmem:[%s1553_s0 + $0x7c] ss:$12 sps:$4 sm:$0xff]   ;;  %v1110_v40 = vld [vmem:[%s1553_s0 + $0x78] ss:$12 sps:$4 sm:$0xff]  }
   0xf   :  { %959 = vmatpush3.bf16.msra.mxu0 %v1069_v7  ;;  %1057 = vmatpush3.bf16.msra.mxu1 %v1069_v7  ;;  %v1111_v41 = vld [vmem:[%s1553_s0 + $0xb0] ss:$12 sps:$4 sm:$0xff]  }
  0x10   :  { %960 = vmatprep.subr.bf16.mxu0 %v1070_v8  ;;  %1050 = vmatprep.subr.bf16.mxu1 %v1070_v8 }
  0x13   :  { %961 = vmatpush3.bf16.msra.mxu0 %v1071_v9  ;;  %1058 = vmatpush3.bf16.msra.mxu1 %v1071_v9 }
  0x14   :  { %962 = vmatprep.subr.bf16.mxu0 %v1072_v10  ;;  %1051 = vmatprep.subr.bf16.mxu1 %v1072_v10 }
  0x17   :  { %963 = vmatpush3.bf16.msra.mxu0 %v1073_v13  ;;  %1059 = vmatpush3.bf16.msra.mxu1 %v1073_v13 }
  0x18   :  { %964 = vmatprep.subr.bf16.mxu0 %v1074_v14  ;;  %1052 = vmatprep.subr.bf16.mxu1 %v1074_v14 }
  0x1b   :  { %965 = vmatpush3.bf16.msra.mxu0 %v1075_v15  ;;  %1060 = vmatpush3.bf16.msra.mxu1 %v1075_v15 }
  0x1c   :  { %966 = vmatprep.subr.bf16.mxu0 %v1076_v16  ;;  %1053 = vmatprep.subr.bf16.mxu1 %v1076_v16 }
  0x1f   :  { %967 = vmatpush3.bf16.msra.mxu0 %v1077_v17  ;;  %1061 = vmatpush3.bf16.msra.mxu1 %v1077_v17 }
  0x20   :  { %1026 = vmatprep.subr.bf16.mxu1 %v1084_v19 }
  0x22   :  { %375 = vmatmul.mubr.bf16.vlgmr.msra.gmra.mxu0 %v1078_v18  ;;  %423 = vmatmul.mubr.bf16.vlgmr.msra.gmra.mxu1 %v1081_v20 }
  0x23   :  { %1027 = vmatpush3.bf16.msra.mxu1 %v1084_v19  ;;  %382 = vmatprep.mubr.bf16.mxu0 %v1085_v21 }
  0x24   :  { %430 = vmatprep.mubr.bf16.mxu1 %v1087_v22  ;;  %1028 = vmatprep.subr.bf16.mxu1 %v1091_v23 }
  0x27   :  { %1029 = vmatpush3.bf16.msra.mxu1 %v1091_v23 }
  0x2a   :  { %383 = vmatmul.mubr.bf16.gmra.mxu0 %v1089_v24  ;;  %431 = vmatmul.mubr.bf16.gmra.mxu1 %v1090_v25 }
  0x2b   :  { %390 = vmatprep.mubr.bf16.mxu0 %v1092_v26  ;;  %1030 = vmatprep.mubr.msk.bf16.mxu1 %vm317_vm0, %v1094_v27 }
  0x32   :  { %391 = vmatmul.mubr.bf16.gmra.mxu0 %v1095_v28  ;;  %1031 = vmatmul.mubr.msk.bf16.vlgmr.msra.gmra.mxu1 %vm317_vm0, %v1096_v29 }
  0x33   :  { %398 = vmatprep.mubr.bf16.mxu0 %v1097_v30  ;;  %1034 = vmatprep.mubr.msk.bf16.mxu1 %vm317_vm0, %v1099_v31 }
  0x3a   :  { %399 = vmatmul.mubr.bf16.gmra.mxu0 %v1100_v32  ;;  %1035 = vmatmul.mubr.msk.bf16.gmra.mxu1 %vm317_vm0, %v1101_v33 }
  0x3b   :  { %406 = vmatprep.mubr.bf16.mxu0 %v1102_v34  ;;  %1038 = vmatprep.mubr.msk.bf16.mxu1 %vm317_vm0, %v1104_v35 }
  0x42   :  { %407 = vmatmul.mubr.bf16.gmra.mxu0 %v1105_v36  ;;  %1039 = vmatmul.mubr.msk.bf16.gmra.mxu1 %vm317_vm0, %v1106_v37 }
  0x43   :  { %414 = vmatprep.mubr.bf16.mxu0 %v1107_v38  ;;  %1042 = vmatprep.mubr.msk.bf16.mxu1 %vm317_vm0, %v1109_v39 }
  0x4a   :  { %415 = vmatmul.mubr.bf16.gmra.mxu0 %v1110_v40  ;;  %1043 = vmatmul.mubr.msk.bf16.gmra.mxu1 %vm317_vm0, %v1111_v41 }
  0xe2   :  { %v968_v42 = vpop.f32.mrf.mxu0  ;;  %v1278_v43 = vpop.f32.mrf.mxu1 }
  0xe4   :  { %v969_v44 = vpop.f32.mrf.mxu0  ;;  %v1280_v45 = vpop.f32.mrf.mxu1 }
  0xe5   :  { %v970_v60 = vadd.f32 %v969_v44, %v968_v42 }
  0xe6   :  { %v971_v46 = vpop.f32.mrf.mxu0  ;;  %v1282_v47 = vpop.f32.mrf.mxu1 }
  0xe8   :  { %v972_v48 = vpop.f32.mrf.mxu0  ;;  %v1284_v49 = vpop.f32.mrf.mxu1 }
  0xe9   :  { %v973_v4 = vadd.f32 %v972_v48, %v971_v46 }
  0xea   :  { %v974_v50 = vpop.f32.mrf.mxu0  ;;  %v1286_v51 = vpop.f32.mrf.mxu1 }
  0xec   :  { %v975_v52 = vpop.f32.mrf.mxu0  ;;  %v1288_v53 = vpop.f32.mrf.mxu1 }
  0xed   :  { %v976_v63 = vadd.f32 %v975_v52, %v974_v50 }
  0xee   :  { %v977_v54 = vpop.f32.mrf.mxu0  ;;  %v1290_v55 = vpop.f32.mrf.mxu1 }
  0xf0   :  { %v978_v56 = vpop.f32.mrf.mxu0  ;;  %v1292_v57 = vpop.f32.mrf.mxu1 }
  0xf1   :  { %v979_v3 = vadd.f32 %v978_v56, %v977_v54 }
  0xf2   :  { %v980_v58 = vpop.f32.mrf.mxu0  ;;  %v1032_v59 = vpop.f32.mrf.mxu1 }
  0xf3   :  { %v1296_v5 = vadd.f32 %v1032_v59, %v976_v63 }
  0xf4   :  { %v981_v61 = vpop.f32.mrf.mxu0  ;;  %v473_v62 = vpop.f32.mrf.mxu1 }
  0xf5   :  { %v1294_v0 = vadd.f32 %v970_v60, %v473_v62  ;;  %v982_v13 = vadd.f32 %v981_v61, %v980_v58  ;;  %v575_v14 = vmul.f32 %v1296_v5, %v1296_v5  ;;  %v539_v23 = vsel %vm317_vm0, %v1296_v5, 0.0 }
  0xf6   :  { %v983_v1 = vpop.f32.mrf.mxu0  ;;  %v1033_v2 = vpop.f32.mrf.mxu1 }
  0xf7   :  { %v1298_v8 = vadd.f32 %v1033_v2, %v979_v3  ;;  %v573_v9 = vmul.f32 %v1294_v0, %v1294_v0  ;;  %v536_v15 = vsel %vm317_vm0, %v1294_v0, 0.0  ;;  %v592_v31 = vsel %vm317_vm0, %v575_v14, 0.0 }
  0xf8   :  { %v984_v6 = vpop.f32.mrf.mxu0  ;;  %v476_v7 = vpop.f32.mrf.mxu1 }
  0xf9   :  { %v1302_v10 = vadd.f32 %v973_v4, %v476_v7  ;;  %v576_v20 = vmul.f32 %v1298_v8, %v1298_v8  ;;  %v589_v24 = vsel %vm317_vm0, %v573_v9, 0.0  ;;  %v541_v32 = vsel %vm317_vm0, %v1298_v8, 0.0 }
  0xfa   :  { %v986_v11 = vpop.f32.mrf.mxu0  ;;  %v1036_v12 = vpop.f32.mrf.mxu1  ;;  %v985_v33 = vadd.f32 %v984_v6, %v983_v1 }
  0xfb   :  { %v537_v16 = vsel %vm317_vm0, %v1302_v10, 0.0  ;;  %v574_v17 = vmul.f32 %v1302_v10, %v1302_v10  ;;  %v594_v37 = vsel %vm317_vm0, %v576_v20, 0.0 }
  0xfc   :  { %v987_v18 = vpop.f32.mrf.mxu0  ;;  %v489_v19 = vpop.f32.mrf.mxu1  ;;  %v538_v21 = vadd.f32 %v537_v16, %v536_v15 }
  0xfd   :  { %v1314_v22 = vadd.f32 %v982_v13, %v489_v19  ;;  %v590_v25 = vsel %vm317_vm0, %v574_v17, 0.0  ;;  %v988_v26 = vadd.f32 %v987_v18, %v986_v11 }
  0xfe   :  { %v989_v27 = vpop.f32.mrf.mxu0  ;;  %v1037_v28 = vpop.f32.mrf.mxu1  ;;  %v540_v29 = vadd.f32 %v539_v23, %v538_v21  ;;  %v591_v30 = vadd.f32 %v590_v25, %v589_v24 }
  0xff   :  { %v577_v34 = vmul.f32 %v1314_v22, %v1314_v22  ;;  %v1326_v40 = vadd.f32 %v1036_v12, %v988_v26  ;;  %v543_v41 = vsel %vm317_vm0, %v1314_v22, 0.0 }
 0x100   :  { %v990_v35 = vpop.f32.mrf.mxu0  ;;  %v492_v36 = vpop.f32.mrf.mxu1  ;;  %v593_v38 = vadd.f32 %v592_v31, %v591_v30  ;;  %v542_v39 = vadd.f32 %v541_v32, %v540_v29 }
 0x101   :  { %v991_v42 = vadd.f32 %v990_v35, %v989_v27  ;;  %v1330_v44 = vadd.f32 %v985_v33, %v492_v36  ;;  %v596_v54 = vsel %vm317_vm0, %v577_v34, 0.0  ;;  %v579_v1 = vmul.f32 %v1326_v40, %v1326_v40 }
 0x102   :  { %v992_v46 = vpop.f32.mrf.mxu0  ;;  %v1040_v48 = vpop.f32.mrf.mxu1  ;;  %v544_v50 = vadd.f32 %v543_v41, %v542_v39  ;;  %v595_v52 = vadd.f32 %v594_v37, %v593_v38  ;;  %v547_v9 = vsel %vm317_vm0, %v1326_v40, 0.0  ;;  %v1006_v36 = vadd.f32 %v1280_v45, %v1278_v43 }
 0x103   :  { %v545_v56 = vsel %vm317_vm0, %v1330_v44, 0.0  ;;  %v578_v58 = vmul.f32 %v1330_v44, %v1330_v44  ;;  %v1339_v2 = vadd.f32 %v1037_v28, %v991_v42  ;;  %v600_v15 = vsel %vm317_vm0, %v579_v1, 0.0 }
 0x104   :  { %v993_v59 = vpop.f32.mrf.mxu0  ;;  %v505_v60 = vpop.f32.mrf.mxu1  ;;  %v597_v61 = vadd.f32 %v596_v54, %v595_v52  ;;  %v546_v62 = vadd.f32 %v545_v56, %v544_v50  ;;  %v1009_v41 = vadd.f32 %v1284_v49, %v1282_v47 }
 0x105   :  { %v994_v63 = vadd.f32 %v993_v59, %v992_v46  ;;  %v598_v3 = vsel %vm317_vm0, %v578_v58, 0.0  ;;  %v580_v16 = vmul.f32 %v1339_v2, %v1339_v2  ;;  %v549_v21 = vsel %vm317_vm0, %v1339_v2, 0.0 }
 0x106   :  { %v995_v4 = vpop.f32.mrf.mxu0  ;;  %v1041_v6 = vpop.f32.mrf.mxu1  ;;  %v599_v7 = vadd.f32 %v598_v3, %v597_v61  ;;  %v548_v14 = vadd.f32 %v547_v9, %v546_v62  ;;  %v1012_v58 = vadd.f32 %v1288_v53, %v1286_v51 }
 0x107   :  { %v1344_v11 = vadd.f32 %v994_v63, %v505_v60  ;;  %v602_v29 = vsel %vm317_vm0, %v580_v16, 0.0  ;;  %v1015_v60 = vadd.f32 %v1292_v57, %v1290_v55 }
 0x108   :  { %v996_v12 = vpop.f32.mrf.mxu0  ;;  %v508_v13 = vpop.f32.mrf.mxu1  ;;  %v601_v20 = vadd.f32 %v600_v15, %v599_v7  ;;  %v550_v27 = vadd.f32 %v549_v21, %v548_v14 }
 0x109   :  { %v997_v17 = vadd.f32 %v996_v12, %v995_v4  ;;  %v581_v23 = vmul.f32 %v1344_v11, %v1344_v11  ;;  %v551_v30 = vsel %vm317_vm0, %v1344_v11, 0.0 }
 0x10a   :  { %v998_v18 = vpop.f32.mrf.mxu0  ;;  %v1044_v19 = vpop.f32.mrf.mxu1  ;;  %v603_v34 = vadd.f32 %v602_v29, %v601_v20  ;;  %v552_v42 = vadd.f32 %v551_v30, %v550_v27 }
 0x10b   :  { %v1353_v24 = vadd.f32 %v997_v17, %v508_v13  ;;  %v604_v37 = vsel %vm317_vm0, %v581_v23, 0.0  ;;  %v1385_v63 = vadd.f32 %v1044_v19, %v1012_v58 }
 0x10c   :  { %v999_v25 = vpop.f32.mrf.mxu0  ;;  %v521_v26 = vpop.f32.mrf.mxu1  ;;  %v605_v54 = vadd.f32 %v604_v37, %v603_v34 }
 0x10d   :  { %v1000_v28 = vadd.f32 %v999_v25, %v998_v18  ;;  %v582_v31 = vmul.f32 %v1353_v24, %v1353_v24  ;;  %v553_v38 = vsel %vm317_vm0, %v1353_v24, 0.0  ;;  %v1374_v43 = vadd.f32 %v1006_v36, %v521_v26 }
 0x10e   :  { %v1001_v32 = vpop.f32.mrf.mxu0  ;;  %v1045_v33 = vpop.f32.mrf.mxu1  ;;  %v554_v56 = vadd.f32 %v553_v38, %v552_v42  ;;  %v587_v13 = vmul.f32 %v1385_v63, %v1385_v63  ;;  %v563_v18 = vsel %vm317_vm0, %v1385_v63, 0.0 }
 0x10f   :  { %v1360_v35 = vadd.f32 %v1040_v48, %v1000_v28  ;;  %v606_v48 = vsel %vm317_vm0, %v582_v31, 0.0  ;;  %v585_v1 = vmul.f32 %v1374_v43, %v1374_v43  ;;  %v1395_v7 = vadd.f32 %v1045_v33, %v1015_v60 }
 0x110   :  { %v1002_v39 = vpop.f32.mrf.mxu0  ;;  %v524_v50 = vpop.f32.mrf.mxu1  ;;  %v607_v61 = vadd.f32 %v606_v48, %v605_v54  ;;  %v616_v25 = vsel %vm317_vm0, %v587_v13, 0.0 }
 0x111   :  { %v583_v46 = vmul.f32 %v1360_v35, %v1360_v35  ;;  %v555_v52 = vsel %vm317_vm0, %v1360_v35, 0.0  ;;  %v1003_v45 = vadd.f32 %v1002_v39, %v1001_v32  ;;  %v1381_v59 = vadd.f32 %v1009_v41, %v524_v50 }
 0x112   :  { %v556_v62 = vadd.f32 %v555_v52, %v554_v56  ;;  %v612_v14 = vsel %vm317_vm0, %v585_v1, 0.0  ;;  %v588_v19 = vmul.f32 %v1395_v7, %v1395_v7  ;;  %v565_v26 = vsel %vm317_vm0, %v1395_v7, 0.0  ;;  %v1420_v1 = vld [vmem:[%s1555_s4] sm:$0xff]  }
 0x113   :  { %v608_v47 = vsel %vm317_vm0, %v583_v46, 0.0  ;;  %v1379_v49 = vadd.f32 %v1041_v6, %v1003_v45  ;;  %v559_v6 = vsel %vm317_vm0, %v1374_v43, 0.0  ;;  %v586_v57 = vmul.f32 %v1381_v59, %v1381_v59 }
 0x114   :  { %v609_v53 = vadd.f32 %v608_v47, %v607_v61  ;;  %v561_v15 = vsel %vm317_vm0, %v1381_v59, 0.0  ;;  %v618_v29 = vsel %vm317_vm0, %v588_v19, 0.0  ;;  %v639_v47 = vlaneseq  ;;  %v631_v61 = vld [vmem:[%s1554_s2] sm:$0x1] }
 0x115   :  { %v557_v3 = vsel %vm317_vm0, %v1379_v49, 0.0  ;;  %v584_v51 = vmul.f32 %v1379_v49, %v1379_v49  ;;  %v614_v20 = vsel %vm317_vm0, %v586_v57, 0.0  ;;  %v635_v57 = vld [vmem:[%s1556_s3] sm:$0x1] }
 0x116   :  { %v558_v4 = vadd.f32 %v557_v3, %v556_v62  ;;  %v640_v60 = vshrl.u32 %v639_v47, 7  ;;  %v1425_v3 = vld [vmem:[%s1555_s4 + $0x8] sm:$0xff]  }
 0x117   :  { %v610_v55 = vsel %vm317_vm0, %v584_v51, 0.0  ;;  %v919_v13 = vunpack.c.l.bf16 %v1425_v3 }
 0x118   :  { %v611_v9 = vadd.f32 %v610_v55, %v609_v53  ;;  %v560_v12 = vadd.f32 %v559_v6, %v558_v4  ;;  %v641_v62 = vsub.s32 0, %v640_v60  ;;  %v1430_v53 = vld [vmem:[%s1555_s4 + $0x10] sm:$0xff]   ;;  %v1435_v6 = vld [vmem:[%s1555_s4 + $0x18] sm:$0xff]   ;;  %v1440_v55 = vld [vmem:[%s1555_s4 + $0x20] sm:$0xff]  }
 0x119   :  { %v923_v19 = vunpack.c.l.bf16 %v1430_v53 }
 0x11a   :  { %v562_v16 = vadd.f32 %v561_v15, %v560_v12  ;;  %v613_v17 = vadd.f32 %v612_v14, %v611_v9  ;;  %v915_v9 = vunpack.c.l.bf16 %v1420_v1  ;;  %v916_v12 = vunpack.c.h.bf16 %v1420_v1  ;;  %v1452_v15 = vld [vmem:[%s1555_s4 + $0x28] sm:$0xff]  }
 0x11b   :  { %v920_v14 = vunpack.c.h.bf16 %v1425_v3 }
 0x11c   :  { %v564_v21 = vadd.f32 %v563_v18, %v562_v16  ;;  %v615_v23 = vadd.f32 %v614_v20, %v613_v17  ;;  %v1457_v16 = vld [vmem:[%s1555_s4 + $0x30] sm:$0xff]   ;;  %v924_v20 = vunpack.c.h.bf16 %v1430_v53 }
 0x11e   :  { %v566_v27 = vadd.f32 %v565_v26, %v564_v21  ;;  %v617_v28 = vadd.f32 %v616_v25, %v615_v23  ;;  %v951_v21 = vld [vmem:[%s1555_s4 + $0x38] sm:$0xff]   ;;  %v927_v23 = vunpack.c.l.bf16 %v1435_v6  ;;  %v928_v25 = vunpack.c.h.bf16 %v1435_v6 }
 0x11f   :  { %v931_v26 = vunpack.c.l.bf16 %v1440_v55 }
 0x120   :  { %v567_v30 = vrot.slane %v566_v27, 4  ;;  %v619_v31 = vadd.f32 %v618_v29, %v617_v28  ;;  %v935_v29 = vunpack.c.l.bf16 %v1452_v15 }
 0x122   :  { %v568_v32 = vadd.f32 %v567_v30, %v566_v27  ;;  %v620_v33 = vrot.slane %v619_v31, 4  ;;  %v932_v27 = vunpack.c.h.bf16 %v1440_v55  ;;  %v936_v30 = vunpack.c.h.bf16 %v1452_v15 }
 0x124   :  { %v569_v34 = vrot.slane %v568_v32, 2  ;;  %v621_v36 = vadd.f32 %v620_v33, %v619_v31  ;;  %v939_v31 = vunpack.c.l.bf16 %v1457_v16  ;;  %v940_v33 = vunpack.c.h.bf16 %v1457_v16 }
 0x126   :  { %v570_v37 = vadd.f32 %v569_v34, %v568_v32  ;;  %v622_v38 = vrot.slane %v621_v36, 2  ;;  %v943_v34 = vunpack.c.l.bf16 %v951_v21 }
 0x128   :  { %v571_v39 = vrot.slane %v570_v37, 1  ;;  %v623_v41 = vadd.f32 %v622_v38, %v621_v36  ;;  %v944_v36 = vunpack.c.h.bf16 %v951_v21 }
 0x12a   :  { %v572_v42 = vadd.f32 %v571_v39, %v570_v37  ;;  %v624_v46 = vrot.slane %v623_v41, 1 }
 0x12c   :  { %v625_v50 = vadd.f32 %v624_v46, %v623_v41  ;;  %v626_v48 = vmul.f32 0.0078125, %v572_v42 }
 0x12e   :  { %v627_v52 = vmul.f32 0.0078125, %v625_v50  ;;  %v628_v45 = vmul.f32 %v626_v48, %v626_v48 }
 0x130   :  { %v629_v54 = vsub.f32 %v627_v52, %v628_v45 }
 0x132   :  { %v630_v56 = vmax.f32 %v629_v54, 0.0 }
 0x134   :  { %v632_v58 = vadd.f32 1e-05, %v630_v56 }
 0x136   :  { %1112 = vrsqrt.f32 %v632_v58 }
 0x143   :  { %v1113_v51 = vpop.eup %1112 }
 0x144   :  { %v634_v4 = vmul.f32 %v1113_v51, %v631_v61 }
 0x146   :  { %v636_v17 = vmul.f32 %v634_v4, %v626_v48  ;;  %v642_v18 = vrot.slane %v634_v4, %v641_v62 }
 0x148   :  { %v637_v28 = vsub.f32 %v635_v57, %v636_v17  ;;  %v644_v32 = vmul.f32 %v642_v18, %v1294_v0  ;;  %v645_v37 = vmul.f32 %v642_v18, %v1302_v10  ;;  %v646_v38 = vmul.f32 %v642_v18, %v1296_v5 }
 0x149   :  { %v647_v39 = vmul.f32 %v642_v18, %v1298_v8  ;;  %v648_v41 = vmul.f32 %v642_v18, %v1314_v22  ;;  %v649_v42 = vmul.f32 %v642_v18, %v1330_v44  ;;  %v650_v46 = vmul.f32 %v642_v18, %v1326_v40 }
 0x14a   :  { %v651_v50 = vmul.f32 %v642_v18, %v1339_v2  ;;  %v652_v0 = vmul.f32 %v642_v18, %v1344_v11  ;;  %v653_v48 = vmul.f32 %v642_v18, %v1353_v24  ;;  %v654_v52 = vmul.f32 %v642_v18, %v1360_v35 }
 0x14b   :  { %v655_v10 = vmul.f32 %v642_v18, %v1379_v49  ;;  %v664_v45 = vrot.slane %v637_v28, %v641_v62  ;;  %v656_v5 = vmul.f32 %v642_v18, %v1374_v43  ;;  %v657_v8 = vmul.f32 %v642_v18, %v1381_v59 }
 0x14c   :  { %v658_v22 = vmul.f32 %v642_v18, %v1385_v63  ;;  %v659_v44 = vmul.f32 %v642_v18, %v1395_v7 }
 0x14d   :  { %v666_v40 = vadd.f32 %v664_v45, %v644_v32  ;;  %v667_v54 = vadd.f32 %v664_v45, %v645_v37  ;;  %v668_v2 = vadd.f32 %v664_v45, %v646_v38  ;;  %v669_v56 = vadd.f32 %v664_v45, %v647_v39 }
 0x14e   :  { %v670_v11 = vadd.f32 %v664_v45, %v648_v41  ;;  %v671_v58 = vadd.f32 %v664_v45, %v649_v42  ;;  %v672_v24 = vadd.f32 %v664_v45, %v650_v46  ;;  %v673_v47 = vadd.f32 %v664_v45, %v651_v50 }
 0x14f   :  { %v674_v35 = vadd.f32 %v664_v45, %v652_v0  ;;  %v675_v60 = vadd.f32 %v664_v45, %v653_v48  ;;  %v676_v49 = vadd.f32 %v664_v45, %v654_v52  ;;  %v677_v61 = vadd.f32 %v664_v45, %v655_v10 }
 0x150   :  { %v678_v62 = vadd.f32 %v664_v45, %v656_v5  ;;  %v679_v43 = vadd.f32 %v664_v45, %v657_v8  ;;  %v680_v1 = vadd.f32 %v664_v45, %v658_v22  ;;  %v681_v59 = vadd.f32 %v664_v45, %v659_v44 }
 0x151   :  { %v714_v63 = vadd.f32 %v915_v9, %v666_v40  ;;  %v715_v3 = vadd.f32 %v916_v12, %v667_v54  ;;  %v716_v7 = vadd.f32 %v919_v13, %v668_v2  ;;  %v717_v51 = vadd.f32 %v920_v14, %v669_v56 }
 0x152   :  { %v718_v53 = vadd.f32 %v923_v19, %v670_v11  ;;  %v719_v4 = vadd.f32 %v924_v20, %v671_v58  ;;  %v720_v6 = vadd.f32 %v927_v23, %v672_v24  ;;  %v721_v55 = vadd.f32 %v928_v25, %v673_v47 }
 0x153   :  { %v722_v57 = vadd.f32 %v931_v26, %v674_v35  ;;  %v723_v15 = vadd.f32 %v932_v27, %v675_v60  ;;  %v724_v16 = vadd.f32 %v935_v29, %v676_v49  ;;  %v725_v17 = vadd.f32 %v936_v30, %v677_v61 }
 0x154   :  { %v726_v18 = vadd.f32 %v939_v31, %v678_v62  ;;  %v727_v21 = vadd.f32 %v940_v33, %v679_v43  ;;  %v728_v28 = vadd.f32 %v943_v34, %v680_v1  ;;  %v729_v32 = vadd.f32 %v944_v36, %v681_v59 }
 0x155   :  { %v730_v37 = vmax.f32 %v714_v63, 0.0  ;;  %v731_v38 = vmax.f32 %v715_v3, 0.0  ;;  %v732_v39 = vmax.f32 %v716_v7, 0.0  ;;  %v733_v41 = vmax.f32 %v717_v51, 0.0 }
 0x156   :  { %v734_v9 = vmax.f32 %v718_v53, 0.0  ;;  %v735_v12 = vmax.f32 %v719_v4, 0.0  ;;  %v736_v13 = vmax.f32 %v720_v6, 0.0  ;;  %v737_v14 = vmax.f32 %v721_v55, 0.0 }
 0x157   :  { %v738_v19 = vmax.f32 %v722_v57, 0.0  ;;  %v739_v20 = vmax.f32 %v723_v15, 0.0  ;;  %v740_v23 = vmax.f32 %v724_v16, 0.0  ;;  %v741_v25 = vmax.f32 %v725_v17, 0.0 }
 0x158   :  { %v742_v26 = vmax.f32 %v726_v18, 0.0  ;;  %v743_v27 = vmax.f32 %v727_v21, 0.0  ;;  %v744_v29 = vmax.f32 %v728_v28, 0.0  ;;  %v745_v30 = vmax.f32 %v729_v32, 0.0 }
 0x159   :  { %v897_v31 = vpack.c.bf16 %v730_v37, %v730_v37  ;;  %v898_v33 = vpack.c.bf16 %v731_v38, %v731_v38  ;;  %v899_v34 = vpack.c.bf16 %v732_v39, %v732_v39  ;;  %v900_v36 = vpack.c.bf16 %v733_v41, %v733_v41 }
 0x15a   :  { %v901_v42 = vpack.c.bf16 %v734_v9, %v734_v9  ;;  %v902_v46 = vpack.c.bf16 %v735_v12, %v735_v12  ;;  %v903_v50 = vpack.c.bf16 %v736_v13, %v736_v13  ;;  %v904_v0 = vpack.c.bf16 %v737_v14, %v737_v14 }
 0x15b   :  { %v905_v48 = vpack.c.bf16 %v738_v19, %v738_v19  ;;  %v906_v52 = vpack.c.bf16 %v739_v20, %v739_v20  ;;  %v907_v10 = vpack.c.bf16 %v740_v23, %v740_v23  ;;  %v908_v45 = vpack.c.bf16 %v741_v25, %v741_v25  ;;  %811 = vst.msk [vmem:[%s1557_s5] sm:$0xf] %vm810_vm1, %v897_v31 }
 0x15c   :  { %812 = vst.msk [vmem:[%s1557_s5 + $0x4] sm:$0xf] %vm810_vm1, %v898_v33  ;;  %813 = vst.msk [vmem:[%s1557_s5 + $0x8] sm:$0xf] %vm810_vm1, %v899_v34  ;;  %v909_v5 = vpack.c.bf16 %v742_v26, %v742_v26  ;;  %v910_v8 = vpack.c.bf16 %v743_v27, %v743_v27  ;;  %v911_v22 = vpack.c.bf16 %v744_v29, %v744_v29 }
 0x15d   :  { %814 = vst.msk [vmem:[%s1557_s5 + $0xc] sm:$0xf] %vm810_vm1, %v900_v36  ;;  %v912_v44 = vpack.c.bf16 %v745_v30, %v745_v30  ;;  %815 = vst.msk [vmem:[%s1557_s5 + $0x10] sm:$0xf] %vm810_vm1, %v901_v42 }
 0x15e   :  { %816 = vst.msk [vmem:[%s1557_s5 + $0x14] sm:$0xf] %vm810_vm1, %v902_v46  ;;  %817 = vst.msk [vmem:[%s1557_s5 + $0x18] sm:$0xf] %vm810_vm1, %v903_v50 }
 0x15f   :  { %818 = vst.msk [vmem:[%s1557_s5 + $0x1c] sm:$0xf] %vm810_vm1, %v904_v0  ;;  %819 = vst.msk [vmem:[%s1557_s5 + $0x20] sm:$0xf] %vm810_vm1, %v905_v48 }
 0x160   :  { %820 = vst.msk [vmem:[%s1557_s5 + $0x24] sm:$0xf] %vm810_vm1, %v906_v52  ;;  %821 = vst.msk [vmem:[%s1557_s5 + $0x28] sm:$0xf] %vm810_vm1, %v907_v10 }
 0x161   :  { %822 = vst.msk [vmem:[%s1557_s5 + $0x2c] sm:$0xf] %vm810_vm1, %v908_v45  ;;  %823 = vst.msk [vmem:[%s1557_s5 + $0x30] sm:$0xf] %vm810_vm1, %v909_v5 }
 0x162   :  { %824 = vst.msk [vmem:[%s1557_s5 + $0x34] sm:$0xf] %vm810_vm1, %v910_v8  ;;  %825 = vst.msk [vmem:[%s1557_s5 + $0x38] sm:$0xf] %vm810_vm1, %v911_v22 }
 0x163   :  { %826 = vst.msk [vmem:[%s1557_s5 + $0x3c] sm:$0xf] %vm810_vm1, %v912_v44 }

// kernel: _lambda_.16
= control target key start
LH: loop header
LB: loop body
LE: loop exit
PB: predicated region body
PF: predicated region fallthrough
CT: control target
= control target key end

     0   :  { %vm200_vm0 = vcmask 261120   ;;  %vm305_vm1 = vcmask 523264   ;;  %vm388_vm2 = vcmask 519168   ;;  %s622_s1 = inlined_call_operand.vmem [shape: bf16[288,64], index: 1, kind: input, shape index: {}]   ;;  %s623_s0 = inlined_call_operand.vmem [shape: bf16[32,288], index: 0, kind: input, shape index: {}]   ;;  %s624_s2 = inlined_call_operand.vmem [shape: f32[1,64], index: 2, kind: input, shape index: {}]   ;;  %s625_s3 = inlined_call_operand.vmem [shape: f32[1,64], index: 3, kind: input, shape index: {}]   ;;  %s626_s4 = inlined_call_operand.vmem [shape: bf16[32,64], index: 4, kind: output, shape index: {}]  }
   0x1   :  { %v471_v0 = vld [vmem:[%s622_s1 + $0x78] sm:$0xff]   ;;  %v473_v2 = vld [vmem:[%s622_s1 + $0x70] sm:$0xff]   ;;  %v475_v4 = vld [vmem:[%s622_s1 + $0x68] sm:$0xff]  }
   0x2   :  { %v472_v1 = vld [vmem:[%s622_s1 + $0x38] sm:$0xff]   ;;  %431 = vmatprep.subr.bf16.mxu0 %v471_v0  ;;  %v474_v3 = vld [vmem:[%s622_s1 + $0x30] sm:$0xff]   ;;  %v476_v5 = vld [vmem:[%s622_s1 + $0x28] sm:$0xff]  }
   0x3   :  { %432 = vmatpush3.bf16.msra.mxu0 %v472_v1  ;;  %v477_v6 = vld [vmem:[%s622_s1 + $0x60] sm:$0xff]   ;;  %v479_v8 = vld [vmem:[%s622_s1 + $0x58] sm:$0xff]   ;;  %v484_v9 = vld [vmem:[%s622_s1 + $0x88] sm:$0xff]  }
   0x4   :  { %433 = vmatprep.subr.bf16.mxu0 %v473_v2  ;;  %v478_v7 = vld [vmem:[%s622_s1 + $0x20] sm:$0xff]   ;;  %v480_v10 = vld [vmem:[%s622_s1 + $0x18] sm:$0xff]   ;;  %v481_v11 = vld [vmem:[%s622_s1 + $0x50] sm:$0xff]   ;;  %463 = vmatprep.subr.bf16.mxu1 %v484_v9 }
   0x5   :  { %464 = vmatpush3.bf16.msra.mxu1 %v484_v9  ;;  %v487_v12 = vld [vmem:[%s622_s1 + $0x80] sm:$0xff]   ;;  %v482_v13 = vld [vmem:[%s622_s1 + $0x10] sm:$0xff]   ;;  %v483_v14 = vld [vmem:[%s622_s1 + $0x48] sm:$0xff]  }
   0x6   :  { %465 = vmatprep.subr.bf16.mxu1 %v487_v12  ;;  %v491_v15 = vld [vmem:[%s623_s0 + $0x4] ss:$12 sps:$4 sm:$0xff]   ;;  %v492_v16 = vld [vmem:[%s623_s0 + $0x8] ss:$12 sps:$4 sm:$0xff]   ;;  %v493_v17 = vld [vmem:[%s623_s0 + $0x20] ss:$12 sps:$4 sm:$0xff]  }
   0x7   :  { %434 = vmatpush3.bf16.msra.mxu0 %v474_v3  ;;  %239 = vmatprep.mubr.bf16.mxu0 %v491_v15  ;;  %v485_v18 = vld [vmem:[%s622_s1 + $0x8] sm:$0xff]   ;;  %v486_v19 = vld [vmem:[%s622_s1 + $0x40] sm:$0xff]  }
   0x8   :  { %435 = vmatprep.subr.bf16.mxu0 %v475_v4  ;;  %467 = vmatprep.mubr.msk.bf16.mxu1 %vm200_vm0, %v492_v16  ;;  %v488_v20 = vld [vmem:[%s622_s1] sm:$0xff]   ;;  %v494_v22 = vld [vmem:[%s623_s0 + $0x1c] ss:$12 sps:$4 sm:$0xff]   ;;  %v349_v16 = vlaneseq }
   0x9   :  { %466 = vmatpush3.bf16.msra.mxu1 %v487_v12  ;;  %v489_v21 = vld [vmem:[%s623_s0] ss:$12 sps:$4 sm:$0xff]   ;;  %v496_v23 = vld [vmem:[%s623_s0 + $0x18] ss:$12 sps:$4 sm:$0xff]  }
   0xb   :  { %436 = vmatpush3.bf16.msra.mxu0 %v476_v5 }
   0xc   :  { %437 = vmatprep.subr.bf16.mxu0 %v477_v6  ;;  %468 = vmatmul.mubr.msk.bf16.vlgmr.msra.gmra.mxu1 %vm200_vm0, %v493_v17  ;;  %v350_v17 = vshrl.u32 %v349_v16, 7 }
   0xf   :  { %438 = vmatpush3.bf16.msra.mxu0 %v478_v7 }
  0x10   :  { %439 = vmatprep.subr.bf16.mxu0 %v479_v8 }
  0x13   :  { %440 = vmatpush3.bf16.msra.mxu0 %v480_v10 }
  0x14   :  { %441 = vmatprep.subr.bf16.mxu0 %v481_v11 }
  0x17   :  { %442 = vmatpush3.bf16.msra.mxu0 %v482_v13 }
  0x18   :  { %443 = vmatprep.subr.bf16.mxu0 %v483_v14 }
  0x1b   :  { %444 = vmatpush3.bf16.msra.mxu0 %v485_v18  ;;  %v341_v18 = vld [vmem:[%s624_s2] sm:$0x1] }
  0x1c   :  { %445 = vmatprep.subr.bf16.mxu0 %v486_v19  ;;  %v351_v19 = vsub.s32 0, %v350_v17 }
  0x1f   :  { %446 = vmatpush3.bf16.msra.mxu0 %v488_v20 }
  0x22   :  { %240 = vmatmul.mubr.bf16.vlgmr.msra.gmra.mxu0 %v489_v21 }
  0x23   :  { %247 = vmatprep.mubr.bf16.mxu0 %v494_v22  ;;  %v345_v22 = vld [vmem:[%s625_s3] sm:$0x1] }
  0x2a   :  { %248 = vmatmul.mubr.bf16.gmra.mxu0 %v496_v23 }
  0xcc   :  { %v469_v24 = vpop.f32.mrf.mxu1 }
  0xce   :  { %v290_v26 = vpop.f32.mrf.mxu1 }
  0xd0   :  { %v470_v29 = vpop.f32.mrf.mxu1 }
  0xd2   :  { %v293_v33 = vpop.f32.mrf.mxu1 }
  0xe2   :  { %v447_v25 = vpop.f32.mrf.mxu0 }
  0xe4   :  { %v448_v27 = vpop.f32.mrf.mxu0 }
  0xe5   :  { %v449_v30 = vadd.f32 %v448_v27, %v447_v25 }
  0xe6   :  { %v450_v28 = vpop.f32.mrf.mxu0 }
  0xe7   :  { %v291_v35 = vadd.f32 %v449_v30, %v290_v26 }
  0xe8   :  { %v451_v31 = vpop.f32.mrf.mxu0 }
  0xe9   :  { %v452_v32 = vadd.f32 %v451_v31, %v450_v28  ;;  %v319_v41 = vmul.f32 %v291_v35, %v291_v35  ;;  %v306_v44 = vsel %vm305_vm1, %v291_v35, 0.0 }
  0xea   :  { %v453_v34 = vpop.f32.mrf.mxu0 }
  0xeb   :  { %v294_v36 = vadd.f32 %v452_v32, %v293_v33  ;;  %v323_v51 = vsel %vm305_vm1, %v319_v41, 0.0 }
  0xec   :  { %v454_v37 = vpop.f32.mrf.mxu0 }
  0xed   :  { %v320_v38 = vmul.f32 %v294_v36, %v294_v36  ;;  %v455_v39 = vadd.f32 %v454_v37, %v453_v34  ;;  %v307_v42 = vsel %vm305_vm1, %v294_v36, 0.0 }
  0xee   :  { %v456_v40 = vpop.f32.mrf.mxu0  ;;  %v308_v50 = vadd.f32 %v307_v42, %v306_v44 }
  0xef   :  { %v299_v43 = vadd.f32 %v469_v24, %v455_v39  ;;  %v324_v46 = vsel %vm305_vm1, %v320_v38, 0.0 }
  0xf0   :  { %v457_v45 = vpop.f32.mrf.mxu0  ;;  %v325_v54 = vadd.f32 %v324_v46, %v323_v51 }
  0xf1   :  { %v309_v47 = vsel %vm305_vm1, %v299_v43, 0.0  ;;  %v321_v48 = vmul.f32 %v299_v43, %v299_v43  ;;  %v458_v49 = vadd.f32 %v457_v45, %v456_v40 }
  0xf2   :  { %v310_v55 = vadd.f32 %v309_v47, %v308_v50 }
  0xf3   :  { %v326_v52 = vsel %vm305_vm1, %v321_v48, 0.0  ;;  %v302_v53 = vadd.f32 %v470_v29, %v458_v49 }
  0xf4   :  { %v327_v58 = vadd.f32 %v326_v52, %v325_v54 }
  0xf5   :  { %v311_v56 = vsel %vm305_vm1, %v302_v53, 0.0  ;;  %v322_v57 = vmul.f32 %v302_v53, %v302_v53 }
  0xf6   :  { %v312_v59 = vadd.f32 %v311_v56, %v310_v55 }
  0xf7   :  { %v328_v60 = vsel %vm305_vm1, %v322_v57, 0.0 }
  0xf8   :  { %v313_v61 = vrot.slane %v312_v59, 4  ;;  %v329_v62 = vadd.f32 %v328_v60, %v327_v58 }
  0xfa   :  { %v314_v63 = vadd.f32 %v313_v61, %v312_v59  ;;  %v330_v0 = vrot.slane %v329_v62, 4 }
  0xfc   :  { %v315_v1 = vrot.slane %v314_v63, 2  ;;  %v331_v2 = vadd.f32 %v330_v0, %v329_v62 }
  0xfe   :  { %v316_v3 = vadd.f32 %v315_v1, %v314_v63  ;;  %v332_v4 = vrot.slane %v331_v2, 2 }
 0x100   :  { %v317_v5 = vrot.slane %v316_v3, 1  ;;  %v333_v6 = vadd.f32 %v332_v4, %v331_v2 }
 0x102   :  { %v318_v7 = vadd.f32 %v317_v5, %v316_v3  ;;  %v334_v8 = vrot.slane %v333_v6, 1 }
 0x104   :  { %v335_v9 = vadd.f32 %v334_v8, %v333_v6  ;;  %v336_v10 = vmul.f32 0.03125, %v318_v7 }
 0x106   :  { %v337_v11 = vmul.f32 0.03125, %v335_v9  ;;  %v338_v12 = vmul.f32 %v336_v10, %v336_v10 }
 0x108   :  { %v339_v13 = vsub.f32 %v337_v11, %v338_v12 }
 0x10a   :  { %v340_v14 = vmax.f32 %v339_v13, 0.0 }
 0x10c   :  { %v342_v15 = vadd.f32 1e-05, %v340_v14 }
 0x10e   :  { %497 = vrsqrt.f32 %v342_v15 }
 0x11b   :  { %v498_v20 = vpop.eup %497 }
 0x11c   :  { %v344_v21 = vmul.f32 %v498_v20, %v341_v18 }
 0x11e   :  { %v346_v23 = vmul.f32 %v344_v21, %v336_v10  ;;  %v352_v24 = vrot.slane %v344_v21, %v351_v19 }
 0x120   :  { %v347_v25 = vsub.f32 %v345_v22, %v346_v23  ;;  %v354_v26 = vmul.f32 %v352_v24, %v291_v35  ;;  %v355_v27 = vmul.f32 %v352_v24, %v294_v36  ;;  %v356_v28 = vmul.f32 %v352_v24, %v299_v43 }
 0x121   :  { %v357_v29 = vmul.f32 %v352_v24, %v302_v53 }
 0x122   :  { %v362_v30 = vrot.slane %v347_v25, %v351_v19 }
 0x124   :  { %v364_v31 = vadd.f32 %v362_v30, %v354_v26  ;;  %v365_v32 = vadd.f32 %v362_v30, %v355_v27  ;;  %v366_v33 = vadd.f32 %v362_v30, %v356_v28  ;;  %v367_v34 = vadd.f32 %v362_v30, %v357_v29 }
 0x126   :  { %v368_v37 = vmax.f32 %v364_v31, 0.0  ;;  %v369_v38 = vmax.f32 %v365_v32, 0.0  ;;  %v370_v39 = vmax.f32 %v366_v33, 0.0  ;;  %v371_v40 = vmax.f32 %v367_v34, 0.0 }
 0x128   :  { %v427_v41 = vpack.c.bf16 %v368_v37, %v368_v37  ;;  %v428_v42 = vpack.c.bf16 %v369_v38, %v369_v38  ;;  %v429_v44 = vpack.c.bf16 %v370_v39, %v370_v39  ;;  %v430_v45 = vpack.c.bf16 %v371_v40, %v371_v40 }
 0x12a   :  { %389 = vst.msk [vmem:[%s626_s4] sm:$0xf] %vm388_vm2, %v427_v41  ;;  %390 = vst.msk [vmem:[%s626_s4 + $0x4] sm:$0xf] %vm388_vm2, %v428_v42 }
 0x12b   :  { %391 = vst.msk [vmem:[%s626_s4 + $0x8] sm:$0xf] %vm388_vm2, %v429_v44  ;;  %392 = vst.msk [vmem:[%s626_s4 + $0xc] sm:$0xf] %vm388_vm2, %v430_v45 }

// kernel: _lambda_.19
= control target key start
LH: loop header
LB: loop body
LE: loop exit
PB: predicated region body
PF: predicated region fallthrough
CT: control target
= control target key end

     0   :  { %v216_v1 = vmov 0.0   ;;  %vm217_vm0 = vmmov 0   ;;  %vm23_vm1 = vcmask 523264   ;;  %s280_s0 = inlined_call_operand.vmem [shape: bf16[2,16,64], index: 0, kind: input, shape index: {}]   ;;  %s281_s1 = inlined_call_operand.vmem [shape: f32[64,10], index: 1, kind: input, shape index: {}]   ;;  %s282_s2 = inlined_call_operand.vmem [shape: f32[1,10], index: 2, kind: input, shape index: {}]   ;;  %s283_s3 = inlined_call_operand.hbm [shape: f32[2,10], index: 3, kind: output, shape index: {}]  }
   0x1   :  { %v52_v0 = vld [vmem:[%s281_s1 + $0x38] sm:$0xff]  ;;  %172 = vmatprep.subr.mxu0 %v216_v1  ;;  %v51_v2 = vld [vmem:[%s281_s1 + $0x30] sm:$0xff]  ;;  %188 = vmatprep.mubr.msk.f32.mxu0 %vm217_vm0, %v216_v1  ;;  %v155_v3 = vld [vmem:[%s280_s0] sm:$0xff]  }
   0x2   :  { %173 = vmatpush3.msra.mxu0 %v52_v0  ;;  %v50_v4 = vld [vmem:[%s281_s1 + $0x28] sm:$0xff]  ;;  %v156_v5 = vunpack.c.l.bf16 %v155_v3  ;;  %v157_v6 = vunpack.c.h.bf16 %v155_v3 }
   0x3   :  { %174 = vmatprep.subr.mxu0 %v216_v1  ;;  %v162_v7 = vld [vmem:[%s280_s0 + $0x8] sm:$0xff]  }
   0x4   :  { %8 = vsyncpa [#allocation3], 0  ;;  %175 = vmatpush3.msra.mxu0 %v51_v2  ;;  %v160_v8 = vunpack.c.l.bf16 %v162_v7  ;;  %v161_v9 = vunpack.c.h.bf16 %v162_v7  ;;  %v49_v10 = vld [vmem:[%s281_s1 + $0x20] sm:$0xff]  ;;  %v24_v11 = vsel %vm23_vm1, %v156_v5, 0.0  ;;  %v25_v12 = vsel %vm23_vm1, %v157_v6, 0.0  ;;  %v48_v16 = vld [vmem:[%s281_s1 + $0x18] sm:$0xff] }
   0x5   :  { %176 = vmatprep.subr.mxu0 %v216_v1  ;;  %v26_v13 = vadd.f32 %v25_v12, %v24_v11  ;;  %v47_v19 = vld [vmem:[%s281_s1 + $0x10] sm:$0xff]  ;;  %v46_v22 = vld [vmem:[%s281_s1 + $0x8] sm:$0xff]  ;;  %v45_v25 = vld [vmem:[%s281_s1] sm:$0xff]  ;;  %vm62_vm2 = vcmask 1041409   ;;  %s218_s1 = smov [#allocation2]   ;;  %vm136_vm3 = vcmask 74752  }
   0x6   :  { %177 = vmatpush3.msra.mxu0 %v50_v4  ;;  %v33_v14 = vsel %vm23_vm1, %v160_v8, 0.0  ;;  %v34_v15 = vsel %vm23_vm1, %v161_v9, 0.0  ;;  %v152_v36 = vld [vmem:[%s282_s2] ss:$0 sm:$0xff]  ;;  %s144_s6 = sshll.u32 %s218_s1, 4  ;;  %s145_s6 = int_to_ptr.vmem [resolvable:$true] %s144_s6 }
   0x7   :  { %178 = vmatprep.subr.mxu0 %v216_v1  ;;  %v35_v17 = vadd.f32 %v34_v15, %v33_v14  ;;  %v27_v18 = vrot.slane %v26_v13, 4  ;;  %s194_s7 = scalar_lea.vmem %s145_s6, 32  ;;  %p199_p1 = scmp.lt.s32.totalorder %s145_s6, %s145_s6 }
   0x8   :  { %179 = vmatpush3.msra.mxu0 %v49_v10  ;;  %p195_p0 = scmp.ne.s32.totalorder %s145_s6, %s194_s7  ;;  %p200_p2 = scmp.lt.s32.totalorder %s194_s7, %s194_s7 }
   0x9   :  { %180 = vmatprep.subr.mxu0 %v216_v1  ;;  %v36_v20 = vrot.slane %v35_v17, 4  ;;  %v28_v21 = vadd.f32 %v27_v18, %v26_v13 }
   0xa   :  { %181 = vmatpush3.msra.mxu0 %v48_v16  ;;  %p201_p3 = por %p200_p2, %p199_p1 }
   0xb   :  { %182 = vmatprep.subr.mxu0 %v216_v1  ;;  %v37_v23 = vadd.f32 %v36_v20, %v35_v17  ;;  %v29_v24 = vrot.slane %v28_v21, 2 }
   0xc   :  { %183 = vmatpush3.msra.mxu0 %v47_v19  ;;  %p202_p4 = pnand %p201_p3, %p195_p0 }
   0xd   :  { %184 = vmatprep.subr.mxu0 %v216_v1  ;;  %v38_v26 = vrot.slane %v37_v23, 2  ;;  %v30_v27 = vadd.f32 %v29_v24, %v28_v21 }
   0xe   :  { %185 = vmatpush3.msra.mxu0 %v46_v22 }
   0xf   :  { %186 = vmatprep.subr.mxu0 %v216_v1  ;;  %v39_v28 = vadd.f32 %v38_v26, %v37_v23  ;;  %v31_v29 = vrot.slane %v30_v27, 1 }
  0x10   :  { %187 = vmatpush3.msra.mxu0 %v45_v25 }
  0x11   :  { %v40_v30 = vrot.slane %v39_v28, 1  ;;  %v32_v31 = vadd.f32 %v31_v29, %v30_v27 }
  0x13   :  { %v41_v32 = vadd.f32 %v40_v30, %v39_v28  ;;  %v43_v33 = vmul.f32 0.0625, %v32_v31 }
  0x15   :  { %v44_v34 = vmul.f32 0.0625, %v41_v32 }
  0x17   :  { %v63_v35 = vsel %vm62_vm2, %v44_v34, %v43_v33 }
  0x18   :  { %189 = vmatmul.mubr.msk.f32.vlgmr.msra.gmra.mxu0 %vm23_vm1, %v63_v35 }
  0xd8   :  { %v132_v37 = vpop.f32.mrf.mxu0 }
  0xd9   :  { %v133_v38 = vadd.f32 %v152_v36, %v132_v37 }
  0xda   :  { %v190_v39 = vpop.f32.mrf.mxu0 }
  0xdb   :  { %137 = vst.msk [vmem:[#allocation2] sm:$0x3] %vm136_vm3, %v133_v38 }
  0xdc   :  { %205 = shalt.err (!%p202_p4)
}
  0xdd   :  { %147 = dma.vmem_to_hbm [thread:$0]  %s145_s6, 32, %s283_s3, [#allocation3]  }
  0xde   :  { %214 = dma.done.wait [#allocation3], 32  }
  0xdf   :  { %215 = vsyncadd [#allocation3], 4294967264 }
  0xe0   :  { %151 = vsyncpa [#allocation3], 1 }

// kernel: _lambda_.17
= control target key start
LH: loop header
LB: loop body
LE: loop exit
PB: predicated region body
PF: predicated region fallthrough
CT: control target
= control target key end

     0   :  { %vm48_vm0 = vcmask 261120   ;;  %vm104_vm1 = vcmask 523264   ;;  %v148_v44 = vlaneseq  ;;  %vm183_vm2 = vcmask 519168   ;;  %s287_s1 = inlined_call_operand.vmem [shape: bf16[32,64], index: 1, kind: input, shape index: {}]   ;;  %s288_s0 = inlined_call_operand.vmem [shape: bf16[32,32], index: 0, kind: input, shape index: {}]   ;;  %s289_s2 = inlined_call_operand.vmem [shape: f32[1,64], index: 2, kind: input, shape index: {}]   ;;  %s290_s3 = inlined_call_operand.vmem [shape: f32[1,64], index: 3, kind: input, shape index: {}]   ;;  %s291_s4 = inlined_call_operand.vmem [shape: bf16[32,64], index: 4, kind: output, shape index: {}]  }
   0x1   :  { %v218_v0 = vld [vmem:[%s287_s1 + $0x8] sm:$0xff]   ;;  %v219_v1 = vld [vmem:[%s287_s1] sm:$0xff]  }
   0x2   :  { %210 = vmatprep.subr.bf16.mxu0 %v218_v0  ;;  %v220_v2 = vld [vmem:[%s288_s0] sm:$0xff]   ;;  %v221_v3 = vld [vmem:[%s288_s0 + $0x8] sm:$0xff]   ;;  %v149_v45 = vshrl.u32 %v148_v44, 7 }
   0x3   :  { %211 = vmatpush3.bf16.msra.mxu0 %v218_v0  ;;  %214 = vmatprep.mubr.msk.bf16.mxu0 %vm48_vm0, %v220_v2  ;;  %v140_v46 = vld [vmem:[%s289_s2] sm:$0x1] }
   0x4   :  { %212 = vmatprep.subr.bf16.mxu0 %v219_v1  ;;  %v150_v47 = vsub.s32 0, %v149_v45  ;;  %v144_v50 = vld [vmem:[%s290_s3] sm:$0x1] }
   0x7   :  { %213 = vmatpush3.bf16.msra.mxu0 %v219_v1 }
   0xa   :  { %215 = vmatmul.mubr.msk.bf16.vlgmr.msra.gmra.mxu0 %vm48_vm0, %v221_v3 }
  0xca   :  { %v216_v4 = vpop.f32.mrf.mxu0 }
  0xcb   :  { %v120_v9 = vmul.f32 %v216_v4, %v216_v4  ;;  %v108_v14 = vsel %vm104_vm1, %v216_v4, 0.0 }
  0xcc   :  { %v89_v5 = vpop.f32.mrf.mxu0 }
  0xcd   :  { %v118_v7 = vmul.f32 %v89_v5, %v89_v5  ;;  %v105_v10 = vsel %vm104_vm1, %v89_v5, 0.0  ;;  %v125_v20 = vsel %vm104_vm1, %v120_v9, 0.0 }
  0xce   :  { %v217_v6 = vpop.f32.mrf.mxu0 }
  0xcf   :  { %v122_v15 = vsel %vm104_vm1, %v118_v7, 0.0  ;;  %v121_v16 = vmul.f32 %v217_v6, %v217_v6  ;;  %v110_v21 = vsel %vm104_vm1, %v217_v6, 0.0 }
  0xd0   :  { %v92_v8 = vpop.f32.mrf.mxu0 }
  0xd1   :  { %v106_v11 = vsel %vm104_vm1, %v92_v8, 0.0  ;;  %v119_v12 = vmul.f32 %v92_v8, %v92_v8  ;;  %v127_v24 = vsel %vm104_vm1, %v121_v16, 0.0 }
  0xd2   :  { %v107_v13 = vadd.f32 %v106_v11, %v105_v10 }
  0xd3   :  { %v123_v17 = vsel %vm104_vm1, %v119_v12, 0.0 }
  0xd4   :  { %v109_v18 = vadd.f32 %v108_v14, %v107_v13  ;;  %v124_v19 = vadd.f32 %v123_v17, %v122_v15 }
  0xd6   :  { %v111_v22 = vadd.f32 %v110_v21, %v109_v18  ;;  %v126_v23 = vadd.f32 %v125_v20, %v124_v19 }
  0xd8   :  { %v112_v25 = vrot.slane %v111_v22, 4  ;;  %v128_v26 = vadd.f32 %v127_v24, %v126_v23 }
  0xda   :  { %v113_v27 = vadd.f32 %v112_v25, %v111_v22  ;;  %v129_v28 = vrot.slane %v128_v26, 4 }
  0xdc   :  { %v114_v29 = vrot.slane %v113_v27, 2  ;;  %v130_v30 = vadd.f32 %v129_v28, %v128_v26 }
  0xde   :  { %v115_v31 = vadd.f32 %v114_v29, %v113_v27  ;;  %v131_v32 = vrot.slane %v130_v30, 2 }
  0xe0   :  { %v116_v33 = vrot.slane %v115_v31, 1  ;;  %v132_v34 = vadd.f32 %v131_v32, %v130_v30 }
  0xe2   :  { %v117_v35 = vadd.f32 %v116_v33, %v115_v31  ;;  %v133_v36 = vrot.slane %v132_v34, 1 }
  0xe4   :  { %v134_v37 = vadd.f32 %v133_v36, %v132_v34  ;;  %v135_v38 = vmul.f32 0.03125, %v117_v35 }
  0xe6   :  { %v136_v39 = vmul.f32 0.03125, %v134_v37  ;;  %v137_v40 = vmul.f32 %v135_v38, %v135_v38 }
  0xe8   :  { %v138_v41 = vsub.f32 %v136_v39, %v137_v40 }
  0xea   :  { %v139_v42 = vmax.f32 %v138_v41, 0.0 }
  0xec   :  { %v141_v43 = vadd.f32 1e-05, %v139_v42 }
  0xee   :  { %222 = vrsqrt.f32 %v141_v43 }
  0xfb   :  { %v223_v48 = vpop.eup %222 }
  0xfc   :  { %v143_v49 = vmul.f32 %v223_v48, %v140_v46 }
  0xfe   :  { %v145_v51 = vmul.f32 %v143_v49, %v135_v38  ;;  %v151_v52 = vrot.slane %v143_v49, %v150_v47 }
 0x100   :  { %v146_v53 = vsub.f32 %v144_v50, %v145_v51  ;;  %v153_v54 = vmul.f32 %v151_v52, %v89_v5  ;;  %v154_v55 = vmul.f32 %v151_v52, %v92_v8  ;;  %v155_v56 = vmul.f32 %v216_v4, %v151_v52 }
 0x101   :  { %v156_v57 = vmul.f32 %v217_v6, %v151_v52 }
 0x102   :  { %v161_v58 = vrot.slane %v146_v53, %v150_v47 }
 0x104   :  { %v163_v59 = vadd.f32 %v161_v58, %v153_v54  ;;  %v164_v60 = vadd.f32 %v161_v58, %v154_v55  ;;  %v165_v61 = vadd.f32 %v161_v58, %v155_v56  ;;  %v166_v62 = vadd.f32 %v161_v58, %v156_v57 }
 0x106   :  { %v202_v63 = vpack.c.bf16 %v163_v59, %v163_v59  ;;  %v203_v0 = vpack.c.bf16 %v164_v60, %v164_v60  ;;  %v204_v1 = vpack.c.bf16 %v165_v61, %v165_v61  ;;  %v205_v2 = vpack.c.bf16 %v166_v62, %v166_v62 }
 0x108   :  { %184 = vst.msk [vmem:[%s291_s4] sm:$0xf] %vm183_vm2, %v202_v63  ;;  %185 = vst.msk [vmem:[%s291_s4 + $0x4] sm:$0xf] %vm183_vm2, %v203_v0 }
 0x109   :  { %186 = vst.msk [vmem:[%s291_s4 + $0x8] sm:$0xf] %vm183_vm2, %v204_v1  ;;  %187 = vst.msk [vmem:[%s291_s4 + $0xc] sm:$0xf] %vm183_vm2, %v205_v2 }

// kernel: _lambda_.18
= control target key start
LH: loop header
LB: loop body
LE: loop exit
PB: predicated region body
PF: predicated region fallthrough
CT: control target
= control target key end

     0   :  { %vm371_vm0 = vcmask 523264   ;;  %vm619_vm1 = vcmask 519168   ;;  %s1027_s1 = inlined_call_operand.vmem [shape: bf16[576,64], index: 1, kind: input, shape index: {}]   ;;  %s1028_s0 = inlined_call_operand.vmem [shape: bf16[32,576], index: 0, kind: input, shape index: {}]   ;;  %s1029_s2 = inlined_call_operand.vmem [shape: f32[1,64], index: 2, kind: input, shape index: {}]   ;;  %s1030_s3 = inlined_call_operand.vmem [shape: f32[1,64], index: 3, kind: input, shape index: {}]   ;;  %s1031_s4 = inlined_call_operand.vmem [shape: bf16[32,64], index: 4, kind: input, shape index: {}]   ;;  %s1032_s5 = inlined_call_operand.vmem [shape: bf16[32,64], index: 5, kind: output, shape index: {}]  }
   0x1   :  { %v767_v0 = vld [vmem:[%s1027_s1 + $0x78] sm:$0xff]   ;;  %v771_v4 = vld [vmem:[%s1027_s1 + $0x70] sm:$0xff]   ;;  %v775_v8 = vld [vmem:[%s1027_s1 + $0x68] sm:$0xff]  }
   0x2   :  { %v768_v1 = vld [vmem:[%s1027_s1 + $0xf8] sm:$0xff]   ;;  %693 = vmatprep.subr.bf16.mxu0 %v767_v0  ;;  %v772_v5 = vld [vmem:[%s1027_s1 + $0xf0] sm:$0xff]   ;;  %v776_v9 = vld [vmem:[%s1027_s1 + $0xe8] sm:$0xff]  }
   0x3   :  { %v769_v2 = vld [vmem:[%s1027_s1 + $0x38] sm:$0xff]   ;;  %721 = vmatprep.subr.bf16.mxu1 %v768_v1  ;;  %v773_v6 = vld [vmem:[%s1027_s1 + $0x30] sm:$0xff]   ;;  %v777_v10 = vld [vmem:[%s1027_s1 + $0x28] sm:$0xff]  }
   0x4   :  { %v770_v3 = vld [vmem:[%s1027_s1 + $0xb8] sm:$0xff]   ;;  %694 = vmatpush3.bf16.msra.mxu0 %v769_v2  ;;  %v774_v7 = vld [vmem:[%s1027_s1 + $0xb0] sm:$0xff]   ;;  %v778_v11 = vld [vmem:[%s1027_s1 + $0xa8] sm:$0xff]  }
   0x5   :  { %722 = vmatpush3.bf16.msra.mxu1 %v770_v3  ;;  %695 = vmatprep.subr.bf16.mxu0 %v771_v4  ;;  %v779_v12 = vld [vmem:[%s1027_s1 + $0x60] sm:$0xff]   ;;  %v783_v16 = vld [vmem:[%s1027_s1 + $0x58] sm:$0xff]   ;;  %v787_v20 = vld [vmem:[%s1027_s1 + $0x50] sm:$0xff]  }
   0x6   :  { %723 = vmatprep.subr.bf16.mxu1 %v772_v5  ;;  %v780_v13 = vld [vmem:[%s1027_s1 + $0xe0] sm:$0xff]   ;;  %v784_v17 = vld [vmem:[%s1027_s1 + $0xd8] sm:$0xff]   ;;  %v788_v21 = vld [vmem:[%s1027_s1 + $0xd0] sm:$0xff]  }
   0x7   :  { %v781_v14 = vld [vmem:[%s1027_s1 + $0x20] sm:$0xff]   ;;  %v785_v18 = vld [vmem:[%s1027_s1 + $0x18] sm:$0xff]   ;;  %v789_v22 = vld [vmem:[%s1027_s1 + $0x10] sm:$0xff]  }
   0x8   :  { %696 = vmatpush3.bf16.msra.mxu0 %v773_v6  ;;  %v782_v15 = vld [vmem:[%s1027_s1 + $0xa0] sm:$0xff]   ;;  %v786_v19 = vld [vmem:[%s1027_s1 + $0x98] sm:$0xff]   ;;  %v790_v23 = vld [vmem:[%s1027_s1 + $0x90] sm:$0xff]  }
   0x9   :  { %724 = vmatpush3.bf16.msra.mxu1 %v774_v7  ;;  %697 = vmatprep.subr.bf16.mxu0 %v775_v8  ;;  %v791_v24 = vld [vmem:[%s1027_s1 + $0x48] sm:$0xff]   ;;  %v795_v28 = vld [vmem:[%s1027_s1 + $0x40] sm:$0xff]   ;;  %v805_v36 = vld [vmem:[%s1027_s1 + $0x118] sm:$0xff]  }
   0xa   :  { %725 = vmatprep.subr.bf16.mxu1 %v776_v9  ;;  %v792_v25 = vld [vmem:[%s1027_s1 + $0xc8] sm:$0xff]   ;;  %v796_v29 = vld [vmem:[%s1027_s1 + $0xc0] sm:$0xff]   ;;  %v806_v37 = vld [vmem:[%s1027_s1 + $0x110] sm:$0xff]  }
   0xb   :  { %v793_v26 = vld [vmem:[%s1027_s1 + $0x8] sm:$0xff]   ;;  %v797_v30 = vld [vmem:[%s1027_s1] sm:$0xff]  }
   0xc   :  { %698 = vmatpush3.bf16.msra.mxu0 %v777_v10  ;;  %v794_v27 = vld [vmem:[%s1027_s1 + $0x88] sm:$0xff]   ;;  %v798_v31 = vld [vmem:[%s1027_s1 + $0x80] sm:$0xff]  }
   0xd   :  { %726 = vmatpush3.bf16.msra.mxu1 %v778_v11  ;;  %699 = vmatprep.subr.bf16.mxu0 %v779_v12  ;;  %v799_v32 = vld [vmem:[%s1028_s0] ss:$20 sps:$4 sm:$0xff]   ;;  %v801_v33 = vld [vmem:[%s1028_s0 + $0x4] ss:$20 sps:$4 sm:$0xff]   ;;  %v802_v34 = vld [vmem:[%s1028_s0 + $0x8] ss:$20 sps:$4 sm:$0xff]  }
   0xe   :  { %727 = vmatprep.subr.bf16.mxu1 %v780_v13  ;;  %v804_v35 = vld [vmem:[%s1028_s0 + $0xc] ss:$20 sps:$4 sm:$0xff]   ;;  %410 = vmatprep.mubr.bf16.mxu0 %v801_v33  ;;  %v809_v39 = vld [vmem:[%s1028_s0 + $0x34] ss:$20 sps:$4 sm:$0xff]   ;;  %v812_v42 = vld [vmem:[%s1028_s0 + $0x30] ss:$20 sps:$4 sm:$0xff]  }
   0xf   :  { %459 = vmatprep.mubr.bf16.mxu1 %v804_v35  ;;  %v807_v38 = vld [vmem:[%s1028_s0 + $0x2c] ss:$20 sps:$4 sm:$0xff]   ;;  %v811_v40 = vld [vmem:[%s1028_s0 + $0x28] ss:$20 sps:$4 sm:$0xff]   ;;  %v815_v43 = vld [vmem:[%s1028_s0 + $0x10] ss:$20 sps:$4 sm:$0xff]  }
  0x10   :  { %700 = vmatpush3.bf16.msra.mxu0 %v781_v14  ;;  %v813_v41 = vld [vmem:[%s1027_s1 + $0x108] sm:$0xff]   ;;  %v814_v44 = vld [vmem:[%s1027_s1 + $0x100] sm:$0xff]  }
  0x11   :  { %728 = vmatpush3.bf16.msra.mxu1 %v782_v15  ;;  %701 = vmatprep.subr.bf16.mxu0 %v783_v16  ;;  %v816_v45 = vld [vmem:[%s1028_s0 + $0x38] ss:$20 sps:$4 sm:$0xff]  }
  0x12   :  { %729 = vmatprep.subr.bf16.mxu1 %v784_v17 }
  0x14   :  { %702 = vmatpush3.bf16.msra.mxu0 %v785_v18 }
  0x15   :  { %730 = vmatpush3.bf16.msra.mxu1 %v786_v19  ;;  %703 = vmatprep.subr.bf16.mxu0 %v787_v20 }
  0x16   :  { %731 = vmatprep.subr.bf16.mxu1 %v788_v21 }
  0x18   :  { %704 = vmatpush3.bf16.msra.mxu0 %v789_v22 }
  0x19   :  { %732 = vmatpush3.bf16.msra.mxu1 %v790_v23  ;;  %705 = vmatprep.subr.bf16.mxu0 %v791_v24 }
  0x1a   :  { %733 = vmatprep.subr.bf16.mxu1 %v792_v25 }
  0x1c   :  { %706 = vmatpush3.bf16.msra.mxu0 %v793_v26 }
  0x1d   :  { %734 = vmatpush3.bf16.msra.mxu1 %v794_v27  ;;  %707 = vmatprep.subr.bf16.mxu0 %v795_v28 }
  0x1e   :  { %735 = vmatprep.subr.bf16.mxu1 %v796_v29 }
  0x20   :  { %708 = vmatpush3.bf16.msra.mxu0 %v797_v30 }
  0x21   :  { %736 = vmatpush3.bf16.msra.mxu1 %v798_v31  ;;  %755 = vmatprep.subr.bf16.mxu0 %v805_v36 }
  0x23   :  { %411 = vmatmul.mubr.bf16.vlgmr.msra.gmra.mxu0 %v799_v32 }
  0x24   :  { %460 = vmatmul.mubr.bf16.vlgmr.msra.gmra.mxu1 %v802_v34  ;;  %756 = vmatpush3.bf16.msra.mxu0 %v805_v36 }
  0x25   :  { %757 = vmatprep.subr.bf16.mxu0 %v806_v37  ;;  %418 = vmatprep.mubr.bf16.mxu0 %v807_v38 }
  0x26   :  { %467 = vmatprep.mubr.bf16.mxu1 %v809_v39 }
  0x28   :  { %758 = vmatpush3.bf16.msra.mxu0 %v806_v37 }
  0x29   :  { %759 = vmatprep.subr.bf16.mxu0 %v813_v41 }
  0x2b   :  { %419 = vmatmul.mubr.bf16.gmra.mxu0 %v811_v40 }
  0x2c   :  { %468 = vmatmul.mubr.bf16.gmra.mxu1 %v812_v42  ;;  %763 = vmatprep.mubr.msk.bf16.mxu0 %vm371_vm0, %v815_v43 }
  0x2d   :  { %760 = vmatpush3.bf16.msra.mxu0 %v813_v41 }
  0x2e   :  { %761 = vmatprep.subr.bf16.mxu0 %v814_v44 }
  0x31   :  { %762 = vmatpush3.bf16.msra.mxu0 %v814_v44 }
  0x34   :  { %764 = vmatmul.mubr.msk.bf16.vlgmr.msra.gmra.mxu0 %vm371_vm0, %v816_v45 }
  0xe3   :  { %v709_v46 = vpop.f32.mrf.mxu0 }
  0xe4   :  { %v737_v47 = vpop.f32.mrf.mxu1 }
  0xe5   :  { %v710_v48 = vpop.f32.mrf.mxu0 }
  0xe6   :  { %v738_v49 = vpop.f32.mrf.mxu1  ;;  %v711_v59 = vadd.f32 %v710_v48, %v709_v46 }
  0xe7   :  { %v712_v50 = vpop.f32.mrf.mxu0  ;;  %v739_v60 = vadd.f32 %v738_v49, %v737_v47 }
  0xe8   :  { %v740_v51 = vpop.f32.mrf.mxu1 }
  0xe9   :  { %v713_v52 = vpop.f32.mrf.mxu0  ;;  %v462_v3 = vadd.f32 %v739_v60, %v711_v59  ;;  %v564_v60 = vld [vmem:[%s1030_s3] sm:$0x1] }
  0xea   :  { %v741_v53 = vpop.f32.mrf.mxu1  ;;  %v714_v4 = vadd.f32 %v713_v52, %v712_v50 }
  0xeb   :  { %v715_v54 = vpop.f32.mrf.mxu0  ;;  %v742_v5 = vadd.f32 %v741_v53, %v740_v51 }
  0xec   :  { %v743_v55 = vpop.f32.mrf.mxu1 }
  0xed   :  { %v716_v56 = vpop.f32.mrf.mxu0  ;;  %v465_v14 = vadd.f32 %v742_v5, %v714_v4 }
  0xee   :  { %v744_v57 = vpop.f32.mrf.mxu1  ;;  %v717_v0 = vadd.f32 %v716_v56, %v715_v54  ;;  %v568_v54 = vlaneseq  ;;  %v560_v56 = vld [vmem:[%s1029_s2] sm:$0x1] }
  0xef   :  { %v718_v58 = vpop.f32.mrf.mxu0  ;;  %v745_v1 = vadd.f32 %v744_v57, %v743_v55 }
  0xf0   :  { %v746_v61 = vpop.f32.mrf.mxu1  ;;  %v569_v55 = vshrl.u32 %v568_v54, 7 }
  0xf1   :  { %v719_v62 = vpop.f32.mrf.mxu0  ;;  %v470_v9 = vadd.f32 %v745_v1, %v717_v0  ;;  %v692_v0 = vld [vmem:[%s1031_s4 + $0x8] sm:$0xff]  }
  0xf2   :  { %v747_v63 = vpop.f32.mrf.mxu1  ;;  %v720_v6 = vadd.f32 %v719_v62, %v718_v58  ;;  %v570_v57 = vsub.s32 0, %v569_v55  ;;  %v690_v5 = vunpack.c.l.bf16 %v692_v0 }
  0xf3   :  { %v748_v7 = vadd.f32 %v747_v63, %v746_v61  ;;  %v685_v61 = vld [vmem:[%s1031_s4] sm:$0xff]  }
  0xf4   :  { %v765_v2 = vpop.f32.mrf.mxu0  ;;  %v687_v4 = vunpack.c.h.bf16 %v685_v61 }
  0xf5   :  { %v989_v12 = vadd.f32 %v765_v2, %v470_v9  ;;  %v473_v13 = vadd.f32 %v748_v7, %v720_v6  ;;  %v686_v2 = vunpack.c.l.bf16 %v685_v61  ;;  %v691_v6 = vunpack.c.h.bf16 %v692_v0 }
  0xf6   :  { %v510_v8 = vpop.f32.mrf.mxu0 }
  0xf7   :  { %v511_v10 = vadd.f32 %v510_v8, %v462_v3  ;;  %v540_v19 = vmul.f32 %v989_v12, %v989_v12  ;;  %v528_v24 = vsel %vm371_vm0, %v989_v12, 0.0 }
  0xf8   :  { %v766_v11 = vpop.f32.mrf.mxu0 }
  0xf9   :  { %v538_v16 = vmul.f32 %v511_v10, %v511_v10  ;;  %v522_v17 = vadd.f32 %v766_v11, %v473_v13  ;;  %v525_v20 = vsel %vm371_vm0, %v511_v10, 0.0  ;;  %v545_v30 = vsel %vm371_vm0, %v540_v19, 0.0 }
  0xfa   :  { %v513_v15 = vpop.f32.mrf.mxu0 }
  0xfb   :  { %v514_v18 = vadd.f32 %v513_v15, %v465_v14  ;;  %v542_v25 = vsel %vm371_vm0, %v538_v16, 0.0  ;;  %v541_v26 = vmul.f32 %v522_v17, %v522_v17  ;;  %v530_v31 = vsel %vm371_vm0, %v522_v17, 0.0 }
  0xfd   :  { %v526_v21 = vsel %vm371_vm0, %v514_v18, 0.0  ;;  %v539_v22 = vmul.f32 %v514_v18, %v514_v18  ;;  %v547_v34 = vsel %vm371_vm0, %v541_v26, 0.0 }
  0xfe   :  { %v527_v23 = vadd.f32 %v526_v21, %v525_v20 }
  0xff   :  { %v543_v27 = vsel %vm371_vm0, %v539_v22, 0.0 }
 0x100   :  { %v529_v28 = vadd.f32 %v528_v24, %v527_v23  ;;  %v544_v29 = vadd.f32 %v543_v27, %v542_v25 }
 0x102   :  { %v531_v32 = vadd.f32 %v530_v31, %v529_v28  ;;  %v546_v33 = vadd.f32 %v545_v30, %v544_v29 }
 0x104   :  { %v532_v35 = vrot.slane %v531_v32, 4  ;;  %v548_v36 = vadd.f32 %v547_v34, %v546_v33 }
 0x106   :  { %v533_v37 = vadd.f32 %v532_v35, %v531_v32  ;;  %v549_v38 = vrot.slane %v548_v36, 4 }
 0x108   :  { %v534_v39 = vrot.slane %v533_v37, 2  ;;  %v550_v40 = vadd.f32 %v549_v38, %v548_v36 }
 0x10a   :  { %v535_v41 = vadd.f32 %v534_v39, %v533_v37  ;;  %v551_v42 = vrot.slane %v550_v40, 2 }
 0x10c   :  { %v536_v43 = vrot.slane %v535_v41, 1  ;;  %v552_v44 = vadd.f32 %v551_v42, %v550_v40 }
 0x10e   :  { %v537_v45 = vadd.f32 %v536_v43, %v535_v41  ;;  %v553_v46 = vrot.slane %v552_v44, 1 }
 0x110   :  { %v554_v47 = vadd.f32 %v553_v46, %v552_v44  ;;  %v555_v48 = vmul.f32 0.03125, %v537_v45 }
 0x112   :  { %v556_v49 = vmul.f32 0.03125, %v554_v47  ;;  %v557_v50 = vmul.f32 %v555_v48, %v555_v48 }
 0x114   :  { %v558_v51 = vsub.f32 %v556_v49, %v557_v50 }
 0x116   :  { %v559_v52 = vmax.f32 %v558_v51, 0.0 }
 0x118   :  { %v561_v53 = vadd.f32 1e-05, %v559_v52 }
 0x11a   :  { %817 = vrsqrt.f32 %v561_v53 }
 0x127   :  { %v818_v58 = vpop.eup %817 }
 0x128   :  { %v563_v59 = vmul.f32 %v818_v58, %v560_v56 }
 0x12a   :  { %v565_v62 = vmul.f32 %v563_v59, %v555_v48  ;;  %v571_v63 = vrot.slane %v563_v59, %v570_v57 }
 0x12c   :  { %v566_v1 = vsub.f32 %v564_v60, %v565_v62  ;;  %v573_v3 = vmul.f32 %v571_v63, %v511_v10  ;;  %v574_v7 = vmul.f32 %v571_v63, %v514_v18  ;;  %v575_v8 = vmul.f32 %v571_v63, %v989_v12 }
 0x12d   :  { %v576_v9 = vmul.f32 %v571_v63, %v522_v17 }
 0x12e   :  { %v581_v11 = vrot.slane %v566_v1, %v570_v57 }
 0x130   :  { %v583_v13 = vadd.f32 %v581_v11, %v573_v3  ;;  %v584_v14 = vadd.f32 %v581_v11, %v574_v7  ;;  %v585_v15 = vadd.f32 %v581_v11, %v575_v8  ;;  %v586_v16 = vadd.f32 %v581_v11, %v576_v9 }
 0x132   :  { %v595_v19 = vadd.f32 %v686_v2, %v583_v13  ;;  %v596_v20 = vadd.f32 %v687_v4, %v584_v14  ;;  %v597_v21 = vadd.f32 %v690_v5, %v585_v15  ;;  %v598_v22 = vadd.f32 %v691_v6, %v586_v16 }
 0x134   :  { %v599_v23 = vmax.f32 %v595_v19, 0.0  ;;  %v600_v24 = vmax.f32 %v596_v20, 0.0  ;;  %v601_v25 = vmax.f32 %v597_v21, 0.0  ;;  %v602_v10 = vmax.f32 %v598_v22, 0.0 }
 0x136   :  { %v680_v26 = vpack.c.bf16 %v599_v23, %v599_v23  ;;  %v681_v27 = vpack.c.bf16 %v600_v24, %v600_v24  ;;  %v682_v18 = vpack.c.bf16 %v601_v25, %v601_v25  ;;  %v683_v28 = vpack.c.bf16 %v602_v10, %v602_v10 }
 0x138   :  { %620 = vst.msk [vmem:[%s1032_s5] sm:$0xf] %vm619_vm1, %v680_v26  ;;  %621 = vst.msk [vmem:[%s1032_s5 + $0x4] sm:$0xf] %vm619_vm1, %v681_v27 }
 0x139   :  { %622 = vst.msk [vmem:[%s1032_s5 + $0x8] sm:$0xf] %vm619_vm1, %v682_v18  ;;  %623 = vst.msk [vmem:[%s1032_s5 + $0xc] sm:$0xf] %vm619_vm1, %v683_v28 }

</bundles_post_ra>
